<compile_context>
chip_gen: v7x
topology: tpu7x:2x2x1
jax: 0.10.0
libtpu: 0.0.40
codegen_flags: <defaults>
</compile_context>

<pallas_src>
import functools

import jax
import jax.numpy as jnp
import numpy as np
from jax.experimental import pallas as pl
from jax.experimental.pallas import tpu as pltpu


def _pick_tile(n, prefs):
    """Largest preferred tile that evenly divides n (else the full extent)."""
    for p in prefs:
        if n % p == 0 and n > p:
            return p
    return n


# ---------------------------------------------------------------------------
# Kernel 1: fused LayerNorm + qkv projection   y = LN(x) @ w_qkv.T
# ---------------------------------------------------------------------------
def _ln_qkv_kernel(x_ref, g_ref, b_ref, w_ref, o_ref):
    x = x_ref[...]                                        # (tm, D) f32
    mu = jnp.mean(x, axis=-1, keepdims=True)
    xc = x - mu
    var = jnp.mean(xc * xc, axis=-1, keepdims=True)
    xn = xc * jax.lax.rsqrt(var + 1e-5) * g_ref[...] + b_ref[...]
    # Contract on w's dim 1 (PyTorch [out, in] layout) -> no wrapper-side w.T.
    o_ref[...] = jax.lax.dot_general(
        xn, w_ref[...], (((1,), (1,)), ((), ())),
        preferred_element_type=jnp.float32).astype(o_ref.dtype)


def pallas_ln_qkv(x, gamma, beta, w):
    """x: [M, D], gamma/beta: [1, D], w: [N, D] (torch layout) -> [M, N] f32."""
    M, D = x.shape
    N = w.shape[0]
    tm = _pick_tile(M, (256,))
    tn = _pick_tile(N, (512, 256))
    return pl.pallas_call(
        _ln_qkv_kernel,
        out_shape=jax.ShapeDtypeStruct((M, N), jnp.float32),
        grid=(M // tm, N // tn),
        in_specs=[
            pl.BlockSpec((tm, D), lambda i, j: (i, 0)),
            pl.BlockSpec((1, D), lambda i, j: (0, 0)),
            pl.BlockSpec((1, D), lambda i, j: (0, 0)),
            pl.BlockSpec((tn, D), lambda i, j: (j, 0)),
        ],
        out_specs=pl.BlockSpec((tm, tn), lambda i, j: (i, j)),
        compiler_params=pltpu.CompilerParams(
            dimension_semantics=("parallel", "parallel")),
    )(x, gamma, beta, w)


# ---------------------------------------------------------------------------
# Kernel 2: Gaussian-splat attention + fused out-projection + residual.
# Grid = (batch, key-tile); all H heads processed per step.
# ---------------------------------------------------------------------------
def _gsa_attn_kernel(cs_ref, nhi_ref, c2n_ref, amp_ref, wo_ref,
                     xres_ref, q_ref, k_ref, v_ref, o_ref,
                     qw_ref, acc_ref):
    """Refs:
      cs_ref   (H, S, hd) : centers * (-2 * nhi)            (pre-scaled)
      nhi_ref  (H, 1, S)  : -0.5 / (scale^2 + 1e-8)
      c2n_ref  (H, 1, S)  : nhi * ||center||^2              (hoisted)
      amp_ref  (H, 1, S)  : effective_amplitude / temperature (temp folded)
      wo_ref   (D, D)     : out-projection weight (torch [out, in])
      xres_ref (T, D)     : residual input (pre-norm x)
      q_ref    (T, D)     : all-head queries (cols 0:D of qkv)
      k_ref    (TK, D)    : all-head keys, current key tile
      v_ref    (TK, D)    : all-head values, current key tile
      o_ref    (T, D)     : layer output = x + out_proj(attn @ v)
      qw_ref   (H, T, S)  : cached amplitude-scaled query splat weights
      acc_ref  (H, T, hd) : per-head (attn @ v) accumulator over key tiles
    """
    kj = pl.program_id(1)
    H, T, S = qw_ref.shape
    hd = cs_ref.shape[-1]
    contract_last = (((1,), (1,)), ((), ()))

    # ---- once per batch row: cache query splat weights, zero accumulator ----
    @pl.when(kj == 0)
    def _():
        q = q_ref[...]
        for h in range(H):
            q_h = q[:, h * hd:(h + 1) * hd]                        # (T, hd)
            q2 = jnp.sum(q_h * q_h, axis=-1, keepdims=True)        # (T, 1)
            qc = jax.lax.dot_general(q_h, cs_ref[h], contract_last,
                                     preferred_element_type=jnp.float32)
            # exp(nhi*||q-c||^2) * amp / temp  (||c||^2*nhi precomputed)
            qw_ref[h] = (jnp.exp(q2 * nhi_ref[h] + qc + c2n_ref[h])
                         * amp_ref[h])                             # (T, S)
        acc_ref[...] = jnp.zeros_like(acc_ref)

    # ---- per key tile --------------------------------------------------------
    k = k_ref[...]
    v = v_ref[...]
    for h in range(H):
        k_h = k[:, h * hd:(h + 1) * hd]                            # (TK, hd)
        k2 = jnp.sum(k_h * k_h, axis=-1, keepdims=True)
        kc = jax.lax.dot_general(k_h, cs_ref[h], contract_last,
                                 preferred_element_type=jnp.float32)
        k_w = jnp.exp(k2 * nhi_ref[h] + kc + c2n_ref[h])           # (TK, S)
        # logits[i, j] = sum_s qw[i, s] * kw[j, s]  (amp & 1/temp folded in qw)
        logits = jax.lax.dot_general(qw_ref[h], k_w, contract_last,
                                     preferred_element_type=jnp.float32)
        # Softmax over the QUERY axis (torch dim=1): key columns are
        # normalized independently, so key tiles need no cross-tile state.
        m = jnp.max(logits, axis=0, keepdims=True)
        e = jnp.exp(logits - m)
        attn = e * pl.reciprocal(jnp.sum(e, axis=0, keepdims=True), approx=True)
        acc_ref[h] += jnp.dot(attn, v[:, h * hd:(h + 1) * hd],
                              preferred_element_type=jnp.float32)   # (T, hd)

    # ---- last key tile: fused output projection + residual, dense store -----
    @pl.when(kj == pl.num_programs(1) - 1)
    def _():
        wo = wo_ref[...]                                           # (D, D)
        out = xres_ref[...]                                        # residual
        for h in range(H):
            out = out + jax.lax.dot_general(
                acc_ref[h], wo[:, h * hd:(h + 1) * hd], contract_last,
                preferred_element_type=jnp.float32)                # (T, D)
        o_ref[...] = out


def gsa_attention_pallas(qkv, x_res, w_out, cs, nhi, c2nhi, ampst):
    """qkv: [B, T, 3D]; x_res: [B, T, D]; w_out: [D, D];
    cs: [H, S, hd]; nhi/c2nhi/ampst: [H, 1, S]  ->  [B, T, D] f32."""
    B, T, D3 = qkv.shape
    D = D3 // 3
    H, S, hd = cs.shape
    TK = _pick_tile(T, (512, 256, 128))          # key-axis tile
    kt = T // TK

    return pl.pallas_call(
        _gsa_attn_kernel,
        out_shape=jax.ShapeDtypeStruct((B, T, D), jnp.float32),
        grid=(B, kt),
        in_specs=[
            pl.BlockSpec((H, S, hd), lambda b, kj: (0, 0, 0)),
            pl.BlockSpec((H, 1, S), lambda b, kj: (0, 0, 0)),
            pl.BlockSpec((H, 1, S), lambda b, kj: (0, 0, 0)),
            pl.BlockSpec((H, 1, S), lambda b, kj: (0, 0, 0)),
            pl.BlockSpec((D, D), lambda b, kj: (0, 0)),
            pl.BlockSpec((None, T, D), lambda b, kj: (b, 0, 0)),     # residual
            pl.BlockSpec((None, T, D), lambda b, kj: (b, 0, 0)),     # q cols
            pl.BlockSpec((None, TK, D), lambda b, kj: (b, kj, 1)),   # k cols
            pl.BlockSpec((None, TK, D), lambda b, kj: (b, kj, 2)),   # v cols
        ],
        out_specs=pl.BlockSpec((None, T, D), lambda b, kj: (b, 0, 0)),
        scratch_shapes=[pltpu.VMEM((H, T, S), jnp.float32),
                        pltpu.VMEM((H, T, hd), jnp.float32)],
        compiler_params=pltpu.CompilerParams(
            dimension_semantics=("parallel", "arbitrary"),
            vmem_limit_bytes=48 * 1024 * 1024),
    )(cs, nhi, c2nhi, ampst, w_out, x_res, qkv, qkv, qkv)


# ---------------------------------------------------------------------------
# Parameters (deterministic, shapes per GSAMechanism / GSALayer __init__)
# ---------------------------------------------------------------------------
def init_params(key, dim, n_heads, n_splats, head_dim):
    ks = jax.random.split(key, 5)
    # TODO(synk): splat_centers use a simple deterministic normal init instead
    # of the grid/sphere strategic init; forward semantics are unaffected.
    splat_centers = jax.random.normal(ks[0], (n_heads, n_splats, head_dim),
                                      dtype=jnp.float32) * 0.2
    splat_deltas = jnp.zeros((n_heads, n_splats, head_dim), dtype=jnp.float32)
    splat_log_scales = (jax.random.normal(ks[1], (n_heads, n_splats),
                                          dtype=jnp.float32) * 0.2
                        + jnp.log(jnp.float32(0.5)))
    splat_log_amplitudes = (jax.random.normal(ks[2], (n_heads, n_splats),
                                              dtype=jnp.float32) * 0.1 - 0.5)
    movement_scale = jnp.float32(0.08)
    temperature = jnp.float32(1.0)
    # xavier_uniform with gain=0.5 (weights stored PyTorch-style [out, in])
    b_qkv = 0.5 * np.sqrt(6.0 / (dim + 3 * dim))
    w_qkv = jax.random.uniform(ks[3], (3 * dim, dim), dtype=jnp.float32,
                               minval=-b_qkv, maxval=b_qkv)
    b_out = 0.5 * np.sqrt(6.0 / (dim + dim))
    w_out = jax.random.uniform(ks[4], (dim, dim), dtype=jnp.float32,
                               minval=-b_out, maxval=b_out)
    ln_gamma = jnp.ones((1, dim), dtype=jnp.float32)
    ln_beta = jnp.zeros((1, dim), dtype=jnp.float32)
    return dict(splat_centers=splat_centers, splat_deltas=splat_deltas,
                splat_log_scales=splat_log_scales,
                splat_log_amplitudes=splat_log_amplitudes,
                movement_scale=movement_scale, temperature=temperature,
                w_qkv=w_qkv, w_out=w_out, ln_gamma=ln_gamma, ln_beta=ln_beta)


# ---------------------------------------------------------------------------
# GSALayer forward (eval mode): out = x + out_proj(GSA_attention(LN(x)))
# ---------------------------------------------------------------------------
def gsa_layer_forward(x, params, n_heads, n_splats, pruning_threshold=0.02):
    B, T, D = x.shape
    H, S = n_heads, n_splats

    # LayerNorm + qkv projection (fused Pallas kernel), no w.T materialization
    qkv = pallas_ln_qkv(x.reshape(B * T, D), params['ln_gamma'],
                        params['ln_beta'], params['w_qkv']).reshape(B, T, 3 * D)

    # Splat constants (tiny; hoisted out of the kernel)
    bounded = jax.nn.sigmoid(params['movement_scale']) * 0.2
    # TODO(synk): training-mode warmup (step_count < 1000), dropout and the
    # optional attention_mask / return_attention paths are not exercised by
    # the eval-mode forward and are not implemented here.
    centers = params['splat_centers'] + params['splat_deltas'] * bounded
    scales = jnp.clip(jnp.exp(params['splat_log_scales']), 0.01, 2.0)      # (H,S)
    amps = jnp.clip(jnp.exp(params['splat_log_amplitudes']), 1e-6, 10.0)   # (H,S)
    eff_amps = amps * (amps > pruning_threshold).astype(jnp.float32)
    temp = jnp.clip(params['temperature'], 0.1, 10.0)

    nhi = -0.5 / (scales ** 2 + 1e-8)                        # (H, S)
    cs = centers * (-2.0 * nhi)[..., None]                   # (H, S, hd)
    c2nhi = nhi * jnp.sum(centers * centers, axis=-1)        # (H, S) hoisted
    ampst = eff_amps / temp                                  # fold 1/temperature

    return gsa_attention_pallas(qkv, x, params['w_out'], cs,
                                nhi.reshape(H, 1, S), c2nhi.reshape(H, 1, S),
                                ampst.reshape(H, 1, S))


# Pure-JAX reference (mirrors the PyTorch GSALayer eval forward) for checking.
def gsa_layer_reference(x, params, n_heads, n_splats, pruning_threshold=0.02):
    B, T, D = x.shape
    H, S = n_heads, n_splats
    hd = D // H
    mu = jnp.mean(x, axis=-1, keepdims=True)
    var = jnp.mean((x - mu) ** 2, axis=-1, keepdims=True)
    xn = (x - mu) / jnp.sqrt(var + 1e-5) * params['ln_gamma'] + params['ln_beta']
    qkv = (xn @ params['w_qkv'].T).reshape(B, T, 3, H, hd)
    q, k, v = qkv[:, :, 0], qkv[:, :, 1], qkv[:, :, 2]
    bounded = jax.nn.sigmoid(params['movement_scale']) * 0.2
    centers = params['splat_centers'] + params['splat_deltas'] * bounded
    scales = jnp.clip(jnp.exp(params['splat_log_scales']), 0.01, 2.0)
    amps = jnp.clip(jnp.exp(params['splat_log_amplitudes']), 1e-6, 10.0)
    eff = amps * (amps > pruning_threshold).astype(jnp.float32)
    qd = jnp.sum((q[:, :, :, None, :] - centers[None, None]) ** 2, axis=-1)
    kd = jnp.sum((k[:, :, :, None, :] - centers[None, None]) ** 2, axis=-1)
    qw = jnp.exp(-0.5 * qd / (scales[None, None] ** 2 + 1e-8))
    kw = jnp.exp(-0.5 * kd / (scales[None, None] ** 2 + 1e-8))
    logits = jnp.einsum('bihs,bjhs,hs->bijh', qw, kw, eff)
    temp = jnp.clip(params['temperature'], 0.1, 10.0)
    attn = jax.nn.softmax(logits / temp, axis=1)     # softmax over query axis
    attn_out = jnp.einsum('btjh,bjhd->bthd', attn, v).reshape(B, T, D)
    return x + attn_out @ params['w_out'].T


if __name__ == "__main__":
    jax.config.update("jax_default_matmul_precision", "highest")

    # Small GSAConfig-consistent shapes: dim divisible by n_heads; dim chosen
    # as a multiple of 128 so the attention q/k/v column blocks are lane-aligned.
    B, T = 2, 16
    dim, n_heads, n_splats = 128, 4, 8
    head_dim = dim // n_heads

    key = jax.random.PRNGKey(0)
    kx, kp = jax.random.split(key)
    x = jax.random.normal(kx, (B, T, dim), dtype=jnp.float32)
    params = init_params(kp, dim, n_heads, n_splats, head_dim)

    fwd = jax.jit(functools.partial(gsa_layer_forward,
                                    n_heads=n_heads, n_splats=n_splats))
    out = jax.block_until_ready(fwd(x, params))

    ref = gsa_layer_reference(x, params, n_heads, n_splats)
    # tolerance loosened slightly for the approx-reciprocal softmax denominator
    np.testing.assert_allclose(np.asarray(out), np.asarray(ref),
                               rtol=1e-3, atol=1e-3)
    print("KERNEL_OK")
</pallas_src>

<mosaic_0001>
module attributes {stable_mosaic.version = 11 : i64} {
  func.func @_ln_qkv_kernel(%arg0: i32, %arg1: i32, %arg2: memref<32x128xf32, #tpu.memory_space<vmem>>, %arg3: memref<1x128xf32, #tpu.memory_space<vmem>>, %arg4: memref<1x128xf32, #tpu.memory_space<vmem>>, %arg5: memref<384x128xf32, #tpu.memory_space<vmem>>, %arg6: memref<32x384xf32, #tpu.memory_space<vmem>>) attributes {dimension_semantics = [#tpu.dimension_semantics<parallel>, #tpu.dimension_semantics<parallel>], iteration_bounds = array<i64: 1, 1>, scalar_prefetch = 0 : i64, scratch_operands = 0 : i64, tpu.core_type = #tpu.core_type<tc>, window_params = [{transform_indices = @transform_0, window_bounds = array<i64: 32, 128>}, {pipeline_mode = #tpu.pipeline_mode<synchronous>, transform_indices = @transform_1, window_bounds = array<i64: 1, 128>}, {pipeline_mode = #tpu.pipeline_mode<synchronous>, transform_indices = @transform_2, window_bounds = array<i64: 1, 128>}, {transform_indices = @transform_3, window_bounds = array<i64: 384, 128>}, {transform_indices = @transform_4, window_bounds = array<i64: 32, 384>}]} {
    %c0 = arith.constant 0 : index
    %c0_0 = arith.constant 0 : index
    %0 = vector.load %arg2[%c0, %c0_0] : memref<32x128xf32, #tpu.memory_space<vmem>>, vector<32x128xf32>
    %cst = arith.constant dense<0.000000e+00> : vector<32xf32>
    %1 = vector.multi_reduction <add>, %0, %cst [1] : vector<32x128xf32> to vector<32xf32>
    %2 = vector.shape_cast %1 : vector<32xf32> to vector<32x1xf32>
    %cst_1 = arith.constant 1.280000e+02 : f32
    %3 = vector.broadcast %cst_1 : f32 to vector<32x1xf32>
    %4 = arith.divf %2, %3 : vector<32x1xf32>
    %5 = vector.broadcast %4 : vector<32x1xf32> to vector<32x128xf32>
    %6 = arith.subf %0, %5 : vector<32x128xf32>
    %7 = arith.mulf %6, %6 : vector<32x128xf32>
    %cst_2 = arith.constant dense<0.000000e+00> : vector<32xf32>
    %8 = vector.multi_reduction <add>, %7, %cst_2 [1] : vector<32x128xf32> to vector<32xf32>
    %9 = vector.shape_cast %8 : vector<32xf32> to vector<32x1xf32>
    %cst_3 = arith.constant 1.280000e+02 : f32
    %10 = vector.broadcast %cst_3 : f32 to vector<32x1xf32>
    %11 = arith.divf %9, %10 : vector<32x1xf32>
    %cst_4 = arith.constant 9.99999974E-6 : f32
    %12 = vector.broadcast %cst_4 : f32 to vector<32x1xf32>
    %13 = arith.addf %11, %12 : vector<32x1xf32>
    %14 = math.rsqrt %13 : vector<32x1xf32>
    %15 = vector.broadcast %14 : vector<32x1xf32> to vector<32x128xf32>
    %16 = arith.mulf %6, %15 : vector<32x128xf32>
    %c0_5 = arith.constant 0 : index
    %c0_6 = arith.constant 0 : index
    %17 = vector.load %arg3[%c0_5, %c0_6] : memref<1x128xf32, #tpu.memory_space<vmem>>, vector<1x128xf32>
    %18 = vector.broadcast %17 : vector<1x128xf32> to vector<32x128xf32>
    %19 = arith.mulf %16, %18 : vector<32x128xf32>
    %c0_7 = arith.constant 0 : index
    %c0_8 = arith.constant 0 : index
    %20 = vector.load %arg4[%c0_7, %c0_8] : memref<1x128xf32, #tpu.memory_space<vmem>>, vector<1x128xf32>
    %21 = vector.broadcast %20 : vector<1x128xf32> to vector<32x128xf32>
    %22 = arith.addf %19, %21 : vector<32x128xf32>
    %c0_9 = arith.constant 0 : index
    %c0_10 = arith.constant 0 : index
    %23 = vector.load %arg5[%c0_9, %c0_10] : memref<384x128xf32, #tpu.memory_space<vmem>>, vector<384x128xf32>
    %cst_11 = arith.constant dense<0.000000e+00> : vector<32x384xf32>
    %24 = tpu.matmul %22, %23, %cst_11 {dimension_numbers = #tpu.dot_dimension_numbers<[1], [1], [0], [0], [0, 0, 1, 0], [], []>, precision = #tpu.contract_precision<fp32>} : vector<32x128xf32>, vector<384x128xf32>, vector<32x384xf32> -> vector<32x384xf32>
    %c0_12 = arith.constant 0 : index
    %c0_13 = arith.constant 0 : index
    %25 = vector.load %arg6[%c0_12, %c0_13] : memref<32x384xf32, #tpu.memory_space<vmem>>, vector<32x384xf32>
    tpu.vector_store %arg6[%c0_12, %c0_13], %24 {strides = array<i32>} : memref<32x384xf32, #tpu.memory_space<vmem>>, vector<32x384xf32>,
    return
  }
  func.func @transform_0(%arg0: i32, %arg1: i32) -> (i32, i32) {
    %c0_i32 = arith.constant 0 : i32
    %c0_i32_0 = arith.constant 0 : i32
    return %arg0, %c0_i32 : i32, i32
  }
  func.func @transform_1(%arg0: i32, %arg1: i32) -> (i32, i32) {
    %c0_i32 = arith.constant 0 : i32
    %c0_i32_0 = arith.constant 0 : i32
    %c0_i32_1 = arith.constant 0 : i32
    return %c0_i32, %c0_i32_0 : i32, i32
  }
  func.func @transform_2(%arg0: i32, %arg1: i32) -> (i32, i32) {
    %c0_i32 = arith.constant 0 : i32
    %c0_i32_0 = arith.constant 0 : i32
    %c0_i32_1 = arith.constant 0 : i32
    return %c0_i32, %c0_i32_0 : i32, i32
  }
  func.func @transform_3(%arg0: i32, %arg1: i32) -> (i32, i32) {
    %c0_i32 = arith.constant 0 : i32
    %c0_i32_0 = arith.constant 0 : i32
    return %arg1, %c0_i32 : i32, i32
  }
  func.func @transform_4(%arg0: i32, %arg1: i32) -> (i32, i32) {
    %c0_i32 = arith.constant 0 : i32
    return %arg0, %arg1 : i32, i32
  }
}

module attributes {stable_mosaic.version = 11 : i64} {
  func.func @_gsa_attn_kernel(%arg0: i32, %arg1: i32, %arg2: memref<4x8x32xf32, #tpu.memory_space<vmem>>, %arg3: memref<4x1x8xf32, #tpu.memory_space<vmem>>, %arg4: memref<4x1x8xf32, #tpu.memory_space<vmem>>, %arg5: memref<4x1x8xf32, #tpu.memory_space<vmem>>, %arg6: memref<128x128xf32, #tpu.memory_space<vmem>>, %arg7: memref<1x16x128xf32, #tpu.memory_space<vmem>>, %arg8: memref<1x16x128xf32, #tpu.memory_space<vmem>>, %arg9: memref<1x16x128xf32, #tpu.memory_space<vmem>>, %arg10: memref<1x16x128xf32, #tpu.memory_space<vmem>>, %arg11: memref<1x16x128xf32, #tpu.memory_space<vmem>>, %arg12: memref<4x16x8xf32, #tpu.memory_space<vmem>>, %arg13: memref<4x16x32xf32, #tpu.memory_space<vmem>>) attributes {dimension_semantics = [#tpu.dimension_semantics<parallel>, #tpu.dimension_semantics<arbitrary>], iteration_bounds = array<i64: 2, 1>, scalar_prefetch = 0 : i64, scratch_operands = 2 : i64, tpu.core_type = #tpu.core_type<tc>, window_params = [{pipeline_mode = #tpu.pipeline_mode<synchronous>, transform_indices = @transform_0, window_bounds = array<i64: 4, 8, 32>}, {pipeline_mode = #tpu.pipeline_mode<synchronous>, transform_indices = @transform_1, window_bounds = array<i64: 4, 1, 8>}, {pipeline_mode = #tpu.pipeline_mode<synchronous>, transform_indices = @transform_2, window_bounds = array<i64: 4, 1, 8>}, {pipeline_mode = #tpu.pipeline_mode<synchronous>, transform_indices = @transform_3, window_bounds = array<i64: 4, 1, 8>}, {pipeline_mode = #tpu.pipeline_mode<synchronous>, transform_indices = @transform_4, window_bounds = array<i64: 128, 128>}, {transform_indices = @transform_5, window_bounds = array<i64: 1, 16, 128>}, {transform_indices = @transform_6, window_bounds = array<i64: 1, 16, 128>}, {transform_indices = @transform_7, window_bounds = array<i64: 1, 16, 128>}, {transform_indices = @transform_8, window_bounds = array<i64: 1, 16, 128>}, {transform_indices = @transform_9, window_bounds = array<i64: 1, 16, 128>}]} {
    %c0_i32 = arith.constant 0 : i32
    %0 = arith.cmpi eq, %arg1, %c0_i32 : i32
    %1 = arith.extui %0 : i1 to i32
    %c0_i32_0 = arith.constant 0 : i32
    %2 = arith.cmpi ne, %1, %c0_i32_0 : i32
    scf.if %2 {
      %c0_100 = arith.constant 0 : index
      %c0_101 = arith.constant 0 : index
      %c0_102 = arith.constant 0 : index
      %166 = vector.load %arg8[%c0_100, %c0_101, %c0_102] : memref<1x16x128xf32, #tpu.memory_space<vmem>>, vector<1x16x128xf32>
      %167 = vector.shape_cast %166 : vector<1x16x128xf32> to vector<16x128xf32>
      %168 = vector.extract_strided_slice %167 {offsets = [0, 0], sizes = [16, 32], strides = [1, 1]} : vector<16x128xf32> to vector<16x32xf32>
      %169 = arith.mulf %168, %168 : vector<16x32xf32>
      %cst_103 = arith.constant dense<0.000000e+00> : vector<16xf32>
      %170 = vector.multi_reduction <add>, %169, %cst_103 [1] : vector<16x32xf32> to vector<16xf32>
      %171 = vector.shape_cast %170 : vector<16xf32> to vector<16x1xf32>
      %c0_104 = arith.constant 0 : index
      %c0_105 = arith.constant 0 : index
      %c0_106 = arith.constant 0 : index
      %172 = vector.load %arg2[%c0_104, %c0_105, %c0_106] : memref<4x8x32xf32, #tpu.memory_space<vmem>>, vector<1x8x32xf32>
      %173 = vector.shape_cast %172 : vector<1x8x32xf32> to vector<8x32xf32>
      %cst_107 = arith.constant dense<0.000000e+00> : vector<16x8xf32>
      %174 = tpu.matmul %168, %173, %cst_107 {dimension_numbers = #tpu.dot_dimension_numbers<[1], [1], [0], [0], [0, 0, 1, 0], [], []>, precision = #tpu.contract_precision<fp32>} : vector<16x32xf32>, vector<8x32xf32>, vector<16x8xf32> -> vector<16x8xf32>
      %c0_108 = arith.constant 0 : index
      %c0_109 = arith.constant 0 : index
      %c0_110 = arith.constant 0 : index
      %175 = vector.load %arg3[%c0_108, %c0_109, %c0_110] : memref<4x1x8xf32, #tpu.memory_space<vmem>>, vector<1x1x8xf32>
      %176 = vector.shape_cast %175 : vector<1x1x8xf32> to vector<1x8xf32>
      %177 = vector.broadcast %171 : vector<16x1xf32> to vector<16x8xf32>
      %178 = vector.broadcast %176 : vector<1x8xf32> to vector<16x8xf32>
      %179 = arith.mulf %177, %178 : vector<16x8xf32>
      %180 = arith.addf %179, %174 : vector<16x8xf32>
      %c0_111 = arith.constant 0 : index
      %c0_112 = arith.constant 0 : index
      %c0_113 = arith.constant 0 : index
      %181 = vector.load %arg4[%c0_111, %c0_112, %c0_113] : memref<4x1x8xf32, #tpu.memory_space<vmem>>, vector<1x1x8xf32>
      %182 = vector.shape_cast %181 : vector<1x1x8xf32> to vector<1x8xf32>
      %183 = vector.broadcast %182 : vector<1x8xf32> to vector<16x8xf32>
      %184 = arith.addf %180, %183 : vector<16x8xf32>
      %185 = math.exp %184 : vector<16x8xf32>
      %c0_114 = arith.constant 0 : index
      %c0_115 = arith.constant 0 : index
      %c0_116 = arith.constant 0 : index
      %186 = vector.load %arg5[%c0_114, %c0_115, %c0_116] : memref<4x1x8xf32, #tpu.memory_space<vmem>>, vector<1x1x8xf32>
      %187 = vector.shape_cast %186 : vector<1x1x8xf32> to vector<1x8xf32>
      %188 = vector.broadcast %187 : vector<1x8xf32> to vector<16x8xf32>
      %189 = arith.mulf %185, %188 : vector<16x8xf32>
      %c0_117 = arith.constant 0 : index
      %c0_118 = arith.constant 0 : index
      %c0_119 = arith.constant 0 : index
      %190 = vector.load %arg12[%c0_117, %c0_118, %c0_119] : memref<4x16x8xf32, #tpu.memory_space<vmem>>, vector<1x16x8xf32>
      %191 = vector.shape_cast %190 : vector<1x16x8xf32> to vector<16x8xf32>
      %192 = vector.shape_cast %189 : vector<16x8xf32> to vector<1x16x8xf32>
      tpu.vector_store %arg12[%c0_117, %c0_118, %c0_119], %192 {strides = array<i32>} : memref<4x16x8xf32, #tpu.memory_space<vmem>>, vector<1x16x8xf32>,
      %193 = vector.extract_strided_slice %167 {offsets = [0, 32], sizes = [16, 32], strides = [1, 1]} : vector<16x128xf32> to vector<16x32xf32>
      %194 = arith.mulf %193, %193 : vector<16x32xf32>
      %cst_120 = arith.constant dense<0.000000e+00> : vector<16xf32>
      %195 = vector.multi_reduction <add>, %194, %cst_120 [1] : vector<16x32xf32> to vector<16xf32>
      %196 = vector.shape_cast %195 : vector<16xf32> to vector<16x1xf32>
      %c1_121 = arith.constant 1 : index
      %c0_122 = arith.constant 0 : index
      %c0_123 = arith.constant 0 : index
      %197 = vector.load %arg2[%c1_121, %c0_122, %c0_123] : memref<4x8x32xf32, #tpu.memory_space<vmem>>, vector<1x8x32xf32>
      %198 = vector.shape_cast %197 : vector<1x8x32xf32> to vector<8x32xf32>
      %cst_124 = arith.constant dense<0.000000e+00> : vector<16x8xf32>
      %199 = tpu.matmul %193, %198, %cst_124 {dimension_numbers = #tpu.dot_dimension_numbers<[1], [1], [0], [0], [0, 0, 1, 0], [], []>, precision = #tpu.contract_precision<fp32>} : vector<16x32xf32>, vector<8x32xf32>, vector<16x8xf32> -> vector<16x8xf32>
      %c1_125 = arith.constant 1 : index
      %c0_126 = arith.constant 0 : index
      %c0_127 = arith.constant 0 : index
      %200 = vector.load %arg3[%c1_125, %c0_126, %c0_127] : memref<4x1x8xf32, #tpu.memory_space<vmem>>, vector<1x1x8xf32>
      %201 = vector.shape_cast %200 : vector<1x1x8xf32> to vector<1x8xf32>
      %202 = vector.broadcast %196 : vector<16x1xf32> to vector<16x8xf32>
      %203 = vector.broadcast %201 : vector<1x8xf32> to vector<16x8xf32>
      %204 = arith.mulf %202, %203 : vector<16x8xf32>
      %205 = arith.addf %204, %199 : vector<16x8xf32>
      %c1_128 = arith.constant 1 : index
      %c0_129 = arith.constant 0 : index
      %c0_130 = arith.constant 0 : index
      %206 = vector.load %arg4[%c1_128, %c0_129, %c0_130] : memref<4x1x8xf32, #tpu.memory_space<vmem>>, vector<1x1x8xf32>
      %207 = vector.shape_cast %206 : vector<1x1x8xf32> to vector<1x8xf32>
      %208 = vector.broadcast %207 : vector<1x8xf32> to vector<16x8xf32>
      %209 = arith.addf %205, %208 : vector<16x8xf32>
      %210 = math.exp %209 : vector<16x8xf32>
      %c1_131 = arith.constant 1 : index
      %c0_132 = arith.constant 0 : index
      %c0_133 = arith.constant 0 : index
      %211 = vector.load %arg5[%c1_131, %c0_132, %c0_133] : memref<4x1x8xf32, #tpu.memory_space<vmem>>, vector<1x1x8xf32>
      %212 = vector.shape_cast %211 : vector<1x1x8xf32> to vector<1x8xf32>
      %213 = vector.broadcast %212 : vector<1x8xf32> to vector<16x8xf32>
      %214 = arith.mulf %210, %213 : vector<16x8xf32>
      %c1_134 = arith.constant 1 : index
      %c0_135 = arith.constant 0 : index
      %c0_136 = arith.constant 0 : index
      %215 = vector.load %arg12[%c1_134, %c0_135, %c0_136] : memref<4x16x8xf32, #tpu.memory_space<vmem>>, vector<1x16x8xf32>
      %216 = vector.shape_cast %215 : vector<1x16x8xf32> to vector<16x8xf32>
      %217 = vector.shape_cast %214 : vector<16x8xf32> to vector<1x16x8xf32>
      tpu.vector_store %arg12[%c1_134, %c0_135, %c0_136], %217 {strides = array<i32>} : memref<4x16x8xf32, #tpu.memory_space<vmem>>, vector<1x16x8xf32>,
      %218 = vector.extract_strided_slice %167 {offsets = [0, 64], sizes = [16, 32], strides = [1, 1]} : vector<16x128xf32> to vector<16x32xf32>
      %219 = arith.mulf %218, %218 : vector<16x32xf32>
      %cst_137 = arith.constant dense<0.000000e+00> : vector<16xf32>
      %220 = vector.multi_reduction <add>, %219, %cst_137 [1] : vector<16x32xf32> to vector<16xf32>
      %221 = vector.shape_cast %220 : vector<16xf32> to vector<16x1xf32>
      %c2_138 = arith.constant 2 : index
      %c0_139 = arith.constant 0 : index
      %c0_140 = arith.constant 0 : index
      %222 = vector.load %arg2[%c2_138, %c0_139, %c0_140] : memref<4x8x32xf32, #tpu.memory_space<vmem>>, vector<1x8x32xf32>
      %223 = vector.shape_cast %222 : vector<1x8x32xf32> to vector<8x32xf32>
      %cst_141 = arith.constant dense<0.000000e+00> : vector<16x8xf32>
      %224 = tpu.matmul %218, %223, %cst_141 {dimension_numbers = #tpu.dot_dimension_numbers<[1], [1], [0], [0], [0, 0, 1, 0], [], []>, precision = #tpu.contract_precision<fp32>} : vector<16x32xf32>, vector<8x32xf32>, vector<16x8xf32> -> vector<16x8xf32>
      %c2_142 = arith.constant 2 : index
      %c0_143 = arith.constant 0 : index
      %c0_144 = arith.constant 0 : index
      %225 = vector.load %arg3[%c2_142, %c0_143, %c0_144] : memref<4x1x8xf32, #tpu.memory_space<vmem>>, vector<1x1x8xf32>
      %226 = vector.shape_cast %225 : vector<1x1x8xf32> to vector<1x8xf32>
      %227 = vector.broadcast %221 : vector<16x1xf32> to vector<16x8xf32>
      %228 = vector.broadcast %226 : vector<1x8xf32> to vector<16x8xf32>
      %229 = arith.mulf %227, %228 : vector<16x8xf32>
      %230 = arith.addf %229, %224 : vector<16x8xf32>
      %c2_145 = arith.constant 2 : index
      %c0_146 = arith.constant 0 : index
      %c0_147 = arith.constant 0 : index
      %231 = vector.load %arg4[%c2_145, %c0_146, %c0_147] : memref<4x1x8xf32, #tpu.memory_space<vmem>>, vector<1x1x8xf32>
      %232 = vector.shape_cast %231 : vector<1x1x8xf32> to vector<1x8xf32>
      %233 = vector.broadcast %232 : vector<1x8xf32> to vector<16x8xf32>
      %234 = arith.addf %230, %233 : vector<16x8xf32>
      %235 = math.exp %234 : vector<16x8xf32>
      %c2_148 = arith.constant 2 : index
      %c0_149 = arith.constant 0 : index
      %c0_150 = arith.constant 0 : index
      %236 = vector.load %arg5[%c2_148, %c0_149, %c0_150] : memref<4x1x8xf32, #tpu.memory_space<vmem>>, vector<1x1x8xf32>
      %237 = vector.shape_cast %236 : vector<1x1x8xf32> to vector<1x8xf32>
      %238 = vector.broadcast %237 : vector<1x8xf32> to vector<16x8xf32>
      %239 = arith.mulf %235, %238 : vector<16x8xf32>
      %c2_151 = arith.constant 2 : index
      %c0_152 = arith.constant 0 : index
      %c0_153 = arith.constant 0 : index
      %240 = vector.load %arg12[%c2_151, %c0_152, %c0_153] : memref<4x16x8xf32, #tpu.memory_space<vmem>>, vector<1x16x8xf32>
      %241 = vector.shape_cast %240 : vector<1x16x8xf32> to vector<16x8xf32>
      %242 = vector.shape_cast %239 : vector<16x8xf32> to vector<1x16x8xf32>
      tpu.vector_store %arg12[%c2_151, %c0_152, %c0_153], %242 {strides = array<i32>} : memref<4x16x8xf32, #tpu.memory_space<vmem>>, vector<1x16x8xf32>,
      %243 = vector.extract_strided_slice %167 {offsets = [0, 96], sizes = [16, 32], strides = [1, 1]} : vector<16x128xf32> to vector<16x32xf32>
      %244 = arith.mulf %243, %243 : vector<16x32xf32>
      %cst_154 = arith.constant dense<0.000000e+00> : vector<16xf32>
      %245 = vector.multi_reduction <add>, %244, %cst_154 [1] : vector<16x32xf32> to vector<16xf32>
      %246 = vector.shape_cast %245 : vector<16xf32> to vector<16x1xf32>
      %c3_155 = arith.constant 3 : index
      %c0_156 = arith.constant 0 : index
      %c0_157 = arith.constant 0 : index
      %247 = vector.load %arg2[%c3_155, %c0_156, %c0_157] : memref<4x8x32xf32, #tpu.memory_space<vmem>>, vector<1x8x32xf32>
      %248 = vector.shape_cast %247 : vector<1x8x32xf32> to vector<8x32xf32>
      %cst_158 = arith.constant dense<0.000000e+00> : vector<16x8xf32>
      %249 = tpu.matmul %243, %248, %cst_158 {dimension_numbers = #tpu.dot_dimension_numbers<[1], [1], [0], [0], [0, 0, 1, 0], [], []>, precision = #tpu.contract_precision<fp32>} : vector<16x32xf32>, vector<8x32xf32>, vector<16x8xf32> -> vector<16x8xf32>
      %c3_159 = arith.constant 3 : index
      %c0_160 = arith.constant 0 : index
      %c0_161 = arith.constant 0 : index
      %250 = vector.load %arg3[%c3_159, %c0_160, %c0_161] : memref<4x1x8xf32, #tpu.memory_space<vmem>>, vector<1x1x8xf32>
      %251 = vector.shape_cast %250 : vector<1x1x8xf32> to vector<1x8xf32>
      %252 = vector.broadcast %246 : vector<16x1xf32> to vector<16x8xf32>
      %253 = vector.broadcast %251 : vector<1x8xf32> to vector<16x8xf32>
      %254 = arith.mulf %252, %253 : vector<16x8xf32>
      %255 = arith.addf %254, %249 : vector<16x8xf32>
      %c3_162 = arith.constant 3 : index
      %c0_163 = arith.constant 0 : index
      %c0_164 = arith.constant 0 : index
      %256 = vector.load %arg4[%c3_162, %c0_163, %c0_164] : memref<4x1x8xf32, #tpu.memory_space<vmem>>, vector<1x1x8xf32>
      %257 = vector.shape_cast %256 : vector<1x1x8xf32> to vector<1x8xf32>
      %258 = vector.broadcast %257 : vector<1x8xf32> to vector<16x8xf32>
      %259 = arith.addf %255, %258 : vector<16x8xf32>
      %260 = math.exp %259 : vector<16x8xf32>
      %c3_165 = arith.constant 3 : index
      %c0_166 = arith.constant 0 : index
      %c0_167 = arith.constant 0 : index
      %261 = vector.load %arg5[%c3_165, %c0_166, %c0_167] : memref<4x1x8xf32, #tpu.memory_space<vmem>>, vector<1x1x8xf32>
      %262 = vector.shape_cast %261 : vector<1x1x8xf32> to vector<1x8xf32>
      %263 = vector.broadcast %262 : vector<1x8xf32> to vector<16x8xf32>
      %264 = arith.mulf %260, %263 : vector<16x8xf32>
      %c3_168 = arith.constant 3 : index
      %c0_169 = arith.constant 0 : index
      %c0_170 = arith.constant 0 : index
      %265 = vector.load %arg12[%c3_168, %c0_169, %c0_170] : memref<4x16x8xf32, #tpu.memory_space<vmem>>, vector<1x16x8xf32>
      %266 = vector.shape_cast %265 : vector<1x16x8xf32> to vector<16x8xf32>
      %267 = vector.shape_cast %264 : vector<16x8xf32> to vector<1x16x8xf32>
      tpu.vector_store %arg12[%c3_168, %c0_169, %c0_170], %267 {strides = array<i32>} : memref<4x16x8xf32, #tpu.memory_space<vmem>>, vector<1x16x8xf32>,
      %cst_171 = arith.constant 0.000000e+00 : f32
      %268 = vector.broadcast %cst_171 : f32 to vector<4x16x32xf32>
      %c0_172 = arith.constant 0 : index
      %c0_173 = arith.constant 0 : index
      %c0_174 = arith.constant 0 : index
      %269 = vector.load %arg13[%c0_172, %c0_173, %c0_174] : memref<4x16x32xf32, #tpu.memory_space<vmem>>, vector<4x16x32xf32>
      tpu.vector_store %arg13[%c0_172, %c0_173, %c0_174], %268 {strides = array<i32>} : memref<4x16x32xf32, #tpu.memory_space<vmem>>, vector<4x16x32xf32>,
    } else {
    }
    %c0 = arith.constant 0 : index
    %c0_1 = arith.constant 0 : index
    %c0_2 = arith.constant 0 : index
    %3 = vector.load %arg9[%c0, %c0_1, %c0_2] : memref<1x16x128xf32, #tpu.memory_space<vmem>>, vector<1x16x128xf32>
    %4 = vector.shape_cast %3 : vector<1x16x128xf32> to vector<16x128xf32>
    %c0_3 = arith.constant 0 : index
    %c0_4 = arith.constant 0 : index
    %c0_5 = arith.constant 0 : index
    %5 = vector.load %arg10[%c0_3, %c0_4, %c0_5] : memref<1x16x128xf32, #tpu.memory_space<vmem>>, vector<1x16x128xf32>
    %6 = vector.shape_cast %5 : vector<1x16x128xf32> to vector<16x128xf32>
    %7 = vector.extract_strided_slice %4 {offsets = [0, 0], sizes = [16, 32], strides = [1, 1]} : vector<16x128xf32> to vector<16x32xf32>
    %8 = arith.mulf %7, %7 : vector<16x32xf32>
    %cst = arith.constant dense<0.000000e+00> : vector<16xf32>
    %9 = vector.multi_reduction <add>, %8, %cst [1] : vector<16x32xf32> to vector<16xf32>
    %10 = vector.shape_cast %9 : vector<16xf32> to vector<16x1xf32>
    %c0_6 = arith.constant 0 : index
    %c0_7 = arith.constant 0 : index
    %c0_8 = arith.constant 0 : index
    %11 = vector.load %arg2[%c0_6, %c0_7, %c0_8] : memref<4x8x32xf32, #tpu.memory_space<vmem>>, vector<1x8x32xf32>
    %12 = vector.shape_cast %11 : vector<1x8x32xf32> to vector<8x32xf32>
    %cst_9 = arith.constant dense<0.000000e+00> : vector<16x8xf32>
    %13 = tpu.matmul %7, %12, %cst_9 {dimension_numbers = #tpu.dot_dimension_numbers<[1], [1], [0], [0], [0, 0, 1, 0], [], []>, precision = #tpu.contract_precision<fp32>} : vector<16x32xf32>, vector<8x32xf32>, vector<16x8xf32> -> vector<16x8xf32>
    %c0_10 = arith.constant 0 : index
    %c0_11 = arith.constant 0 : index
    %c0_12 = arith.constant 0 : index
    %14 = vector.load %arg3[%c0_10, %c0_11, %c0_12] : memref<4x1x8xf32, #tpu.memory_space<vmem>>, vector<1x1x8xf32>
    %15 = vector.shape_cast %14 : vector<1x1x8xf32> to vector<1x8xf32>
    %16 = vector.broadcast %10 : vector<16x1xf32> to vector<16x8xf32>
    %17 = vector.broadcast %15 : vector<1x8xf32> to vector<16x8xf32>
    %18 = arith.mulf %16, %17 : vector<16x8xf32>
    %19 = arith.addf %18, %13 : vector<16x8xf32>
    %c0_13 = arith.constant 0 : index
    %c0_14 = arith.constant 0 : index
    %c0_15 = arith.constant 0 : index
    %20 = vector.load %arg4[%c0_13, %c0_14, %c0_15] : memref<4x1x8xf32, #tpu.memory_space<vmem>>, vector<1x1x8xf32>
    %21 = vector.shape_cast %20 : vector<1x1x8xf32> to vector<1x8xf32>
    %22 = vector.broadcast %21 : vector<1x8xf32> to vector<16x8xf32>
    %23 = arith.addf %19, %22 : vector<16x8xf32>
    %24 = math.exp %23 : vector<16x8xf32>
    %c0_16 = arith.constant 0 : index
    %c0_17 = arith.constant 0 : index
    %c0_18 = arith.constant 0 : index
    %25 = vector.load %arg12[%c0_16, %c0_17, %c0_18] : memref<4x16x8xf32, #tpu.memory_space<vmem>>, vector<1x16x8xf32>
    %26 = vector.shape_cast %25 : vector<1x16x8xf32> to vector<16x8xf32>
    %cst_19 = arith.constant dense<0.000000e+00> : vector<16x16xf32>
    %27 = tpu.matmul %26, %24, %cst_19 {dimension_numbers = #tpu.dot_dimension_numbers<[1], [1], [0], [0], [0, 0, 1, 0], [], []>, precision = #tpu.contract_precision<fp32>} : vector<16x8xf32>, vector<16x8xf32>, vector<16x16xf32> -> vector<16x16xf32>
    %cst_20 = arith.constant dense<0xFF800000> : vector<16xf32>
    %28 = vector.multi_reduction <maximumf>, %27, %cst_20 [0] : vector<16x16xf32> to vector<16xf32>
    %29 = vector.shape_cast %28 : vector<16xf32> to vector<1x16xf32>
    %30 = vector.broadcast %29 : vector<1x16xf32> to vector<16x16xf32>
    %31 = arith.subf %27, %30 : vector<16x16xf32>
    %32 = math.exp %31 : vector<16x16xf32>
    %cst_21 = arith.constant dense<0.000000e+00> : vector<16xf32>
    %33 = vector.multi_reduction <add>, %32, %cst_21 [0] : vector<16x16xf32> to vector<16xf32>
    %34 = vector.shape_cast %33 : vector<16xf32> to vector<1x16xf32>
    %35 = tpu.reciprocal %34 {approx = true} : vector<1x16xf32> -> vector<1x16xf32>
    %36 = vector.broadcast %35 : vector<1x16xf32> to vector<16x16xf32>
    %37 = arith.mulf %32, %36 : vector<16x16xf32>
    %c0_22 = arith.constant 0 : index
    %c0_23 = arith.constant 0 : index
    %c0_24 = arith.constant 0 : index
    %38 = vector.load %arg13[%c0_22, %c0_23, %c0_24] : memref<4x16x32xf32, #tpu.memory_space<vmem>>, vector<1x16x32xf32>
    %39 = vector.shape_cast %38 : vector<1x16x32xf32> to vector<16x32xf32>
    %40 = vector.extract_strided_slice %6 {offsets = [0, 0], sizes = [16, 32], strides = [1, 1]} : vector<16x128xf32> to vector<16x32xf32>
    %cst_25 = arith.constant dense<0.000000e+00> : vector<16x32xf32>
    %41 = tpu.matmul %37, %40, %cst_25 {dimension_numbers = #tpu.dot_dimension_numbers<[1], [0], [0], [1], [0, 0, 1, 1], [], []>, precision = #tpu.contract_precision<fp32>} : vector<16x16xf32>, vector<16x32xf32>, vector<16x32xf32> -> vector<16x32xf32>
    %42 = arith.addf %39, %41 : vector<16x32xf32>
    %c0_26 = arith.constant 0 : index
    %c0_27 = arith.constant 0 : index
    %c0_28 = arith.constant 0 : index
    %43 = vector.load %arg13[%c0_26, %c0_27, %c0_28] : memref<4x16x32xf32, #tpu.memory_space<vmem>>, vector<1x16x32xf32>
    %44 = vector.shape_cast %43 : vector<1x16x32xf32> to vector<16x32xf32>
    %45 = vector.shape_cast %42 : vector<16x32xf32> to vector<1x16x32xf32>
    tpu.vector_store %arg13[%c0_26, %c0_27, %c0_28], %45 {strides = array<i32>} : memref<4x16x32xf32, #tpu.memory_space<vmem>>, vector<1x16x32xf32>,
    %46 = vector.extract_strided_slice %4 {offsets = [0, 32], sizes = [16, 32], strides = [1, 1]} : vector<16x128xf32> to vector<16x32xf32>
    %47 = arith.mulf %46, %46 : vector<16x32xf32>
    %cst_29 = arith.constant dense<0.000000e+00> : vector<16xf32>
    %48 = vector.multi_reduction <add>, %47, %cst_29 [1] : vector<16x32xf32> to vector<16xf32>
    %49 = vector.shape_cast %48 : vector<16xf32> to vector<16x1xf32>
    %c1 = arith.constant 1 : index
    %c0_30 = arith.constant 0 : index
    %c0_31 = arith.constant 0 : index
    %50 = vector.load %arg2[%c1, %c0_30, %c0_31] : memref<4x8x32xf32, #tpu.memory_space<vmem>>, vector<1x8x32xf32>
    %51 = vector.shape_cast %50 : vector<1x8x32xf32> to vector<8x32xf32>
    %cst_32 = arith.constant dense<0.000000e+00> : vector<16x8xf32>
    %52 = tpu.matmul %46, %51, %cst_32 {dimension_numbers = #tpu.dot_dimension_numbers<[1], [1], [0], [0], [0, 0, 1, 0], [], []>, precision = #tpu.contract_precision<fp32>} : vector<16x32xf32>, vector<8x32xf32>, vector<16x8xf32> -> vector<16x8xf32>
    %c1_33 = arith.constant 1 : index
    %c0_34 = arith.constant 0 : index
    %c0_35 = arith.constant 0 : index
    %53 = vector.load %arg3[%c1_33, %c0_34, %c0_35] : memref<4x1x8xf32, #tpu.memory_space<vmem>>, vector<1x1x8xf32>
    %54 = vector.shape_cast %53 : vector<1x1x8xf32> to vector<1x8xf32>
    %55 = vector.broadcast %49 : vector<16x1xf32> to vector<16x8xf32>
    %56 = vector.broadcast %54 : vector<1x8xf32> to vector<16x8xf32>
    %57 = arith.mulf %55, %56 : vector<16x8xf32>
    %58 = arith.addf %57, %52 : vector<16x8xf32>
    %c1_36 = arith.constant 1 : index
    %c0_37 = arith.constant 0 : index
    %c0_38 = arith.constant 0 : index
    %59 = vector.load %arg4[%c1_36, %c0_37, %c0_38] : memref<4x1x8xf32, #tpu.memory_space<vmem>>, vector<1x1x8xf32>
    %60 = vector.shape_cast %59 : vector<1x1x8xf32> to vector<1x8xf32>
    %61 = vector.broadcast %60 : vector<1x8xf32> to vector<16x8xf32>
    %62 = arith.addf %58, %61 : vector<16x8xf32>
    %63 = math.exp %62 : vector<16x8xf32>
    %c1_39 = arith.constant 1 : index
    %c0_40 = arith.constant 0 : index
    %c0_41 = arith.constant 0 : index
    %64 = vector.load %arg12[%c1_39, %c0_40, %c0_41] : memref<4x16x8xf32, #tpu.memory_space<vmem>>, vector<1x16x8xf32>
    %65 = vector.shape_cast %64 : vector<1x16x8xf32> to vector<16x8xf32>
    %cst_42 = arith.constant dense<0.000000e+00> : vector<16x16xf32>
    %66 = tpu.matmul %65, %63, %cst_42 {dimension_numbers = #tpu.dot_dimension_numbers<[1], [1], [0], [0], [0, 0, 1, 0], [], []>, precision = #tpu.contract_precision<fp32>} : vector<16x8xf32>, vector<16x8xf32>, vector<16x16xf32> -> vector<16x16xf32>
    %cst_43 = arith.constant dense<0xFF800000> : vector<16xf32>
    %67 = vector.multi_reduction <maximumf>, %66, %cst_43 [0] : vector<16x16xf32> to vector<16xf32>
    %68 = vector.shape_cast %67 : vector<16xf32> to vector<1x16xf32>
    %69 = vector.broadcast %68 : vector<1x16xf32> to vector<16x16xf32>
    %70 = arith.subf %66, %69 : vector<16x16xf32>
    %71 = math.exp %70 : vector<16x16xf32>
    %cst_44 = arith.constant dense<0.000000e+00> : vector<16xf32>
    %72 = vector.multi_reduction <add>, %71, %cst_44 [0] : vector<16x16xf32> to vector<16xf32>
    %73 = vector.shape_cast %72 : vector<16xf32> to vector<1x16xf32>
    %74 = tpu.reciprocal %73 {approx = true} : vector<1x16xf32> -> vector<1x16xf32>
    %75 = vector.broadcast %74 : vector<1x16xf32> to vector<16x16xf32>
    %76 = arith.mulf %71, %75 : vector<16x16xf32>
    %c1_45 = arith.constant 1 : index
    %c0_46 = arith.constant 0 : index
    %c0_47 = arith.constant 0 : index
    %77 = vector.load %arg13[%c1_45, %c0_46, %c0_47] : memref<4x16x32xf32, #tpu.memory_space<vmem>>, vector<1x16x32xf32>
    %78 = vector.shape_cast %77 : vector<1x16x32xf32> to vector<16x32xf32>
    %79 = vector.extract_strided_slice %6 {offsets = [0, 32], sizes = [16, 32], strides = [1, 1]} : vector<16x128xf32> to vector<16x32xf32>
    %cst_48 = arith.constant dense<0.000000e+00> : vector<16x32xf32>
    %80 = tpu.matmul %76, %79, %cst_48 {dimension_numbers = #tpu.dot_dimension_numbers<[1], [0], [0], [1], [0, 0, 1, 1], [], []>, precision = #tpu.contract_precision<fp32>} : vector<16x16xf32>, vector<16x32xf32>, vector<16x32xf32> -> vector<16x32xf32>
    %81 = arith.addf %78, %80 : vector<16x32xf32>
    %c1_49 = arith.constant 1 : index
    %c0_50 = arith.constant 0 : index
    %c0_51 = arith.constant 0 : index
    %82 = vector.load %arg13[%c1_49, %c0_50, %c0_51] : memref<4x16x32xf32, #tpu.memory_space<vmem>>, vector<1x16x32xf32>
    %83 = vector.shape_cast %82 : vector<1x16x32xf32> to vector<16x32xf32>
    %84 = vector.shape_cast %81 : vector<16x32xf32> to vector<1x16x32xf32>
    tpu.vector_store %arg13[%c1_49, %c0_50, %c0_51], %84 {strides = array<i32>} : memref<4x16x32xf32, #tpu.memory_space<vmem>>, vector<1x16x32xf32>,
    %85 = vector.extract_strided_slice %4 {offsets = [0, 64], sizes = [16, 32], strides = [1, 1]} : vector<16x128xf32> to vector<16x32xf32>
    %86 = arith.mulf %85, %85 : vector<16x32xf32>
    %cst_52 = arith.constant dense<0.000000e+00> : vector<16xf32>
    %87 = vector.multi_reduction <add>, %86, %cst_52 [1] : vector<16x32xf32> to vector<16xf32>
    %88 = vector.shape_cast %87 : vector<16xf32> to vector<16x1xf32>
    %c2 = arith.constant 2 : index
    %c0_53 = arith.constant 0 : index
    %c0_54 = arith.constant 0 : index
    %89 = vector.load %arg2[%c2, %c0_53, %c0_54] : memref<4x8x32xf32, #tpu.memory_space<vmem>>, vector<1x8x32xf32>
    %90 = vector.shape_cast %89 : vector<1x8x32xf32> to vector<8x32xf32>
    %cst_55 = arith.constant dense<0.000000e+00> : vector<16x8xf32>
    %91 = tpu.matmul %85, %90, %cst_55 {dimension_numbers = #tpu.dot_dimension_numbers<[1], [1], [0], [0], [0, 0, 1, 0], [], []>, precision = #tpu.contract_precision<fp32>} : vector<16x32xf32>, vector<8x32xf32>, vector<16x8xf32> -> vector<16x8xf32>
    %c2_56 = arith.constant 2 : index
    %c0_57 = arith.constant 0 : index
    %c0_58 = arith.constant 0 : index
    %92 = vector.load %arg3[%c2_56, %c0_57, %c0_58] : memref<4x1x8xf32, #tpu.memory_space<vmem>>, vector<1x1x8xf32>
    %93 = vector.shape_cast %92 : vector<1x1x8xf32> to vector<1x8xf32>
    %94 = vector.broadcast %88 : vector<16x1xf32> to vector<16x8xf32>
    %95 = vector.broadcast %93 : vector<1x8xf32> to vector<16x8xf32>
    %96 = arith.mulf %94, %95 : vector<16x8xf32>
    %97 = arith.addf %96, %91 : vector<16x8xf32>
    %c2_59 = arith.constant 2 : index
    %c0_60 = arith.constant 0 : index
    %c0_61 = arith.constant 0 : index
    %98 = vector.load %arg4[%c2_59, %c0_60, %c0_61] : memref<4x1x8xf32, #tpu.memory_space<vmem>>, vector<1x1x8xf32>
    %99 = vector.shape_cast %98 : vector<1x1x8xf32> to vector<1x8xf32>
    %100 = vector.broadcast %99 : vector<1x8xf32> to vector<16x8xf32>
    %101 = arith.addf %97, %100 : vector<16x8xf32>
    %102 = math.exp %101 : vector<16x8xf32>
    %c2_62 = arith.constant 2 : index
    %c0_63 = arith.constant 0 : index
    %c0_64 = arith.constant 0 : index
    %103 = vector.load %arg12[%c2_62, %c0_63, %c0_64] : memref<4x16x8xf32, #tpu.memory_space<vmem>>, vector<1x16x8xf32>
    %104 = vector.shape_cast %103 : vector<1x16x8xf32> to vector<16x8xf32>
    %cst_65 = arith.constant dense<0.000000e+00> : vector<16x16xf32>
    %105 = tpu.matmul %104, %102, %cst_65 {dimension_numbers = #tpu.dot_dimension_numbers<[1], [1], [0], [0], [0, 0, 1, 0], [], []>, precision = #tpu.contract_precision<fp32>} : vector<16x8xf32>, vector<16x8xf32>, vector<16x16xf32> -> vector<16x16xf32>
    %cst_66 = arith.constant dense<0xFF800000> : vector<16xf32>
    %106 = vector.multi_reduction <maximumf>, %105, %cst_66 [0] : vector<16x16xf32> to vector<16xf32>
    %107 = vector.shape_cast %106 : vector<16xf32> to vector<1x16xf32>
    %108 = vector.broadcast %107 : vector<1x16xf32> to vector<16x16xf32>
    %109 = arith.subf %105, %108 : vector<16x16xf32>
    %110 = math.exp %109 : vector<16x16xf32>
    %cst_67 = arith.constant dense<0.000000e+00> : vector<16xf32>
    %111 = vector.multi_reduction <add>, %110, %cst_67 [0] : vector<16x16xf32> to vector<16xf32>
    %112 = vector.shape_cast %111 : vector<16xf32> to vector<1x16xf32>
    %113 = tpu.reciprocal %112 {approx = true} : vector<1x16xf32> -> vector<1x16xf32>
    %114 = vector.broadcast %113 : vector<1x16xf32> to vector<16x16xf32>
    %115 = arith.mulf %110, %114 : vector<16x16xf32>
    %c2_68 = arith.constant 2 : index
    %c0_69 = arith.constant 0 : index
    %c0_70 = arith.constant 0 : index
    %116 = vector.load %arg13[%c2_68, %c0_69, %c0_70] : memref<4x16x32xf32, #tpu.memory_space<vmem>>, vector<1x16x32xf32>
    %117 = vector.shape_cast %116 : vector<1x16x32xf32> to vector<16x32xf32>
    %118 = vector.extract_strided_slice %6 {offsets = [0, 64], sizes = [16, 32], strides = [1, 1]} : vector<16x128xf32> to vector<16x32xf32>
    %cst_71 = arith.constant dense<0.000000e+00> : vector<16x32xf32>
    %119 = tpu.matmul %115, %118, %cst_71 {dimension_numbers = #tpu.dot_dimension_numbers<[1], [0], [0], [1], [0, 0, 1, 1], [], []>, precision = #tpu.contract_precision<fp32>} : vector<16x16xf32>, vector<16x32xf32>, vector<16x32xf32> -> vector<16x32xf32>
    %120 = arith.addf %117, %119 : vector<16x32xf32>
    %c2_72 = arith.constant 2 : index
    %c0_73 = arith.constant 0 : index
    %c0_74 = arith.constant 0 : index
    %121 = vector.load %arg13[%c2_72, %c0_73, %c0_74] : memref<4x16x32xf32, #tpu.memory_space<vmem>>, vector<1x16x32xf32>
    %122 = vector.shape_cast %121 : vector<1x16x32xf32> to vector<16x32xf32>
    %123 = vector.shape_cast %120 : vector<16x32xf32> to vector<1x16x32xf32>
    tpu.vector_store %arg13[%c2_72, %c0_73, %c0_74], %123 {strides = array<i32>} : memref<4x16x32xf32, #tpu.memory_space<vmem>>, vector<1x16x32xf32>,
    %124 = vector.extract_strided_slice %4 {offsets = [0, 96], sizes = [16, 32], strides = [1, 1]} : vector<16x128xf32> to vector<16x32xf32>
    %125 = arith.mulf %124, %124 : vector<16x32xf32>
    %cst_75 = arith.constant dense<0.000000e+00> : vector<16xf32>
    %126 = vector.multi_reduction <add>, %125, %cst_75 [1] : vector<16x32xf32> to vector<16xf32>
    %127 = vector.shape_cast %126 : vector<16xf32> to vector<16x1xf32>
    %c3 = arith.constant 3 : index
    %c0_76 = arith.constant 0 : index
    %c0_77 = arith.constant 0 : index
    %128 = vector.load %arg2[%c3, %c0_76, %c0_77] : memref<4x8x32xf32, #tpu.memory_space<vmem>>, vector<1x8x32xf32>
    %129 = vector.shape_cast %128 : vector<1x8x32xf32> to vector<8x32xf32>
    %cst_78 = arith.constant dense<0.000000e+00> : vector<16x8xf32>
    %130 = tpu.matmul %124, %129, %cst_78 {dimension_numbers = #tpu.dot_dimension_numbers<[1], [1], [0], [0], [0, 0, 1, 0], [], []>, precision = #tpu.contract_precision<fp32>} : vector<16x32xf32>, vector<8x32xf32>, vector<16x8xf32> -> vector<16x8xf32>
    %c3_79 = arith.constant 3 : index
    %c0_80 = arith.constant 0 : index
    %c0_81 = arith.constant 0 : index
    %131 = vector.load %arg3[%c3_79, %c0_80, %c0_81] : memref<4x1x8xf32, #tpu.memory_space<vmem>>, vector<1x1x8xf32>
    %132 = vector.shape_cast %131 : vector<1x1x8xf32> to vector<1x8xf32>
    %133 = vector.broadcast %127 : vector<16x1xf32> to vector<16x8xf32>
    %134 = vector.broadcast %132 : vector<1x8xf32> to vector<16x8xf32>
    %135 = arith.mulf %133, %134 : vector<16x8xf32>
    %136 = arith.addf %135, %130 : vector<16x8xf32>
    %c3_82 = arith.constant 3 : index
    %c0_83 = arith.constant 0 : index
    %c0_84 = arith.constant 0 : index
    %137 = vector.load %arg4[%c3_82, %c0_83, %c0_84] : memref<4x1x8xf32, #tpu.memory_space<vmem>>, vector<1x1x8xf32>
    %138 = vector.shape_cast %137 : vector<1x1x8xf32> to vector<1x8xf32>
    %139 = vector.broadcast %138 : vector<1x8xf32> to vector<16x8xf32>
    %140 = arith.addf %136, %139 : vector<16x8xf32>
    %141 = math.exp %140 : vector<16x8xf32>
    %c3_85 = arith.constant 3 : index
    %c0_86 = arith.constant 0 : index
    %c0_87 = arith.constant 0 : index
    %142 = vector.load %arg12[%c3_85, %c0_86, %c0_87] : memref<4x16x8xf32, #tpu.memory_space<vmem>>, vector<1x16x8xf32>
    %143 = vector.shape_cast %142 : vector<1x16x8xf32> to vector<16x8xf32>
    %cst_88 = arith.constant dense<0.000000e+00> : vector<16x16xf32>
    %144 = tpu.matmul %143, %141, %cst_88 {dimension_numbers = #tpu.dot_dimension_numbers<[1], [1], [0], [0], [0, 0, 1, 0], [], []>, precision = #tpu.contract_precision<fp32>} : vector<16x8xf32>, vector<16x8xf32>, vector<16x16xf32> -> vector<16x16xf32>
    %cst_89 = arith.constant dense<0xFF800000> : vector<16xf32>
    %145 = vector.multi_reduction <maximumf>, %144, %cst_89 [0] : vector<16x16xf32> to vector<16xf32>
    %146 = vector.shape_cast %145 : vector<16xf32> to vector<1x16xf32>
    %147 = vector.broadcast %146 : vector<1x16xf32> to vector<16x16xf32>
    %148 = arith.subf %144, %147 : vector<16x16xf32>
    %149 = math.exp %148 : vector<16x16xf32>
    %cst_90 = arith.constant dense<0.000000e+00> : vector<16xf32>
    %150 = vector.multi_reduction <add>, %149, %cst_90 [0] : vector<16x16xf32> to vector<16xf32>
    %151 = vector.shape_cast %150 : vector<16xf32> to vector<1x16xf32>
    %152 = tpu.reciprocal %151 {approx = true} : vector<1x16xf32> -> vector<1x16xf32>
    %153 = vector.broadcast %152 : vector<1x16xf32> to vector<16x16xf32>
    %154 = arith.mulf %149, %153 : vector<16x16xf32>
    %c3_91 = arith.constant 3 : index
    %c0_92 = arith.constant 0 : index
    %c0_93 = arith.constant 0 : index
    %155 = vector.load %arg13[%c3_91, %c0_92, %c0_93] : memref<4x16x32xf32, #tpu.memory_space<vmem>>, vector<1x16x32xf32>
    %156 = vector.shape_cast %155 : vector<1x16x32xf32> to vector<16x32xf32>
    %157 = vector.extract_strided_slice %6 {offsets = [0, 96], sizes = [16, 32], strides = [1, 1]} : vector<16x128xf32> to vector<16x32xf32>
    %cst_94 = arith.constant dense<0.000000e+00> : vector<16x32xf32>
    %158 = tpu.matmul %154, %157, %cst_94 {dimension_numbers = #tpu.dot_dimension_numbers<[1], [0], [0], [1], [0, 0, 1, 1], [], []>, precision = #tpu.contract_precision<fp32>} : vector<16x16xf32>, vector<16x32xf32>, vector<16x32xf32> -> vector<16x32xf32>
    %159 = arith.addf %156, %158 : vector<16x32xf32>
    %c3_95 = arith.constant 3 : index
    %c0_96 = arith.constant 0 : index
    %c0_97 = arith.constant 0 : index
    %160 = vector.load %arg13[%c3_95, %c0_96, %c0_97] : memref<4x16x32xf32, #tpu.memory_space<vmem>>, vector<1x16x32xf32>
    %161 = vector.shape_cast %160 : vector<1x16x32xf32> to vector<16x32xf32>
    %162 = vector.shape_cast %159 : vector<16x32xf32> to vector<1x16x32xf32>
    tpu.vector_store %arg13[%c3_95, %c0_96, %c0_97], %162 {strides = array<i32>} : memref<4x16x32xf32, #tpu.memory_space<vmem>>, vector<1x16x32xf32>,
    %c0_i32_98 = arith.constant 0 : i32
    %163 = arith.cmpi eq, %arg1, %c0_i32_98 : i32
    %164 = arith.extui %163 : i1 to i32
    %c0_i32_99 = arith.constant 0 : i32
    %165 = arith.cmpi ne, %164, %c0_i32_99 : i32
    scf.if %165 {
      %c0_100 = arith.constant 0 : index
      %c0_101 = arith.constant 0 : index
      %166 = vector.load %arg6[%c0_100, %c0_101] : memref<128x128xf32, #tpu.memory_space<vmem>>, vector<128x128xf32>
      %c0_102 = arith.constant 0 : index
      %c0_103 = arith.constant 0 : index
      %c0_104 = arith.constant 0 : index
      %167 = vector.load %arg7[%c0_102, %c0_103, %c0_104] : memref<1x16x128xf32, #tpu.memory_space<vmem>>, vector<1x16x128xf32>
      %168 = vector.shape_cast %167 : vector<1x16x128xf32> to vector<16x128xf32>
      %c0_105 = arith.constant 0 : index
      %c0_106 = arith.constant 0 : index
      %c0_107 = arith.constant 0 : index
      %169 = vector.load %arg13[%c0_105, %c0_106, %c0_107] : memref<4x16x32xf32, #tpu.memory_space<vmem>>, vector<1x16x32xf32>
      %170 = vector.shape_cast %169 : vector<1x16x32xf32> to vector<16x32xf32>
      %171 = vector.extract_strided_slice %166 {offsets = [0, 0], sizes = [128, 32], strides = [1, 1]} : vector<128x128xf32> to vector<128x32xf32>
      %cst_108 = arith.constant dense<0.000000e+00> : vector<16x128xf32>
      %172 = tpu.matmul %170, %171, %cst_108 {dimension_numbers = #tpu.dot_dimension_numbers<[1], [1], [0], [0], [0, 0, 1, 0], [], []>, precision = #tpu.contract_precision<fp32>} : vector<16x32xf32>, vector<128x32xf32>, vector<16x128xf32> -> vector<16x128xf32>
      %173 = arith.addf %168, %172 : vector<16x128xf32>
      %c1_109 = arith.constant 1 : index
      %c0_110 = arith.constant 0 : index
      %c0_111 = arith.constant 0 : index
      %174 = vector.load %arg13[%c1_109, %c0_110, %c0_111] : memref<4x16x32xf32, #tpu.memory_space<vmem>>, vector<1x16x32xf32>
      %175 = vector.shape_cast %174 : vector<1x16x32xf32> to vector<16x32xf32>
      %176 = vector.extract_strided_slice %166 {offsets = [0, 32], sizes = [128, 32], strides = [1, 1]} : vector<128x128xf32> to vector<128x32xf32>
      %cst_112 = arith.constant dense<0.000000e+00> : vector<16x128xf32>
      %177 = tpu.matmul %175, %176, %cst_112 {dimension_numbers = #tpu.dot_dimension_numbers<[1], [1], [0], [0], [0, 0, 1, 0], [], []>, precision = #tpu.contract_precision<fp32>} : vector<16x32xf32>, vector<128x32xf32>, vector<16x128xf32> -> vector<16x128xf32>
      %178 = arith.addf %173, %177 : vector<16x128xf32>
      %c2_113 = arith.constant 2 : index
      %c0_114 = arith.constant 0 : index
      %c0_115 = arith.constant 0 : index
      %179 = vector.load %arg13[%c2_113, %c0_114, %c0_115] : memref<4x16x32xf32, #tpu.memory_space<vmem>>, vector<1x16x32xf32>
      %180 = vector.shape_cast %179 : vector<1x16x32xf32> to vector<16x32xf32>
      %181 = vector.extract_strided_slice %166 {offsets = [0, 64], sizes = [128, 32], strides = [1, 1]} : vector<128x128xf32> to vector<128x32xf32>
      %cst_116 = arith.constant dense<0.000000e+00> : vector<16x128xf32>
      %182 = tpu.matmul %180, %181, %cst_116 {dimension_numbers = #tpu.dot_dimension_numbers<[1], [1], [0], [0], [0, 0, 1, 0], [], []>, precision = #tpu.contract_precision<fp32>} : vector<16x32xf32>, vector<128x32xf32>, vector<16x128xf32> -> vector<16x128xf32>
      %183 = arith.addf %178, %182 : vector<16x128xf32>
      %c3_117 = arith.constant 3 : index
      %c0_118 = arith.constant 0 : index
      %c0_119 = arith.constant 0 : index
      %184 = vector.load %arg13[%c3_117, %c0_118, %c0_119] : memref<4x16x32xf32, #tpu.memory_space<vmem>>, vector<1x16x32xf32>
      %185 = vector.shape_cast %184 : vector<1x16x32xf32> to vector<16x32xf32>
      %186 = vector.extract_strided_slice %166 {offsets = [0, 96], sizes = [128, 32], strides = [1, 1]} : vector<128x128xf32> to vector<128x32xf32>
      %cst_120 = arith.constant dense<0.000000e+00> : vector<16x128xf32>
      %187 = tpu.matmul %185, %186, %cst_120 {dimension_numbers = #tpu.dot_dimension_numbers<[1], [1], [0], [0], [0, 0, 1, 0], [], []>, precision = #tpu.contract_precision<fp32>} : vector<16x32xf32>, vector<128x32xf32>, vector<16x128xf32> -> vector<16x128xf32>
      %188 = arith.addf %183, %187 : vector<16x128xf32>
      %c0_121 = arith.constant 0 : index
      %c0_122 = arith.constant 0 : index
      %c0_123 = arith.constant 0 : index
      %189 = vector.load %arg11[%c0_121, %c0_122, %c0_123] : memref<1x16x128xf32, #tpu.memory_space<vmem>>, vector<1x16x128xf32>
      %190 = vector.shape_cast %189 : vector<1x16x128xf32> to vector<16x128xf32>
      %191 = vector.shape_cast %188 : vector<16x128xf32> to vector<1x16x128xf32>
      tpu.vector_store %arg11[%c0_121, %c0_122, %c0_123], %191 {strides = array<i32>} : memref<1x16x128xf32, #tpu.memory_space<vmem>>, vector<1x16x128xf32>,
    } else {
    }
    return
  }
  func.func @transform_0(%arg0: i32, %arg1: i32) -> (i32, i32, i32) {
    %c0_i32 = arith.constant 0 : i32
    %c0_i32_0 = arith.constant 0 : i32
    %c0_i32_1 = arith.constant 0 : i32
    %c0_i32_2 = arith.constant 0 : i32
    return %c0_i32, %c0_i32_0, %c0_i32_1 : i32, i32, i32
  }
  func.func @transform_1(%arg0: i32, %arg1: i32) -> (i32, i32, i32) {
    %c0_i32 = arith.constant 0 : i32
    %c0_i32_0 = arith.constant 0 : i32
    %c0_i32_1 = arith.constant 0 : i32
    %c0_i32_2 = arith.constant 0 : i32
    return %c0_i32, %c0_i32_0, %c0_i32_1 : i32, i32, i32
  }
  func.func @transform_2(%arg0: i32, %arg1: i32) -> (i32, i32, i32) {
    %c0_i32 = arith.constant 0 : i32
    %c0_i32_0 = arith.constant 0 : i32
    %c0_i32_1 = arith.constant 0 : i32
    %c0_i32_2 = arith.constant 0 : i32
    return %c0_i32, %c0_i32_0, %c0_i32_1 : i32, i32, i32
  }
  func.func @transform_3(%arg0: i32, %arg1: i32) -> (i32, i32, i32) {
    %c0_i32 = arith.constant 0 : i32
    %c0_i32_0 = arith.constant 0 : i32
    %c0_i32_1 = arith.constant 0 : i32
    %c0_i32_2 = arith.constant 0 : i32
    return %c0_i32, %c0_i32_0, %c0_i32_1 : i32, i32, i32
  }
  func.func @transform_4(%arg0: i32, %arg1: i32) -> (i32, i32) {
    %c0_i32 = arith.constant 0 : i32
    %c0_i32_0 = arith.constant 0 : i32
    %c0_i32_1 = arith.constant 0 : i32
    return %c0_i32, %c0_i32_0 : i32, i32
  }
  func.func @transform_5(%arg0: i32, %arg1: i32) -> (i32, i32, i32) {
    %c0_i32 = arith.constant 0 : i32
    %c0_i32_0 = arith.constant 0 : i32
    %c0_i32_1 = arith.constant 0 : i32
    return %arg0, %c0_i32, %c0_i32_0 : i32, i32, i32
  }
  func.func @transform_6(%arg0: i32, %arg1: i32) -> (i32, i32, i32) {
    %c0_i32 = arith.constant 0 : i32
    %c0_i32_0 = arith.constant 0 : i32
    %c0_i32_1 = arith.constant 0 : i32
    return %arg0, %c0_i32, %c0_i32_0 : i32, i32, i32
  }
  func.func @transform_7(%arg0: i32, %arg1: i32) -> (i32, i32, i32) {
    %c1_i32 = arith.constant 1 : i32
    %c0_i32 = arith.constant 0 : i32
    return %arg0, %arg1, %c1_i32 : i32, i32, i32
  }
  func.func @transform_8(%arg0: i32, %arg1: i32) -> (i32, i32, i32) {
    %c2_i32 = arith.constant 2 : i32
    %c0_i32 = arith.constant 0 : i32
    return %arg0, %arg1, %c2_i32 : i32, i32, i32
  }
  func.func @transform_9(%arg0: i32, %arg1: i32) -> (i32, i32, i32) {
    %c0_i32 = arith.constant 0 : i32
    %c0_i32_0 = arith.constant 0 : i32
    %c0_i32_1 = arith.constant 0 : i32
    return %arg0, %c0_i32, %c0_i32_0 : i32, i32, i32
  }
}

</mosaic_0001>

<bundles_post_ra>
// kernel: gsa_layer_forward.2
= control target key start
LH: loop header
LB: loop body
LE: loop exit
PB: predicated region body
PF: predicated region fallthrough
CT: control target
= control target key end

     0   :  { %9 = vsyncpa [#allocation3], 0  ;;  %s3008_s15 = smov [#allocation2]   ;;  %s3944_s0 = inlined_call_operand.vmem [shape: f32[32,128], index: 0, kind: input, shape index: {}]   ;;  %s3945_s1 = inlined_call_operand.vmem [shape: f32[1,128], index: 1, kind: input, shape index: {}]   ;;  %s3946_s2 = inlined_call_operand.vmem [shape: f32[1,128], index: 2, kind: input, shape index: {}]   ;;  %s3947_s3 = inlined_call_operand.hbm [shape: f32[384,128], index: 3, kind: input, shape index: {}]   ;;  %s3948_s4 = inlined_call_operand.vmem [shape: f32[32,384], index: 4, kind: output, shape index: {}]  }
   0x1   :  { %s21_s16 = sshll.u32 %s3008_s15, 4  ;;  %s2984_s19 = scalar_lea.hbm %s3947_s3, 6144  ;;  %s22_s16 = int_to_ptr.vmem [resolvable:$true] %s21_s16 }
   0x2   :  { %p2985_p0 = scmp.ne.s32.totalorder %s3947_s3, %s2984_s19  ;;  %p2988_p1 = scmp.lt.u32.totalorder %s2984_s19, %s3947_s3 }
   0x4   :  { %p2990_p2 = pnand %p2988_p1, %p2985_p0 }
   0x6   :  { %2993 = shalt.err (!%p2990_p2)
}
   0x7   :  { %s2994_s24 = scalar_lea.vmem %s22_s16, 6144  ;;  %p2999_p4 = scmp.lt.s32.totalorder %s22_s16, %s22_s16 }
   0x8   :  { %p2995_p3 = scmp.ne.s32.totalorder %s22_s16, %s2994_s24  ;;  %p3000_p5 = scmp.lt.s32.totalorder %s2994_s24, %s2994_s24 }
   0xa   :  { %p3001_p6 = por %p3000_p5, %p2999_p4 }
   0xc   :  { %p3002_p7 = pnand %p3001_p6, %p2995_p3 }
   0xe   :  { %3005 = shalt.err (!%p3002_p7)
}
   0xf   :  { %s3009_s25 = smov 128   ;;  %s3010_s26 = smov 8  }
  0x10   :  { %27 = dma.hbm_to_vmem [thread:$0]  %s3947_s3, 6144, %s22_s16, [#allocation3], %s3009_s25, %s3009_s25, %s3010_s26  }
  0x11   :  { %3006 = dma.done.wait [#allocation3], 6144  }
  0x12   :  { %3007 = vsyncadd [#allocation3], 4294961152  ;;  %v3051_v0 = vld [vmem:[%s3944_s0] sm:$0xff]  ;;  %v3056_v1 = vld [vmem:[%s3944_s0 + $0x10] sm:$0xff] }
  0x13   :  { %35 = vadd.xlane.f32.xlu0 %v3051_v0  ;;  %39 = vadd.xlane.f32.xlu1 %v3056_v1  ;;  %v3063_v2 = vld [vmem:[%s3944_s0 + $0x8] sm:$0xff]  ;;  %v3068_v3 = vld [vmem:[%s3944_s0 + $0x18] sm:$0xff]  ;;  %v118_v4 = vld [vmem:[#allocation2 + $0x80] sm:$0xff] }
  0x14   :  { %v119_v5 = vld [vmem:[#allocation2 + $0x88] sm:$0xff]  ;;  %v102_v6 = vld [vmem:[#allocation2] sm:$0xff]  ;;  %v199_v7 = vand.u32 4294901760, %v118_v4  ;;  %v120_v16 = vld [vmem:[#allocation2 + $0x90] sm:$0xff] }
  0x15   :  { %v202_v8 = vand.u32 4294901760, %v119_v5  ;;  %v103_v9 = vld [vmem:[#allocation2 + $0x8] sm:$0xff]  ;;  %v151_v10 = vand.u32 4294901760, %v102_v6  ;;  %v3072_v11 = vld [vmem:[#allocation2 + $0x100] sm:$0xff]  ;;  %v121_v17 = vld [vmem:[#allocation2 + $0x98] sm:$0xff]  ;;  %v205_v29 = vand.u32 4294901760, %v120_v16 }
  0x16   :  { %v3074_v12 = vld [vmem:[#allocation2 + $0x108] sm:$0xff]  ;;  %v154_v13 = vand.u32 4294901760, %v103_v9  ;;  %v3958_v14 = vand.u32 4294901760, %v3072_v11  ;;  %v104_v18 = vld [vmem:[#allocation2 + $0x10] sm:$0xff]  ;;  %v3080_v20 = vsub.f32 %v118_v4, %v199_v7  ;;  %v105_v23 = vld [vmem:[#allocation2 + $0x18] sm:$0xff]  ;;  %v208_v32 = vand.u32 4294901760, %v121_v17 }
  0x17   :  { %37 = vadd.xlane.f32.xlu0 %v3063_v2  ;;  %41 = vadd.xlane.f32.xlu1 %v3068_v3  ;;  %v3957_v15 = vand.u32 4294901760, %v3074_v12  ;;  %v3078_v19 = vpack.c.bf16 %v202_v8, %v199_v7  ;;  %v3082_v21 = vsub.f32 %v119_v5, %v202_v8  ;;  %v3084_v22 = vsub.f32 %v102_v6, %v151_v10  ;;  %v3086_v24 = vld [vmem:[#allocation2 + $0x110] sm:$0xff]  ;;  %v3088_v25 = vld [vmem:[#allocation2 + $0x118] sm:$0xff]  ;;  %v122_v30 = vld [vmem:[#allocation2 + $0xa0] sm:$0xff] }
  0x18   :  { %v3090_v26 = vpack.c.bf16 %v154_v13, %v151_v10  ;;  %v3092_v27 = vsub.f32 %v103_v9, %v154_v13  ;;  %v123_v31 = vld [vmem:[#allocation2 + $0xa8] sm:$0xff]  ;;  %v157_v33 = vand.u32 4294901760, %v104_v18  ;;  %v160_v34 = vand.u32 4294901760, %v105_v23  ;;  %v106_v40 = vld [vmem:[#allocation2 + $0x20] sm:$0xff]  ;;  %v124_v47 = vld [vmem:[#allocation2 + $0xb0] sm:$0xff] }
  0x19   :  { %4102 = vst [vmem:[#allocation5_spill] sm:$0xff] %v3078_v19  ;;  %v3098_v28 = vpack.c.bf16 %v3957_v15, %v3958_v14  ;;  %2530 = vmatprep.subr.bf16.mxu0 %v3078_v19  ;;  %v3954_v35 = vand.u32 4294901760, %v3086_v24  ;;  %v3104_v36 = vsub.f32 %v120_v16, %v205_v29  ;;  %v3953_v37 = vand.u32 4294901760, %v3088_v25  ;;  %v107_v41 = vld [vmem:[#allocation2 + $0x28] sm:$0xff]  ;;  %v3107_v42 = vld [vmem:[#allocation2 + $0x120] sm:$0xff]  ;;  %v125_v48 = vld [vmem:[#allocation2 + $0xb8] sm:$0xff] }
  0x1a   :  { %4103 = vst [vmem:[#allocation6_spill] sm:$0xff] %v3090_v26  ;;  %2532 = vmatpush3.bf16.xpose.msra.mxu0 %v3090_v26  ;;  %v211_v38 = vand.u32 4294901760, %v122_v30  ;;  %v214_v39 = vand.u32 4294901760, %v123_v31  ;;  %v3110_v43 = vpack.c.bf16 %v208_v32, %v205_v29  ;;  %v3112_v44 = vsub.f32 %v121_v17, %v208_v32  ;;  %v3116_v46 = vld [vmem:[#allocation2 + $0x128] sm:$0xff]  ;;  %v108_v53 = vld [vmem:[#allocation2 + $0x30] sm:$0xff]  ;;  %v109_v54 = vld [vmem:[#allocation2 + $0x38] sm:$0xff] }
  0x1b   :  { %4104 = vst [vmem:[#allocation7_spill] sm:$0xff] %v3098_v28  ;;  %2722 = vmatprep.subr.bf16.mxu1 %v3098_v28  ;;  %v3114_v45 = vsub.f32 %v104_v18, %v157_v33  ;;  %v3118_v49 = vpack.c.bf16 %v160_v34, %v157_v33  ;;  %v3120_v50 = vsub.f32 %v105_v23, %v160_v34  ;;  %v163_v56 = vand.u32 4294901760, %v106_v40  ;;  %v126_v7 = vld [vmem:[#allocation2 + $0xc0] sm:$0xff]  ;;  %v127_v8 = vld [vmem:[#allocation2 + $0xc8] sm:$0xff]  ;;  %v3156_v18 = vld [vmem:[#allocation2 + $0x130] sm:$0xff] }
  0x1c   :  { %2724 = vmatpush3.bf16.xpose.msra.mxu1 %v3098_v28  ;;  %4105 = vst [vmem:[#allocation8_spill] sm:$0xff] %v3110_v43  ;;  %v3126_v51 = vpack.c.bf16 %v3953_v37, %v3954_v35  ;;  %v3128_v52 = vsub.f32 %v122_v30, %v211_v38  ;;  %2534 = vmatprep.subr.bf16.mxu0 %v3110_v43  ;;  %v166_v57 = vand.u32 4294901760, %v107_v41  ;;  %v3952_v58 = vand.u32 4294901760, %v3107_v42  ;;  %v3158_v23 = vld [vmem:[#allocation2 + $0x138] sm:$0xff]  ;;  %v116_v19 = vld [vmem:[#allocation2 + $0x70] sm:$0xff] }
  0x1d   :  { %4106 = vst [vmem:[#allocation9_spill] sm:$0xff] %v3118_v49  ;;  %4107 = vst [vmem:[#allocation10_spill] sm:$0xff] %v3120_v50  ;;  %v3131_v55 = vsub.f32 %v123_v31, %v214_v39  ;;  %v3135_v59 = vpack.c.bf16 %v214_v39, %v211_v38  ;;  %v3951_v60 = vand.u32 4294901760, %v3116_v46  ;;  %v217_v61 = vand.u32 4294901760, %v124_v47  ;;  %v133_v43 = vld [vmem:[#allocation2 + $0xf8] sm:$0xff] }
  0x1e   :  { %4108 = vst [vmem:[#allocation11_spill] sm:$0xff] %v3126_v51  ;;  %4109 = vst [vmem:[#allocation12_spill] sm:$0xff] %v3128_v52  ;;  %2726 = vmatprep.subr.bf16.mxu1 %v3126_v51  ;;  %v220_v62 = vand.u32 4294901760, %v125_v48  ;;  %v3138_v63 = vsub.f32 %v106_v40, %v163_v56  ;;  %v3140_v4 = vsub.f32 %v107_v41, %v166_v57  ;;  %v169_v5 = vand.u32 4294901760, %v108_v53 }
  0x1f   :  { %4110 = vst [vmem:[#allocation13_spill] sm:$0xff] %v3131_v55  ;;  %4111 = vst [vmem:[#allocation14_spill] sm:$0xff] %v3135_v59  ;;  %v172_v6 = vand.u32 4294901760, %v109_v54  ;;  %v3146_v9 = vpack.c.bf16 %v3951_v60, %v3952_v58  ;;  %v3148_v10 = vsub.f32 %v124_v47, %v217_v61  ;;  %v223_v29 = vand.u32 4294901760, %v126_v7  ;;  %v3230_v60 = vld [vmem:[#allocation2 + $0x58] sm:$0xff] }
  0x20   :  { %4112 = vst [vmem:[#allocation15_spill] sm:$0xff] %v3138_v63  ;;  %4113 = vst [vmem:[#allocation16_spill] sm:$0xff] %v3140_v4  ;;  %v3150_v13 = vsub.f32 %v125_v48, %v220_v62  ;;  %v3152_v16 = vsub.f32 %v108_v53, %v169_v5  ;;  %v226_v30 = vand.u32 4294901760, %v127_v8  ;;  %v3950_v31 = vand.u32 4294901760, %v3156_v18 }
  0x21   :  { %4114 = vst [vmem:[#allocation17_spill] sm:$0xff] %v3146_v9  ;;  %4115 = vst [vmem:[#allocation18_spill] sm:$0xff] %v3148_v10  ;;  %v3154_v17 = vsub.f32 %v109_v54, %v172_v6  ;;  %v3949_v32 = vand.u32 4294901760, %v3158_v23  ;;  %v3166_v33 = vsub.f32 %v126_v7, %v223_v29  ;;  %v3170_v38 = vpack.c.bf16 %v166_v57, %v163_v56  ;;  %v149_v10 = vld [vmem:[#allocation2 + $0x178] sm:$0xff] }
  0x22   :  { %4116 = vst [vmem:[#allocation19_spill] sm:$0xff] %v3150_v13  ;;  %4117 = vst [vmem:[#allocation20_spill] sm:$0xff] %v3152_v16  ;;  %2536 = vmatpush3.bf16.xpose.msra.mxu0 %v3118_v49  ;;  %v3168_v34 = vsub.f32 %v127_v8, %v226_v30  ;;  %v3172_v39 = vpack.c.bf16 %v220_v62, %v217_v61  ;;  %v3184_v41 = vpack.c.bf16 %v172_v6, %v169_v5 }
  0x23   :  { %4118 = vst [vmem:[#allocation21_spill] sm:$0xff] %v3154_v17  ;;  %4119 = vst [vmem:[#allocation22_spill] sm:$0xff] %v3156_v18  ;;  %2538 = vmatprep.subr.bf16.mxu0 %v3135_v59  ;;  %v3178_v40 = vpack.c.bf16 %v3949_v32, %v3950_v31  ;;  %v3186_v47 = vpack.c.bf16 %v226_v30, %v223_v29  ;;  %v3228_v31 = vld [vmem:[#allocation2 + $0x50] sm:$0xff]  ;;  %v3967_v37 = vand.u32 4294901760, %v3230_v60  ;;  %v3262_v59 = vld [vmem:[#allocation2 + $0x168] sm:$0xff]  ;;  %v244_v28 = vand.u32 4294901760, %v133_v43 }
  0x24   :  { %4120 = vst [vmem:[#allocation23_spill] sm:$0xff] %v3158_v23  ;;  %2728 = vmatpush3.bf16.xpose.msra.mxu1 %v3126_v51  ;;  %4121 = vst [vmem:[#allocation24_spill] sm:$0xff] %v3166_v33  ;;  %v3968_v58 = vand.u32 4294901760, %v3228_v31  ;;  %v1192_v49 = vand.u32 4294901760, %v3262_v59  ;;  %v132_v51 = vld [vmem:[#allocation2 + $0xf0] sm:$0xff]  ;;  %v193_v16 = vand.u32 4294901760, %v116_v19 }
  0x25   :  { %2730 = vmatprep.subr.bf16.mxu1 %v3146_v9  ;;  %4122 = vst [vmem:[#allocation25_spill] sm:$0xff] %v3168_v34  ;;  %4123 = vst [vmem:[#allocation26_spill] sm:$0xff] %v3170_v38  ;;  %v241_v26 = vand.u32 4294901760, %v132_v51  ;;  %v117_v34 = vld [vmem:[#allocation2 + $0x78] sm:$0xff]  ;;  %v1198_v4 = vand.u32 4294901760, %v149_v10  ;;  %v4024_v63 = vand.u32 4294901760, %v3082_v21 }
  0x26   :  { %4124 = vst [vmem:[#allocation27_spill] sm:$0xff] %v3172_v39  ;;  %4125 = vst [vmem:[#allocation28_spill] sm:$0xff] %v3178_v40  ;;  %v3244_v15 = vpack.c.bf16 %v3967_v37, %v3968_v58 }
  0x27   :  { %4126 = vst [vmem:[#allocation29_spill] sm:$0xff] %v3184_v41  ;;  %4127 = vst [vmem:[#allocation30_spill] sm:$0xff] %v3186_v47  ;;  %v3278_v13 = vpack.c.bf16 %v244_v28, %v241_v26 }
  0x28   :  { %4131 = vst [vmem:[#allocation34_spill] sm:$0xff] %v3244_v15 }
  0x29   :  { %4138 = vst [vmem:[#allocation41_spill] sm:$0xff] %v3278_v13 }
  0x2a   :  { %2540 = vmatpush3.bf16.xpose.msra.mxu0 %v3170_v38 }
  0x2b   :  { %2542 = vmatprep.subr.bf16.mxu0 %v3172_v39  ;;  %v115_v39 = vld [vmem:[#allocation2 + $0x68] sm:$0xff] }
  0x2c   :  { %2732 = vmatpush3.bf16.xpose.msra.mxu1 %v3146_v9 }
  0x2d   :  { %2734 = vmatprep.subr.bf16.mxu1 %v3178_v40 }
  0x32   :  { %2544 = vmatpush3.bf16.xpose.msra.mxu0 %v3184_v41  ;;  %v131_v41 = vld [vmem:[#allocation2 + $0xe8] sm:$0xff] }
  0x33   :  { %2546 = vmatprep.subr.bf16.mxu0 %v3186_v47  ;;  %v130_v47 = vld [vmem:[#allocation2 + $0xe0] sm:$0xff]  ;;  %v238_v58 = vand.u32 4294901760, %v131_v41 }
  0x34   :  { %2736 = vmatpush3.bf16.xpose.msra.mxu1 %v3178_v40  ;;  %v235_v37 = vand.u32 4294901760, %v130_v47  ;;  %v114_v40 = vld [vmem:[#allocation2 + $0x60] sm:$0xff] }
  0x35   :  { %v187_v38 = vand.u32 4294901760, %v114_v40 }
  0x36   :  { %v3258_v9 = vpack.c.bf16 %v238_v58, %v235_v37 }
  0x38   :  { %4133 = vst [vmem:[#allocation36_spill] sm:$0xff] %v3258_v9 }
  0xa0   :  { %v36_v48 = vpop.xlane.xlu0 %35  ;;  %v40_v53 = vpop.xlane.xlu1 %39 }
  0xa1   :  { %v44_v54 = vmul.f32 0.0078125, %v36_v48  ;;  %v46_v56 = vmul.f32 0.0078125, %v40_v53  ;;  %v110_v53 = vld [vmem:[#allocation2 + $0x40] sm:$0xff] }
  0xa3   :  { %v3192_v57 = vsub.f32 %v3051_v0, %v44_v54  ;;  %v3195_v61 = vsub.f32 %v3056_v1, %v46_v56  ;;  %v111_v54 = vld [vmem:[#allocation2 + $0x48] sm:$0xff] }
  0xa4   :  { %v38_v62 = vpop.xlane.xlu0 %37  ;;  %v42_v5 = vpop.xlane.xlu1 %41  ;;  %v178_v56 = vand.u32 4294901760, %v111_v54 }
  0xa5   :  { %v45_v6 = vmul.f32 0.0078125, %v38_v62  ;;  %v52_v7 = vmul.f32 %v3192_v57, %v3192_v57  ;;  %v47_v8 = vmul.f32 0.0078125, %v42_v5  ;;  %v54_v0 = vmul.f32 %v3195_v61, %v3195_v61  ;;  %v3211_v62 = vld [vmem:[#allocation2 + $0x140] sm:$0xff] }
  0xa6   :  { %v3276_v17 = vsub.f32 %v111_v54, %v178_v56  ;;  %v4141_v54 = vand.u32 4294901760, %v3072_v11 }
  0xa7   :  { %v3200_v29 = vsub.f32 %v3063_v2, %v45_v6  ;;  %56 = vadd.xlane.f32.xlu0 %v52_v7  ;;  %v3203_v30 = vsub.f32 %v3068_v3, %v47_v8  ;;  %v175_v2 = vand.u32 4294901760, %v110_v53  ;;  %v3213_v3 = vld [vmem:[#allocation2 + $0x148] sm:$0xff]  ;;  %v3956_v6 = vand.u32 4294901760, %v3211_v62 }
  0xa8   :  { %v3955_v7 = vand.u32 4294901760, %v3213_v3  ;;  %4137 = vst [vmem:[#allocation40_spill] sm:$0xff] %v3276_v17 }
  0xa9   :  { %v53_v1 = vmul.f32 %v3200_v29, %v3200_v29  ;;  %v55_v48 = vmul.f32 %v3203_v30, %v3203_v30  ;;  %v3215_v5 = vpack.c.bf16 %v178_v56, %v175_v2  ;;  %v3274_v33 = vsub.f32 %v110_v53, %v175_v2 }
  0xaa   :  { %v3224_v8 = vpack.c.bf16 %v3955_v7, %v3956_v6  ;;  %v3236_v7 = vld [vmem:[#allocation2 + $0x150] sm:$0xff]  ;;  %v3238_v6 = vld [vmem:[#allocation2 + $0x158] sm:$0xff]  ;;  %v3291_v2 = vsub.f32 %v3072_v11, %v4141_v54  ;;  %v4144_v54 = vand.u32 4294901760, %v3230_v60 }
  0xab   :  { %60 = vadd.xlane.f32.xlu0 %v54_v0  ;;  %58 = vadd.xlane.f32.xlu1 %v53_v1  ;;  %4128 = vst [vmem:[#allocation31_spill] sm:$0xff] %v3215_v5  ;;  %v128_v0 = vld [vmem:[#allocation2 + $0xd0] sm:$0xff]  ;;  %v129_v1 = vld [vmem:[#allocation2 + $0xd8] sm:$0xff]  ;;  %v3984_v14 = vand.u32 4294901760, %v3236_v7  ;;  %4136 = vst [vmem:[#allocation39_spill] sm:$0xff] %v3274_v33  ;;  %v414_v33 = vsub.f32 %v3082_v21, %v4024_v63 }
  0xac   :  { %2548 = vmatpush3.bf16.xpose.msra.mxu0 %v3215_v5  ;;  %4129 = vst [vmem:[#allocation32_spill] sm:$0xff] %v3224_v8  ;;  %2738 = vmatprep.subr.bf16.mxu1 %v3224_v8  ;;  %v232_v32 = vand.u32 4294901760, %v129_v1  ;;  %v3983_v5 = vand.u32 4294901760, %v3238_v6  ;;  %v3319_v63 = vsub.f32 %v3230_v60, %v4144_v54  ;;  %v4145_v60 = vand.u32 4294901760, %v3291_v2 }
  0xad   :  { %2740 = vmatpush3.bf16.xpose.msra.mxu1 %v3224_v8  ;;  %v415_v55 = vand.u32 4294901760, %v414_v33  ;;  %v3325_v33 = vsub.f32 %v114_v40, %v187_v38  ;;  %v3371_v40 = vsub.f32 %v3262_v59, %v1192_v49 }
  0xae   :  { %v3254_v8 = vpack.c.bf16 %v3983_v5, %v3984_v14  ;;  %v3295_v17 = vsub.f32 %v129_v1, %v232_v32  ;;  %v4143_v1 = vand.u32 4294901760, %v3228_v31 }
  0xaf   :  { %62 = vadd.xlane.f32.xlu1 %v55_v48  ;;  %v229_v48 = vand.u32 4294901760, %v128_v0 }
  0xb0   :  { %4132 = vst [vmem:[#allocation35_spill] sm:$0xff] %v3254_v8  ;;  %2742 = vmatprep.subr.bf16.mxu1 %v3254_v8 }
  0xb1   :  { %v3234_v35 = vpack.c.bf16 %v232_v32, %v229_v48  ;;  %v3293_v56 = vsub.f32 %v128_v0, %v229_v48  ;;  %v4142_v0 = vand.u32 4294901760, %v3074_v12  ;;  %v3314_v48 = vsub.f32 %v3228_v31, %v4143_v1 }
  0xb3   :  { %4130 = vst [vmem:[#allocation33_spill] sm:$0xff] %v3234_v35  ;;  %2550 = vmatprep.subr.bf16.mxu0 %v3234_v35  ;;  %v190_v35 = vand.u32 4294901760, %v115_v39  ;;  %v3309_v32 = vsub.f32 %v3074_v12, %v4142_v0  ;;  %v3329_v12 = vsub.f32 %v132_v51, %v241_v26  ;;  %v3331_v0 = vsub.f32 %v133_v43, %v244_v28 }
  0xb4   :  { %2552 = vmatpush3.bf16.xpose.msra.mxu0 %v3244_v15  ;;  %v3260_v15 = vld [vmem:[#allocation2 + $0x160] sm:$0xff]  ;;  %v4148_v51 = vand.u32 4294901760, %v3213_v3 }
  0xb5   :  { %2744 = vmatpush3.bf16.xpose.msra.mxu1 %v3254_v8  ;;  %v3264_v5 = vpack.c.bf16 %v190_v35, %v187_v38  ;;  %v1189_v14 = vand.u32 4294901760, %v3260_v15  ;;  %2554 = vmatprep.subr.bf16.mxu0 %v3258_v9  ;;  %v196_v9 = vand.u32 4294901760, %v117_v34  ;;  %v3327_v11 = vsub.f32 %v115_v39, %v190_v35 }
  0xb7   :  { %4134 = vst [vmem:[#allocation37_spill] sm:$0xff] %v3264_v5  ;;  %v3270_v8 = vpack.c.bf16 %v1192_v49, %v1189_v14  ;;  %v3280_v23 = vpack.c.bf16 %v196_v9, %v193_v16  ;;  %v3335_v31 = vsub.f32 %v117_v34, %v196_v9  ;;  %v4149_v9 = vand.u32 4294901760, %v3236_v7 }
  0xb8   :  { %v3368_v39 = vsub.f32 %v3260_v15, %v1189_v14  ;;  %v4035_v15 = vand.u32 4294901760, %v3084_v22  ;;  %v4034_v49 = vand.u32 4294901760, %v3092_v27 }
  0xb9   :  { %4135 = vst [vmem:[#allocation38_spill] sm:$0xff] %v3270_v8  ;;  %2746 = vmatprep.subr.bf16.mxu1 %v3270_v8  ;;  %4139 = vst [vmem:[#allocation42_spill] sm:$0xff] %v3280_v23 }
  0xbc   :  { %2556 = vmatpush3.bf16.xpose.msra.mxu0 %v3264_v5  ;;  %v148_v5 = vld [vmem:[#allocation2 + $0x170] sm:$0xff] }
  0xbd   :  { %2748 = vmatpush3.bf16.xpose.msra.mxu1 %v3270_v8  ;;  %v1195_v18 = vand.u32 4294901760, %v148_v5  ;;  %2558 = vmatprep.subr.bf16.mxu0 %v3278_v13  ;;  %v4025_v8 = vand.u32 4294901760, %v3080_v20 }
  0xbf   :  { %v3286_v53 = vpack.c.bf16 %v1198_v4, %v1195_v18  ;;  %v407_v13 = vsub.f32 %v3080_v20, %v4025_v8  ;;  %v3321_v8 = vsub.f32 %v130_v47, %v235_v37  ;;  %v1277_v37 = vsub.f32 %v3291_v2, %v4145_v60 }
  0xc0   :  { %v3375_v47 = vsub.f32 %v149_v10, %v1198_v4  ;;  %v295_v4 = vsub.f32 %v3084_v22, %v4035_v15  ;;  %v302_v10 = vsub.f32 %v3092_v27, %v4034_v49  ;;  %v4159_v15 = vld [vmem:[#allocation13_spill] sm:$0xff] }
  0xc1   :  { %4140 = vst [vmem:[#allocation43_spill] sm:$0xff] %v3286_v53  ;;  %2750 = vmatprep.subr.bf16.mxu1 %v3286_v53  ;;  %v1278_v38 = vand.u32 4294901760, %v1277_v37 }
  0xc4   :  { %2560 = vmatpush3.bf16.xpose.msra.mxu0 %v3280_v23  ;;  %v408_v23 = vand.u32 4294901760, %v407_v13  ;;  %v3323_v13 = vsub.f32 %v131_v41, %v238_v58  ;;  %v4036_v58 = vand.u32 4294901760, %v3309_v32  ;;  %v3373_v41 = vsub.f32 %v148_v5, %v1195_v18  ;;  %v1939_v5 = vld [vmem:[%s3945_s1] ss:$0 sm:$0xff] }
  0xc5   :  { %2752 = vmatpush3.bf16.xpose.msra.mxu1 %v3286_v53  ;;  %v3333_v53 = vsub.f32 %v116_v19, %v193_v16  ;;  %v4146_v19 = vand.u32 4294901760, %v3211_v62  ;;  %v3360_v16 = vsub.f32 %v3236_v7, %v4149_v9 }
  0xc6   :  { %v2561_v1 = vpack.c.bf16 %v415_v55, %v408_v23  ;;  %v1284_v26 = vsub.f32 %v3309_v32, %v4036_v58  ;;  %v3355_v55 = vsub.f32 %v3213_v3, %v4148_v51  ;;  %v4150_v23 = vand.u32 4294901760, %v3238_v6 }
  0xc7   :  { %v3350_v43 = vsub.f32 %v3211_v62, %v4146_v19  ;;  %v4151_v19 = vand.u32 4294901760, %v3086_v24 }
  0xc8   :  { %2562 = vmatprep.subr.bf16.mxu0 %v2561_v1  ;;  %v1285_v35 = vand.u32 4294901760, %v1284_v26  ;;  %v3365_v34 = vsub.f32 %v3238_v6, %v4150_v23  ;;  %v4152_v23 = vand.u32 4294901760, %v3088_v25 }
  0xc9   :  { %4147 = vst [vmem:[#allocation44_spill] sm:$0xff] %v3350_v43  ;;  %v3392_v51 = vsub.f32 %v3086_v24, %v4151_v19 }
  0xca   :  { %v3344_v28 = vpack.c.bf16 %v1285_v35, %v1278_v38  ;;  %v4028_v35 = vand.u32 4294901760, %v3104_v36 }
  0xcc   :  { %2754 = vmatprep.subr.bf16.mxu1 %v3344_v28 }
 0x134   :  { %v57_v62 = vpop.xlane.xlu0 %56 }
 0x135   :  { %v64_v3 = vmul.f32 0.0078125, %v57_v62  ;;  %v3398_v62 = vsub.f32 %v3088_v25, %v4152_v23  ;;  %v4031_v25 = vand.u32 4294901760, %v3392_v51 }
 0x137   :  { %v68_v54 = vadd.f32 1e-05, %v64_v3  ;;  %v1940_v3 = vld [vmem:[%s3946_s2] ss:$0 sm:$0xff] }
 0x138   :  { %v59_v7 = vpop.xlane.xlu1 %58  ;;  %v61_v1 = vpop.xlane.xlu0 %60 }
 0x139   :  { %2976 = vrsqrt.f32 %v68_v54  ;;  %v65_v60 = vmul.f32 0.0078125, %v59_v7  ;;  %v66_v37 = vmul.f32 0.0078125, %v61_v1  ;;  %v296_v54 = vand.u32 4294901760, %v295_v4 }
 0x13a   :  { %v303_v7 = vand.u32 4294901760, %v302_v10 }
 0x13b   :  { %v69_v6 = vadd.f32 1e-05, %v65_v60  ;;  %v70_v38 = vadd.f32 1e-05, %v66_v37  ;;  %v4033_v60 = vand.u32 4294901760, %v3112_v44  ;;  %v4030_v37 = vand.u32 4294901760, %v3114_v45 }
 0x13c   :  { %v63_v26 = vpop.xlane.xlu1 %62  ;;  %v2563_v10 = vpack.c.bf16 %v303_v7, %v296_v54  ;;  %v1291_v54 = vsub.f32 %v3392_v51, %v4031_v25  ;;  %v4155_v25 = vand.u32 4294901760, %v3116_v46 }
 0x13d   :  { %2978 = vrsqrt.f32 %v69_v6  ;;  %v67_v14 = vmul.f32 0.0078125, %v63_v26  ;;  %v4029_v6 = vand.u32 4294901760, %v3120_v50  ;;  %v3421_v23 = vsub.f32 %v3114_v45, %v4030_v37 }
 0x13e   :  { %2980 = vrsqrt.f32 %v70_v38  ;;  %v1292_v49 = vand.u32 4294901760, %v1291_v54 }
 0x13f   :  { %v71_v59 = vadd.f32 1e-05, %v67_v14 }
 0x141   :  { %2982 = vrsqrt.f32 %v71_v59  ;;  %v4032_v59 = vand.u32 4294901760, %v3398_v62 }
 0x143   :  { %v2977_v18 = vpop.eup %2976 }
 0x144   :  { %v76_v9 = vmul.f32 %v2977_v18, %v3192_v57  ;;  %v421_v57 = vsub.f32 %v3104_v36, %v4028_v35 }
 0x146   :  { %v87_v1 = vmul.f32 %v1939_v5, %v76_v9  ;;  %v428_v9 = vsub.f32 %v3112_v44, %v4033_v60  ;;  %v310_v60 = vand.u32 4294901760, %v3421_v23 }
 0x147   :  { %v2979_v24 = vpop.eup %2978 }
 0x148   :  { %v2981_v38 = vpop.eup %2980  ;;  %v98_v26 = vadd.f32 %v1940_v3, %v87_v1  ;;  %v77_v14 = vmul.f32 %v2979_v24, %v3200_v29  ;;  %v422_v29 = vand.u32 4294901760, %v421_v57 }
 0x149   :  { %v78_v4 = vmul.f32 %v2981_v38, %v3195_v61  ;;  %v3426_v61 = vsub.f32 %v3120_v50, %v4029_v6  ;;  %v4154_v6 = vand.u32 4294901760, %v3107_v42 }
 0x14a   :  { %v3413_v18 = vand.u32 4294901760, %v98_v26  ;;  %v88_v19 = vmul.f32 %v1939_v5, %v77_v14  ;;  %v1298_v14 = vsub.f32 %v3398_v62, %v4032_v59  ;;  %v429_v59 = vand.u32 4294901760, %v428_v9 }
 0x14b   :  { %v2983_v1 = vpop.eup %2982  ;;  %v89_v35 = vmul.f32 %v1939_v5, %v78_v4  ;;  %v4037_v4 = vand.u32 4294901760, %v3128_v52  ;;  %v3442_v37 = vsub.f32 %v3107_v42, %v4154_v6  ;;  %v4044_v42 = vand.u32 4294901760, %v4159_v15 }
 0x14c   :  { %v99_v7 = vadd.f32 %v1940_v3, %v88_v19  ;;  %v79_v24 = vmul.f32 %v2983_v1, %v3203_v30  ;;  %v3433_v38 = vsub.f32 %v98_v26, %v3413_v18  ;;  %v3447_v19 = vsub.f32 %v3116_v46, %v4155_v25 }
 0x14d   :  { %v100_v57 = vadd.f32 %v1940_v3, %v89_v35  ;;  %v1299_v25 = vand.u32 4294901760, %v1298_v14  ;;  %v435_v9 = vsub.f32 %v3128_v52, %v4037_v4  ;;  %v442_v4 = vsub.f32 %v4159_v15, %v4044_v42  ;;  %v4174_v52 = vld [vmem:[#allocation23_spill] sm:$0xff] }
 0x14e   :  { %4153 = vst [vmem:[#allocation45_spill] sm:$0xff] %v3433_v38  ;;  %4156 = vst [vmem:[#allocation46_spill] sm:$0xff] %v3447_v19  ;;  %v3449_v30 = vand.u32 4294901760, %v99_v7  ;;  %v90_v26 = vmul.f32 %v1939_v5, %v79_v24  ;;  %v3452_v1 = vand.u32 4294901760, %v3433_v38  ;;  %v4168_v42 = vand.u32 4294901760, %v3442_v37 }
 0x14f   :  { %v3454_v35 = vand.u32 4294901760, %v100_v57  ;;  %v4169_v15 = vand.u32 4294901760, %v3447_v19 }
 0x150   :  { %4157 = vst [vmem:[#allocation47_spill] sm:$0xff] %v3452_v1  ;;  %v101_v6 = vadd.f32 %v1940_v3, %v90_v26  ;;  %v250_v58 = vsub.f32 %v3433_v38, %v3452_v1  ;;  %v3461_v46 = vsub.f32 %v99_v7, %v3449_v30  ;;  %v317_v7 = vand.u32 4294901760, %v3426_v61  ;;  %v4165_v1 = vld [vmem:[#allocation15_spill] sm:$0xff]  ;;  %v4167_v61 = vld [vmem:[#allocation16_spill] sm:$0xff] }
 0x151   :  { %4158 = vst [vmem:[#allocation48_spill] sm:$0xff] %v3454_v35  ;;  %v3464_v5 = vsub.f32 %v100_v57, %v3454_v35  ;;  %v2565_v57 = vpack.c.bf16 %v429_v59, %v422_v29  ;;  %v2757_v38 = vpack.c.bf16 %v1299_v25, %v1292_v49  ;;  %v436_v29 = vand.u32 4294901760, %v435_v9  ;;  %v4171_v49 = vld [vmem:[#allocation22_spill] sm:$0xff] }
 0x152   :  { %4160 = vst [vmem:[#allocation49_spill] sm:$0xff] %v3461_v46  ;;  %v3471_v24 = vand.u32 4294901760, %v101_v6  ;;  %v251_v3 = vand.u32 4294901760, %v250_v58  ;;  %v3474_v26 = vand.u32 4294901760, %v3461_v46  ;;  %v1305_v23 = vsub.f32 %v3442_v37, %v4168_v42 }
 0x153   :  { %4161 = vst [vmem:[#allocation50_spill] sm:$0xff] %v3464_v5  ;;  %v3478_v14 = vand.u32 4294901760, %v3464_v5  ;;  %v1312_v50 = vsub.f32 %v3447_v19, %v4169_v15  ;;  %v4172_v25 = vand.u32 4294901760, %v4171_v49  ;;  %v4175_v9 = vand.u32 4294901760, %v4174_v52 }
 0x154   :  { %4162 = vst [vmem:[#allocation51_spill] sm:$0xff] %v3471_v24  ;;  %4163 = vst [vmem:[#allocation52_spill] sm:$0xff] %v3474_v26  ;;  %1973 = vmatprep.mubr.f32.mxu0 %v251_v3  ;;  %2333 = vmatprep.mubr.f32.mxu1 %v251_v3  ;;  %v261_v58 = vsub.f32 %v3461_v46, %v3474_v26  ;;  %v3487_v54 = vsub.f32 %v101_v6, %v3471_v24  ;;  %v4177_v46 = vld [vmem:[#allocation18_spill] sm:$0xff] }
 0x155   :  { %4164 = vst [vmem:[#allocation53_spill] sm:$0xff] %v3478_v14  ;;  %1974 = vmatmul.mubr.f32.vlgmr.msra.gmra.mrb[0].mxu0 %v251_v3  ;;  %v272_v59 = vsub.f32 %v3464_v5, %v3478_v14  ;;  %v3504_v3 = vsub.f32 %v4171_v49, %v4172_v25  ;;  %v3509_v14 = vsub.f32 %v4174_v52, %v4175_v9  ;;  %v443_v5 = vand.u32 4294901760, %v442_v4 }
 0x156   :  { %4166 = vst [vmem:[#allocation15_spill] sm:$0xff] %v3487_v54  ;;  %2564 = vmatpush3.bf16.xpose.msra.mxu0 %v2563_v10  ;;  %v262_v26 = vand.u32 4294901760, %v261_v58  ;;  %v3499_v6 = vand.u32 4294901760, %v3487_v54  ;;  %v4178_v10 = vld [vmem:[#allocation19_spill] sm:$0xff]  ;;  %v4179_v49 = vand.u32 4294901760, %v4165_v1  ;;  %v1313_v25 = vand.u32 4294901760, %v1312_v50 }
 0x157   :  { %4173 = vst [vmem:[#allocation22_spill] sm:$0xff] %v3504_v3  ;;  %4176 = vst [vmem:[#allocation23_spill] sm:$0xff] %v3509_v14  ;;  %v273_v42 = vand.u32 4294901760, %v272_v59  ;;  %2566 = vmatprep.subr.bf16.mxu0 %v2565_v57  ;;  %v4180_v59 = vand.u32 4294901760, %v4167_v61  ;;  %v1306_v57 = vand.u32 4294901760, %v1305_v23  ;;  %v2567_v58 = vpack.c.bf16 %v317_v7, %v310_v60  ;;  %v4183_v23 = vld [vmem:[#allocation20_spill] sm:$0xff] }
 0x158   :  { %4170 = vst [vmem:[#allocation16_spill] sm:$0xff] %v3499_v6  ;;  %1975 = vmatprep.mubr.f32.mxu0 %v262_v26  ;;  %2334 = vmatmul.mubr.f32.vlgmr.msra.gmra.mrb[0].mxu1 %v262_v26  ;;  %v283_v19 = vsub.f32 %v3487_v54, %v3499_v6  ;;  %v323_v52 = vsub.f32 %v4165_v1, %v4179_v49  ;;  %v4063_v15 = vand.u32 4294901760, %v3504_v3  ;;  %v4064_v6 = vand.u32 4294901760, %v3509_v14  ;;  %v4190_v7 = vld [vmem:[#allocation39_spill] sm:$0xff] }
 0x159   :  { %2756 = vmatpush3.bf16.xpose.msra.mxu1 %v3344_v28  ;;  %1976 = vmatmul.mubr.f32.gmra.mrb[2].mxu0 %v262_v26  ;;  %v330_v4 = vsub.f32 %v4167_v61, %v4180_v59  ;;  %v2569_v28 = vpack.c.bf16 %v443_v5, %v436_v29  ;;  %v4181_v26 = vand.u32 4294901760, %v4177_v46  ;;  %v4182_v54 = vand.u32 4294901760, %v4178_v10  ;;  %v4184_v5 = vld [vmem:[#allocation21_spill] sm:$0xff] }
 0x15a   :  { %2336 = vmatprep.mubr.f32.mxu1 %v273_v42  ;;  %1977 = vmatprep.mubr.f32.mxu0 %v273_v42  ;;  %v284_v9 = vand.u32 4294901760, %v283_v19  ;;  %v324_v50 = vand.u32 4294901760, %v323_v52  ;;  %v2761_v19 = vpack.c.bf16 %v1313_v25, %v1306_v57  ;;  %v4185_v52 = vld [vmem:[#allocation24_spill] sm:$0xff]  ;;  %v4186_v57 = vld [vmem:[#allocation25_spill] sm:$0xff]  ;;  %v4076_v29 = vand.u32 4294901760, %v3295_v17 }
 0x15b   :  { %2758 = vmatprep.subr.bf16.mxu1 %v2757_v38  ;;  %v449_v49 = vsub.f32 %v4177_v46, %v4181_v26  ;;  %v456_v59 = vsub.f32 %v4178_v10, %v4182_v54  ;;  %v331_v60 = vand.u32 4294901760, %v330_v4  ;;  %v1319_v26 = vsub.f32 %v3504_v3, %v4063_v15 }
 0x15c   :  { %2337 = vmatmul.mubr.f32.gmra.mrb[2].mxu1 %v284_v9  ;;  %v1326_v54 = vsub.f32 %v3509_v14, %v4064_v6  ;;  %v4070_v4 = vand.u32 4294901760, %v4185_v52  ;;  %v4187_v15 = vand.u32 4294901760, %v4183_v23  ;;  %v4191_v14 = vld [vmem:[#allocation40_spill] sm:$0xff]  ;;  %v4194_v3 = vand.u32 4294901760, %v4190_v7 }
 0x15d   :  { %1978 = vmatmul.mubr.f32.gmra.mrb[4].mxu0 %v273_v42  ;;  %2371 = vmatprep.mubr.f32.mxu1 %v3413_v18  ;;  %v450_v42 = vand.u32 4294901760, %v449_v49  ;;  %v457_v10 = vand.u32 4294901760, %v456_v59  ;;  %v2571_v25 = vpack.c.bf16 %v331_v60, %v324_v50  ;;  %v4188_v49 = vand.u32 4294901760, %v4184_v5 }
 0x15e   :  { %2568 = vmatpush3.bf16.xpose.msra.mxu0 %v2567_v58  ;;  %1979 = vmatprep.mubr.f32.mxu0 %v284_v9  ;;  %v1320_v6 = vand.u32 4294901760, %v1319_v26  ;;  %v1327_v58 = vand.u32 4294901760, %v1326_v54  ;;  %v4189_v50 = vand.u32 4294901760, %v4186_v57  ;;  %v4193_v26 = vand.u32 4294901760, %v3355_v55 }
 0x15f   :  { %2570 = vmatprep.subr.bf16.mxu0 %v2569_v28  ;;  %v337_v28 = vsub.f32 %v4183_v23, %v4187_v15  ;;  %v344_v59 = vsub.f32 %v4184_v5, %v4188_v49  ;;  %v4192_v15 = vand.u32 4294901760, %v3350_v43 }
 0x160   :  { %v470_v60 = vsub.f32 %v4186_v57, %v4189_v50  ;;  %v2765_v49 = vpack.c.bf16 %v1327_v58, %v1320_v6  ;;  %v4081_v50 = vand.u32 4294901760, %v3293_v56  ;;  %v4074_v6 = vand.u32 4294901760, %v3360_v16 }
 0x161   :  { %2760 = vmatpush3.bf16.xpose.msra.mxu1 %v2757_v38  ;;  %1980 = vmatmul.mubr.f32.gmra.mrb[6].mxu0 %v284_v9  ;;  %v2573_v38 = vpack.c.bf16 %v457_v10, %v450_v42  ;;  %v463_v9 = vsub.f32 %v4185_v52, %v4070_v4  ;;  %v1333_v23 = vsub.f32 %v3350_v43, %v4192_v15  ;;  %v338_v54 = vand.u32 4294901760, %v337_v28 }
 0x162   :  { %2013 = vmatprep.mubr.f32.mxu0 %v3413_v18  ;;  %2762 = vmatprep.subr.bf16.mxu1 %v2761_v19  ;;  %v1340_v10 = vsub.f32 %v3355_v55, %v4193_v26  ;;  %v345_v42 = vand.u32 4294901760, %v344_v59  ;;  %v471_v52 = vand.u32 4294901760, %v470_v60  ;;  %v351_v15 = vsub.f32 %v4190_v7, %v4194_v3 }
 0x163   :  { %v464_v4 = vand.u32 4294901760, %v463_v9  ;;  %v4195_v43 = vand.u32 4294901760, %v4191_v14  ;;  %v4075_v58 = vand.u32 4294901760, %v3365_v34  ;;  %v484_v3 = vsub.f32 %v3295_v17, %v4076_v29 }
 0x164   :  { %v1341_v28 = vand.u32 4294901760, %v1340_v10  ;;  %v2575_v59 = vpack.c.bf16 %v345_v42, %v338_v54  ;;  %v352_v9 = vand.u32 4294901760, %v351_v15  ;;  %v4079_v10 = vand.u32 4294901760, %v3319_v63 }
 0x165   :  { %v358_v26 = vsub.f32 %v4191_v14, %v4195_v43  ;;  %v485_v42 = vand.u32 4294901760, %v484_v3  ;;  %v4078_v15 = vand.u32 4294901760, %v3321_v8  ;;  %v4085_v29 = vand.u32 4294901760, %v3327_v11 }
 0x166   :  { %2572 = vmatpush3.bf16.xpose.msra.mxu0 %v2571_v25  ;;  %v1334_v25 = vand.u32 4294901760, %v1333_v23  ;;  %v4077_v23 = vand.u32 4294901760, %v3314_v48 }
 0x167   :  { %2574 = vmatprep.subr.bf16.mxu0 %v2573_v38  ;;  %v2577_v38 = vpack.c.bf16 %v471_v52, %v464_v4  ;;  %v359_v60 = vand.u32 4294901760, %v358_v26  ;;  %v1347_v52 = vsub.f32 %v3360_v16, %v4074_v6  ;;  %v1354_v4 = vsub.f32 %v3365_v34, %v4075_v58 }
 0x168   :  { %v2769_v43 = vpack.c.bf16 %v1341_v28, %v1334_v25  ;;  %v4080_v26 = vand.u32 4294901760, %v3323_v13  ;;  %v4082_v28 = vand.u32 4294901760, %v3368_v39  ;;  %v365_v6 = vsub.f32 %v3314_v48, %v4077_v23 }
 0x169   :  { %2764 = vmatpush3.bf16.xpose.msra.mxu1 %v2761_v19  ;;  %v477_v19 = vsub.f32 %v3293_v56, %v4081_v50  ;;  %v2579_v25 = vpack.c.bf16 %v359_v60, %v352_v9  ;;  %v1355_v3 = vand.u32 4294901760, %v1354_v4  ;;  %v4084_v60 = vand.u32 4294901760, %v3325_v33 }
 0x16a   :  { %2766 = vmatprep.subr.bf16.mxu1 %v2765_v49  ;;  %v498_v9 = vsub.f32 %v3323_v13, %v4080_v26  ;;  %v1361_v23 = vsub.f32 %v3368_v39, %v4082_v28  ;;  %v366_v4 = vand.u32 4294901760, %v365_v6  ;;  %v4091_v26 = vand.u32 4294901760, %v3329_v12 }
 0x16b   :  { %v478_v54 = vand.u32 4294901760, %v477_v19  ;;  %v1348_v19 = vand.u32 4294901760, %v1347_v52  ;;  %v4087_v50 = vand.u32 4294901760, %v3331_v0  ;;  %v379_v28 = vsub.f32 %v3325_v33, %v4084_v60 }
 0x16d   :  { %v2581_v58 = vpack.c.bf16 %v485_v42, %v478_v54  ;;  %v2773_v42 = vpack.c.bf16 %v1355_v3, %v1348_v19  ;;  %v4088_v19 = vand.u32 4294901760, %v3375_v47 }
 0x16e   :  { %2576 = vmatpush3.bf16.xpose.msra.mxu0 %v2575_v59  ;;  %v4083_v59 = vand.u32 4294901760, %v3371_v40 }
 0x16f   :  { %2578 = vmatprep.subr.bf16.mxu0 %v2577_v38  ;;  %v372_v38 = vsub.f32 %v3319_v63, %v4079_v10  ;;  %v499_v10 = vand.u32 4294901760, %v498_v9  ;;  %v380_v9 = vand.u32 4294901760, %v379_v28 }
 0x170   :  { %v1368_v52 = vsub.f32 %v3371_v40, %v4083_v59  ;;  %v386_v59 = vsub.f32 %v3327_v11, %v4085_v29 }
 0x171   :  { %2768 = vmatpush3.bf16.xpose.msra.mxu1 %v2765_v49  ;;  %v491_v49 = vsub.f32 %v3321_v8, %v4078_v15  ;;  %v373_v54 = vand.u32 4294901760, %v372_v38 }
 0x172   :  { %2770 = vmatprep.subr.bf16.mxu1 %v2769_v43  ;;  %v1369_v6 = vand.u32 4294901760, %v1368_v52  ;;  %v387_v60 = vand.u32 4294901760, %v386_v59  ;;  %v4089_v52 = vand.u32 4294901760, %v3335_v31 }
 0x173   :  { %v492_v15 = vand.u32 4294901760, %v491_v49  ;;  %v2583_v38 = vpack.c.bf16 %v373_v54, %v366_v4  ;;  %v512_v49 = vsub.f32 %v3331_v0, %v4087_v50 }
 0x174   :  { %v2587_v28 = vpack.c.bf16 %v387_v60, %v380_v9  ;;  %v2593_v60 = vpack.c.bf16 %v3082_v21, %v3080_v20  ;;  %v2597_v9 = vpack.c.bf16 %v3112_v44, %v3104_v36 }
 0x175   :  { %v2585_v3 = vpack.c.bf16 %v499_v10, %v492_v15  ;;  %v1382_v15 = vsub.f32 %v3375_v47, %v4088_v19  ;;  %v513_v54 = vand.u32 4294901760, %v512_v49  ;;  %v2595_v49 = vpack.c.bf16 %v3092_v27, %v3084_v22 }
 0x176   :  { %2580 = vmatpush3.bf16.xpose.msra.mxu0 %v2579_v25  ;;  %v1362_v25 = vand.u32 4294901760, %v1361_v23  ;;  %v4090_v23 = vand.u32 4294901760, %v3333_v53 }
 0x177   :  { %2582 = vmatprep.subr.bf16.mxu0 %v2581_v58  ;;  %v4086_v58 = vand.u32 4294901760, %v3373_v41 }
 0x178   :  { %v2777_v29 = vpack.c.bf16 %v1369_v6, %v1362_v25  ;;  %v393_v59 = vsub.f32 %v3333_v53, %v4090_v23  ;;  %v400_v25 = vsub.f32 %v3335_v31, %v4089_v52  ;;  %v4216_v52 = vld [vmem:[#allocation9_spill] sm:$0xff]  ;;  %v4217_v23 = vld [vmem:[#allocation14_spill] sm:$0xff] }
 0x179   :  { %2772 = vmatpush3.bf16.xpose.msra.mxu1 %v2769_v43  ;;  %v505_v43 = vsub.f32 %v3329_v12, %v4091_v26  ;;  %v1375_v10 = vsub.f32 %v3373_v41, %v4086_v58  ;;  %v4219_v26 = vld [vmem:[#allocation26_spill] sm:$0xff] }
 0x17a   :  { %2774 = vmatprep.subr.bf16.mxu1 %v2773_v42  ;;  %v394_v50 = vand.u32 4294901760, %v393_v59  ;;  %v401_v19 = vand.u32 4294901760, %v400_v25  ;;  %v2603_v59 = vpack.c.bf16 %v4167_v61, %v4165_v1  ;;  %v4201_v25 = vld [vmem:[#allocation19_spill] sm:$0xff] }
 0x17b   :  { %v506_v4 = vand.u32 4294901760, %v505_v43  ;;  %v1376_v6 = vand.u32 4294901760, %v1375_v10  ;;  %v2785_v43 = vpack.c.bf16 %v3309_v32, %v3291_v2  ;;  %v4198_v10 = vld [vmem:[#allocation13_spill] sm:$0xff] }
 0x17d   :  { %v2589_v58 = vpack.c.bf16 %v513_v54, %v506_v4  ;;  %v4199_v4 = vld [vmem:[#allocation45_spill] sm:$0xff]  ;;  %v4200_v54 = vld [vmem:[#allocation46_spill] sm:$0xff] }
 0x17e   :  { %2584 = vmatpush3.bf16.xpose.msra.mxu0 %v2583_v38  ;;  %v1383_v38 = vand.u32 4294901760, %v1382_v15 }
 0x17f   :  { %2586 = vmatprep.subr.bf16.mxu0 %v2585_v3 }
 0x180   :  { %v2781_v3 = vpack.c.bf16 %v1383_v38, %v1376_v6  ;;  %v2605_v6 = vpack.c.bf16 %v4201_v25, %v4177_v46  ;;  %v4202_v38 = vld [vmem:[#allocation22_spill] sm:$0xff] }
 0x181   :  { %2776 = vmatpush3.bf16.xpose.msra.mxu1 %v2773_v42  ;;  %v2591_v42 = vpack.c.bf16 %v401_v19, %v394_v50  ;;  %v4196_v50 = vld [vmem:[#allocation10_spill] sm:$0xff]  ;;  %v4197_v19 = vld [vmem:[#allocation12_spill] sm:$0xff] }
 0x182   :  { %2778 = vmatprep.subr.bf16.mxu1 %v2777_v29  ;;  %v2601_v15 = vpack.c.bf16 %v4198_v10, %v4197_v19 }
 0x186   :  { %2588 = vmatpush3.bf16.xpose.msra.mxu0 %v2587_v28  ;;  %v2793_v28 = vpack.c.bf16 %v4200_v54, %v3442_v37 }
 0x187   :  { %2590 = vmatprep.subr.bf16.mxu0 %v2589_v58  ;;  %v2599_v58 = vpack.c.bf16 %v4196_v50, %v3114_v45 }
 0x189   :  { %2780 = vmatpush3.bf16.xpose.msra.mxu1 %v2777_v29  ;;  %v2789_v29 = vpack.c.bf16 %v3398_v62, %v3392_v51 }
 0x18a   :  { %2782 = vmatprep.subr.bf16.mxu1 %v2781_v3 }
 0x18e   :  { %2592 = vmatpush3.bf16.xpose.msra.mxu0 %v2591_v42 }
 0x18f   :  { %2594 = vmatprep.subr.bf16.mxu0 %v2593_v60  ;;  %v4204_v60 = vld [vmem:[#allocation20_spill] sm:$0xff] }
 0x191   :  { %2784 = vmatpush3.bf16.xpose.msra.mxu1 %v2781_v3  ;;  %v4203_v3 = vld [vmem:[#allocation23_spill] sm:$0xff] }
 0x192   :  { %2786 = vmatprep.subr.bf16.mxu1 %v2785_v43  ;;  %v2797_v42 = vpack.c.bf16 %v4203_v3, %v4202_v38 }
 0x195   :  { %2014 = vmatmul.mubr.f32.vlgmr.msra.gmra.mrb[0].mxu0 %v3413_v18 }
 0x196   :  { %2015 = vmatprep.mubr.f32.mxu0 %v3449_v30  ;;  %2596 = vmatpush3.bf16.xpose.msra.mxu0 %v2595_v49  ;;  %v4205_v49 = vld [vmem:[#allocation24_spill] sm:$0xff] }
 0x197   :  { %2598 = vmatprep.subr.bf16.mxu0 %v2597_v9  ;;  %v2609_v9 = vpack.c.bf16 %v4186_v57, %v4205_v49 }
 0x198   :  { %2372 = vmatmul.mubr.f32.vlgmr.msra.gmra.mrb[0].mxu1 %v3449_v30 }
 0x199   :  { %2016 = vmatmul.mubr.f32.gmra.mrb[2].mxu0 %v3449_v30  ;;  %2374 = vmatprep.mubr.f32.mxu1 %v3454_v35 }
 0x19a   :  { %2788 = vmatpush3.bf16.xpose.msra.mxu1 %v2785_v43  ;;  %2017 = vmatprep.mubr.f32.mxu0 %v3454_v35  ;;  %v2607_v43 = vpack.c.bf16 %v4184_v5, %v4204_v60 }
 0x19b   :  { %2790 = vmatprep.subr.bf16.mxu1 %v2789_v29 }
 0x19c   :  { %2375 = vmatmul.mubr.f32.gmra.mrb[2].mxu1 %v3471_v24 }
 0x19d   :  { %2018 = vmatmul.mubr.f32.gmra.mrb[4].mxu0 %v3454_v35  ;;  %2409 = vmatprep.mubr.f32.mxu1 %v4199_v4  ;;  %v4222_v35 = vld [vmem:[#allocation29_spill] sm:$0xff] }
 0x19e   :  { %2019 = vmatprep.mubr.f32.mxu0 %v3471_v24  ;;  %2600 = vmatpush3.bf16.xpose.msra.mxu0 %v2599_v58 }
 0x19f   :  { %2602 = vmatprep.subr.bf16.mxu0 %v2601_v15  ;;  %v2611_v15 = vpack.c.bf16 %v4191_v14, %v4190_v7 }
 0x1a1   :  { %2020 = vmatmul.mubr.f32.gmra.mrb[6].mxu0 %v3471_v24  ;;  %v4220_v24 = vld [vmem:[#allocation27_spill] sm:$0xff] }
 0x1a2   :  { %2792 = vmatpush3.bf16.xpose.msra.mxu1 %v2789_v29  ;;  %2053 = vmatprep.mubr.f32.mxu0 %v4199_v4  ;;  %v4206_v29 = vld [vmem:[#allocation44_spill] sm:$0xff] }
 0x1a3   :  { %2794 = vmatprep.subr.bf16.mxu1 %v2793_v28  ;;  %v2801_v58 = vpack.c.bf16 %v3355_v55, %v4206_v29 }
 0x1a6   :  { %2604 = vmatpush3.bf16.xpose.msra.mxu0 %v2603_v59  ;;  %v2805_v59 = vpack.c.bf16 %v3365_v34, %v3360_v16 }
 0x1a7   :  { %2606 = vmatprep.subr.bf16.mxu0 %v2605_v6  ;;  %v2615_v6 = vpack.c.bf16 %v3319_v63, %v3314_v48 }
 0x1aa   :  { %2796 = vmatpush3.bf16.xpose.msra.mxu1 %v2793_v28  ;;  %v2613_v28 = vpack.c.bf16 %v3295_v17, %v3293_v56 }
 0x1ab   :  { %2798 = vmatprep.subr.bf16.mxu1 %v2797_v42 }
 0x1ae   :  { %2608 = vmatpush3.bf16.xpose.msra.mxu0 %v2607_v43  ;;  %v2809_v43 = vpack.c.bf16 %v3371_v40, %v3368_v39 }
 0x1af   :  { %2610 = vmatprep.subr.bf16.mxu0 %v2609_v9  ;;  %v2619_v9 = vpack.c.bf16 %v3327_v11, %v3325_v33 }
 0x1b2   :  { %2800 = vmatpush3.bf16.xpose.msra.mxu1 %v2797_v42  ;;  %v2617_v42 = vpack.c.bf16 %v3323_v13, %v3321_v8 }
 0x1b3   :  { %2802 = vmatprep.subr.bf16.mxu1 %v2801_v58 }
 0x1b6   :  { %2612 = vmatpush3.bf16.xpose.msra.mxu0 %v2611_v15  ;;  %v2813_v15 = vpack.c.bf16 %v3375_v47, %v3373_v41 }
 0x1b7   :  { %2614 = vmatprep.subr.bf16.mxu0 %v2613_v28  ;;  %v2623_v28 = vpack.c.bf16 %v3335_v31, %v3333_v53 }
 0x1ba   :  { %2804 = vmatpush3.bf16.xpose.msra.mxu1 %v2801_v58  ;;  %v2621_v58 = vpack.c.bf16 %v3331_v0, %v3329_v12 }
 0x1bb   :  { %2806 = vmatprep.subr.bf16.mxu1 %v2805_v59 }
 0x1be   :  { %2616 = vmatpush3.bf16.xpose.msra.mxu0 %v2615_v6  ;;  %v4207_v6 = vld [vmem:[#allocation5_spill] sm:$0xff] }
 0x1bf   :  { %2618 = vmatprep.subr.bf16.mxu0 %v2617_v42  ;;  %v4209_v42 = vld [vmem:[#allocation49_spill] sm:$0xff] }
 0x1c2   :  { %2808 = vmatpush3.bf16.xpose.msra.mxu1 %v2805_v59  ;;  %v4208_v59 = vld [vmem:[#allocation7_spill] sm:$0xff] }
 0x1c3   :  { %2810 = vmatprep.subr.bf16.mxu1 %v2809_v43 }
 0x1c6   :  { %2620 = vmatpush3.bf16.xpose.msra.mxu0 %v2619_v9  ;;  %v4210_v9 = vld [vmem:[#allocation6_spill] sm:$0xff] }
 0x1c7   :  { %2622 = vmatprep.subr.bf16.mxu0 %v2621_v58  ;;  %v4211_v58 = vld [vmem:[#allocation8_spill] sm:$0xff] }
 0x1ca   :  { %2812 = vmatpush3.bf16.xpose.msra.mxu1 %v2809_v43  ;;  %v4212_v43 = vld [vmem:[#allocation50_spill] sm:$0xff] }
 0x1cb   :  { %2814 = vmatprep.subr.bf16.mxu1 %v2813_v15 }
 0x1ce   :  { %2624 = vmatpush3.bf16.xpose.msra.mxu0 %v2623_v28  ;;  %v4214_v28 = vld [vmem:[#allocation15_spill] sm:$0xff] }
 0x1cf   :  { %2626 = vmatprep.subr.bf16.mxu0 %v4207_v6 }
 0x1d2   :  { %2816 = vmatpush3.bf16.xpose.msra.mxu1 %v2813_v15  ;;  %v4213_v15 = vld [vmem:[#allocation11_spill] sm:$0xff] }
 0x1d3   :  { %2818 = vmatprep.subr.bf16.mxu1 %v4208_v59 }
 0x1d5   :  { %2054 = vmatmul.mubr.f32.vlgmr.msra.gmra.mrb[0].mxu0 %v4199_v4  ;;  %v4215_v4 = vld [vmem:[#allocation47_spill] sm:$0xff] }
 0x1d6   :  { %2055 = vmatprep.mubr.f32.mxu0 %v4209_v42  ;;  %2628 = vmatpush3.bf16.xpose.msra.mxu0 %v4210_v9 }
 0x1d7   :  { %2630 = vmatprep.subr.bf16.mxu0 %v4211_v58 }
 0x1d9   :  { %2410 = vmatmul.mubr.f32.vlgmr.msra.gmra.mrb[0].mxu1 %v4209_v42  ;;  %2056 = vmatmul.mubr.f32.gmra.mrb[2].mxu0 %v4209_v42  ;;  %v4218_v42 = vld [vmem:[#allocation17_spill] sm:$0xff] }
 0x1da   :  { %2412 = vmatprep.mubr.f32.mxu1 %v4212_v43  ;;  %2820 = vmatpush3.bf16.xpose.msra.mxu1 %v4208_v59 }
 0x1db   :  { %2057 = vmatprep.mubr.f32.mxu0 %v4212_v43  ;;  %2822 = vmatprep.subr.bf16.mxu1 %v4213_v15 }
 0x1dd   :  { %2413 = vmatmul.mubr.f32.gmra.mrb[2].mxu1 %v4214_v28  ;;  %2058 = vmatmul.mubr.f32.gmra.mrb[4].mxu0 %v4212_v43  ;;  %v4221_v43 = vld [vmem:[#allocation28_spill] sm:$0xff] }
 0x1de   :  { %2447 = vmatprep.mubr.f32.mxu1 %v4215_v4  ;;  %2059 = vmatprep.mubr.f32.mxu0 %v4214_v28 }
 0x1df   :  { %2632 = vmatpush3.bf16.xpose.msra.mxu0 %v4216_v52  ;;  %v4223_v52 = vld [vmem:[#allocation30_spill] sm:$0xff] }
 0x1e0   :  { %2634 = vmatprep.subr.bf16.mxu0 %v4217_v23  ;;  %v4225_v23 = vld [vmem:[#allocation31_spill] sm:$0xff] }
 0x1e1   :  { %2060 = vmatmul.mubr.f32.gmra.mrb[6].mxu0 %v4214_v28  ;;  %v4224_v28 = vld [vmem:[#allocation32_spill] sm:$0xff] }
 0x1e2   :  { %2824 = vmatpush3.bf16.xpose.msra.mxu1 %v4213_v15  ;;  %2093 = vmatprep.mubr.f32.mxu0 %v4215_v4  ;;  %v4226_v15 = vld [vmem:[#allocation33_spill] sm:$0xff] }
 0x1e3   :  { %2826 = vmatprep.subr.bf16.mxu1 %v4218_v42 }
 0x1e7   :  { %2636 = vmatpush3.bf16.xpose.msra.mxu0 %v4219_v26  ;;  %v4227_v26 = vld [vmem:[#allocation35_spill] sm:$0xff] }
 0x1e8   :  { %2638 = vmatprep.subr.bf16.mxu0 %v4220_v24  ;;  %v4228_v24 = vld [vmem:[#allocation34_spill] sm:$0xff] }
 0x1ea   :  { %2828 = vmatpush3.bf16.xpose.msra.mxu1 %v4218_v42  ;;  %v4229_v42 = vld [vmem:[#allocation36_spill] sm:$0xff] }
 0x1eb   :  { %2830 = vmatprep.subr.bf16.mxu1 %v4221_v43 }
 0x1ef   :  { %2640 = vmatpush3.bf16.xpose.msra.mxu0 %v4222_v35  ;;  %v4230_v35 = vld [vmem:[#allocation38_spill] sm:$0xff] }
 0x1f0   :  { %2642 = vmatprep.subr.bf16.mxu0 %v4223_v52  ;;  %v4231_v52 = vld [vmem:[#allocation37_spill] sm:$0xff] }
 0x1f2   :  { %2832 = vmatpush3.bf16.xpose.msra.mxu1 %v4221_v43  ;;  %v4232_v43 = vld [vmem:[#allocation41_spill] sm:$0xff] }
 0x1f3   :  { %2834 = vmatprep.subr.bf16.mxu1 %v4224_v28 }
 0x1f7   :  { %2644 = vmatpush3.bf16.xpose.msra.mxu0 %v4225_v23  ;;  %v4233_v23 = vld [vmem:[#allocation43_spill] sm:$0xff] }
 0x1f8   :  { %2646 = vmatprep.subr.bf16.mxu0 %v4226_v15  ;;  %v4234_v15 = vand.u32 4294901760, %v3080_v20  ;;  %v4241_v20 = vand.u32 4294901760, %v3104_v36  ;;  %v4247_v36 = vand.u32 4294901760, %v3114_v45  ;;  %v4252_v45 = vand.u32 4294901760, %v3442_v37 }
 0x1f9   :  { %v4258_v37 = vand.u32 4294901760, %v4202_v38  ;;  %v4265_v38 = vand.u32 4294901760, %v3355_v55 }
 0x1fa   :  { %2836 = vmatpush3.bf16.xpose.msra.mxu1 %v4224_v28  ;;  %v4235_v28 = vand.u32 4294901760, %v3082_v21  ;;  %v4242_v21 = vand.u32 4294901760, %v3112_v44  ;;  %v4248_v44 = vand.u32 4294901760, %v4196_v50  ;;  %v4253_v50 = vand.u32 4294901760, %v4200_v54 }
 0x1fb   :  { %2838 = vmatprep.subr.bf16.mxu1 %v4227_v26  ;;  %v4259_v54 = vand.u32 4294901760, %v4203_v3 }
 0x1fc   :  { %v2657_v58 = vpack.c.bf16 %v4235_v28, %v4234_v15  ;;  %v2661_v15 = vpack.c.bf16 %v4242_v21, %v4241_v20  ;;  %v4260_v21 = vand.u32 4294901760, %v4204_v60  ;;  %v4267_v60 = vand.u32 4294901760, %v4191_v14 }
 0x1fd   :  { %v2861_v20 = vpack.c.bf16 %v4259_v54, %v4258_v37  ;;  %v4304_v37 = vld [vmem:[#allocation36_spill] sm:$0xff]  ;;  %v4305_v54 = vld [vmem:[#allocation38_spill] sm:$0xff] }
 0x1ff   :  { %2648 = vmatpush3.bf16.xpose.msra.mxu0 %v4228_v24  ;;  %v4236_v24 = vld [vmem:[#allocation42_spill] sm:$0xff] }
 0x200   :  { %2650 = vmatprep.subr.bf16.mxu0 %v4229_v42  ;;  %v4237_v42 = vand.u32 4294901760, %v3291_v2  ;;  %v4243_v2 = vld [vmem:[#allocation52_spill] sm:$0xff] }
 0x202   :  { %2840 = vmatpush3.bf16.xpose.msra.mxu1 %v4227_v26  ;;  %v4238_v26 = vand.u32 4294901760, %v3309_v32  ;;  %v4244_v32 = vand.u32 4294901760, %v3392_v51  ;;  %v4249_v51 = vand.u32 4294901760, %v4197_v19  ;;  %v4254_v19 = vand.u32 4294901760, %v4165_v1 }
 0x203   :  { %2842 = vmatprep.subr.bf16.mxu1 %v4230_v35  ;;  %v4261_v1 = vand.u32 4294901760, %v4184_v5 }
 0x204   :  { %v2849_v9 = vpack.c.bf16 %v4238_v26, %v4237_v42  ;;  %v4245_v26 = vand.u32 4294901760, %v3398_v62  ;;  %v4250_v62 = vand.u32 4294901760, %v4198_v10  ;;  %v4255_v10 = vand.u32 4294901760, %v4167_v61 }
 0x205   :  { %v4256_v42 = vand.u32 4294901760, %v4177_v46  ;;  %v2671_v61 = vpack.c.bf16 %v4261_v1, %v4260_v21  ;;  %v4263_v46 = vand.u32 4294901760, %v4186_v57  ;;  %v4307_v21 = vld [vmem:[#allocation41_spill] sm:$0xff] }
 0x207   :  { %2652 = vmatpush3.bf16.xpose.msra.mxu0 %v4231_v52  ;;  %v4240_v52 = vand.u32 4294901760, %v3092_v27  ;;  %v4246_v27 = vld [vmem:[#allocation53_spill] sm:$0xff] }
 0x208   :  { %2654 = vmatprep.subr.bf16.mxu0 %v4232_v43  ;;  %v4239_v43 = vand.u32 4294901760, %v3084_v22  ;;  %v2853_v22 = vpack.c.bf16 %v4245_v26, %v4244_v32  ;;  %v4266_v32 = vand.u32 4294901760, %v4190_v7  ;;  %v4268_v26 = vand.u32 4294901760, %v3293_v56 }
 0x209   :  { %v4273_v7 = vand.u32 4294901760, %v3319_v63  ;;  %v4275_v56 = vand.u32 4294901760, %v3323_v13 }
 0x20a   :  { %2844 = vmatpush3.bf16.xpose.msra.mxu1 %v4230_v35  ;;  %v2659_v35 = vpack.c.bf16 %v4240_v52, %v4239_v43  ;;  %v2665_v52 = vpack.c.bf16 %v4250_v62, %v4249_v51  ;;  %v4257_v43 = vand.u32 4294901760, %v4201_v25  ;;  %v2675_v5 = vpack.c.bf16 %v4267_v60, %v4266_v32 }
 0x20b   :  { %2846 = vmatprep.subr.bf16.mxu1 %v4233_v23  ;;  %v4280_v51 = vand.u32 4294901760, %v3329_v12  ;;  %v4282_v62 = vand.u32 4294901760, %v3373_v41  ;;  %v4286_v12 = vld [vmem:[#allocation6_spill] sm:$0xff]  ;;  %v4290_v41 = vld [vmem:[#allocation51_spill] sm:$0xff] }
 0x20c   :  { %v2669_v28 = vpack.c.bf16 %v4257_v43, %v4256_v42  ;;  %v4301_v42 = vld [vmem:[#allocation33_spill] sm:$0xff]  ;;  %v4302_v43 = vld [vmem:[#allocation35_spill] sm:$0xff] }
 0x20f   :  { %2656 = vmatpush3.bf16.xpose.msra.mxu0 %v4236_v24 }
 0x210   :  { %2658 = vmatprep.subr.bf16.mxu0 %v2657_v58  ;;  %v4251_v58 = vld [vmem:[#allocation16_spill] sm:$0xff] }
 0x212   :  { %2848 = vmatpush3.bf16.xpose.msra.mxu1 %v4233_v23 }
 0x213   :  { %2850 = vmatprep.subr.bf16.mxu1 %v2849_v9 }
 0x216   :  { %2094 = vmatmul.mubr.f32.vlgmr.msra.gmra.mrb[0].mxu0 %v4215_v4  ;;  %v2667_v4 = vpack.c.bf16 %v4255_v10, %v4254_v19  ;;  %v4298_v19 = vld [vmem:[#allocation30_spill] sm:$0xff]  ;;  %v4299_v10 = vld [vmem:[#allocation32_spill] sm:$0xff] }
 0x217   :  { %2095 = vmatprep.mubr.f32.mxu0 %v4243_v2  ;;  %2660 = vmatpush3.bf16.xpose.msra.mxu0 %v2659_v35  ;;  %v2663_v35 = vpack.c.bf16 %v4248_v44, %v4247_v36  ;;  %v4274_v36 = vand.u32 4294901760, %v3321_v8  ;;  %v4276_v44 = vand.u32 4294901760, %v3368_v39  ;;  %v4281_v8 = vand.u32 4294901760, %v3331_v0  ;;  %v4287_v0 = vld [vmem:[#allocation8_spill] sm:$0xff] }
 0x218   :  { %2662 = vmatprep.subr.bf16.mxu0 %v2661_v15  ;;  %v4262_v15 = vand.u32 4294901760, %v4205_v49  ;;  %v4269_v49 = vand.u32 4294901760, %v3295_v17  ;;  %v4283_v39 = vand.u32 4294901760, %v3375_v47  ;;  %v4291_v47 = vld [vmem:[#allocation9_spill] sm:$0xff] }
 0x219   :  { %2448 = vmatmul.mubr.f32.vlgmr.msra.gmra.mrb[0].mxu1 %v4243_v2  ;;  %v2681_v17 = vpack.c.bf16 %v4275_v56, %v4274_v36  ;;  %v2685_v13 = vpack.c.bf16 %v4281_v8, %v4280_v51 }
 0x21a   :  { %2096 = vmatmul.mubr.f32.gmra.mrb[2].mxu0 %v4243_v2  ;;  %2450 = vmatprep.mubr.f32.mxu1 %v4246_v27  ;;  %v2673_v25 = vpack.c.bf16 %v4263_v46, %v4262_v15  ;;  %v4264_v2 = vand.u32 4294901760, %v4206_v29  ;;  %v2677_v57 = vpack.c.bf16 %v4269_v49, %v4268_v26  ;;  %v4271_v29 = vand.u32 4294901760, %v3365_v34 }
 0x21b   :  { %2852 = vmatpush3.bf16.xpose.msra.mxu1 %v2849_v9  ;;  %2097 = vmatprep.mubr.f32.mxu0 %v4246_v27  ;;  %v2857_v9 = vpack.c.bf16 %v4253_v50, %v4252_v45  ;;  %v4295_v45 = vld [vmem:[#allocation27_spill] sm:$0xff]  ;;  %v4296_v50 = vld [vmem:[#allocation28_spill] sm:$0xff] }
 0x21c   :  { %2854 = vmatprep.subr.bf16.mxu1 %v2853_v22  ;;  %v2865_v3 = vpack.c.bf16 %v4265_v38, %v4264_v2 }
 0x21d   :  { %2451 = vmatmul.mubr.f32.gmra.mrb[2].mxu1 %v4251_v58 }
 0x21e   :  { %2098 = vmatmul.mubr.f32.gmra.mrb[4].mxu0 %v4246_v27  ;;  %2485 = vmatprep.mubr.f32.mxu1 %v3413_v18  ;;  %v4272_v27 = vand.u32 4294901760, %v3314_v48  ;;  %v4279_v48 = vand.u32 4294901760, %v3327_v11 }
 0x21f   :  { %2099 = vmatprep.mubr.f32.mxu0 %v4251_v58  ;;  %2664 = vmatpush3.bf16.xpose.msra.mxu0 %v2663_v35  ;;  %v4278_v35 = vand.u32 4294901760, %v3325_v33  ;;  %v4285_v33 = vand.u32 4294901760, %v3335_v31  ;;  %v4289_v31 = vld [vmem:[#allocation11_spill] sm:$0xff] }
 0x220   :  { %2666 = vmatprep.subr.bf16.mxu0 %v2665_v52  ;;  %v2679_v14 = vpack.c.bf16 %v4273_v7, %v4272_v27  ;;  %v4284_v52 = vand.u32 4294901760, %v3333_v53  ;;  %v4288_v53 = vld [vmem:[#allocation48_spill] sm:$0xff] }
 0x221   :  { %v2683_v63 = vpack.c.bf16 %v4279_v48, %v4278_v35 }
 0x222   :  { %2100 = vmatmul.mubr.f32.gmra.mrb[6].mxu0 %v4251_v58  ;;  %v2687_v11 = vpack.c.bf16 %v4285_v33, %v4284_v52  ;;  %v4294_v58 = vld [vmem:[#allocation26_spill] sm:$0xff] }
 0x223   :  { %2856 = vmatpush3.bf16.xpose.msra.mxu1 %v2853_v22  ;;  %2133 = vmatprep.mubr.f32.mxu0 %v3413_v18  ;;  %v4270_v22 = vand.u32 4294901760, %v3360_v16  ;;  %v4277_v16 = vand.u32 4294901760, %v3371_v40  ;;  %v2877_v40 = vpack.c.bf16 %v4283_v39, %v4282_v62 }
 0x224   :  { %2858 = vmatprep.subr.bf16.mxu1 %v2857_v9 }
 0x225   :  { %v2869_v55 = vpack.c.bf16 %v4271_v29, %v4270_v22  ;;  %v2873_v34 = vpack.c.bf16 %v4277_v16, %v4276_v44 }
 0x227   :  { %2668 = vmatpush3.bf16.xpose.msra.mxu0 %v2667_v4  ;;  %v4300_v4 = vld [vmem:[#allocation31_spill] sm:$0xff] }
 0x228   :  { %2670 = vmatprep.subr.bf16.mxu0 %v2669_v28  ;;  %v4303_v28 = vld [vmem:[#allocation34_spill] sm:$0xff] }
 0x22b   :  { %2860 = vmatpush3.bf16.xpose.msra.mxu1 %v2857_v9  ;;  %v4297_v9 = vld [vmem:[#allocation29_spill] sm:$0xff] }
 0x22c   :  { %2862 = vmatprep.subr.bf16.mxu1 %v2861_v20 }
 0x22f   :  { %2672 = vmatpush3.bf16.xpose.msra.mxu0 %v2671_v61 }
 0x230   :  { %2674 = vmatprep.subr.bf16.mxu0 %v2673_v25 }
 0x233   :  { %2864 = vmatpush3.bf16.xpose.msra.mxu1 %v2861_v20  ;;  %v4306_v20 = vld [vmem:[#allocation37_spill] sm:$0xff] }
 0x234   :  { %2866 = vmatprep.subr.bf16.mxu1 %v2865_v3 }
 0x237   :  { %2676 = vmatpush3.bf16.xpose.msra.mxu0 %v2675_v5 }
 0x238   :  { %2678 = vmatprep.subr.bf16.mxu0 %v2677_v57 }
 0x23b   :  { %2868 = vmatpush3.bf16.xpose.msra.mxu1 %v2865_v3 }
 0x23c   :  { %2870 = vmatprep.subr.bf16.mxu1 %v2869_v55 }
 0x23f   :  { %2680 = vmatpush3.bf16.xpose.msra.mxu0 %v2679_v14 }
 0x240   :  { %2682 = vmatprep.subr.bf16.mxu0 %v2681_v17 }
 0x243   :  { %2872 = vmatpush3.bf16.xpose.msra.mxu1 %v2869_v55 }
 0x244   :  { %2874 = vmatprep.subr.bf16.mxu1 %v2873_v34 }
 0x247   :  { %2684 = vmatpush3.bf16.xpose.msra.mxu0 %v2683_v63 }
 0x248   :  { %2686 = vmatprep.subr.bf16.mxu0 %v2685_v13 }
 0x24b   :  { %2876 = vmatpush3.bf16.xpose.msra.mxu1 %v2873_v34 }
 0x24c   :  { %2878 = vmatprep.subr.bf16.mxu1 %v2877_v40 }
 0x24f   :  { %2688 = vmatpush3.bf16.xpose.msra.mxu0 %v2687_v11 }
 0x250   :  { %2690 = vmatprep.subr.bf16.mxu0 %v4207_v6  ;;  %v4292_v6 = vld [vmem:[#allocation14_spill] sm:$0xff] }
 0x253   :  { %2880 = vmatpush3.bf16.xpose.msra.mxu1 %v2877_v40 }
 0x254   :  { %2882 = vmatprep.subr.bf16.mxu1 %v4208_v59 }
 0x256   :  { %2134 = vmatmul.mubr.f32.vlgmr.msra.gmra.mrb[0].mxu0 %v3413_v18 }
 0x257   :  { %2135 = vmatprep.mubr.f32.mxu0 %v3449_v30  ;;  %2692 = vmatpush3.bf16.xpose.msra.mxu0 %v4286_v12 }
 0x258   :  { %2694 = vmatprep.subr.bf16.mxu0 %v4287_v0 }
 0x25a   :  { %2486 = vmatmul.mubr.f32.vlgmr.msra.gmra.mrb[0].mxu1 %v3449_v30  ;;  %2136 = vmatmul.mubr.f32.gmra.mrb[2].mxu0 %v3449_v30 }
 0x25b   :  { %2488 = vmatprep.mubr.f32.mxu1 %v4288_v53  ;;  %2884 = vmatpush3.bf16.xpose.msra.mxu1 %v4208_v59  ;;  %v4293_v59 = vld [vmem:[#allocation17_spill] sm:$0xff] }
 0x25c   :  { %2137 = vmatprep.mubr.f32.mxu0 %v4288_v53  ;;  %2886 = vmatprep.subr.bf16.mxu1 %v4289_v31 }
 0x25e   :  { %2489 = vmatmul.mubr.f32.gmra.mrb[2].mxu1 %v4290_v41  ;;  %2138 = vmatmul.mubr.f32.gmra.mrb[4].mxu0 %v4288_v53 }
 0x25f   :  { %2523 = vmatprep.mubr.f32.mxu1 %v3413_v18  ;;  %2139 = vmatprep.mubr.f32.mxu0 %v4290_v41 }
 0x260   :  { %2696 = vmatpush3.bf16.xpose.msra.mxu0 %v4291_v47 }
 0x261   :  { %2698 = vmatprep.subr.bf16.mxu0 %v4292_v6 }
 0x262   :  { %2140 = vmatmul.mubr.f32.gmra.mrb[6].mxu0 %v4290_v41 }
 0x263   :  { %2888 = vmatpush3.bf16.xpose.msra.mxu1 %v4289_v31  ;;  %2173 = vmatprep.mubr.f32.mxu0 %v3413_v18 }
 0x264   :  { %2890 = vmatprep.subr.bf16.mxu1 %v4293_v59 }
 0x268   :  { %2700 = vmatpush3.bf16.xpose.msra.mxu0 %v4294_v58 }
 0x269   :  { %2702 = vmatprep.subr.bf16.mxu0 %v4295_v45 }
 0x26b   :  { %2892 = vmatpush3.bf16.xpose.msra.mxu1 %v4293_v59 }
 0x26c   :  { %2894 = vmatprep.subr.bf16.mxu1 %v4296_v50 }
 0x270   :  { %2704 = vmatpush3.bf16.xpose.msra.mxu0 %v4297_v9 }
 0x271   :  { %2706 = vmatprep.subr.bf16.mxu0 %v4298_v19 }
 0x273   :  { %2896 = vmatpush3.bf16.xpose.msra.mxu1 %v4296_v50 }
 0x274   :  { %2898 = vmatprep.subr.bf16.mxu1 %v4299_v10 }
 0x278   :  { %2708 = vmatpush3.bf16.xpose.msra.mxu0 %v4300_v4 }
 0x279   :  { %2710 = vmatprep.subr.bf16.mxu0 %v4301_v42 }
 0x27b   :  { %2900 = vmatpush3.bf16.xpose.msra.mxu1 %v4299_v10 }
 0x27c   :  { %2902 = vmatprep.subr.bf16.mxu1 %v4302_v43 }
 0x280   :  { %2712 = vmatpush3.bf16.xpose.msra.mxu0 %v4303_v28 }
 0x281   :  { %2714 = vmatprep.subr.bf16.mxu0 %v4304_v37 }
 0x283   :  { %2904 = vmatpush3.bf16.xpose.msra.mxu1 %v4302_v43 }
 0x284   :  { %2906 = vmatprep.subr.bf16.mxu1 %v4305_v54 }
 0x288   :  { %2716 = vmatpush3.bf16.xpose.msra.mxu0 %v4306_v20 }
 0x289   :  { %2718 = vmatprep.subr.bf16.mxu0 %v4307_v21 }
 0x28b   :  { %2908 = vmatpush3.bf16.xpose.msra.mxu1 %v4305_v54 }
 0x28c   :  { %2910 = vmatprep.subr.bf16.mxu1 %v4233_v23 }
 0x290   :  { %2720 = vmatpush3.bf16.xpose.msra.mxu0 %v4236_v24 }
 0x293   :  { %2912 = vmatpush3.bf16.xpose.msra.mxu1 %v4233_v23 }
 0x297   :  { %2174 = vmatmul.mubr.f32.vlgmr.msra.gmra.mrb[0].mxu0 %v3413_v18 }
 0x298   :  { %2175 = vmatprep.mubr.f32.mxu0 %v3449_v30 }
 0x29a   :  { %2524 = vmatmul.mubr.f32.vlgmr.msra.gmra.mrb[0].mxu1 %v3449_v30 }
 0x29b   :  { %2176 = vmatmul.mubr.f32.gmra.mrb[2].mxu0 %v3449_v30  ;;  %2526 = vmatprep.mubr.f32.mxu1 %v4288_v53 }
 0x29c   :  { %2177 = vmatprep.mubr.f32.mxu0 %v4288_v53 }
 0x29e   :  { %2527 = vmatmul.mubr.f32.gmra.mrb[2].mxu1 %v4290_v41 }
 0x29f   :  { %2178 = vmatmul.mubr.f32.gmra.mrb[4].mxu0 %v4288_v53 }
 0x2a0   :  { %2179 = vmatprep.mubr.f32.mxu0 %v4290_v41 }
 0x2a3   :  { %2180 = vmatmul.mubr.f32.gmra.mrb[6].mxu0 %v4290_v41 }
 0x36a   :  { %v1126_v24 = vpop.f32.mrb[0].mxu0 }
 0x36b   :  { %1922 = vst [vmem:[%s3948_s4] sm:$0xff] %v1126_v24  ;;  %v1128_v18 = vpop.f32.mrb[1].mxu0 }
 0x36c   :  { %1923 = vst [vmem:[%s3948_s4 + $0x8] sm:$0xff] %v1128_v18 }
 0x36d   :  { %v2525_v30 = vpop.f32.mrb[0].mxu1 }
 0x36e   :  { %1927 = vst [vmem:[%s3948_s4 + $0x28] sm:$0xff] %v2525_v30  ;;  %v1133_v23 = vpop.f32.mrb[2].mxu0  ;;  %v1900_v1 = vpop.f32.mrb[1].mxu1 }
 0x36f   :  { %1925 = vst [vmem:[%s3948_s4 + $0x18] sm:$0xff] %v1133_v23  ;;  %1924 = vst [vmem:[%s3948_s4 + $0x10] sm:$0xff] %v1900_v1  ;;  %v1135_v61 = vpop.f32.mrb[3].mxu0 }
 0x370   :  { %1926 = vst [vmem:[%s3948_s4 + $0x20] sm:$0xff] %v1135_v61 }
 0x371   :  { %v2528_v15 = vpop.f32.mrb[2].mxu1 }
 0x372   :  { %1933 = vst [vmem:[%s3948_s4 + $0x58] sm:$0xff] %v2528_v15  ;;  %v1140_v46 = vpop.f32.mrb[4].mxu0  ;;  %v1912_v25 = vpop.f32.mrb[3].mxu1 }
 0x373   :  { %1928 = vst [vmem:[%s3948_s4 + $0x30] sm:$0xff] %v1140_v46  ;;  %1930 = vst [vmem:[%s3948_s4 + $0x40] sm:$0xff] %v1912_v25  ;;  %v1142_v2 = vpop.f32.mrb[5].mxu0 }
 0x374   :  { %1929 = vst [vmem:[%s3948_s4 + $0x38] sm:$0xff] %v1142_v2 }
 0x376   :  { %v1147_v38 = vpop.f32.mrb[6].mxu0 }
 0x377   :  { %1931 = vst [vmem:[%s3948_s4 + $0x48] sm:$0xff] %v1147_v38  ;;  %v1149_v3 = vpop.f32.mrb[7].mxu0 }
 0x378   :  { %1932 = vst [vmem:[%s3948_s4 + $0x50] sm:$0xff] %v1149_v3 }
 0x379   :  { %1938 = vsyncpa [#allocation3], 1 }

// kernel: gsa_layer_forward.3
= control target key start
LH: loop header
LB: loop body
LE: loop exit
PB: predicated region body
PF: predicated region fallthrough
CT: control target
= control target key end

     0   :  { %14 = vsyncpa [#allocation8], 0  ;;  %s18724_s0 = inlined_call_operand.vmem [shape: f32[4,8,32], index: 0, kind: input, shape index: {}]   ;;  %s18725_s1 = inlined_call_operand.vmem [shape: f32[4,1,8], index: 1, kind: input, shape index: {}]   ;;  %s18726_s2 = inlined_call_operand.vmem [shape: f32[4,1,8], index: 2, kind: input, shape index: {}]   ;;  %s18727_s3 = inlined_call_operand.vmem [shape: f32[4,1,8], index: 3, kind: input, shape index: {}]   ;;  %s18728_s4 = inlined_call_operand.vmem [shape: f32[128,128], index: 4, kind: input, shape index: {}]   ;;  %s18729_s5 = inlined_call_operand.vmem [shape: f32[2,16,128], index: 5, kind: input, shape index: {}]   ;;  %s18730_s6 = inlined_call_operand.vmem [shape: f32[2,16,384], index: 6, kind: input, shape index: {}, may-alias: {6,7,8}]   ;;  %s18731_s7 = inlined_call_operand.vmem [shape: f32[2,16,384], index: 7, kind: input, shape index: {}, may-alias: {6,7,8}]   ;;  %s18732_s8 = inlined_call_operand.vmem [shape: f32[2,16,384], index: 8, kind: input, shape index: {}, may-alias: {6,7,8}]   ;;  %s18733_s9 = inlined_call_operand.hbm [shape: f32[2,16,128], index: 9, kind: output, shape index: {}]  }
   0x1   :  { %16 = vsyncpa [#allocation8 + $0x1], 0  ;;  %s16031_s30 = smov 0   ;;  %s16033_s10 = smov 0  }
   0x2   :  { %s16035_s11 = smov 0   ;;  %s16037_s12 = smov 0  }
   0x3   :  { %s16039_s13 = smov 0   ;;  %s16041_s14 = smov 0  }
   0x4 LB: > { %s12352_s15 = sadd.s32 4294967295, %s15972_s14   ;;  %s12353_s16 = sadd.s32 4294967294, %s15972_s14   ;;  %s15972_s14 = sphi %s16041_s14, %s22_s14   ;;  %s15968_s13 = sphi %s16039_s13, %s19104_s13   ;;  %s15964_s12 = sphi %s16037_s12, %s19103_s12   ;;  %s15960_s11 = sphi %s16035_s11, %s19102_s11   ;;  %s15956_s10 = sphi %s16033_s10, %s19101_s10   ;;  %s15952_s30 = sphi %s16031_s30, %s19100_s30  }
   0x5   : > { %s34_s17 = sadd.s32 1, %s15968_s13  ;;  %s172_s18 = sadd.s32 1, %s15960_s11 }
   0x6   : > { %p36_p0 = scmp.ge.s32.totalorder %s34_s17, 2  ;;  %p179_p1 = scmp.ne.s32.totalorder %s15960_s11, %s15956_s10 }
   0x7   : > { %p180_p2 = scmp.eq.s32.totalorder %s15972_s14, 0  ;;  %p265_p3 = scmp.eq.s32.totalorder %s12352_s15, 1 }
   0x8   : > { %s19106_s17 = smov (%p36_p0, %s34_s17), 0  ;;  %p270_p6 = scmp.ne.s32.totalorder %s15956_s10, %s15952_s30 }
   0x9   : > { %18901 = sst [smem:[#allocation10_spill]] %s19106_s17  ;;  %p16070_p4 = por %p180_p2, %p179_p1 }
   0xa   : > { %p16074_p5 = por %p265_p3, %p179_p1  ;;  %s169_s21 = ssub.s32 %s15968_s13, %s19106_s17 }
   0xb   : > { %p170_p7 = scmp.eq.s32.totalorder %s169_s21, 0  ;;  %p271_p8 = scmp.eq.s32.totalorder %s12353_s16, 1 }
   0xc   : > { %p12355_p10 = scmp.ge.s32.totalorder %s15972_s14, 2 }
   0xd   : > { %s16083_s22 = scalar_select %p170_p7, %s15960_s11, %s172_s18  }
   0xe   : > { %p16085_p9 = por %p271_p8, %p270_p6  ;;  %302 = sbr.rel (%p12355_p10) target bundleno = 42 (0x2a), region = 36 }
   0xf   : > { %18904 = sst [smem:[#allocation11_spill]] %s16083_s22 }
  0x15   : > { %313 = sbr.rel (!%p16070_p4) target bundleno = 28 (0x1c), region = 44  ;;  %s315_s24 = sand.u32 (%p16070_p4), 1, %s15960_s11  }
  0x16   : > { %s15773_s25 = smul.u32 (%p16070_p4), 48, %s15968_s13  ;;  %s12356_s26 = sshll.u32 (%p16070_p4), %s315_s24, 4 }
  0x17   : > { %s317_s15 = scalar_lea.vmem (%p16070_p4), [#allocation4], %s12356_s26 }
  0x18   : > { %s320_s29 = scalar_lea.vmem (%p16070_p4), %s18730_s6, %s15773_s25 }
  0x19   : > { %v350_v0 = vld [vmem:[%s320_s29] sm:$0xff] (%p16070_p4)  ;;  %v352_v1 = vld [vmem:[%s320_s29 + $0x18] sm:$0xff] (%p16070_p4) }
  0x1a   : > { %351 = vst [vmem:[%s317_s15] sm:$0xff] (%p16070_p4), %v350_v0  ;;  %353 = vst [vmem:[%s317_s15 + $0x8] sm:$0xff] (%p16070_p4), %v352_v1 }
  0x1c PF: > { %359 = sbr.rel (!%p16070_p4) target bundleno = 35 (0x23), region = 82  ;;  %s361_s16 = sand.u32 (%p16070_p4), 1, %s15960_s11  }
  0x1d   : > { %s12359_s18 = smul.u32 (%p16070_p4), 48, %s15968_s13  ;;  %s12358_s21 = sshll.u32 (%p16070_p4), %s361_s16, 4 }
  0x1e   : > { %s363_s25 = scalar_lea.vmem (%p16070_p4), [#allocation5], %s12358_s21 }
  0x1f   : > { %s12256_s22 = scalar_lea.vmem (%p16070_p4), %s18731_s7, %s12359_s18 }
  0x20   : > { %v12360_v2 = vld [vmem:[%s12256_s22 + $0x8] sm:$0xff] (%p16070_p4)  ;;  %v12361_v3 = vld [vmem:[%s12256_s22 + $0x20] sm:$0xff] (%p16070_p4) }
  0x21   : > { %401 = vst [vmem:[%s363_s25] sm:$0xff] (%p16070_p4), %v12360_v2  ;;  %403 = vst [vmem:[%s363_s25 + $0x8] sm:$0xff] (%p16070_p4), %v12361_v3 }
  0x23 PF: > { %409 = sbr.rel (!%p16070_p4) target bundleno = 42 (0x2a), region = 120  ;;  %s411_s26 = sand.u32 (%p16070_p4), 1, %s15960_s11  }
  0x24   : > { %s12363_s27 = smul.u32 (%p16070_p4), 48, %s15968_s13  ;;  %s12362_s28 = sshll.u32 (%p16070_p4), %s411_s26, 4 }
  0x25   : > { %s413_s17 = scalar_lea.vmem (%p16070_p4), [#allocation6], %s12362_s28 }
  0x26   : > { %s12264_s16 = scalar_lea.vmem (%p16070_p4), %s18732_s8, %s12363_s27 }
  0x27   : > { %v12364_v4 = vld [vmem:[%s12264_s16 + $0x10] sm:$0xff] (%p16070_p4)  ;;  %v12365_v5 = vld [vmem:[%s12264_s16 + $0x28] sm:$0xff] (%p16070_p4) }
  0x28   : > { %451 = vst [vmem:[%s413_s17] sm:$0xff] (%p16070_p4), %v12364_v4  ;;  %453 = vst [vmem:[%s413_s17 + $0x8] sm:$0xff] (%p16070_p4), %v12365_v5 }
  0x2a PF: > { %p12366_p11 = scmp.ge.s32.totalorder %s15972_s14, 1  ;;  %p458_p12 = scmp.lt.s32.totalorder %s15972_s14, 3 }
  0x2c   : > { %p459_p13 = pnand %p12366_p11, %p458_p12 }
  0x2e   : > { %462 = sbr.rel (%p459_p13) target bundleno = 3833 (0xef9), region = 158 }
  0x35   : > { %s465_s19 = sand.u32 1, %s15956_s10   ;;  %vm542_vm0 = vcmask 261120   ;;  %v549_v6 = vld [vmem:[%s18724_s0] sm:$0xff]  ;;  %s15974_s25 = smov 96   ;;  %v12383_v27 = vld [vmem:[%s18724_s0 + $0x10] sm:$0xff]  ;;  %v12376_v44 = vld [vmem:[%s18724_s0 + $0x8] sm:$0xff] }
  0x36   : > { %s16121_s21 = sshll.u32 %s465_s19, 4  ;;  %v557_v7 = vsel %vm542_vm0, %v549_v6, 0  ;;  %s15975_s26 = smov 64   ;;  %v1662_v28 = vsel %vm542_vm0, %v12383_v27, 0  ;;  %v1109_v45 = vsel %vm542_vm0, %v12376_v44, 0  ;;  %vm1081_vm1 = vcmask 64512  }
  0x37   : > { %v16124_v8 = vand.u32 4294901760, %v557_v7  ;;  %s467_s24 = scalar_lea.vmem [#allocation4], %s16121_s21  ;;  %s15976_s27 = smov 32   ;;  %v16163_v31 = vand.u32 4294901760, %v1662_v28  ;;  %v16214_v46 = vand.u32 4294901760, %v1109_v45  ;;  %vm3806_vm2 = vcmask 130048  }
  0x38   : > { %v538_v9 = vld [vmem:[%s467_s24] sm:$0xff]  ;;  %v539_v10 = vld [vmem:[%s467_s24 + $0x8] sm:$0xff]  ;;  %s474_s15 = scalar_lea.vmem [#allocation5], %s16121_s21  ;;  %s16368_s29 = scalar_lea.vmem [#allocation6], %s16121_s21 }
  0x39   : > { %1100 = vrot.lane.b32.xlu1 %v538_v9, %s15974_s25  ;;  %1653 = vrot.lane.b32.xlu0 %v538_v9, %s15975_s26  ;;  %v551_v11 = vsel %vm542_vm0, %v538_v9, 0  ;;  %v554_v12 = vsel %vm542_vm0, %v539_v10, 0  ;;  %v16133_v15 = vsub.f32 %v557_v7, %v16124_v8  ;;  %v16158_v29 = vmul.f32 %v538_v9, %v538_v9  ;;  %v16161_v30 = vld [vmem:[%s474_s15] sm:$0xff]  ;;  %v16173_v35 = vld [vmem:[%s474_s15 + $0x8] sm:$0xff]  ;;  %p527_p0 = scmp.lt.s32.totalorder %s15964_s12, 1  ;;  %s12420_s18 = sshll.u32 %s15964_s12, 8 }
  0x3a   : > { %13189 = vmatprep.subr.mxu0 %v16124_v8  ;;  %v625_v13 = vand.u32 4294901760, %v551_v11  ;;  %v635_v14 = vand.u32 4294901760, %v554_v12  ;;  %v16169_v33 = vmul.f32 %v16161_v30, %v16161_v30  ;;  %v16171_v34 = vmul.f32 %v539_v10, %v539_v10  ;;  %13219 = vmatprep.subr.mxu1 %v16214_v46  ;;  %s18673_s28 = scalar_lea.hbm %s18733_s9, %s12420_s18 }
  0x3b   : > { %13190 = vmatpush3.xpose.msra.mxu0 %v16124_v8  ;;  %v16137_v18 = vand.u32 4294901760, %v16133_v15  ;;  %v543_v32 = vsel %vm542_vm0, %v16158_v29, 0.0  ;;  %v16178_v36 = vsub.f32 %v1662_v28, %v16163_v31  ;;  %v16184_v38 = vmul.f32 %v16173_v35, %v16173_v35  ;;  %13220 = vmatpush3.xpose.msra.mxu1 %v16214_v46 }
  0x3c   : > { %v626_v16 = vsub.f32 %v551_v11, %v625_v13  ;;  %v636_v17 = vsub.f32 %v554_v12, %v635_v14  ;;  %v2760_v37 = vsel %vm542_vm0, %v16169_v33, 0.0  ;;  %v546_v39 = vsel %vm542_vm0, %v16171_v34, 0.0 }
  0x3d   : > { %1102 = vrot.lane.b32.xlu1 %v539_v10, %s15974_s25  ;;  %1655 = vrot.lane.b32.xlu0 %v539_v10, %s15975_s26  ;;  %v649_v21 = vsub.f32 %v16133_v15, %v16137_v18  ;;  %v16189_v40 = vand.u32 4294901760, %v16178_v36  ;;  %v2763_v41 = vsel %vm542_vm0, %v16184_v38, 0.0  ;;  %v16218_v47 = vsub.f32 %v1109_v45, %v16214_v46 }
  0x3e   : > { %v627_v19 = vand.u32 4294901760, %v626_v16  ;;  %v637_v20 = vand.u32 4294901760, %v636_v17 }
  0x3f   : > { %v16143_v24 = vand.u32 4294901760, %v649_v21  ;;  %v1754_v42 = vsub.f32 %v16178_v36, %v16189_v40  ;;  %v16222_v48 = vand.u32 4294901760, %v16218_v47 }
  0x40   : > { %v628_v22 = vsub.f32 %v626_v16, %v627_v19  ;;  %v638_v23 = vsub.f32 %v636_v17, %v637_v20 }
  0x41   : > { %2208 = vrot.lane.b32.xlu1 %v539_v10, %s15976_s27  ;;  %2206 = vrot.lane.b32.xlu0 %v538_v9, %s15976_s27  ;;  %v1755_v43 = vand.u32 4294901760, %v1754_v42  ;;  %v1201_v51 = vsub.f32 %v16218_v47, %v16222_v48 }
  0x42   : > { %v629_v25 = vand.u32 4294901760, %v628_v22  ;;  %v639_v26 = vand.u32 4294901760, %v638_v23  ;;  %13194 = vmatprep.subr.mxu0 %v16143_v24 }
  0x43   : > { %v16232_v56 = vand.u32 4294901760, %v1201_v51 }
  0x44   : > { %13191 = vmatprep.mubr.f32.mxu0 %v629_v25  ;;  %v2771_v25 = vsel %vm542_vm0, %v16173_v35, 0 }
  0x45   : > { %13192 = vmatmul.mubr.f32.vlgmr.msra.gmra.mrb[0].mxu0 %v639_v26  ;;  %13224 = vmatprep.subr.mxu1 %v16232_v56 }
  0x46   : > { %13195 = vmatpush3.xpose.msra.mxu0 %v16143_v24  ;;  %13196 = vmatprep.mubr.f32.mxu0 %v625_v13 }
  0x47   : > { %13199 = vmatprep.subr.mxu0 %v16133_v15 }
  0x4d   : > { %13197 = vmatmul.mubr.f32.vlgmr.msra.gmra.mrb[0].mxu0 %v635_v14 }
  0x4e   : > { %13200 = vmatpush3.xpose.msra.mxu0 %v16133_v15  ;;  %13201 = vmatprep.mubr.f32.mxu0 %v626_v16 }
  0x4f   : > { %13204 = vmatprep.subr.mxu0 %v16124_v8 }
  0x55   : > { %13202 = vmatmul.mubr.f32.vlgmr.msra.gmra.mrb[0].mxu0 %v636_v17  ;;  %v12390_v17 = vld [vmem:[%s18724_s0 + $0x18] sm:$0xff] }
  0x56   : > { %13205 = vmatpush3.xpose.msra.mxu0 %v16124_v8  ;;  %13206 = vmatprep.mubr.f32.mxu0 %v627_v19  ;;  %v2768_v19 = vsel %vm542_vm0, %v16161_v30, 0  ;;  %v2215_v22 = vsel %vm542_vm0, %v12390_v17, 0 }
  0x57   : > { %13209 = vmatprep.subr.mxu0 %v16137_v18  ;;  %v16267_v23 = vand.u32 4294901760, %v2768_v19 }
  0x5d   : > { %13207 = vmatmul.mubr.f32.vlgmr.msra.gmra.mrb[0].mxu0 %v637_v20 }
  0x5e   : > { %13210 = vmatpush3.xpose.msra.mxu0 %v16137_v18  ;;  %13211 = vmatprep.mubr.f32.mxu0 %v625_v13 }
  0x5f   : > { %13214 = vmatprep.subr.mxu0 %v16124_v8 }
  0x60   : > { %544 = vadd.xlane.f32.xlu0 %v543_v32  ;;  %v16274_v32 = vand.u32 4294901760, %v2215_v22 }
  0x64   : > { %2761 = vadd.xlane.f32.xlu0 %v2760_v37  ;;  %v16281_v37 = vsub.f32 %v2768_v19, %v16267_v23 }
  0x65   : > { %547 = vadd.xlane.f32.xlu1 %v546_v39  ;;  %13212 = vmatmul.mubr.f32.vlgmr.msra.gmra.mrb[0].mxu0 %v635_v14 }
  0x66   : > { %13215 = vmatpush3.xpose.msra.mxu0 %v16124_v8  ;;  %13216 = vmatprep.mubr.f32.mxu0 %v625_v13 }
  0x67   : > { %13249 = vmatprep.subr.mxu0 %v16163_v31 }
  0x68   : > { %2764 = vadd.xlane.f32.xlu0 %v2763_v41 }
  0x6d   : > { %13217 = vmatmul.mubr.f32.vlgmr.msra.gmra.mrb[0].mxu0 %v635_v14 }
  0x6e   : > { %13250 = vmatpush3.xpose.msra.mxu0 %v16163_v31 }
  0x6f   : > { %13254 = vmatprep.subr.mxu0 %v1755_v43 }
  0x76   : > { %4364 = vrot.lane.b32.xlu1 %v16161_v30, %s15974_s25 }
  0x7a   : > { %1086 = vrot.lane.b32.xlu1 %v16158_v29, %s15974_s25 }
  0x7e   : > { %4366 = vrot.lane.b32.xlu0 %v16173_v35, %s15974_s25  ;;  %1088 = vrot.lane.b32.xlu1 %v16171_v34, %s15974_s25 }
  0x82   : > { %4350 = vrot.lane.b32.xlu0 %v16169_v33, %s15974_s25  ;;  %4352 = vrot.lane.b32.xlu1 %v16184_v38, %s15974_s25 }
  0xab   : > { %v1654_v49 = vpop.permute.xlu0 %1653  ;;  %v1101_v50 = vpop.permute.xlu1 %1100 }
  0xac   : > { %v1657_v52 = vsel %vm542_vm0, %v1654_v49, 0  ;;  %v1104_v53 = vsel %vm542_vm0, %v1101_v50, 0 }
  0xad   : > { %v16228_v54 = vand.u32 4294901760, %v1657_v52  ;;  %v16230_v55 = vand.u32 4294901760, %v1104_v53 }
  0xaf   : > { %v1731_v57 = vsub.f32 %v1657_v52, %v16228_v54  ;;  %v1656_v58 = vpop.permute.xlu0 %1655  ;;  %v1178_v59 = vsub.f32 %v1104_v53, %v16230_v55  ;;  %v1103_v60 = vpop.permute.xlu1 %1102 }
  0xb0   : > { %v1659_v61 = vsel %vm542_vm0, %v1656_v58, 0  ;;  %v1106_v62 = vsel %vm542_vm0, %v1103_v60, 0 }
  0xb1   : > { %v1732_v63 = vand.u32 4294901760, %v1731_v57  ;;  %v16239_v0 = vand.u32 4294901760, %v1659_v61  ;;  %v16241_v1 = vand.u32 4294901760, %v1106_v62  ;;  %v1179_v2 = vand.u32 4294901760, %v1178_v59 }
  0xb3   : > { %v1741_v3 = vsub.f32 %v1659_v61, %v16239_v0  ;;  %v1733_v4 = vsub.f32 %v1731_v57, %v1732_v63  ;;  %v1188_v5 = vsub.f32 %v1106_v62, %v16241_v1  ;;  %v1180_v6 = vsub.f32 %v1178_v59, %v1179_v2  ;;  %v2207_v20 = vpop.permute.xlu0 %2206  ;;  %v2209_v26 = vpop.permute.xlu1 %2208 }
  0xb4   : > { %v2210_v21 = vsel %vm542_vm0, %v2207_v20, 0  ;;  %v2212_v28 = vsel %vm542_vm0, %v2209_v26, 0 }
  0xb5   : > { %v1742_v7 = vand.u32 4294901760, %v1741_v3  ;;  %v1734_v9 = vand.u32 4294901760, %v1733_v4  ;;  %v1189_v10 = vand.u32 4294901760, %v1188_v5  ;;  %v1181_v11 = vand.u32 4294901760, %v1180_v6 }
  0xb6   : > { %v16271_v27 = vand.u32 4294901760, %v2210_v21  ;;  %v16284_v39 = vand.u32 4294901760, %v2212_v28 }
  0xb7   : > { %v1743_v12 = vsub.f32 %v1741_v3, %v1742_v7  ;;  %13251 = vmatprep.mubr.f32.mxu0 %v1734_v9  ;;  %v1190_v13 = vsub.f32 %v1188_v5, %v1189_v10  ;;  %13221 = vmatprep.mubr.f32.mxu1 %v1181_v11 }
  0xb8   : > { %v16288_v41 = vsub.f32 %v2210_v21, %v16271_v27  ;;  %v16298_v44 = vsub.f32 %v2212_v28, %v16284_v39 }
  0xb9   : > { %v1744_v14 = vand.u32 4294901760, %v1743_v12  ;;  %v1191_v16 = vand.u32 4294901760, %v1190_v13  ;;  %v16371_v12 = vld [vmem:[%s16368_s29] sm:$0xff]  ;;  %v16374_v13 = vld [vmem:[%s16368_s29 + $0x8] sm:$0xff] }
  0xba   : > { %v2285_v45 = vand.u32 4294901760, %v16288_v41  ;;  %v2295_v52 = vand.u32 4294901760, %v16298_v44 }
  0xbb   : > { %13252 = vmatmul.mubr.f32.vlgmr.msra.gmra.mrb[2].mxu0 %v1744_v14  ;;  %13222 = vmatmul.mubr.f32.vlgmr.msra.gmra.mrb[0].mxu1 %v1191_v16  ;;  %v3843_v14 = vand.u32 4294901760, %v16371_v12  ;;  %v3846_v16 = vand.u32 4294901760, %v16374_v13 }
  0xbc   : > { %13255 = vmatpush3.xpose.msra.mxu0 %v1755_v43  ;;  %13256 = vmatprep.mubr.f32.mxu0 %v16228_v54  ;;  %v2844_v43 = vand.u32 4294901760, %v16281_v37  ;;  %v2286_v53 = vsub.f32 %v16288_v41, %v2285_v45  ;;  %v2296_v58 = vsub.f32 %v16298_v44, %v2295_v52 }
  0xbd   : > { %13259 = vmatprep.subr.mxu0 %v16178_v36  ;;  %13225 = vmatpush3.xpose.msra.mxu1 %v16232_v56  ;;  %v16390_v19 = vpack.c.bf16 %v3846_v16, %v3843_v14 }
  0xbe   : > { %13226 = vmatprep.mubr.f32.mxu1 %v16230_v55  ;;  %13229 = vmatprep.subr.mxu1 %v16218_v47  ;;  %v2845_v51 = vsub.f32 %v16281_v37, %v2844_v43  ;;  %v2297_v61 = vand.u32 4294901760, %v2296_v58 }
  0xc3   : > { %13257 = vmatmul.mubr.f32.vlgmr.msra.gmra.mrb[2].mxu0 %v16239_v0  ;;  %13227 = vmatmul.mubr.f32.vlgmr.msra.gmra.mrb[0].mxu1 %v16241_v1 }
  0xc4   : > { %13260 = vmatpush3.xpose.msra.mxu0 %v16178_v36  ;;  %13261 = vmatprep.mubr.f32.mxu0 %v1731_v57  ;;  %v16276_v36 = vand.u32 4294901760, %v2771_v25 }
  0xc5   : > { %13264 = vmatprep.subr.mxu0 %v16163_v31  ;;  %13230 = vmatpush3.xpose.msra.mxu1 %v16218_v47 }
  0xc6   : > { %13231 = vmatprep.mubr.f32.mxu1 %v1178_v59  ;;  %13234 = vmatprep.subr.mxu1 %v16214_v46  ;;  %v16294_v42 = vsub.f32 %v2771_v25, %v16276_v36  ;;  %v2287_v59 = vand.u32 4294901760, %v2286_v53 }
  0xc8   : > { %v2854_v50 = vand.u32 4294901760, %v16294_v42 }
  0xcb   : > { %13262 = vmatmul.mubr.f32.vlgmr.msra.gmra.mrb[2].mxu0 %v1741_v3  ;;  %13232 = vmatmul.mubr.f32.vlgmr.msra.gmra.mrb[0].mxu1 %v1188_v5 }
  0xcc   : > { %13265 = vmatpush3.xpose.msra.mxu0 %v16163_v31  ;;  %13266 = vmatprep.mubr.f32.mxu0 %v1732_v63 }
  0xcd   : > { %13269 = vmatprep.subr.mxu0 %v16189_v40  ;;  %13235 = vmatpush3.xpose.msra.mxu1 %v16214_v46 }
  0xce   : > { %13236 = vmatprep.mubr.f32.mxu1 %v1179_v2  ;;  %13239 = vmatprep.subr.mxu1 %v16222_v48 }
  0xd3   : > { %13267 = vmatmul.mubr.f32.vlgmr.msra.gmra.mrb[2].mxu0 %v1742_v7  ;;  %13237 = vmatmul.mubr.f32.vlgmr.msra.gmra.mrb[0].mxu1 %v1189_v10 }
  0xd4   : > { %13270 = vmatpush3.xpose.msra.mxu0 %v16189_v40  ;;  %13271 = vmatprep.mubr.f32.mxu0 %v16228_v54  ;;  %v2305_v40 = vsub.f32 %v2215_v22, %v16274_v32  ;;  %v16424_v22 = vld [vmem:[%s18726_s2] ss:$0 sm:$0xff] }
  0xd5   : > { %13274 = vmatprep.subr.mxu0 %v16163_v31  ;;  %13240 = vmatpush3.xpose.msra.mxu1 %v16222_v48 }
  0xd6   : > { %13241 = vmatprep.mubr.f32.mxu1 %v16230_v55  ;;  %13244 = vmatprep.subr.mxu1 %v16214_v46  ;;  %v16301_v49 = vand.u32 4294901760, %v2305_v40 }
  0xd8   : > { %v2307_v57 = vsub.f32 %v2305_v40, %v16301_v49 }
  0xda   : > { %v2308_v60 = vand.u32 4294901760, %v2307_v57 }
  0xdb   : > { %13272 = vmatmul.mubr.f32.vlgmr.msra.gmra.mrb[2].mxu0 %v16239_v0  ;;  %13242 = vmatmul.mubr.f32.vlgmr.msra.gmra.mrb[0].mxu1 %v16241_v1 }
  0xdc   : > { %13275 = vmatpush3.xpose.msra.mxu0 %v16163_v31  ;;  %13276 = vmatprep.mubr.f32.mxu0 %v16228_v54  ;;  %v2855_v31 = vsub.f32 %v16294_v42, %v2854_v50  ;;  %v2846_v54 = vand.u32 4294901760, %v2845_v51 }
  0xdd   : > { %13309 = vmatprep.subr.mxu0 %v16124_v8  ;;  %13245 = vmatpush3.xpose.msra.mxu1 %v16214_v46 }
  0xde   : > { %13246 = vmatprep.mubr.f32.mxu1 %v16230_v55  ;;  %13279 = vmatprep.subr.mxu1 %v16274_v32  ;;  %v2856_v55 = vand.u32 4294901760, %v2855_v31  ;;  %v12378_v31 = vld [vmem:[%s18725_s1 + $0x1] ss:$0 sm:$0xff] }
  0xe3   : > { %13277 = vmatmul.mubr.f32.vlgmr.msra.gmra.mrb[2].mxu0 %v16239_v0  ;;  %13247 = vmatmul.mubr.f32.vlgmr.msra.gmra.mrb[0].mxu1 %v16241_v1 }
  0xe4   : > { %13310 = vmatpush3.xpose.msra.mxu0 %v16124_v8  ;;  %13311 = vmatprep.mubr.f32.mxu0 %v2846_v54 }
  0xe5   : > { %13314 = vmatprep.subr.mxu0 %v16143_v24  ;;  %13280 = vmatpush3.xpose.msra.mxu1 %v16274_v32 }
  0xe6   : > { %13281 = vmatprep.mubr.f32.mxu1 %v2287_v59  ;;  %13284 = vmatprep.subr.mxu1 %v2308_v60 }
  0xe7   : > { %13312 = vmatmul.mubr.f32.vlgmr.msra.gmra.mrb[4].mxu0 %v2856_v55 }
  0xe8   : > { %13315 = vmatpush3.xpose.msra.mxu0 %v16143_v24  ;;  %13316 = vmatprep.mubr.f32.mxu0 %v16267_v23  ;;  %v16339_v24 = vld [vmem:[%s18725_s1] ss:$0 sm:$0xff] }
  0xe9   : > { %13319 = vmatprep.subr.mxu0 %v16133_v15  ;;  %13282 = vmatmul.mubr.f32.vlgmr.msra.gmra.mrb[2].mxu1 %v2297_v61 }
  0xea   : > { %13285 = vmatpush3.xpose.msra.mxu1 %v2308_v60  ;;  %13286 = vmatprep.mubr.f32.mxu1 %v16271_v27 }
  0xeb   : > { %13289 = vmatprep.subr.mxu1 %v2305_v40 }
  0xed   : > { %v16331_v62 = vpop.xlane.xlu0 %544 }
  0xee   : > { %v1055_v20 = vmul.f32 %v16339_v24, %v16331_v62 }
  0xef   : > { %13317 = vmatmul.mubr.f32.vlgmr.msra.gmra.mrb[4].mxu0 %v16276_v36 }
  0xf0   : > { %13320 = vmatpush3.xpose.msra.mxu0 %v16133_v15  ;;  %13321 = vmatprep.mubr.f32.mxu0 %v16281_v37  ;;  %v12375_v37 = vld [vmem:[%s18727_s3] ss:$0 sm:$0xff] }
  0xf1   : > { %v2762_v63 = vpop.xlane.xlu0 %2761  ;;  %13324 = vmatprep.subr.mxu0 %v16124_v8  ;;  %13287 = vmatmul.mubr.f32.vlgmr.msra.gmra.mrb[2].mxu1 %v16284_v39 }
  0xf2   : > { %v548_v0 = vpop.xlane.xlu1 %547  ;;  %v16344_v1 = vmul.f32 %v16339_v24, %v2762_v63  ;;  %13290 = vmatpush3.xpose.msra.mxu1 %v2305_v40  ;;  %13291 = vmatprep.mubr.f32.mxu1 %v16288_v41 }
  0xf3   : > { %13294 = vmatprep.subr.mxu1 %v16274_v32 }
  0xf5   : > { %v2765_v15 = vpop.xlane.xlu0 %2764 }
  0xf6   : > { %v16348_v2 = vpop.permute.xlu1 %4364  ;;  %v16351_v3 = vmul.f32 %v16339_v24, %v2765_v15 }
  0xf7   : > { %13322 = vmatmul.mubr.f32.vlgmr.msra.gmra.mrb[4].mxu0 %v16294_v42 }
  0xf8   : > { %13325 = vmatpush3.xpose.msra.mxu0 %v16124_v8  ;;  %13326 = vmatprep.mubr.f32.mxu0 %v2844_v43 }
  0xf9   : > { %v16355_v4 = vpop.permute.xlu0 %4366  ;;  %13329 = vmatprep.subr.mxu0 %v16137_v18  ;;  %13292 = vmatmul.mubr.f32.vlgmr.msra.gmra.mrb[2].mxu1 %v16298_v44 }
  0xfa   : > { %v1087_v5 = vpop.permute.xlu1 %1086  ;;  %13295 = vmatpush3.xpose.msra.mxu1 %v16274_v32  ;;  %13296 = vmatprep.mubr.f32.mxu1 %v2285_v45 }
  0xfb   : > { %v1092_v6 = vsel %vm542_vm0, %v1087_v5, 0.0  ;;  %13299 = vmatprep.subr.mxu1 %v16301_v49 }
  0xfc   : > { %1093 = vadd.xlane.f32.xlu0 %v1092_v6 }
  0xfd   : > { %v4351_v7 = vpop.permute.xlu0 %4350 }
  0xfe   : > { %v1089_v9 = vpop.permute.xlu1 %1088  ;;  %v4356_v10 = vsel %vm542_vm0, %v4351_v7, 0.0 }
  0xff   : > { %13327 = vmatmul.mubr.f32.vlgmr.msra.gmra.mrb[4].mxu0 %v2854_v50  ;;  %v1095_v11 = vsel %vm542_vm0, %v1089_v9, 0.0 }
 0x100   : > { %13330 = vmatpush3.xpose.msra.mxu0 %v16137_v18  ;;  %1096 = vadd.xlane.f32.xlu1 %v1095_v11 }
 0x101   : > { %4357 = vadd.xlane.f32.xlu0 %v4356_v10  ;;  %13331 = vmatprep.mubr.f32.mxu0 %v16267_v23 }
 0x102   : > { %v4353_v17 = vpop.permute.xlu1 %4352  ;;  %13334 = vmatprep.subr.mxu0 %v16124_v8  ;;  %13297 = vmatmul.mubr.f32.vlgmr.msra.gmra.mrb[2].mxu1 %v2295_v52 }
 0x103   : > { %v4359_v18 = vsel %vm542_vm0, %v4353_v17, 0.0  ;;  %13300 = vmatpush3.xpose.msra.mxu1 %v16301_v49  ;;  %13301 = vmatprep.mubr.f32.mxu1 %v16271_v27 }
 0x104   : > { %13304 = vmatprep.subr.mxu1 %v16274_v32 }
 0x105   : > { %4360 = vadd.xlane.f32.xlu0 %v4359_v18 }
 0x107   : > { %13332 = vmatmul.mubr.f32.vlgmr.msra.gmra.mrb[4].mxu0 %v16276_v36 }
 0x108   : > { %13335 = vmatpush3.xpose.msra.mxu0 %v16124_v8  ;;  %13336 = vmatprep.mubr.f32.mxu0 %v16267_v23  ;;  %v1056_v8 = vmul.f32 %v16339_v24, %v548_v0 }
 0x109   : > { %14630 = vmatprep.subr.bf16.mxu0 %v16390_v19 }
 0x10a   : > { %13302 = vmatmul.mubr.f32.vlgmr.msra.gmra.mrb[2].mxu1 %v16284_v39 }
 0x10b   : > { %13305 = vmatpush3.xpose.msra.mxu1 %v16274_v32  ;;  %13306 = vmatprep.mubr.f32.mxu1 %v16271_v27 }
 0x10f   : > { %13337 = vmatmul.mubr.f32.vlgmr.msra.gmra.mrb[4].mxu0 %v16276_v36 }
 0x110   : > { %14632 = vmatpush3.bf16.msra.mxu0 %v16390_v19 }
 0x111   : > { %5439 = vrot.lane.b32.xlu1 %v16371_v12, %s15974_s25 }
 0x112   : > { %13307 = vmatmul.mubr.f32.vlgmr.msra.gmra.mrb[2].mxu1 %v16284_v39 }
 0x115   : > { %5971 = vrot.lane.b32.xlu1 %v16161_v30, %s15975_s26 }
 0x119   : > { %5973 = vrot.lane.b32.xlu1 %v16173_v35, %s15975_s26 }
 0x11b   : > { %5441 = vrot.lane.b32.xlu0 %v16374_v13, %s15974_s25 }
 0x11d   : > { %1641 = vrot.lane.b32.xlu1 %v16171_v34, %s15975_s26 }
 0x11f   : > { %1639 = vrot.lane.b32.xlu0 %v16158_v29, %s15975_s26 }
 0x121   : > { %5959 = vrot.lane.b32.xlu1 %v16184_v38, %s15975_s26 }
 0x123   : > { %5957 = vrot.lane.b32.xlu0 %v16169_v33, %s15975_s26 }
 0x140   : > { %v13218_v21 = vpop.f32.mrb[0].mxu0 }
 0x141   : > { %v1058_v23 = vadd.f32 %v13218_v21, %v1056_v8  ;;  %v1038_v25 = vpop.f32.mrb[1].mxu0 }
 0x142   : > { %v1057_v26 = vadd.f32 %v1055_v20, %v1038_v25 }
 0x143   : > { %v1067_v27 = vadd.f32 %v16424_v22, %v1058_v23 }
 0x144   : > { %v1066_v28 = vadd.f32 %v16424_v22, %v1057_v26 }
 0x145   : > { %v1070_v32 = vmul.f32 1.442695, %v1067_v27 }
 0x146   : > { %v1068_v36 = vmul.f32 1.442695, %v1066_v28 }
 0x147   : > { %15835 = vpow2.f32 %v1070_v32 }
 0x148   : > { %15837 = vpow2.f32 %v1068_v36 }
 0x151   : > { %v15836_v39 = vpop.eup %15835 }
 0x152   : > { %v15838_v41 = vpop.eup %15837  ;;  %v1080_v40 = vmul.f32 %v15836_v39, %v12375_v37 }
 0x153   : > { %v1079_v42 = vmul.f32 %v15838_v41, %v12375_v37 }
 0x154   : > { %1083 = vst.msk [vmem:[#allocation2 + $0x8] sm:$0xff] %vm1081_vm1, %v1080_v40 }
 0x155   : > { %1082 = vst.msk [vmem:[#allocation2] sm:$0xff] %vm1081_vm1, %v1079_v42 }
 0x15c   : > { %v3289_v43 = vld [vmem:[#allocation2] sm:$0xff] }
 0x15d   : > { %v3293_v44 = vsel %vm1081_vm1, %v3289_v43, 0 }
 0x15e   : > { %v16434_v45 = vand.u32 4294901760, %v3293_v44 }
 0x160   : > { %v16437_v49 = vsub.f32 %v3293_v44, %v16434_v45 }
 0x162   : > { %v3373_v50 = vand.u32 4294901760, %v16437_v49 }
 0x164   : > { %v3374_v51 = vsub.f32 %v16437_v49, %v3373_v50 }
 0x166   : > { %v3375_v52 = vand.u32 4294901760, %v3374_v51 }
 0x168   : > { %13343 = vmatprep.mubr.f32.mxu1 %v3375_v52 }
 0x189   : > { %v1094_v53 = vpop.xlane.xlu0 %1093 }
 0x18a   : > { %v1608_v26 = vmul.f32 %v12378_v31, %v1094_v53 }
 0x18d   : > { %v1097_v57 = vpop.xlane.xlu1 %1096 }
 0x18e   : > { %v4358_v54 = vpop.xlane.xlu0 %4357  ;;  %v1609_v25 = vmul.f32 %v12378_v31, %v1097_v57 }
 0x18f   : > { %v16446_v58 = vmul.f32 %v12378_v31, %v4358_v54 }
 0x191   : > { %v5440_v59 = vpop.permute.xlu1 %5439 }
 0x192   : > { %v5452_v60 = vand.u32 4294901760, %v5440_v59  ;;  %v4361_v55 = vpop.xlane.xlu0 %4360 }
 0x193   : > { %v16448_v61 = vmul.f32 %v12378_v31, %v4361_v55 }
 0x194   : > { %v16450_v62 = vsub.f32 %v5440_v59, %v5452_v60 }
 0x195   : > { %v16452_v24 = vpop.permute.xlu1 %5971 }
 0x196   : > { %v5442_v63 = vpop.permute.xlu0 %5441 }
 0x197   : > { %v5455_v0 = vand.u32 4294901760, %v5442_v63 }
 0x199   : > { %v16454_v15 = vpack.c.bf16 %v5455_v0, %v5452_v60  ;;  %v16456_v5 = vsub.f32 %v5442_v63, %v5455_v0  ;;  %v16458_v6 = vpop.permute.xlu1 %5973  ;;  %v3290_v60 = vld [vmem:[#allocation2 + $0x8] sm:$0xff] }
 0x19a   : > { %v1640_v7 = vpop.permute.xlu0 %1639  ;;  %v3296_v55 = vsel %vm1081_vm1, %v3290_v60, 0 }
 0x19b   : > { %v1645_v9 = vsel %vm542_vm0, %v1640_v7, 0.0  ;;  %v3381_v63 = vand.u32 4294901760, %v3296_v55 }
 0x19c   : > { %1646 = vadd.xlane.f32.xlu0 %v1645_v9 }
 0x19d   : > { %v1642_v10 = vpop.permute.xlu1 %1641  ;;  %v3382_v7 = vsub.f32 %v3296_v55, %v3381_v63 }
 0x19e   : > { %v5958_v11 = vpop.permute.xlu0 %5957  ;;  %v1648_v17 = vsel %vm542_vm0, %v1642_v10, 0.0 }
 0x19f   : > { %1649 = vadd.xlane.f32.xlu1 %v1648_v17  ;;  %v5963_v18 = vsel %vm542_vm0, %v5958_v11, 0.0 }
 0x1a0   : > { %5964 = vadd.xlane.f32.xlu0 %v5963_v18  ;;  %v3383_v18 = vand.u32 4294901760, %v3382_v7 }
 0x1a1   : > { %v5960_v8 = vpop.permute.xlu1 %5959 }
 0x1a2   : > { %v5966_v20 = vsel %vm542_vm0, %v5960_v8, 0.0 }
 0x1a4   : > { %5967 = vadd.xlane.f32.xlu0 %v5966_v20 }
 0x1b0   : > { %7044 = vrot.lane.b32.xlu1 %v16371_v12, %s15975_s26 }
 0x1b4   : > { %7576 = vrot.lane.b32.xlu1 %v16161_v30, %s15976_s27 }
 0x1b6   : > { %v16468_v21 = vpop.f32.mrb[2].mxu0  ;;  %v13248_v30 = vpop.f32.mrb[0].mxu1 }
 0x1b7   : > { %v16470_v23 = vpop.f32.mrb[3].mxu0  ;;  %v1611_v27 = vadd.f32 %v13248_v30, %v1609_v25  ;;  %v1590_v28 = vpop.f32.mrb[1].mxu1 }
 0x1b8   : > { %7578 = vrot.lane.b32.xlu1 %v16173_v35, %s15976_s27  ;;  %v16487_v35 = vld [vmem:[%s18726_s2 + $0x1] ss:$0 sm:$0xff] }
 0x1b9   : > { %v1621_v32 = vadd.f32 %v16487_v35, %v1611_v27  ;;  %v3384_v27 = vsub.f32 %v3382_v7, %v3383_v18 }
 0x1ba   : > { %7046 = vrot.lane.b32.xlu0 %v16374_v13, %s15975_s26 }
 0x1bb   : > { %v1624_v36 = vmul.f32 1.442695, %v1621_v32 }
 0x1bc   : > { %2194 = vrot.lane.b32.xlu1 %v16171_v34, %s15976_s27  ;;  %v1610_v34 = vadd.f32 %v1608_v26, %v1590_v28 }
 0x1bd   : > { %15839 = vpow2.f32 %v1624_v36  ;;  %v3385_v36 = vand.u32 4294901760, %v3384_v27 }
 0x1be   : > { %2192 = vrot.lane.b32.xlu0 %v16158_v29, %s15976_s27  ;;  %v1620_v29 = vadd.f32 %v16487_v35, %v1610_v34 }
 0x1c0   : > { %7564 = vrot.lane.b32.xlu1 %v16184_v38, %s15976_s27  ;;  %v1622_v37 = vmul.f32 1.442695, %v1620_v29 }
 0x1c2   : > { %7562 = vrot.lane.b32.xlu0 %v16169_v33, %s15976_s27  ;;  %15841 = vpow2.f32 %v1622_v37  ;;  %v12382_v33 = vld [vmem:[%s18727_s3 + $0x1] ss:$0 sm:$0xff] }
 0x1c7   : > { %v15840_v38 = vpop.eup %15839 }
 0x1c8   : > { %v1635_v41 = vmul.f32 %v15840_v38, %v12382_v33 }
 0x1ca   : > { %1638 = vst.msk [vmem:[#allocation2 + $0x18] sm:$0xff] %vm1081_vm1, %v1635_v41 }
 0x1cc   : > { %v15842_v39 = vpop.eup %15841 }
 0x1cd   : > { %v1634_v40 = vmul.f32 %v15842_v39, %v12382_v33 }
 0x1cf   : > { %1637 = vst.msk [vmem:[#allocation2 + $0x10] sm:$0xff] %vm1081_vm1, %v1634_v40 }
 0x1d6   : > { %v4891_v33 = vld [vmem:[#allocation2 + $0x10] sm:$0xff] }
 0x1d7   : > { %v4894_v38 = vsel %vm1081_vm1, %v4891_v33, 0 }
 0x1d8   : > { %v16512_v39 = vand.u32 4294901760, %v4894_v38 }
 0x1da   : > { %v16516_v41 = vsub.f32 %v4894_v38, %v16512_v39 }
 0x1dc   : > { %v4974_v40 = vand.u32 4294901760, %v16516_v41 }
 0x1e2   : > { %v13338_v42 = vpop.f32.mrb[4].mxu0 }
 0x1e3   : > { %v3275_v43 = vadd.f32 %v13338_v42, %v16351_v3  ;;  %v3255_v44 = vpop.f32.mrb[5].mxu0 }
 0x1e4   : > { %v3274_v51 = vadd.f32 %v16344_v1, %v3255_v44 }
 0x1e5   : > { %v3284_v52 = vadd.f32 %v16424_v22, %v3275_v43  ;;  %v16499_v53 = vpop.f32.mrb[2].mxu1 }
 0x1e6   : > { %v3283_v57 = vadd.f32 %v16424_v22, %v3274_v51  ;;  %v16502_v31 = vpop.f32.mrb[3].mxu1  ;;  %v16529_v51 = vld [vmem:[%s18726_s2 + $0x2] ss:$0 sm:$0xff] }
 0x1e7   : > { %v3287_v54 = vmul.f32 1.442695, %v3284_v52 }
 0x1e8   : > { %v3285_v59 = vmul.f32 1.442695, %v3283_v57 }
 0x1e9   : > { %15843 = vpow2.f32 %v3287_v54 }
 0x1ea   : > { %15845 = vpow2.f32 %v3285_v59 }
 0x1f3   : > { %v15844_v3 = vpop.eup %15843 }
 0x1f4   : > { %v15846_v0 = vpop.eup %15845  ;;  %v3302_v1 = vsel %vm1081_vm1, %v15844_v3, 0 }
 0x1f5   : > { %v3308_v9 = vand.u32 4294901760, %v3302_v1  ;;  %v3299_v10 = vsel %vm1081_vm1, %v15846_v0, 0 }
 0x1f6   : > { %v3305_v11 = vand.u32 4294901760, %v3299_v10 }
 0x1f7   : > { %v3400_v22 = vsub.f32 %v3302_v1, %v3308_v9 }
 0x1f8   : > { %v14605_v17 = vpack.c.bf16 %v3308_v9, %v3305_v11  ;;  %v3393_v8 = vsub.f32 %v3299_v10, %v3305_v11 }
 0x1f9   : > { %v3401_v20 = vand.u32 4294901760, %v3400_v22 }
 0x1fa   : > { %14606 = vmatprep.subr.bf16.mxu1 %v14605_v17  ;;  %v3394_v25 = vand.u32 4294901760, %v3393_v8  ;;  %v14613_v26 = vpack.c.bf16 %v3400_v22, %v3393_v8 }
 0x1fb   : > { %14608 = vmatpush3.bf16.xpose.msra.mxu1 %v14605_v17  ;;  %v3402_v30 = vsub.f32 %v3400_v22, %v3401_v20 }
 0x1fc   : > { %v3395_v28 = vsub.f32 %v3393_v8, %v3394_v25  ;;  %v14621_v34 = vpack.c.bf16 %v3401_v20, %v3394_v25  ;;  %v12389_v25 = vld [vmem:[%s18727_s3 + $0x2] ss:$0 sm:$0xff] }
 0x1fd   : > { %v3403_v32 = vand.u32 4294901760, %v3402_v30 }
 0x1fe   : > { %v3396_v29 = vand.u32 4294901760, %v3395_v28 }
 0x200   : > { %v14609_v37 = vpack.c.bf16 %v3403_v32, %v3396_v29 }
 0x202   : > { %13344 = vmatmul.mubr.f32.vlgmr.msra.gmra.mrb[4].mxu1 %v3385_v36  ;;  %14610 = vmatprep.subr.bf16.mxu1 %v14609_v37  ;;  %v3931_v36 = vsub.f32 %v16371_v12, %v3843_v14 }
 0x203   : > { %14612 = vmatpush3.bf16.xpose.msra.mxu1 %v14609_v37  ;;  %13350 = vmatprep.mubr.f32.mxu1 %v16434_v45  ;;  %v3938_v37 = vsub.f32 %v16374_v13, %v3846_v16  ;;  %v12394_v13 = vld [vmem:[%s18726_s2 + $0x3] ss:$0 sm:$0xff] }
 0x204   : > { %14614 = vmatprep.subr.bf16.mxu1 %v14613_v26  ;;  %v3932_v38 = vand.u32 4294901760, %v3931_v36 }
 0x20a   : > { %13351 = vmatmul.mubr.f32.vlgmr.msra.gmra.mrb[4].mxu1 %v3381_v63 }
 0x20b   : > { %14616 = vmatpush3.bf16.xpose.msra.mxu1 %v14613_v26  ;;  %13357 = vmatprep.mubr.f32.mxu1 %v16437_v49  ;;  %v4975_v49 = vsub.f32 %v16516_v41, %v4974_v40 }
 0x20c   : > { %14618 = vmatprep.subr.bf16.mxu1 %v14605_v17 }
 0x20d   : > { %v4976_v42 = vand.u32 4294901760, %v4975_v49  ;;  %v3939_v49 = vand.u32 4294901760, %v3938_v37 }
 0x212   : > { %13358 = vmatmul.mubr.f32.vlgmr.msra.gmra.mrb[4].mxu1 %v3382_v7 }
 0x213   : > { %14620 = vmatpush3.bf16.xpose.msra.mxu1 %v14605_v17  ;;  %13364 = vmatprep.mubr.f32.mxu1 %v3373_v50  ;;  %v12385_v50 = vld [vmem:[%s18725_s1 + $0x2] ss:$0 sm:$0xff] }
 0x214   : > { %14622 = vmatprep.subr.bf16.mxu1 %v14621_v34 }
 0x21a   : > { %13365 = vmatmul.mubr.f32.vlgmr.msra.gmra.mrb[4].mxu1 %v3383_v18 }
 0x21b   : > { %14624 = vmatpush3.bf16.xpose.msra.mxu1 %v14621_v34  ;;  %13371 = vmatprep.mubr.f32.mxu1 %v16434_v45 }
 0x21c   : > { %14626 = vmatprep.subr.bf16.mxu1 %v14605_v17 }
 0x222   : > { %13372 = vmatmul.mubr.f32.vlgmr.msra.gmra.mrb[4].mxu1 %v3381_v63 }
 0x223   : > { %14628 = vmatpush3.bf16.xpose.msra.mxu1 %v14605_v17  ;;  %13378 = vmatprep.mubr.f32.mxu1 %v16434_v45 }
 0x229   : > { %v1647_v43 = vpop.xlane.xlu0 %1646 }
 0x22a   : > { %v2161_v44 = vmul.f32 %v12385_v50, %v1647_v43  ;;  %13379 = vmatmul.mubr.f32.vlgmr.msra.gmra.mrb[4].mxu1 %v3381_v63 }
 0x22b   : > { %13457 = vmatprep.mubr.f32.mxu1 %v4976_v42  ;;  %v3940_v42 = vsub.f32 %v3938_v37, %v3939_v49 }
 0x22c   : > { %v2163_v45 = vadd.f32 %v2161_v44, %v16470_v23  ;;  %v1650_v52 = vpop.xlane.xlu1 %1649  ;;  %v12392_v44 = vld [vmem:[%s18725_s1 + $0x3] ss:$0 sm:$0xff] }
 0x22d   : > { %v2162_v57 = vmul.f32 %v12385_v50, %v1650_v52  ;;  %v5965_v54 = vpop.xlane.xlu0 %5964  ;;  %v3941_v52 = vand.u32 4294901760, %v3940_v42 }
 0x22e   : > { %v2173_v59 = vadd.f32 %v16529_v51, %v2163_v45  ;;  %v16533_v60 = vmul.f32 %v12385_v50, %v5965_v54 }
 0x22f   : > { %v2164_v55 = vadd.f32 %v16468_v21, %v2162_v57 }
 0x230   : > { %v2175_v3 = vmul.f32 1.442695, %v2173_v59  ;;  %v7045_v0 = vpop.permute.xlu1 %7044 }
 0x231   : > { %v2174_v63 = vadd.f32 %v16529_v51, %v2164_v55  ;;  %v7057_v1 = vand.u32 4294901760, %v7045_v0  ;;  %v5968_v7 = vpop.xlane.xlu0 %5967 }
 0x232   : > { %15847 = vpow2.f32 %v2175_v3  ;;  %v16537_v9 = vmul.f32 %v12385_v50, %v5968_v7  ;;  %v3933_v50 = vsub.f32 %v3931_v36, %v3932_v38 }
 0x233   : > { %v2177_v10 = vmul.f32 1.442695, %v2174_v63  ;;  %v16539_v23 = vsub.f32 %v7045_v0, %v7057_v1  ;;  %v16579_v0 = vpack.c.bf16 %v3938_v37, %v3931_v36 }
 0x234   : > { %v16541_v11 = vpop.permute.xlu1 %7576  ;;  %v3934_v45 = vand.u32 4294901760, %v3933_v50 }
 0x235   : > { %15849 = vpow2.f32 %v2177_v10  ;;  %v7047_v22 = vpop.permute.xlu0 %7046  ;;  %v12396_v10 = vld [vmem:[%s18727_s3 + $0x3] ss:$0 sm:$0xff] }
 0x236   : > { %v7060_v17 = vand.u32 4294901760, %v7047_v22 }
 0x238   : > { %v16543_v18 = vpack.c.bf16 %v7060_v17, %v7057_v1  ;;  %v16545_v21 = vsub.f32 %v7047_v22, %v7060_v17  ;;  %v16547_v8 = vpop.permute.xlu1 %7578 }
 0x239   : > { %v2193_v20 = vpop.permute.xlu0 %2192 }
 0x23a   : > { %v2198_v26 = vsel %vm542_vm0, %v2193_v20, 0.0 }
 0x23b   : > { %2199 = vadd.xlane.f32.xlu0 %v2198_v26 }
 0x23c   : > { %v15848_v30 = vpop.eup %15847  ;;  %v2195_v27 = vpop.permute.xlu1 %2194 }
 0x23d   : > { %v2187_v28 = vmul.f32 %v15848_v30, %v12389_v25  ;;  %v2201_v34 = vsel %vm542_vm0, %v2195_v27, 0.0  ;;  %v16564_v33 = vpop.permute.xlu0 %7562 }
 0x23e   : > { %2202 = vadd.xlane.f32.xlu1 %v2201_v34 }
 0x23f   : > { %v15850_v32 = vpop.eup %15849  ;;  %2190 = vst.msk [vmem:[#allocation2 + $0x20] sm:$0xff] %vm1081_vm1, %v2187_v28 }
 0x240   : > { %v2188_v29 = vmul.f32 %v15850_v32, %v12389_v25  ;;  %v16566_v43 = vpop.permute.xlu1 %7564 }
 0x242   : > { %2191 = vst.msk [vmem:[#allocation2 + $0x28] sm:$0xff] %vm1081_vm1, %v2188_v29 }
 0x24f   : > { %8649 = vrot.lane.b32.xlu1 %v16371_v12, %s15976_s27  ;;  %v16571_v12 = vpack.c.bf16 %v3941_v52, %v3934_v45  ;;  %v15977_v52 = vmov 0.0  }
 0x250   : > { %2746 = vst.msk [vmem:[#allocation3 + $0x8] sm:$0xff] %vm542_vm0, %v15977_v52  ;;  %2745 = vst.msk [vmem:[#allocation3] sm:$0xff] %vm542_vm0, %v15977_v52 }
 0x251   : > { %14634 = vmatprep.subr.bf16.mxu0 %v16571_v12  ;;  %2747 = vst.msk [vmem:[#allocation3 + $0x10] sm:$0xff] %vm542_vm0, %v15977_v52  ;;  %2748 = vst.msk [vmem:[#allocation3 + $0x18] sm:$0xff] %vm542_vm0, %v15977_v52 }
 0x252   : > { %2749 = vst.msk [vmem:[#allocation3 + $0x20] sm:$0xff] %vm542_vm0, %v15977_v52  ;;  %2750 = vst.msk [vmem:[#allocation3 + $0x28] sm:$0xff] %vm542_vm0, %v15977_v52 }
 0x253   : > { %2751 = vst.msk [vmem:[#allocation3 + $0x30] sm:$0xff] %vm542_vm0, %v15977_v52  ;;  %2752 = vst.msk [vmem:[#allocation3 + $0x38] sm:$0xff] %vm542_vm0, %v15977_v52 }
 0x2c8   : > { %v2200_v57 = vpop.xlane.xlu0 %2199 }
 0x2c9   : > { %v2714_v14 = vmul.f32 %v12392_v44, %v2200_v57 }
 0x2cb   : > { %v2716_v16 = vadd.f32 %v2714_v14, %v16502_v31  ;;  %v2203_v54 = vpop.xlane.xlu1 %2202  ;;  %v16585_v31 = vpack.c.bf16 %v3939_v49, %v3932_v38 }
 0x2cc   : > { %v2715_v59 = vmul.f32 %v12392_v44, %v2203_v54 }
 0x2cd   : > { %v2726_v55 = vadd.f32 %v12394_v13, %v2716_v16 }
 0x2ce   : > { %v2717_v3 = vadd.f32 %v16499_v53, %v2715_v59 }
 0x2cf   : > { %v2728_v63 = vmul.f32 1.442695, %v2726_v55 }
 0x2d0   : > { %v2727_v1 = vadd.f32 %v12394_v13, %v2717_v3 }
 0x2d1   : > { %15851 = vpow2.f32 %v2728_v63 }
 0x2d2   : > { %v2730_v7 = vmul.f32 1.442695, %v2727_v1 }
 0x2d4   : > { %15853 = vpow2.f32 %v2730_v7 }
 0x2db   : > { %v15852_v22 = vpop.eup %15851 }
 0x2dc   : > { %v2740_v17 = vmul.f32 %v15852_v22, %v12396_v10 }
 0x2de   : > { %v15854_v20 = vpop.eup %15853  ;;  %2743 = vst.msk [vmem:[#allocation2 + $0x30] sm:$0xff] %vm1081_vm1, %v2740_v17 }
 0x2df   : > { %v2741_v25 = vmul.f32 %v15854_v20, %v12396_v10 }
 0x2e1   : > { %2744 = vst.msk [vmem:[#allocation2 + $0x38] sm:$0xff] %vm1081_vm1, %v2741_v25 }
 0x2fd   : > { %v13380_v53 = vpop.f32.mrb[4].mxu1 }
 0x2fe   : > { %v3808_v26 = vsel %vm3806_vm2, %v13380_v53, -inf  ;;  %v3796_v30 = vpop.f32.mrb[5].mxu1 }
 0x2ff   : > { %v3807_v27 = vsel %vm3806_vm2, %v3796_v30, -inf }
 0x300   : > { %v3809_v28 = vmax.f32 %v3807_v27, %v3808_v26 }
 0x302   : > { %v3810_v34 = vrot.slane %v3809_v28, 4 }
 0x304   : > { %v3811_v32 = vmax.f32 %v3809_v28, %v3810_v34 }
 0x306   : > { %v3812_v29 = vrot.slane %v3811_v32, 2 }
 0x308   : > { %v3813_v36 = vmax.f32 %v3811_v32, %v3812_v29 }
 0x30a   : > { %v3814_v37 = vrot.slane %v3813_v36, 1 }
 0x30c   : > { %v3815_v50 = vmax.f32 %v3813_v36, %v3814_v37  ;;  %v4368_v37 = vsel %vm542_vm0, %v16348_v2, 0 }
 0x30e   : > { %v3816_v42 = vsub.f32 %v3796_v30, %v3815_v50  ;;  %v3817_v38 = vsub.f32 %v13380_v53, %v3815_v50  ;;  %v4441_v50 = vand.u32 4294901760, %v4368_v37 }
 0x310   : > { %v3818_v49 = vmul.f32 1.442695, %v3816_v42  ;;  %v3820_v44 = vmul.f32 1.442695, %v3817_v38 }
 0x312   : > { %15855 = vpow2.f32 %v3818_v49 }
 0x313   : > { %15857 = vpow2.f32 %v3820_v44 }
 0x31c   : > { %v15856_v45 = vpop.eup %15855 }
 0x31d   : > { %v15858_v57 = vpop.eup %15857  ;;  %v3822_v14 = vsel %vm3806_vm2, %v15856_v45, 0.0 }
 0x31e   : > { %v3823_v13 = vsel %vm3806_vm2, %v15858_v57, 0.0 }
 0x31f   : > { %v3824_v16 = vadd.f32 %v3823_v13, %v3822_v14 }
 0x321   : > { %v3825_v54 = vrot.slane %v3824_v16, 4 }
 0x323   : > { %v3826_v59 = vadd.f32 %v3825_v54, %v3824_v16 }
 0x325   : > { %v3827_v55 = vrot.slane %v3826_v59, 2 }
 0x327   : > { %v3828_v3 = vadd.f32 %v3827_v55, %v3826_v59 }
 0x329   : > { %v3829_v63 = vrot.slane %v3828_v3, 1 }
 0x32b   : > { %v3830_v1 = vadd.f32 %v3829_v63, %v3828_v3  ;;  %v4892_v63 = vld [vmem:[#allocation2 + $0x18] sm:$0xff] }
 0x32d   : > { %15859 = vrcp.f32 %v3830_v1  ;;  %v4897_v1 = vsel %vm1081_vm1, %v4892_v63, 0 }
 0x337   : > { %v15860_v7 = vpop.eup %15859 }
 0x338   : > { %v3832_v10 = vmul.f32 %v15860_v7, %v15856_v45  ;;  %v3833_v22 = vmul.f32 %v15860_v7, %v15858_v57  ;;  %v4982_v7 = vand.u32 4294901760, %v4897_v1 }
 0x33a   : > { %v3837_v17 = vsel %vm3806_vm2, %v3832_v10, 0  ;;  %v3840_v20 = vsel %vm3806_vm2, %v3833_v22, 0 }
 0x33b   : > { %v3909_v25 = vand.u32 4294901760, %v3837_v17  ;;  %v3919_v53 = vand.u32 4294901760, %v3840_v20 }
 0x33d   : > { %v3910_v26 = vsub.f32 %v3837_v17, %v3909_v25  ;;  %v3920_v30 = vsub.f32 %v3840_v20, %v3919_v53 }
 0x33f   : > { %v3911_v27 = vand.u32 4294901760, %v3910_v26  ;;  %v3921_v28 = vand.u32 4294901760, %v3920_v30 }
 0x341   : > { %v3912_v34 = vsub.f32 %v3910_v26, %v3911_v27  ;;  %v3922_v32 = vsub.f32 %v3920_v30, %v3921_v28 }
 0x343   : > { %v3913_v29 = vand.u32 4294901760, %v3912_v34  ;;  %v3923_v36 = vand.u32 4294901760, %v3922_v32 }
 0x345   : > { %13385 = vmatprep.mubr.f32.mxu0 %v3913_v29 }
 0x346   : > { %13386 = vmatmul.mubr.f32.vlgmr.msra.gmra.mrb[6].mxu0 %v3923_v36 }
 0x347   : > { %14636 = vmatpush3.bf16.msra.mxu0 %v16571_v12  ;;  %13392 = vmatprep.mubr.f32.mxu0 %v3909_v25  ;;  %v4370_v12 = vsel %vm542_vm0, %v16355_v4, 0 }
 0x348   : > { %14638 = vmatprep.subr.bf16.mxu0 %v16579_v0  ;;  %v4451_v42 = vand.u32 4294901760, %v4370_v12 }
 0x34a   : > { %v4452_v49 = vsub.f32 %v4370_v12, %v4451_v42 }
 0x34c   : > { %v4453_v2 = vand.u32 4294901760, %v4452_v49 }
 0x34e   : > { %13393 = vmatmul.mubr.f32.vlgmr.msra.gmra.mrb[6].mxu0 %v3919_v53  ;;  %v4454_v45 = vsub.f32 %v4452_v49, %v4453_v2 }
 0x34f   : > { %14640 = vmatpush3.bf16.msra.mxu0 %v16579_v0  ;;  %13399 = vmatprep.mubr.f32.mxu0 %v3910_v26  ;;  %v4442_v0 = vsub.f32 %v4368_v37, %v4441_v50 }
 0x350   : > { %14642 = vmatprep.subr.bf16.mxu0 %v16390_v19 }
 0x351   : > { %v4443_v38 = vand.u32 4294901760, %v4442_v0 }
 0x353   : > { %v4444_v44 = vsub.f32 %v4442_v0, %v4443_v38 }
 0x355   : > { %v4445_v4 = vand.u32 4294901760, %v4444_v44 }
 0x356   : > { %13400 = vmatmul.mubr.f32.vlgmr.msra.gmra.mrb[6].mxu0 %v3920_v30 }
 0x357   : > { %14644 = vmatpush3.bf16.msra.mxu0 %v16390_v19  ;;  %13406 = vmatprep.mubr.f32.mxu0 %v3911_v27 }
 0x358   : > { %14646 = vmatprep.subr.bf16.mxu0 %v16585_v31 }
 0x35e   : > { %13407 = vmatmul.mubr.f32.vlgmr.msra.gmra.mrb[6].mxu0 %v3921_v28 }
 0x35f   : > { %14648 = vmatpush3.bf16.msra.mxu0 %v16585_v31  ;;  %13413 = vmatprep.mubr.f32.mxu0 %v3909_v25  ;;  %v4455_v31 = vand.u32 4294901760, %v4454_v45 }
 0x360   : > { %14650 = vmatprep.subr.bf16.mxu0 %v16390_v19 }
 0x366   : > { %13414 = vmatmul.mubr.f32.vlgmr.msra.gmra.mrb[6].mxu0 %v3919_v53 }
 0x367   : > { %14652 = vmatpush3.bf16.msra.mxu0 %v16390_v19  ;;  %13420 = vmatprep.mubr.f32.mxu0 %v3909_v25 }
 0x368   : > { %13423 = vmatprep.subr.mxu0 %v16214_v46 }
 0x36e   : > { %13421 = vmatmul.mubr.f32.vlgmr.msra.gmra.mrb[6].mxu0 %v3919_v53 }
 0x36f   : > { %13425 = vmatprep.mubr.f32.mxu0 %v4445_v4  ;;  %v5541_v4 = vand.u32 4294901760, %v16450_v62 }
 0x370   : > { %13424 = vmatpush3.xpose.msra.mxu0 %v16214_v46 }
 0x371   : > { %13428 = vmatprep.subr.mxu0 %v16232_v56 }
 0x373   : > { %13426 = vmatmul.mubr.f32.vlgmr.msra.gmra.mrb[8].mxu0 %v4455_v31  ;;  %v5548_v31 = vand.u32 4294901760, %v16456_v5 }
 0x374   : > { %13429 = vmatpush3.xpose.msra.mxu0 %v16232_v56  ;;  %13430 = vmatprep.mubr.f32.mxu0 %v4441_v50  ;;  %v3834_v56 = vld [vmem:[#allocation3] sm:$0xff] }
 0x375   : > { %13433 = vmatprep.subr.mxu0 %v16218_v47 }
 0x37b   : > { %13431 = vmatmul.mubr.f32.vlgmr.msra.gmra.mrb[8].mxu0 %v4451_v42 }
 0x37c   : > { %13434 = vmatpush3.xpose.msra.mxu0 %v16218_v47  ;;  %13435 = vmatprep.mubr.f32.mxu0 %v4442_v0  ;;  %v3835_v47 = vld [vmem:[#allocation3 + $0x8] sm:$0xff] }
 0x37d   : > { %13438 = vmatprep.subr.mxu0 %v16214_v46 }
 0x383   : > { %13436 = vmatmul.mubr.f32.vlgmr.msra.gmra.mrb[8].mxu0 %v4452_v49 }
 0x384   : > { %13439 = vmatpush3.xpose.msra.mxu0 %v16214_v46  ;;  %13440 = vmatprep.mubr.f32.mxu0 %v4443_v38  ;;  %v6498_v38 = vld [vmem:[#allocation2 + $0x20] sm:$0xff] }
 0x385   : > { %13443 = vmatprep.subr.mxu0 %v16222_v48  ;;  %v6501_v49 = vsel %vm1081_vm1, %v6498_v38, 0 }
 0x38b   : > { %13441 = vmatmul.mubr.f32.vlgmr.msra.gmra.mrb[8].mxu0 %v4453_v2  ;;  %v16643_v2 = vand.u32 4294901760, %v6501_v49 }
 0x38c   : > { %13444 = vmatpush3.xpose.msra.mxu0 %v16222_v48  ;;  %13445 = vmatprep.mubr.f32.mxu0 %v4441_v50 }
 0x38d   : > { %13448 = vmatprep.subr.mxu0 %v16214_v46  ;;  %v16647_v44 = vsub.f32 %v6501_v49, %v16643_v2 }
 0x38f   : > { %v6581_v45 = vand.u32 4294901760, %v16647_v44 }
 0x393   : > { %13446 = vmatmul.mubr.f32.vlgmr.msra.gmra.mrb[8].mxu0 %v4451_v42 }
 0x394   : > { %13449 = vmatpush3.xpose.msra.mxu0 %v16214_v46  ;;  %13450 = vmatprep.mubr.f32.mxu0 %v4441_v50 }
 0x395   : > { %14678 = vmatprep.subr.bf16.mxu0 %v16454_v15 }
 0x39b   : > { %13451 = vmatmul.mubr.f32.vlgmr.msra.gmra.mrb[8].mxu0 %v4451_v42 }
 0x39c   : > { %14680 = vmatpush3.bf16.msra.mxu0 %v16454_v15 }
 0x441   : > { %v13422_v19 = vpop.f32.mrb[6].mxu0 }
 0x442   : > { %v4345_v52 = vadd.f32 %v13422_v19, %v3835_v47  ;;  %v4334_v57 = vpop.f32.mrb[7].mxu0  ;;  %v5542_v47 = vsub.f32 %v16450_v62, %v5541_v4 }
 0x443   : > { %v4344_v14 = vadd.f32 %v4334_v57, %v3834_v56  ;;  %v5549_v56 = vsub.f32 %v16456_v5, %v5548_v31 }
 0x444   : > { %4347 = vst.msk [vmem:[#allocation3 + $0x8] sm:$0xff] %vm542_vm0, %v4345_v52  ;;  %v5543_v19 = vand.u32 4294901760, %v5542_v47 }
 0x445   : > { %4346 = vst.msk [vmem:[#allocation3] sm:$0xff] %vm542_vm0, %v4344_v14  ;;  %v5550_v52 = vand.u32 4294901760, %v5549_v56 }
 0x46e   : > { %v13452_v48 = vpop.f32.mrb[8].mxu0 }
 0x46f   : > { %v4875_v13 = vadd.f32 %v13452_v48, %v16448_v61  ;;  %v4854_v46 = vpop.f32.mrb[9].mxu0  ;;  %v4983_v61 = vsub.f32 %v4897_v1, %v4982_v7 }
 0x470   : > { %v4874_v16 = vadd.f32 %v16446_v58, %v4854_v46 }
 0x471   : > { %v4885_v54 = vadd.f32 %v16487_v35, %v4875_v13 }
 0x472   : > { %v4884_v59 = vadd.f32 %v16487_v35, %v4874_v16  ;;  %v4984_v35 = vand.u32 4294901760, %v4983_v61 }
 0x473   : > { %v4888_v55 = vmul.f32 1.442695, %v4885_v54 }
 0x474   : > { %v4886_v3 = vmul.f32 1.442695, %v4884_v59  ;;  %v4985_v29 = vsub.f32 %v4983_v61, %v4984_v35 }
 0x475   : > { %15861 = vpow2.f32 %v4888_v55 }
 0x476   : > { %15863 = vpow2.f32 %v4886_v3  ;;  %v4986_v0 = vand.u32 4294901760, %v4985_v29 }
 0x47f   : > { %v15862_v10 = vpop.eup %15861 }
 0x480   : > { %v15864_v22 = vpop.eup %15863  ;;  %v4903_v17 = vsel %vm1081_vm1, %v15862_v10, 0 }
 0x481   : > { %v4909_v20 = vand.u32 4294901760, %v4903_v17  ;;  %v4900_v58 = vsel %vm1081_vm1, %v15864_v22, 0 }
 0x482   : > { %v4906_v25 = vand.u32 4294901760, %v4900_v58 }
 0x483   : > { %v5001_v53 = vsub.f32 %v4903_v17, %v4909_v20 }
 0x484   : > { %v14653_v26 = vpack.c.bf16 %v4909_v20, %v4906_v25  ;;  %v4994_v30 = vsub.f32 %v4900_v58, %v4906_v25 }
 0x485   : > { %v5002_v27 = vand.u32 4294901760, %v5001_v53 }
 0x486   : > { %14654 = vmatprep.subr.bf16.mxu1 %v14653_v26  ;;  %v4995_v28 = vand.u32 4294901760, %v4994_v30  ;;  %v14661_v34 = vpack.c.bf16 %v5001_v53, %v4994_v30 }
 0x487   : > { %14656 = vmatpush3.bf16.xpose.msra.mxu1 %v14653_v26  ;;  %v5003_v32 = vsub.f32 %v5001_v53, %v5002_v27 }
 0x488   : > { %v4996_v36 = vsub.f32 %v4994_v30, %v4995_v28  ;;  %v14669_v37 = vpack.c.bf16 %v5002_v27, %v4995_v28 }
 0x489   : > { %v5004_v50 = vand.u32 4294901760, %v5003_v32 }
 0x48a   : > { %v4997_v12 = vand.u32 4294901760, %v4996_v36 }
 0x48c   : > { %v14657_v42 = vpack.c.bf16 %v5004_v50, %v4997_v12 }
 0x48e   : > { %13458 = vmatmul.mubr.f32.vlgmr.msra.gmra.mrb[6].mxu1 %v4986_v0  ;;  %14658 = vmatprep.subr.bf16.mxu1 %v14657_v42 }
 0x48f   : > { %14660 = vmatpush3.bf16.xpose.msra.mxu1 %v14657_v42  ;;  %13464 = vmatprep.mubr.f32.mxu1 %v16512_v39 }
 0x490   : > { %14662 = vmatprep.subr.bf16.mxu1 %v14661_v34 }
 0x496   : > { %13465 = vmatmul.mubr.f32.vlgmr.msra.gmra.mrb[6].mxu1 %v4982_v7 }
 0x497   : > { %14664 = vmatpush3.bf16.xpose.msra.mxu1 %v14661_v34  ;;  %13471 = vmatprep.mubr.f32.mxu1 %v16516_v41  ;;  %v6582_v41 = vsub.f32 %v16647_v44, %v6581_v45 }
 0x498   : > { %14666 = vmatprep.subr.bf16.mxu1 %v14653_v26 }
 0x49e   : > { %13472 = vmatmul.mubr.f32.vlgmr.msra.gmra.mrb[6].mxu1 %v4983_v61 }
 0x49f   : > { %14668 = vmatpush3.bf16.xpose.msra.mxu1 %v14653_v26  ;;  %13478 = vmatprep.mubr.f32.mxu1 %v4974_v40  ;;  %v6583_v40 = vand.u32 4294901760, %v6582_v41 }
 0x4a0   : > { %14670 = vmatprep.subr.bf16.mxu1 %v14669_v37 }
 0x4a6   : > { %13479 = vmatmul.mubr.f32.vlgmr.msra.gmra.mrb[6].mxu1 %v4984_v35 }
 0x4a7   : > { %14672 = vmatpush3.bf16.xpose.msra.mxu1 %v14669_v37  ;;  %13485 = vmatprep.mubr.f32.mxu1 %v16512_v39 }
 0x4a8   : > { %14674 = vmatprep.subr.bf16.mxu1 %v14653_v26 }
 0x4ae   : > { %13486 = vmatmul.mubr.f32.vlgmr.msra.gmra.mrb[6].mxu1 %v4982_v7 }
 0x4af   : > { %14676 = vmatpush3.bf16.xpose.msra.mxu1 %v14653_v26  ;;  %13492 = vmatprep.mubr.f32.mxu1 %v16512_v39  ;;  %v14681_v39 = vpack.c.bf16 %v5550_v52, %v5543_v19  ;;  %v14685_v19 = vpack.c.bf16 %v16456_v5, %v16450_v62  ;;  %v14693_v52 = vpack.c.bf16 %v5548_v31, %v5541_v4  ;;  %v5975_v5 = vsel %vm542_vm0, %v16452_v24, 0 }
 0x4b1   : > { %14682 = vmatprep.subr.bf16.mxu0 %v14681_v39 }
 0x4b6   : > { %13493 = vmatmul.mubr.f32.vlgmr.msra.gmra.mrb[6].mxu1 %v4982_v7 }
 0x4b7   : > { %13571 = vmatprep.mubr.f32.mxu1 %v6583_v40 }
 0x589   : > { %v13494_v57 = vpop.f32.mrb[6].mxu1 }
 0x58a   : > { %v5408_v14 = vsel %vm3806_vm2, %v13494_v57, -inf  ;;  %v5397_v48 = vpop.f32.mrb[7].mxu1 }
 0x58b   : > { %v5407_v13 = vsel %vm3806_vm2, %v5397_v48, -inf }
 0x58c   : > { %v5409_v46 = vmax.f32 %v5407_v13, %v5408_v14  ;;  %v6048_v14 = vand.u32 4294901760, %v5975_v5  ;;  %v5977_v13 = vsel %vm542_vm0, %v16458_v6, 0 }
 0x58d   : > { %v6058_v4 = vand.u32 4294901760, %v5977_v13 }
 0x58e   : > { %v5410_v16 = vrot.slane %v5409_v46, 4  ;;  %v6049_v62 = vsub.f32 %v5975_v5, %v6048_v14 }
 0x590   : > { %v5411_v54 = vmax.f32 %v5409_v46, %v5410_v16  ;;  %v6050_v46 = vand.u32 4294901760, %v6049_v62  ;;  %v6059_v16 = vsub.f32 %v5977_v13, %v6058_v4 }
 0x592   : > { %v5412_v59 = vrot.slane %v5411_v54, 2  ;;  %v6060_v24 = vand.u32 4294901760, %v6059_v16 }
 0x594   : > { %v5413_v55 = vmax.f32 %v5411_v54, %v5412_v59  ;;  %v6051_v59 = vsub.f32 %v6049_v62, %v6050_v46  ;;  %v6061_v6 = vsub.f32 %v6059_v16, %v6060_v24 }
 0x596   : > { %v5414_v3 = vrot.slane %v5413_v55, 1 }
 0x598   : > { %v5415_v63 = vmax.f32 %v5413_v55, %v5414_v3  ;;  %v6052_v3 = vand.u32 4294901760, %v6051_v59 }
 0x59a   : > { %v5416_v1 = vsub.f32 %v5397_v48, %v5415_v63  ;;  %v5417_v7 = vsub.f32 %v13494_v57, %v5415_v63  ;;  %v12404_v57 = vld [vmem:[%s18724_s0 + $0x10] sm:$0xff] }
 0x59c   : > { %v5418_v10 = vmul.f32 1.442695, %v5416_v1  ;;  %v5420_v22 = vmul.f32 1.442695, %v5417_v7  ;;  %v6062_v1 = vand.u32 4294901760, %v6061_v6  ;;  %v5435_v7 = vld [vmem:[#allocation3 + $0x10] sm:$0xff] }
 0x59e   : > { %15865 = vpow2.f32 %v5418_v10 }
 0x59f   : > { %15867 = vpow2.f32 %v5420_v22 }
 0x5a8   : > { %v15866_v17 = vpop.eup %15865 }
 0x5a9   : > { %v15868_v61 = vpop.eup %15867  ;;  %v5422_v20 = vsel %vm3806_vm2, %v15866_v17, 0.0 }
 0x5aa   : > { %v5423_v58 = vsel %vm3806_vm2, %v15868_v61, 0.0 }
 0x5ab   : > { %v5424_v25 = vadd.f32 %v5423_v58, %v5422_v20 }
 0x5ad   : > { %v5425_v53 = vrot.slane %v5424_v25, 4 }
 0x5af   : > { %v5426_v26 = vadd.f32 %v5425_v53, %v5424_v25 }
 0x5b1   : > { %v5427_v35 = vrot.slane %v5426_v26, 2 }
 0x5b3   : > { %v5428_v30 = vadd.f32 %v5427_v35, %v5426_v26 }
 0x5b5   : > { %v5429_v27 = vrot.slane %v5428_v30, 1 }
 0x5b7   : > { %v5430_v28 = vadd.f32 %v5429_v27, %v5428_v30 }
 0x5b9   : > { %15869 = vrcp.f32 %v5430_v28  ;;  %v6499_v28 = vld [vmem:[#allocation2 + $0x28] sm:$0xff] }
 0x5c3   : > { %v15870_v34 = vpop.eup %15869 }
 0x5c4   : > { %v5432_v32 = vmul.f32 %v15870_v34, %v15866_v17  ;;  %v5433_v29 = vmul.f32 %v15870_v34, %v15868_v61  ;;  %v6504_v34 = vsel %vm1081_vm1, %v6499_v28, 0 }
 0x5c6   : > { %v5446_v36 = vsel %vm3806_vm2, %v5432_v32, 0  ;;  %v5449_v37 = vsel %vm3806_vm2, %v5433_v29, 0  ;;  %v6589_v32 = vand.u32 4294901760, %v6504_v34 }
 0x5c7   : > { %v5518_v50 = vand.u32 4294901760, %v5446_v36  ;;  %v5528_v12 = vand.u32 4294901760, %v5449_v37 }
 0x5c9   : > { %v5519_v0 = vsub.f32 %v5446_v36, %v5518_v50  ;;  %v5529_v42 = vsub.f32 %v5449_v37, %v5528_v12 }
 0x5cb   : > { %v5520_v38 = vand.u32 4294901760, %v5519_v0  ;;  %v5530_v49 = vand.u32 4294901760, %v5529_v42 }
 0x5cd   : > { %v5521_v41 = vsub.f32 %v5519_v0, %v5520_v38  ;;  %v5531_v40 = vsub.f32 %v5529_v42, %v5530_v49 }
 0x5cf   : > { %v5522_v47 = vand.u32 4294901760, %v5521_v41  ;;  %v5532_v56 = vand.u32 4294901760, %v5531_v40 }
 0x5d1   : > { %13499 = vmatprep.mubr.f32.mxu0 %v5522_v47 }
 0x5d2   : > { %13500 = vmatmul.mubr.f32.vlgmr.msra.gmra.mrb[10].mxu0 %v5532_v56 }
 0x5d3   : > { %14684 = vmatpush3.bf16.msra.mxu0 %v14681_v39  ;;  %13506 = vmatprep.mubr.f32.mxu0 %v5518_v50  ;;  %v5980_v39 = vsel %vm542_vm0, %v12404_v57, 0 }
 0x5d4   : > { %14686 = vmatprep.subr.bf16.mxu0 %v14685_v19  ;;  %v5983_v48 = vand.u32 4294901760, %v5980_v39 }
 0x5d6   : > { %v6070_v31 = vsub.f32 %v5980_v39, %v5983_v48 }
 0x5d8   : > { %v6071_v54 = vand.u32 4294901760, %v6070_v31 }
 0x5da   : > { %13507 = vmatmul.mubr.f32.vlgmr.msra.gmra.mrb[10].mxu0 %v5528_v12  ;;  %v6072_v55 = vsub.f32 %v6070_v31, %v6071_v54 }
 0x5db   : > { %14688 = vmatpush3.bf16.msra.mxu0 %v14685_v19  ;;  %13513 = vmatprep.mubr.f32.mxu0 %v5519_v0 }
 0x5dc   : > { %14690 = vmatprep.subr.bf16.mxu0 %v16454_v15  ;;  %v6073_v63 = vand.u32 4294901760, %v6072_v55 }
 0x5e2   : > { %13514 = vmatmul.mubr.f32.vlgmr.msra.gmra.mrb[10].mxu0 %v5529_v42 }
 0x5e3   : > { %14692 = vmatpush3.bf16.msra.mxu0 %v16454_v15  ;;  %13520 = vmatprep.mubr.f32.mxu0 %v5520_v38 }
 0x5e4   : > { %14694 = vmatprep.subr.bf16.mxu0 %v14693_v52 }
 0x5ea   : > { %13521 = vmatmul.mubr.f32.vlgmr.msra.gmra.mrb[10].mxu0 %v5530_v49 }
 0x5eb   : > { %14696 = vmatpush3.bf16.msra.mxu0 %v14693_v52  ;;  %13527 = vmatprep.mubr.f32.mxu0 %v5518_v50 }
 0x5ec   : > { %14698 = vmatprep.subr.bf16.mxu0 %v16454_v15 }
 0x5f2   : > { %13528 = vmatmul.mubr.f32.vlgmr.msra.gmra.mrb[10].mxu0 %v5528_v12 }
 0x5f3   : > { %14700 = vmatpush3.bf16.msra.mxu0 %v16454_v15  ;;  %13534 = vmatprep.mubr.f32.mxu0 %v5518_v50  ;;  %v5436_v15 = vld [vmem:[#allocation3 + $0x18] sm:$0xff] }
 0x5f4   : > { %13537 = vmatprep.subr.mxu0 %v5983_v48 }
 0x5fa   : > { %13535 = vmatmul.mubr.f32.vlgmr.msra.gmra.mrb[10].mxu0 %v5528_v12 }
 0x5fb   : > { %13539 = vmatprep.mubr.f32.mxu0 %v6052_v3 }
 0x5fc   : > { %13538 = vmatpush3.xpose.msra.mxu0 %v5983_v48 }
 0x5fd   : > { %13542 = vmatprep.subr.mxu0 %v6073_v63 }
 0x5ff   : > { %13540 = vmatmul.mubr.f32.vlgmr.msra.gmra.mrb[12].mxu0 %v6062_v1 }
 0x600   : > { %13543 = vmatpush3.xpose.msra.mxu0 %v6073_v63  ;;  %13544 = vmatprep.mubr.f32.mxu0 %v6048_v14 }
 0x601   : > { %13547 = vmatprep.subr.mxu0 %v6070_v31 }
 0x607   : > { %13545 = vmatmul.mubr.f32.vlgmr.msra.gmra.mrb[12].mxu0 %v6058_v4 }
 0x608   : > { %13548 = vmatpush3.xpose.msra.mxu0 %v6070_v31  ;;  %13549 = vmatprep.mubr.f32.mxu0 %v6049_v62 }
 0x609   : > { %13552 = vmatprep.subr.mxu0 %v5983_v48 }
 0x60f   : > { %13550 = vmatmul.mubr.f32.vlgmr.msra.gmra.mrb[12].mxu0 %v6059_v16  ;;  %v7153_v16 = vand.u32 4294901760, %v16545_v21 }
 0x610   : > { %13553 = vmatpush3.xpose.msra.mxu0 %v5983_v48  ;;  %13554 = vmatprep.mubr.f32.mxu0 %v6050_v46  ;;  %v7146_v46 = vand.u32 4294901760, %v16539_v23 }
 0x611   : > { %13557 = vmatprep.subr.mxu0 %v6071_v54 }
 0x617   : > { %13555 = vmatmul.mubr.f32.vlgmr.msra.gmra.mrb[12].mxu0 %v6060_v24  ;;  %v7154_v24 = vsub.f32 %v16545_v21, %v7153_v16 }
 0x618   : > { %13558 = vmatpush3.xpose.msra.mxu0 %v6071_v54  ;;  %13559 = vmatprep.mubr.f32.mxu0 %v6048_v14  ;;  %v7147_v54 = vsub.f32 %v16539_v23, %v7146_v46 }
 0x619   : > { %13562 = vmatprep.subr.mxu0 %v5983_v48  ;;  %v7155_v59 = vand.u32 4294901760, %v7154_v24 }
 0x61f   : > { %13560 = vmatmul.mubr.f32.vlgmr.msra.gmra.mrb[12].mxu0 %v6058_v4 }
 0x620   : > { %13563 = vmatpush3.xpose.msra.mxu0 %v5983_v48  ;;  %13564 = vmatprep.mubr.f32.mxu0 %v6048_v14  ;;  %v8103_v48 = vld [vmem:[#allocation2 + $0x30] sm:$0xff] }
 0x621   : > { %14726 = vmatprep.subr.bf16.mxu0 %v16543_v18  ;;  %v8106_v13 = vsel %vm1081_vm1, %v8103_v48, 0  ;;  %v14741_v48 = vpack.c.bf16 %v7153_v16, %v7146_v46 }
 0x622   : > { %v16698_v62 = vand.u32 4294901760, %v8106_v13 }
 0x627   : > { %13565 = vmatmul.mubr.f32.vlgmr.msra.gmra.mrb[12].mxu0 %v6058_v4  ;;  %v16702_v4 = vsub.f32 %v8106_v13, %v16698_v62  ;;  %v12409_v13 = vld [vmem:[%s18724_s0 + $0x18] sm:$0xff] }
 0x628   : > { %14728 = vmatpush3.bf16.msra.mxu0 %v16543_v18 }
 0x629   : > { %v8186_v31 = vand.u32 4294901760, %v16702_v4 }
 0x6cd   : > { %v13536_v10 = vpop.f32.mrb[10].mxu0 }
 0x6ce   : > { %v5954_v22 = vadd.f32 %v13536_v10, %v5436_v15  ;;  %v5943_v17 = vpop.f32.mrb[11].mxu0 }
 0x6cf   : > { %v5953_v61 = vadd.f32 %v5943_v17, %v5435_v7 }
 0x6d0   : > { %5956 = vst.msk [vmem:[#allocation3 + $0x18] sm:$0xff] %vm542_vm0, %v5954_v22 }
 0x6d1   : > { %5955 = vst.msk [vmem:[#allocation3 + $0x10] sm:$0xff] %vm542_vm0, %v5953_v61 }
 0x6fa   : > { %v13566_v20 = vpop.f32.mrb[12].mxu0 }
 0x6fb   : > { %v6482_v58 = vadd.f32 %v13566_v20, %v16537_v9  ;;  %v6461_v25 = vpop.f32.mrb[13].mxu0  ;;  %v6590_v9 = vsub.f32 %v6504_v34, %v6589_v32  ;;  %v7571_v34 = vsel %vm542_vm0, %v16566_v43, 0.0 }
 0x6fc   : > { %v6481_v53 = vadd.f32 %v16533_v60, %v6461_v25 }
 0x6fd   : > { %v6492_v26 = vadd.f32 %v16529_v51, %v6482_v58 }
 0x6fe   : > { %v6491_v35 = vadd.f32 %v16529_v51, %v6481_v53  ;;  %v6591_v51 = vand.u32 4294901760, %v6590_v9 }
 0x6ff   : > { %v6495_v30 = vmul.f32 1.442695, %v6492_v26 }
 0x700   : > { %v6493_v27 = vmul.f32 1.442695, %v6491_v35  ;;  %v6592_v56 = vsub.f32 %v6590_v9, %v6591_v51  ;;  %v7568_v35 = vsel %vm542_vm0, %v16564_v33, 0.0  ;;  %v15891_v33 = vld [vmem:[%s16368_s29 + $0x8] sm:$0xff]  ;;  %s526_s29 = scalar_lea.vmem [#allocation7], %s16121_s21 }
 0x701   : > { %15871 = vpow2.f32 %v6495_v30  ;;  %7569 = vadd.xlane.f32.xlu0 %v7568_v35  ;;  %s12220_s22 = sshll.u32 %s526_s29, 4  ;;  %s18668_s22 = int_to_ptr.vmem [resolvable:$true] %s12220_s22 }
 0x702   : > { %15873 = vpow2.f32 %v6493_v27  ;;  %v6593_v39 = vand.u32 4294901760, %v6592_v56  ;;  %s15894_s21 = scalar_lea.vmem %s18668_s22, 256 }
 0x703   : > { %p15895_p1 = scmp.ne.s32.totalorder %s18668_s22, %s15894_s21 }
 0x705   : > { %7572 = vadd.xlane.f32.xlu0 %v7571_v34  ;;  %v16810_v34 = vld [vmem:[%s18728_s4 + $0x20] sm:$0xff]  ;;  %p15896_p2 = pnand %p15895_p1, %p16074_p5 }
 0x707   : > { %p15897_p3 = pneg %p15896_p2 }
 0x70b   : > { %v15872_v29 = vpop.eup %15871 }
 0x70c   : > { %v15874_v36 = vpop.eup %15873  ;;  %v6510_v37 = vsel %vm1081_vm1, %v15872_v29, 0 }
 0x70d   : > { %v6516_v50 = vand.u32 4294901760, %v6510_v37  ;;  %v6507_v60 = vsel %vm1081_vm1, %v15874_v36, 0 }
 0x70e   : > { %v6513_v12 = vand.u32 4294901760, %v6507_v60 }
 0x70f   : > { %v6608_v0 = vsub.f32 %v6510_v37, %v6516_v50 }
 0x710   : > { %v14701_v42 = vpack.c.bf16 %v6516_v50, %v6513_v12  ;;  %v6601_v38 = vsub.f32 %v6507_v60, %v6513_v12 }
 0x711   : > { %v6609_v49 = vand.u32 4294901760, %v6608_v0 }
 0x712   : > { %14702 = vmatprep.subr.bf16.mxu1 %v14701_v42  ;;  %v6602_v41 = vand.u32 4294901760, %v6601_v38  ;;  %v14709_v40 = vpack.c.bf16 %v6608_v0, %v6601_v38 }
 0x713   : > { %14704 = vmatpush3.bf16.xpose.msra.mxu1 %v14701_v42  ;;  %v6610_v47 = vsub.f32 %v6608_v0, %v6609_v49 }
 0x714   : > { %v6603_v19 = vsub.f32 %v6601_v38, %v6602_v41  ;;  %v14717_v52 = vpack.c.bf16 %v6609_v49, %v6602_v41 }
 0x715   : > { %v6611_v57 = vand.u32 4294901760, %v6610_v47 }
 0x716   : > { %v6604_v5 = vand.u32 4294901760, %v6603_v19 }
 0x718   : > { %v14705_v14 = vpack.c.bf16 %v6611_v57, %v6604_v5 }
 0x71a   : > { %13572 = vmatmul.mubr.f32.vlgmr.msra.gmra.mrb[8].mxu1 %v6593_v39  ;;  %14706 = vmatprep.subr.bf16.mxu1 %v14705_v14 }
 0x71b   : > { %14708 = vmatpush3.bf16.xpose.msra.mxu1 %v14705_v14  ;;  %13578 = vmatprep.mubr.f32.mxu1 %v16643_v2  ;;  %v14733_v14 = vpack.c.bf16 %v16545_v21, %v16539_v23  ;;  %v7582_v23 = vsel %vm542_vm0, %v16547_v8, 0 }
 0x71c   : > { %14710 = vmatprep.subr.bf16.mxu1 %v14709_v40  ;;  %8651 = vrot.lane.b32.xlu0 %v15891_v33, %s15976_s27  ;;  %v7663_v46 = vand.u32 4294901760, %v7582_v23 }
 0x722   : > { %13579 = vmatmul.mubr.f32.vlgmr.msra.gmra.mrb[8].mxu1 %v6589_v32 }
 0x723   : > { %14712 = vmatpush3.bf16.xpose.msra.mxu1 %v14709_v40  ;;  %13585 = vmatprep.mubr.f32.mxu1 %v16647_v44  ;;  %v8187_v44 = vsub.f32 %v16702_v4, %v8186_v31 }
 0x724   : > { %14714 = vmatprep.subr.bf16.mxu1 %v14701_v42 }
 0x72a   : > { %13586 = vmatmul.mubr.f32.vlgmr.msra.gmra.mrb[8].mxu1 %v6590_v9 }
 0x72b   : > { %14716 = vmatpush3.bf16.xpose.msra.mxu1 %v14701_v42  ;;  %13592 = vmatprep.mubr.f32.mxu1 %v6581_v45  ;;  %v8188_v45 = vand.u32 4294901760, %v8187_v44  ;;  %v7580_v44 = vsel %vm542_vm0, %v16541_v11, 0 }
 0x72c   : > { %14718 = vmatprep.subr.bf16.mxu1 %v14717_v52 }
 0x732   : > { %13593 = vmatmul.mubr.f32.vlgmr.msra.gmra.mrb[8].mxu1 %v6591_v51 }
 0x733   : > { %14720 = vmatpush3.bf16.xpose.msra.mxu1 %v14717_v52  ;;  %13599 = vmatprep.mubr.f32.mxu1 %v16643_v2 }
 0x734   : > { %14722 = vmatprep.subr.bf16.mxu1 %v14701_v42 }
 0x73a   : > { %13600 = vmatmul.mubr.f32.vlgmr.msra.gmra.mrb[8].mxu1 %v6589_v32 }
 0x73b   : > { %14724 = vmatpush3.bf16.xpose.msra.mxu1 %v14701_v42  ;;  %13606 = vmatprep.mubr.f32.mxu1 %v16643_v2  ;;  %v7148_v2 = vand.u32 4294901760, %v7147_v54  ;;  %v7653_v54 = vand.u32 4294901760, %v7580_v44 }
 0x73d   : > { %v14729_v55 = vpack.c.bf16 %v7155_v59, %v7148_v2  ;;  %v7654_v21 = vsub.f32 %v7580_v44, %v7653_v54  ;;  %v7664_v59 = vsub.f32 %v7582_v23, %v7663_v46 }
 0x73f   : > { %14730 = vmatprep.subr.bf16.mxu0 %v14729_v55  ;;  %v7655_v2 = vand.u32 4294901760, %v7654_v21  ;;  %v7665_v11 = vand.u32 4294901760, %v7664_v59 }
 0x741   : > { %v7666_v8 = vsub.f32 %v7664_v59, %v7665_v11 }
 0x742   : > { %13607 = vmatmul.mubr.f32.vlgmr.msra.gmra.mrb[8].mxu1 %v6589_v32 }
 0x743   : > { %13685 = vmatprep.mubr.f32.mxu1 %v8188_v45  ;;  %v7585_v45 = vsel %vm542_vm0, %v12409_v13, 0 }
 0x744   : > { %v7588_v24 = vand.u32 4294901760, %v7585_v45 }
 0x746   : > { %v7675_v16 = vsub.f32 %v7585_v45, %v7588_v24 }
 0x815   : > { %v13608_v6 = vpop.f32.mrb[8].mxu1 }
 0x816   : > { %v7015_v3 = vsel %vm3806_vm2, %v13608_v6, -inf  ;;  %v7004_v63 = vpop.f32.mrb[9].mxu1 }
 0x817   : > { %v7014_v1 = vsel %vm3806_vm2, %v7004_v63, -inf }
 0x818   : > { %v7016_v15 = vmax.f32 %v7014_v1, %v7015_v3 }
 0x81a   : > { %v7017_v7 = vrot.slane %v7016_v15, 4 }
 0x81c   : > { %v7018_v10 = vmax.f32 %v7016_v15, %v7017_v7  ;;  %v7667_v15 = vand.u32 4294901760, %v7666_v8  ;;  %v16755_v7 = vld [vmem:[%s18728_s4 + $0x8] sm:$0xff] }
 0x81e   : > { %v7019_v22 = vrot.slane %v7018_v10, 2 }
 0x820   : > { %v7020_v17 = vmax.f32 %v7018_v10, %v7019_v22  ;;  %v16763_v22 = vsel %vm542_vm0, %v16755_v7, 0 }
 0x822   : > { %v7021_v61 = vrot.slane %v7020_v17, 1 }
 0x824   : > { %v7022_v20 = vmax.f32 %v7020_v17, %v7021_v61  ;;  %v9248_v61 = vand.u32 4294901760, %v16763_v22 }
 0x826   : > { %v7023_v58 = vsub.f32 %v7004_v63, %v7022_v20  ;;  %v7024_v25 = vsub.f32 %v13608_v6, %v7022_v20  ;;  %v7656_v6 = vsub.f32 %v7654_v21, %v7655_v2 }
 0x828   : > { %v7025_v53 = vmul.f32 1.442695, %v7023_v58  ;;  %v7027_v26 = vmul.f32 1.442695, %v7024_v25  ;;  %v7657_v63 = vand.u32 4294901760, %v7656_v6  ;;  %v16780_v58 = vld [vmem:[%s18728_s4 + $0x10] sm:$0xff] }
 0x829   : > { %v16785_v25 = vld [vmem:[%s18728_s4 + $0x18] sm:$0xff]  ;;  %10694 = vrot.lane.b32.xlu0 %v16780_v58, %s15975_s26 }
 0x82a   : > { %15875 = vpow2.f32 %v7025_v53  ;;  %v16789_v53 = vsel %vm542_vm0, %v16780_v58, 0 }
 0x82b   : > { %15877 = vpow2.f32 %v7027_v26  ;;  %v16793_v26 = vsel %vm542_vm0, %v16785_v25, 0  ;;  %v9251_v35 = vand.u32 4294901760, %v16789_v53 }
 0x82d   : > { %10698 = vrot.lane.b32.xlu0 %v16810_v34, %s15975_s26 }
 0x834   : > { %v15876_v30 = vpop.eup %15875 }
 0x835   : > { %v15878_v27 = vpop.eup %15877  ;;  %v7029_v28 = vsel %vm3806_vm2, %v15876_v30, 0.0 }
 0x836   : > { %v7030_v32 = vsel %vm3806_vm2, %v15878_v27, 0.0 }
 0x837   : > { %v7031_v29 = vadd.f32 %v7030_v32, %v7029_v28  ;;  %v7043_v28 = vld [vmem:[#allocation3 + $0x28] sm:$0xff] }
 0x838   : > { %v16815_v32 = vld [vmem:[%s18728_s4 + $0x28] sm:$0xff] }
 0x839   : > { %v7032_v36 = vrot.slane %v7031_v29, 4 }
 0x83b   : > { %v7033_v37 = vadd.f32 %v7032_v36, %v7031_v29  ;;  %v7042_v29 = vld [vmem:[#allocation3 + $0x20] sm:$0xff]  ;;  %v16819_v36 = vsel %vm542_vm0, %v16810_v34, 0 }
 0x83d   : > { %v7034_v9 = vrot.slane %v7033_v37, 2 }
 0x83f   : > { %v7035_v50 = vadd.f32 %v7034_v9, %v7033_v37  ;;  %v16823_v37 = vsel %vm542_vm0, %v16815_v32, 0 }
 0x841   : > { %v7036_v60 = vrot.slane %v7035_v50, 1 }
 0x843   : > { %v7037_v12 = vadd.f32 %v7036_v60, %v7035_v50  ;;  %v9257_v50 = vand.u32 4294901760, %v16819_v36  ;;  %v9260_v60 = vand.u32 4294901760, %v16823_v37 }
 0x845   : > { %15879 = vrcp.f32 %v7037_v12 }
 0x84f   : > { %v15880_v0 = vpop.eup %15879 }
 0x850   : > { %v7039_v42 = vmul.f32 %v15880_v0, %v15876_v30  ;;  %v7040_v51 = vmul.f32 %v15880_v0, %v15878_v27  ;;  %v9254_v30 = vand.u32 4294901760, %v16793_v26 }
 0x852   : > { %v7051_v38 = vsel %vm3806_vm2, %v7039_v42, 0  ;;  %v7054_v43 = vsel %vm3806_vm2, %v7040_v51, 0  ;;  %v16805_v27 = vpack.c.bf16 %v9254_v30, %v9251_v35  ;;  %v16835_v42 = vpack.c.bf16 %v9260_v60, %v9257_v50  ;;  %v16842_v51 = vld [vmem:[%s18728_s4 + $0x30] sm:$0xff] }
 0x853   : > { %v7123_v49 = vand.u32 4294901760, %v7051_v38  ;;  %v7133_v41 = vand.u32 4294901760, %v7054_v43  ;;  %10702 = vrot.lane.b32.xlu0 %v16842_v51, %s15975_s26 }
 0x855   : > { %v7124_v40 = vsub.f32 %v7051_v38, %v7123_v49  ;;  %v7134_v47 = vsub.f32 %v7054_v43, %v7133_v41  ;;  %v16847_v38 = vld [vmem:[%s18728_s4 + $0x38] sm:$0xff]  ;;  %v16856_v43 = vld [vmem:[%s18728_s4 + $0x40] sm:$0xff] }
 0x857   : > { %v7125_v56 = vand.u32 4294901760, %v7124_v40  ;;  %v7135_v19 = vand.u32 4294901760, %v7134_v47  ;;  %10706 = vrot.lane.b32.xlu0 %v16856_v43, %s15975_s26 }
 0x859   : > { %v7126_v52 = vsub.f32 %v7124_v40, %v7125_v56  ;;  %v7136_v57 = vsub.f32 %v7134_v47, %v7135_v19 }
 0x85b   : > { %v7127_v5 = vand.u32 4294901760, %v7126_v52  ;;  %v7137_v39 = vand.u32 4294901760, %v7136_v57  ;;  %v16898_v52 = vld [vmem:[%s18728_s4 + $0x70] sm:$0xff]  ;;  %v16903_v57 = vld [vmem:[%s18728_s4 + $0x78] sm:$0xff] }
 0x85d   : > { %13613 = vmatprep.mubr.f32.mxu0 %v7127_v5 }
 0x85e   : > { %13614 = vmatmul.mubr.f32.vlgmr.msra.gmra.mrb[14].mxu0 %v7137_v39  ;;  %v15892_v39 = vld [vmem:[%s18725_s1 + $0x3] ss:$0 sm:$0xff] }
 0x85f   : > { %14732 = vmatpush3.bf16.msra.mxu0 %v14729_v55  ;;  %13620 = vmatprep.mubr.f32.mxu0 %v7123_v49  ;;  %v7676_v55 = vand.u32 4294901760, %v7675_v16 }
 0x860   : > { %14734 = vmatprep.subr.bf16.mxu0 %v14733_v14 }
 0x861   : > { %v7677_v3 = vsub.f32 %v7675_v16, %v7676_v55 }
 0x863   : > { %v7678_v1 = vand.u32 4294901760, %v7677_v3 }
 0x866   : > { %13621 = vmatmul.mubr.f32.vlgmr.msra.gmra.mrb[14].mxu0 %v7133_v41 }
 0x867   : > { %14736 = vmatpush3.bf16.msra.mxu0 %v14733_v14  ;;  %13627 = vmatprep.mubr.f32.mxu0 %v7124_v40  ;;  %v16875_v40 = vld [vmem:[%s18728_s4 + $0x58] sm:$0xff] }
 0x868   : > { %14738 = vmatprep.subr.bf16.mxu0 %v16543_v18 }
 0x86e   : > { %13628 = vmatmul.mubr.f32.vlgmr.msra.gmra.mrb[14].mxu0 %v7134_v47  ;;  %v16884_v47 = vld [vmem:[%s18728_s4 + $0x60] sm:$0xff] }
 0x86f   : > { %14740 = vmatpush3.bf16.msra.mxu0 %v16543_v18  ;;  %13634 = vmatprep.mubr.f32.mxu0 %v7125_v56  ;;  %v16889_v56 = vld [vmem:[%s18728_s4 + $0x68] sm:$0xff] }
 0x870   : > { %14742 = vmatprep.subr.bf16.mxu0 %v14741_v48 }
 0x876   : > { %13635 = vmatmul.mubr.f32.vlgmr.msra.gmra.mrb[14].mxu0 %v7135_v19  ;;  %v7570_v19 = vpop.xlane.xlu0 %7569 }
 0x877   : > { %14744 = vmatpush3.bf16.msra.mxu0 %v14741_v48  ;;  %13641 = vmatprep.mubr.f32.mxu0 %v7123_v49  ;;  %v8084_v48 = vmul.f32 %v15892_v39, %v7570_v19 }
 0x878   : > { %14746 = vmatprep.subr.bf16.mxu0 %v16543_v18 }
 0x87a   : > { %v7573_v5 = vpop.xlane.xlu0 %7572 }
 0x87b   : > { %v8085_v14 = vmul.f32 %v15892_v39, %v7573_v5 }
 0x87e   : > { %13642 = vmatmul.mubr.f32.vlgmr.msra.gmra.mrb[14].mxu0 %v7133_v41 }
 0x87f   : > { %14748 = vmatpush3.bf16.msra.mxu0 %v16543_v18  ;;  %13648 = vmatprep.mubr.f32.mxu0 %v7123_v49  ;;  %v16750_v18 = vld [vmem:[%s18728_s4] sm:$0xff]  ;;  %v16861_v49 = vld [vmem:[%s18728_s4 + $0x48] sm:$0xff] }
 0x880   : > { %13651 = vmatprep.subr.mxu0 %v7588_v24  ;;  %v16759_v10 = vsel %vm542_vm0, %v16750_v18, 0  ;;  %10690 = vrot.lane.b32.xlu1 %v16750_v18, %s15975_s26 }
 0x881   : > { %v9245_v17 = vand.u32 4294901760, %v16759_v10 }
 0x883   : > { %v16773_v20 = vpack.c.bf16 %v9248_v61, %v9245_v17 }
 0x884   : > { %10692 = vrot.lane.b32.xlu1 %v16755_v7, %s15975_s26 }
 0x886   : > { %13649 = vmatmul.mubr.f32.vlgmr.msra.gmra.mrb[14].mxu0 %v7133_v41  ;;  %v16870_v41 = vld [vmem:[%s18728_s4 + $0x50] sm:$0xff] }
 0x887   : > { %13653 = vmatprep.mubr.f32.mxu0 %v7657_v63  ;;  %10710 = vrot.lane.b32.xlu0 %v16870_v41, %s15975_s26 }
 0x888   : > { %13652 = vmatpush3.xpose.msra.mxu0 %v7588_v24  ;;  %10696 = vrot.lane.b32.xlu1 %v16785_v25, %s15975_s26 }
 0x889   : > { %13656 = vmatprep.subr.mxu0 %v7678_v1 }
 0x88b   : > { %13654 = vmatmul.mubr.f32.vlgmr.msra.gmra.mrb[16].mxu0 %v7667_v15  ;;  %10714 = vrot.lane.b32.xlu0 %v16884_v47, %s15975_s26 }
 0x88c   : > { %13657 = vmatpush3.xpose.msra.mxu0 %v7678_v1  ;;  %13658 = vmatprep.mubr.f32.mxu0 %v7653_v54 }
 0x88d   : > { %13661 = vmatprep.subr.mxu0 %v7675_v16  ;;  %10700 = vrot.lane.b32.xlu1 %v16815_v32, %s15975_s26 }
 0x88f   : > { %10718 = vrot.lane.b32.xlu0 %v16898_v52, %s15975_s26 }
 0x891   : > { %10704 = vrot.lane.b32.xlu1 %v16847_v38, %s15975_s26 }
 0x893   : > { %13659 = vmatmul.mubr.f32.vlgmr.msra.gmra.mrb[16].mxu0 %v7663_v46  ;;  %9932 = vrot.lane.b32.xlu0 %v16750_v18, %s15974_s25 }
 0x894   : > { %13662 = vmatpush3.xpose.msra.mxu0 %v7675_v16  ;;  %13663 = vmatprep.mubr.f32.mxu0 %v7654_v21 }
 0x895   : > { %13666 = vmatprep.subr.mxu0 %v7588_v24  ;;  %10708 = vrot.lane.b32.xlu1 %v16861_v49, %s15975_s26 }
 0x897   : > { %11448 = vrot.lane.b32.xlu0 %v16750_v18, %s15976_s27 }
 0x899   : > { %10712 = vrot.lane.b32.xlu1 %v16875_v40, %s15975_s26 }
 0x89b   : > { %13664 = vmatmul.mubr.f32.vlgmr.msra.gmra.mrb[16].mxu0 %v7664_v59  ;;  %9936 = vrot.lane.b32.xlu0 %v16780_v58, %s15974_s25 }
 0x89c   : > { %13667 = vmatpush3.xpose.msra.mxu0 %v7588_v24  ;;  %13668 = vmatprep.mubr.f32.mxu0 %v7655_v2  ;;  %v8104_v2 = vld [vmem:[#allocation2 + $0x38] sm:$0xff] }
 0x89d   : > { %13671 = vmatprep.subr.mxu0 %v7676_v55  ;;  %10716 = vrot.lane.b32.xlu1 %v16889_v56, %s15975_s26  ;;  %v8109_v59 = vsel %vm1081_vm1, %v8104_v2, 0 }
 0x89f   : > { %11452 = vrot.lane.b32.xlu0 %v16780_v58, %s15976_s27 }
 0x8a1   : > { %10720 = vrot.lane.b32.xlu1 %v16903_v57, %s15975_s26 }
 0x8a3   : > { %13669 = vmatmul.mubr.f32.vlgmr.msra.gmra.mrb[16].mxu0 %v7665_v11  ;;  %9940 = vrot.lane.b32.xlu0 %v16810_v34, %s15974_s25 }
 0x8a4   : > { %13672 = vmatpush3.xpose.msra.mxu0 %v7676_v55  ;;  %13673 = vmatprep.mubr.f32.mxu0 %v7653_v54  ;;  %v16932_v55 = vand.u32 4294901760, %v8109_v59 }
 0x8a5   : > { %13676 = vmatprep.subr.mxu0 %v7588_v24  ;;  %9934 = vrot.lane.b32.xlu1 %v16755_v7, %s15974_s25 }
 0x8a6   : > { %v8195_v8 = vsub.f32 %v8109_v59, %v16932_v55 }
 0x8a7   : > { %11456 = vrot.lane.b32.xlu0 %v16810_v34, %s15976_s27 }
 0x8a8   : > { %v8196_v58 = vand.u32 4294901760, %v8195_v8 }
 0x8a9   : > { %11450 = vrot.lane.b32.xlu1 %v16755_v7, %s15976_s27 }
 0x8ab   : > { %13674 = vmatmul.mubr.f32.vlgmr.msra.gmra.mrb[16].mxu0 %v7663_v46  ;;  %9944 = vrot.lane.b32.xlu0 %v16842_v51, %s15974_s25 }
 0x8ac   : > { %13677 = vmatpush3.xpose.msra.mxu0 %v7588_v24  ;;  %13678 = vmatprep.mubr.f32.mxu0 %v7653_v54  ;;  %v15893_v24 = vld [vmem:[%s18726_s2 + $0x3] ss:$0 sm:$0xff] }
 0x8ad   : > { %9938 = vrot.lane.b32.xlu1 %v16785_v25, %s15974_s25 }
 0x8af   : > { %11460 = vrot.lane.b32.xlu0 %v16842_v51, %s15976_s27 }
 0x8b1   : > { %11454 = vrot.lane.b32.xlu1 %v16785_v25, %s15976_s27 }
 0x8b3   : > { %13679 = vmatmul.mubr.f32.vlgmr.msra.gmra.mrb[16].mxu0 %v7663_v46  ;;  %9948 = vrot.lane.b32.xlu0 %v16856_v43, %s15974_s25 }
 0x8b5   : > { %9942 = vrot.lane.b32.xlu1 %v16815_v32, %s15974_s25 }
 0x8b7   : > { %11464 = vrot.lane.b32.xlu0 %v16856_v43, %s15976_s27 }
 0x8b9   : > { %11458 = vrot.lane.b32.xlu1 %v16815_v32, %s15976_s27 }
 0x8bb   : > { %9952 = vrot.lane.b32.xlu0 %v16870_v41, %s15974_s25 }
 0x8bd   : > { %9946 = vrot.lane.b32.xlu1 %v16847_v38, %s15974_s25 }
 0x8bf   : > { %11468 = vrot.lane.b32.xlu0 %v16870_v41, %s15976_s27 }
 0x8c1   : > { %11462 = vrot.lane.b32.xlu1 %v16847_v38, %s15976_s27 }
 0x8c3   : > { %9956 = vrot.lane.b32.xlu0 %v16884_v47, %s15974_s25 }
 0x8c5   : > { %9950 = vrot.lane.b32.xlu1 %v16861_v49, %s15974_s25 }
 0x8c7   : > { %11472 = vrot.lane.b32.xlu0 %v16884_v47, %s15976_s27 }
 0x8c9   : > { %11466 = vrot.lane.b32.xlu1 %v16861_v49, %s15976_s27 }
 0x8cb   : > { %9960 = vrot.lane.b32.xlu0 %v16898_v52, %s15974_s25 }
 0x8cd   : > { %9954 = vrot.lane.b32.xlu1 %v16875_v40, %s15974_s25 }
 0x8cf   : > { %11476 = vrot.lane.b32.xlu0 %v16898_v52, %s15976_s27 }
 0x8d1   : > { %11470 = vrot.lane.b32.xlu1 %v16875_v40, %s15976_s27 }
 0x8d5   : > { %9958 = vrot.lane.b32.xlu1 %v16889_v56, %s15974_s25 }
 0x8d9   : > { %11474 = vrot.lane.b32.xlu1 %v16889_v56, %s15976_s27 }
 0x8dd   : > { %9962 = vrot.lane.b32.xlu1 %v16903_v57, %s15974_s25  ;;  %s528_s25 = scalar_select %p527_p0, %s15964_s12, 1 }
 0x8de   : > { %s18677_s12 = scalar_lea.sflag [#allocation8], %s465_s19 }
 0x8e1   : > { %11478 = vrot.lane.b32.xlu1 %v16903_v57, %s15976_s27  ;;  %s12419_s27 = sshll.u32 %s528_s25, 4  ;;  %s15978_s25 = smov [#allocation7]  }
 0x8e2   : > { %s531_s17 = scalar_lea.vmem %s18729_s5, %s12419_s27  ;;  %s15898_s27 = sshll.u32 %s15978_s25, 4  ;;  %s15899_s27 = int_to_ptr.vmem [resolvable:$false] %s15898_s27 }
 0x8e3   : > { %s15900_s15 = scalar_lea.vmem %s15899_s27, 512  ;;  %p15901_p4 = scmp.lt.s32.totalorder %s18668_s22, %s15899_s27 }
 0x8e4   : > { %p15902_p6 = scmp.lt.s32.totalorder %s15900_s15, %s15894_s21 }
 0x8e6   : > { %p15903_p7 = por %p15902_p6, %p15901_p4 }
 0x8e8   : > { %p15904_p8 = pnand %p15903_p7, %p15897_p3 }
 0x959   : > { %v13650_v9 = vpop.f32.mrb[14].mxu0 }
 0x95a   : > { %v7559_v12 = vadd.f32 %v13650_v9, %v7043_v28  ;;  %v7548_v33 = vpop.f32.mrb[15].mxu0  ;;  %v8197_v9 = vsub.f32 %v8195_v8, %v8196_v58 }
 0x95b   : > { %v7558_v0 = vadd.f32 %v7548_v33, %v7042_v29 }
 0x95c   : > { %7561 = vst.msk [vmem:[#allocation3 + $0x28] sm:$0xff] %vm542_vm0, %v7559_v12  ;;  %v8198_v5 = vand.u32 4294901760, %v8197_v9 }
 0x95d   : > { %7560 = vst.msk [vmem:[#allocation3 + $0x20] sm:$0xff] %vm542_vm0, %v7558_v0 }
 0x986   : > { %v13680_v13 = vpop.f32.mrb[16].mxu0 }
 0x987   : > { %v8087_v44 = vadd.f32 %v13680_v13, %v8085_v14  ;;  %v8066_v45 = vpop.f32.mrb[17].mxu0  ;;  %v9188_v14 = vld [vmem:[#allocation3] sm:$0xff] }
 0x988   : > { %v8086_v54 = vadd.f32 %v8084_v48, %v8066_v45  ;;  %v9191_v48 = vsel %vm542_vm0, %v9188_v14, 0 }
 0x989   : > { %v8097_v23 = vadd.f32 %v15893_v24, %v8087_v44  ;;  %v16985_v13 = vand.u32 4294901760, %v9191_v48 }
 0x98a   : > { %v8096_v21 = vadd.f32 %v15893_v24, %v8086_v54  ;;  %v17009_v54 = vsel %vm542_vm0, %v16842_v51, 0  ;;  %v17027_v51 = vsel %vm542_vm0, %v16856_v43, 0  ;;  %v17045_v43 = vsel %vm542_vm0, %v16870_v41, 0 }
 0x98b   : > { %v8100_v46 = vmul.f32 1.442695, %v8097_v23  ;;  %v9263_v24 = vand.u32 4294901760, %v17009_v54  ;;  %v9275_v59 = vand.u32 4294901760, %v17045_v43  ;;  %v17063_v41 = vsel %vm542_vm0, %v16884_v47, 0 }
 0x98c   : > { %v8098_v16 = vmul.f32 1.442695, %v8096_v21  ;;  %v17081_v47 = vsel %vm542_vm0, %v16898_v52, 0 }
 0x98d   : > { %15881 = vpow2.f32 %v8100_v46  ;;  %v9269_v46 = vand.u32 4294901760, %v17027_v51  ;;  %v9287_v52 = vand.u32 4294901760, %v17081_v47 }
 0x98e   : > { %15883 = vpow2.f32 %v8098_v16 }
 0x997   : > { %v15882_v11 = vpop.eup %15881 }
 0x998   : > { %v15884_v6 = vpop.eup %15883  ;;  %v8115_v3 = vsel %vm1081_vm1, %v15882_v11, 0 }
 0x999   : > { %v8121_v63 = vand.u32 4294901760, %v8115_v3  ;;  %v8112_v1 = vsel %vm1081_vm1, %v15884_v6, 0  ;;  %v9281_v6 = vand.u32 4294901760, %v17063_v41 }
 0x99a   : > { %v8118_v15 = vand.u32 4294901760, %v8112_v1 }
 0x99b   : > { %v8213_v18 = vsub.f32 %v8115_v3, %v8121_v63 }
 0x99c   : > { %v14749_v7 = vpack.c.bf16 %v8121_v63, %v8118_v15  ;;  %v8206_v25 = vsub.f32 %v8112_v1, %v8118_v15  ;;  %v17090_v63 = vsub.f32 %v16759_v10, %v9245_v17  ;;  %v17095_v1 = vsub.f32 %v16763_v22, %v9248_v61  ;;  %v9189_v15 = vld [vmem:[#allocation3 + $0x8] sm:$0xff] }
 0x99d   : > { %v8214_v28 = vand.u32 4294901760, %v8213_v18 }
 0x99e   : > { %14750 = vmatprep.subr.bf16.mxu1 %v14749_v7  ;;  %v8207_v32 = vand.u32 4294901760, %v8206_v25  ;;  %v14757_v29 = vpack.c.bf16 %v8213_v18, %v8206_v25  ;;  %v18760_v10 = vand.u32 4294901760, %v17095_v1 }
 0x99f   : > { %14752 = vmatpush3.bf16.xpose.msra.mxu1 %v14749_v7  ;;  %v8215_v34 = vsub.f32 %v8213_v18, %v8214_v28 }
 0x9a0   : > { %v8208_v12 = vsub.f32 %v8206_v25, %v8207_v32  ;;  %v14765_v33 = vpack.c.bf16 %v8214_v28, %v8207_v32  ;;  %v17121_v25 = vsub.f32 %v16789_v53, %v9251_v35  ;;  %v17126_v28 = vsub.f32 %v16793_v26, %v9254_v30 }
 0x9a1   : > { %v8216_v0 = vand.u32 4294901760, %v8215_v34  ;;  %v17138_v53 = vsub.f32 %v16819_v36, %v9257_v50  ;;  %v17143_v26 = vsub.f32 %v16823_v37, %v9260_v60 }
 0x9a2   : > { %v8209_v19 = vand.u32 4294901760, %v8208_v12  ;;  %v18759_v9 = vand.u32 4294901760, %v17121_v25  ;;  %v18758_v12 = vand.u32 4294901760, %v17126_v28 }
 0x9a3   : > { %v18756_v36 = vand.u32 4294901760, %v17138_v53  ;;  %v18755_v50 = vand.u32 4294901760, %v17143_v26 }
 0x9a4   : > { %v14753_v39 = vpack.c.bf16 %v8216_v0, %v8209_v19  ;;  %v9370_v0 = vsub.f32 %v17126_v28, %v18758_v12 }
 0x9a6   : > { %13686 = vmatmul.mubr.f32.vlgmr.msra.gmra.mrb[10].mxu1 %v8198_v5  ;;  %14754 = vmatprep.subr.bf16.mxu1 %v14753_v39  ;;  %v9371_v19 = vand.u32 4294901760, %v9370_v0  ;;  %v9377_v5 = vsub.f32 %v17138_v53, %v18756_v36 }
 0x9a7   : > { %14756 = vmatpush3.bf16.xpose.msra.mxu1 %v14753_v39  ;;  %13692 = vmatprep.mubr.f32.mxu1 %v16698_v62  ;;  %v9384_v39 = vsub.f32 %v17143_v26, %v18755_v50 }
 0x9a8   : > { %14758 = vmatprep.subr.bf16.mxu1 %v14757_v29 }
 0x9ae   : > { %13693 = vmatmul.mubr.f32.vlgmr.msra.gmra.mrb[10].mxu1 %v16932_v55 }
 0x9af   : > { %14760 = vmatpush3.bf16.xpose.msra.mxu1 %v14757_v29  ;;  %13699 = vmatprep.mubr.f32.mxu1 %v16702_v4  ;;  %v16993_v4 = vsub.f32 %v9191_v48, %v16985_v13 }
 0x9b0   : > { %14762 = vmatprep.subr.bf16.mxu1 %v14749_v7 }
 0x9b6   : > { %13700 = vmatmul.mubr.f32.vlgmr.msra.gmra.mrb[10].mxu1 %v8195_v8 }
 0x9b7   : > { %14764 = vmatpush3.bf16.xpose.msra.mxu1 %v14749_v7  ;;  %13706 = vmatprep.mubr.f32.mxu1 %v8186_v31  ;;  %v9327_v31 = vand.u32 4294901760, %v16993_v4 }
 0x9b8   : > { %14766 = vmatprep.subr.bf16.mxu1 %v14765_v33 }
 0x9b9   : > { %v9328_v44 = vsub.f32 %v16993_v4, %v9327_v31 }
 0x9bb   : > { %v9329_v45 = vand.u32 4294901760, %v9328_v44  ;;  %v17167_v44 = vsub.f32 %v17009_v54, %v9263_v24 }
 0x9be   : > { %13707 = vmatmul.mubr.f32.vlgmr.msra.gmra.mrb[10].mxu1 %v8196_v58  ;;  %v9356_v58 = vsub.f32 %v17095_v1, %v18760_v10 }
 0x9bf   : > { %14768 = vmatpush3.bf16.xpose.msra.mxu1 %v14765_v33  ;;  %13713 = vmatprep.mubr.f32.mxu1 %v16698_v62  ;;  %v9363_v33 = vsub.f32 %v17121_v25, %v18759_v9 }
 0x9c0   : > { %14770 = vmatprep.subr.bf16.mxu1 %v14749_v7  ;;  %v9357_v34 = vand.u32 4294901760, %v9356_v58 }
 0x9c1   : > { %v9364_v60 = vand.u32 4294901760, %v9363_v33 }
 0x9c3   : > { %v14833_v48 = vpack.c.bf16 %v9371_v19, %v9364_v60 }
 0x9c6   : > { %13714 = vmatmul.mubr.f32.vlgmr.msra.gmra.mrb[10].mxu1 %v16932_v55 }
 0x9c7   : > { %14772 = vmatpush3.bf16.xpose.msra.mxu1 %v14749_v7  ;;  %13720 = vmatprep.mubr.f32.mxu1 %v16698_v62  ;;  %v17013_v62 = vsel %vm542_vm0, %v16847_v38, 0  ;;  %v17031_v38 = vsel %vm542_vm0, %v16861_v49, 0  ;;  %v17049_v49 = vsel %vm542_vm0, %v16875_v40, 0  ;;  %v17067_v40 = vsel %vm542_vm0, %v16889_v56, 0 }
 0x9c8   : > { %14798 = vmatprep.subr.bf16.mxu1 %v16773_v20  ;;  %v9266_v23 = vand.u32 4294901760, %v17013_v62  ;;  %v9272_v16 = vand.u32 4294901760, %v17031_v38  ;;  %v9284_v3 = vand.u32 4294901760, %v17067_v40  ;;  %v17085_v56 = vsel %vm542_vm0, %v16903_v57, 0 }
 0x9c9   : > { %v9290_v18 = vand.u32 4294901760, %v17085_v56  ;;  %v9194_v57 = vsel %vm542_vm0, %v9189_v15, 0  ;;  %v18761_v7 = vand.u32 4294901760, %v17090_v63  ;;  %v9378_v15 = vand.u32 4294901760, %v9377_v5 }
 0x9ca   : > { %v17023_v21 = vpack.c.bf16 %v9266_v23, %v9263_v24  ;;  %v17041_v2 = vpack.c.bf16 %v9272_v16, %v9269_v46  ;;  %v17077_v8 = vpack.c.bf16 %v9284_v3, %v9281_v6  ;;  %v17110_v17 = vand.u32 4294901760, %v9194_v57 }
 0x9cb   : > { %v17108_v22 = vpack.c.bf16 %v9290_v18, %v9287_v52  ;;  %v9349_v61 = vsub.f32 %v17090_v63, %v18761_v7  ;;  %v17186_v24 = vsub.f32 %v17027_v51, %v9269_v46 }
 0x9cc   : > { %v17130_v32 = vsub.f32 %v9194_v57, %v17110_v17  ;;  %v9385_v57 = vand.u32 4294901760, %v9384_v39  ;;  %v17222_v39 = vsub.f32 %v17063_v41, %v9281_v6  ;;  %v17245_v6 = vsub.f32 %v17085_v56, %v9290_v18 }
 0x9cd   : > { %v9350_v29 = vand.u32 4294901760, %v9349_v61  ;;  %v18754_v61 = vand.u32 4294901760, %v17167_v44  ;;  %v18751_v33 = vand.u32 4294901760, %v17186_v24 }
 0x9ce   : > { %13721 = vmatmul.mubr.f32.vlgmr.msra.gmra.mrb[10].mxu1 %v16932_v55  ;;  %v9278_v55 = vand.u32 4294901760, %v17049_v49  ;;  %v18757_v35 = vand.u32 4294901760, %v17130_v32 }
 0x9cf   : > { %14800 = vmatpush3.bf16.xpose.msra.mxu1 %v16773_v20  ;;  %13797 = vmatprep.mubr.f32.mxu1 %v9329_v45  ;;  %v14829_v30 = vpack.c.bf16 %v9357_v34, %v9350_v29  ;;  %v17172_v45 = vsub.f32 %v17013_v62, %v9266_v23  ;;  %v14837_v29 = vpack.c.bf16 %v9385_v57, %v9378_v15  ;;  %v18744_v57 = vand.u32 4294901760, %v17222_v39 }
 0x9d0   : > { %14802 = vmatprep.subr.bf16.mxu1 %v16805_v27  ;;  %v17059_v11 = vpack.c.bf16 %v9278_v55, %v9275_v59  ;;  %v9338_v37 = vsub.f32 %v17130_v32, %v18757_v35  ;;  %v9391_v54 = vsub.f32 %v17167_v44, %v18754_v61  ;;  %v17191_v23 = vsub.f32 %v17031_v38, %v9272_v16 }
 0x9d1   : > { %v18753_v58 = vand.u32 4294901760, %v17172_v45  ;;  %v17203_v51 = vsub.f32 %v17049_v49, %v9278_v55  ;;  %v9405_v46 = vsub.f32 %v17186_v24, %v18751_v33 }
 0x9d2   : > { %v9339_v14 = vand.u32 4294901760, %v9338_v37  ;;  %v9392_v34 = vand.u32 4294901760, %v9391_v54  ;;  %v18747_v0 = vand.u32 4294901760, %v17191_v23  ;;  %v17198_v37 = vsub.f32 %v17045_v43, %v9275_v59 }
 0x9d3   : > { %v9398_v62 = vsub.f32 %v17172_v45, %v18753_v58  ;;  %v18745_v43 = vand.u32 4294901760, %v17203_v51  ;;  %v9406_v59 = vand.u32 4294901760, %v9405_v46 }
 0x9d4   : > { %v9412_v16 = vsub.f32 %v17191_v23, %v18747_v0  ;;  %v18746_v60 = vand.u32 4294901760, %v17198_v37 }
 0x9d5   : > { %v9426_v55 = vsub.f32 %v17203_v51, %v18745_v43 }
 0x9d6   : > { %v9413_v19 = vand.u32 4294901760, %v9412_v16  ;;  %v9419_v49 = vsub.f32 %v17198_v37, %v18746_v60 }
 0x9d7   : > { %14804 = vmatpush3.bf16.xpose.msra.mxu1 %v16805_v27  ;;  %v9427_v15 = vand.u32 4294901760, %v9426_v55  ;;  %v8650_v55 = vpop.permute.xlu1 %8649 }
 0x9d8   : > { %14806 = vmatprep.subr.bf16.mxu1 %v16835_v42  ;;  %v14845_v5 = vpack.c.bf16 %v9413_v19, %v9406_v59  ;;  %v14861_v59 = vpack.c.bf16 %v17095_v1, %v17090_v63  ;;  %v14865_v19 = vpack.c.bf16 %v17126_v28, %v17121_v25 }
 0x9df   : > { %14808 = vmatpush3.bf16.xpose.msra.mxu1 %v16835_v42 }
 0x9e0   : > { %14810 = vmatprep.subr.bf16.mxu1 %v17023_v21 }
 0x9e7   : > { %14812 = vmatpush3.bf16.xpose.msra.mxu1 %v17023_v21 }
 0x9e8   : > { %14814 = vmatprep.subr.bf16.mxu1 %v17041_v2 }
 0x9ef   : > { %14816 = vmatpush3.bf16.xpose.msra.mxu1 %v17041_v2 }
 0x9f0   : > { %14818 = vmatprep.subr.bf16.mxu1 %v17059_v11 }
 0x9f7   : > { %14820 = vmatpush3.bf16.xpose.msra.mxu1 %v17059_v11 }
 0x9f8   : > { %14822 = vmatprep.subr.bf16.mxu1 %v17077_v8 }
 0x9ff   : > { %14824 = vmatpush3.bf16.xpose.msra.mxu1 %v17077_v8 }
 0xa00   : > { %14826 = vmatprep.subr.bf16.mxu1 %v17108_v22 }
 0xa07   : > { %14828 = vmatpush3.bf16.xpose.msra.mxu1 %v17108_v22 }
 0xa08   : > { %14830 = vmatprep.subr.bf16.mxu1 %v14829_v30 }
 0xa0e   : > { %13798 = vmatmul.mubr.f32.vlgmr.msra.gmra.mrb[12].mxu1 %v9339_v14  ;;  %v17227_v14 = vsub.f32 %v17067_v40, %v9284_v3  ;;  %v17240_v40 = vsub.f32 %v17081_v47, %v9287_v52 }
 0xa0f   : > { %14832 = vmatpush3.bf16.xpose.msra.mxu1 %v14829_v30  ;;  %13832 = vmatprep.mubr.f32.mxu1 %v16985_v13  ;;  %v9399_v30 = vand.u32 4294901760, %v9398_v62  ;;  %v9433_v62 = vsub.f32 %v17222_v39, %v18744_v57 }
 0xa10   : > { %14834 = vmatprep.subr.bf16.mxu1 %v14833_v48 }
 0xa11   : > { %v14841_v38 = vpack.c.bf16 %v9399_v30, %v9392_v34  ;;  %v9434_v3 = vand.u32 4294901760, %v9433_v62  ;;  %v18742_v30 = vand.u32 4294901760, %v17240_v40 }
 0xa13   : > { %v9447_v16 = vsub.f32 %v17240_v40, %v18742_v30 }
 0xa15   : > { %v9448_v56 = vand.u32 4294901760, %v9447_v16 }
 0xa17   : > { %14836 = vmatpush3.bf16.xpose.msra.mxu1 %v14833_v48  ;;  %v9420_v48 = vand.u32 4294901760, %v9419_v49  ;;  %v14869_v49 = vpack.c.bf16 %v17143_v26, %v17138_v53 }
 0xa18   : > { %14838 = vmatprep.subr.bf16.mxu1 %v14837_v29 }
 0xa19   : > { %v14849_v54 = vpack.c.bf16 %v9427_v15, %v9420_v48  ;;  %v8662_v48 = vand.u32 4294901760, %v8650_v55 }
 0xa1f   : > { %14840 = vmatpush3.bf16.xpose.msra.mxu1 %v14837_v29  ;;  %v18743_v29 = vand.u32 4294901760, %v17227_v14 }
 0xa20   : > { %14842 = vmatprep.subr.bf16.mxu1 %v14841_v38 }
 0xa21   : > { %v9440_v41 = vsub.f32 %v17227_v14, %v18743_v29 }
 0xa23   : > { %v9441_v34 = vand.u32 4294901760, %v9440_v41 }
 0xa25   : > { %v14853_v46 = vpack.c.bf16 %v9441_v34, %v9434_v3  ;;  %v14873_v3 = vpack.c.bf16 %v17172_v45, %v17167_v44 }
 0xa27   : > { %14844 = vmatpush3.bf16.xpose.msra.mxu1 %v14841_v38  ;;  %v18740_v38 = vand.u32 4294901760, %v17245_v6 }
 0xa28   : > { %14846 = vmatprep.subr.bf16.mxu1 %v14845_v5 }
 0xa29   : > { %v9454_v47 = vsub.f32 %v17245_v6, %v18740_v38 }
 0xa2b   : > { %v9455_v52 = vand.u32 4294901760, %v9454_v47 }
 0xa2d   : > { %v14857_v18 = vpack.c.bf16 %v9455_v52, %v9448_v56 }
 0xa2f   : > { %14848 = vmatpush3.bf16.xpose.msra.mxu1 %v14845_v5  ;;  %v8652_v5 = vpop.permute.xlu0 %8651 }
 0xa30   : > { %14850 = vmatprep.subr.bf16.mxu1 %v14849_v54  ;;  %v8665_v15 = vand.u32 4294901760, %v8652_v5 }
 0xa32   : > { %v17263_v62 = vpack.c.bf16 %v8665_v15, %v8662_v48  ;;  %v8757_v41 = vsub.f32 %v8652_v5, %v8665_v15  ;;  %v14881_v5 = vpack.c.bf16 %v17203_v51, %v17198_v37  ;;  %v10691_v15 = vpop.permute.xlu1 %10690 }
 0xa34   : > { %14774 = vmatprep.subr.bf16.mxu0 %v17263_v62 }
 0xa35   : > { %14776 = vmatpush3.bf16.msra.mxu0 %v17263_v62 }
 0xa37   : > { %14852 = vmatpush3.bf16.xpose.msra.mxu1 %v14849_v54  ;;  %v8750_v54 = vsub.f32 %v8650_v55, %v8662_v48  ;;  %v14889_v48 = vpack.c.bf16 %v17245_v6, %v17240_v40 }
 0xa38   : > { %14854 = vmatprep.subr.bf16.mxu1 %v14853_v46 }
 0xa39   : > { %v8751_v34 = vand.u32 4294901760, %v8750_v54 }
 0xa3b   : > { %v8752_v16 = vsub.f32 %v8750_v54, %v8751_v34 }
 0xa3d   : > { %v8753_v56 = vand.u32 4294901760, %v8752_v16 }
 0xa3f   : > { %14856 = vmatpush3.bf16.xpose.msra.mxu1 %v14853_v46  ;;  %v8758_v46 = vand.u32 4294901760, %v8757_v41 }
 0xa40   : > { %14858 = vmatprep.subr.bf16.mxu1 %v14857_v18 }
 0xa41   : > { %v8759_v47 = vsub.f32 %v8757_v41, %v8758_v46  ;;  %v17276_v55 = vpack.c.bf16 %v8758_v46, %v8751_v34 }
 0xa43   : > { %v8760_v52 = vand.u32 4294901760, %v8759_v47 }
 0xa47   : > { %14860 = vmatpush3.bf16.xpose.msra.mxu1 %v14857_v18  ;;  %v17269_v18 = vpack.c.bf16 %v8760_v52, %v8753_v56 }
 0xa48   : > { %14862 = vmatprep.subr.bf16.mxu1 %v14861_v59 }
 0xa49   : > { %14778 = vmatprep.subr.bf16.mxu0 %v17269_v18 }
 0xa4e   : > { %13833 = vmatmul.mubr.f32.vlgmr.msra.gmra.mrb[12].mxu1 %v17110_v17 }
 0xa4f   : > { %14864 = vmatpush3.bf16.xpose.msra.mxu1 %v14861_v59  ;;  %13867 = vmatprep.mubr.f32.mxu1 %v16993_v4  ;;  %v14877_v59 = vpack.c.bf16 %v17191_v23, %v17186_v24 }
 0xa50   : > { %14866 = vmatprep.subr.bf16.mxu1 %v14865_v19 }
 0xa57   : > { %14868 = vmatpush3.bf16.xpose.msra.mxu1 %v14865_v19  ;;  %v17274_v19 = vpack.c.bf16 %v8757_v41, %v8750_v54  ;;  %v17285_v54 = vsel %vm542_vm0, %v10691_v15, 0  ;;  %v10693_v41 = vpop.permute.xlu1 %10692 }
 0xa58   : > { %14870 = vmatprep.subr.bf16.mxu1 %v14869_v49  ;;  %v17289_v34 = vsel %vm542_vm0, %v10693_v41, 0 }
 0xa59   : > { %v18735_v46 = vand.u32 4294901760, %v17289_v34 }
 0xa5b   : > { %v17301_v47 = vsub.f32 %v17289_v34, %v18735_v46 }
 0xa5d   : > { %18907 = vst [vmem:[#allocation13_spill] sm:$0xff] %v17301_v47  ;;  %v18736_v52 = vand.u32 4294901760, %v17301_v47 }
 0xa5f   : > { %14872 = vmatpush3.bf16.xpose.msra.mxu1 %v14869_v49  ;;  %v14885_v49 = vpack.c.bf16 %v17227_v14, %v17222_v39 }
 0xa60   : > { %14874 = vmatprep.subr.bf16.mxu1 %v14873_v3 }
 0xa67   : > { %14876 = vmatpush3.bf16.xpose.msra.mxu1 %v14873_v3  ;;  %v18738_v3 = vand.u32 4294901760, %v17285_v54 }
 0xa68   : > { %14878 = vmatprep.subr.bf16.mxu1 %v14877_v59 }
 0xa69   : > { %v17296_v16 = vsub.f32 %v17285_v54, %v18738_v3 }
 0xa6b   : > { %18906 = vst [vmem:[#allocation12_spill] sm:$0xff] %v17296_v16  ;;  %v18737_v56 = vand.u32 4294901760, %v17296_v16 }
 0xa6f   : > { %14880 = vmatpush3.bf16.xpose.msra.mxu1 %v14877_v59  ;;  %v17307_v59 = vpack.c.bf16 %v17301_v47, %v17296_v16 }
 0xa70   : > { %14882 = vmatprep.subr.bf16.mxu1 %v14881_v5 }
 0xa71   : > { %18908 = vst [vmem:[#allocation14_spill] sm:$0xff] %v17307_v59 }
 0xa77   : > { %14884 = vmatpush3.bf16.xpose.msra.mxu1 %v14881_v5  ;;  %v10697_v5 = vpop.permute.xlu1 %10696 }
 0xa78   : > { %14886 = vmatprep.subr.bf16.mxu1 %v14885_v49  ;;  %v17321_v15 = vsel %vm542_vm0, %v10697_v5, 0 }
 0xa79   : > { %v18739_v46 = vand.u32 4294901760, %v17321_v15 }
 0xa7b   : > { %v10701_v5 = vpop.permute.xlu1 %10700 }
 0xa7f   : > { %14888 = vmatpush3.bf16.xpose.msra.mxu1 %v14885_v49  ;;  %v10695_v49 = vpop.permute.xlu0 %10694  ;;  %v10705_v43 = vpop.permute.xlu1 %10704 }
 0xa80   : > { %14890 = vmatprep.subr.bf16.mxu1 %v14889_v48  ;;  %v17324_v41 = vsel %vm542_vm0, %v10695_v49, 0  ;;  %v17341_v49 = vsel %vm542_vm0, %v10701_v5, 0  ;;  %v17373_v0 = vsel %vm542_vm0, %v10705_v43, 0 }
 0xa81   : > { %v18741_v4 = vand.u32 4294901760, %v17324_v41  ;;  %v18764_v50 = vand.u32 4294901760, %v17373_v0 }
 0xa83   : > { %v17397_v9 = vsub.f32 %v17373_v0, %v18764_v50 }
 0xa85   : > { %18918 = vst [vmem:[#allocation24_spill] sm:$0xff] %v17397_v9 }
 0xa87   : > { %14892 = vmatpush3.bf16.xpose.msra.mxu1 %v14889_v48  ;;  %v17317_v48 = vpack.c.bf16 %v18736_v52, %v18737_v56  ;;  %v17336_v52 = vsub.f32 %v17324_v41, %v18741_v4  ;;  %v10699_v56 = vpop.permute.xlu0 %10698 }
 0xa88   : > { %14894 = vmatprep.subr.bf16.mxu1 %v16773_v20  ;;  %v17344_v3 = vsel %vm542_vm0, %v10699_v56, 0 }
 0xa89   : > { %18909 = vst [vmem:[#allocation15_spill] sm:$0xff] %v17317_v48  ;;  %18911 = vst [vmem:[#allocation17_spill] sm:$0xff] %v17336_v52  ;;  %v18748_v30 = vand.u32 4294901760, %v17336_v52  ;;  %v18752_v29 = vand.u32 4294901760, %v17344_v3  ;;  %v18773_v48 = vand.u32 4294901760, %v17397_v9 }
 0xa8b   : > { %v17368_v57 = vsub.f32 %v17344_v3, %v18752_v29  ;;  %v10703_v60 = vpop.permute.xlu0 %10702 }
 0xa8d   : > { %18915 = vst [vmem:[#allocation21_spill] sm:$0xff] %v17368_v57  ;;  %v18762_v61 = vand.u32 4294901760, %v17368_v57 }
 0xa8e   : > { %13868 = vmatmul.mubr.f32.vlgmr.msra.gmra.mrb[12].mxu1 %v17130_v32 }
 0xa8f   : > { %14896 = vmatpush3.bf16.xpose.msra.mxu1 %v16773_v20  ;;  %13902 = vmatprep.mubr.f32.mxu1 %v9327_v31  ;;  %v17331_v31 = vsub.f32 %v17321_v15, %v18739_v46  ;;  %v18750_v46 = vand.u32 4294901760, %v17341_v49 }
 0xa90   : > { %14898 = vmatprep.subr.bf16.mxu1 %v16805_v27 }
 0xa91   : > { %18910 = vst [vmem:[#allocation16_spill] sm:$0xff] %v17331_v31  ;;  %v17349_v38 = vpack.c.bf16 %v17331_v31, %v17336_v52  ;;  %v18749_v4 = vand.u32 4294901760, %v17331_v31  ;;  %v17363_v56 = vsub.f32 %v17341_v49, %v18750_v46  ;;  %v18936_v52 = vand.u32 4294901760, %v17095_v1 }
 0xa93   : > { %18912 = vst [vmem:[#allocation18_spill] sm:$0xff] %v17349_v38  ;;  %v17358_v5 = vpack.c.bf16 %v18749_v4, %v18748_v30  ;;  %18914 = vst [vmem:[#allocation20_spill] sm:$0xff] %v17363_v56  ;;  %v17376_v30 = vsel %vm542_vm0, %v10703_v60, 0  ;;  %v18763_v46 = vand.u32 4294901760, %v17363_v56  ;;  %v17381_v33 = vpack.c.bf16 %v17363_v56, %v17368_v57 }
 0xa94   : > { %v18766_v43 = vand.u32 4294901760, %v17376_v30 }
 0xa95   : > { %18913 = vst [vmem:[#allocation19_spill] sm:$0xff] %v17358_v5  ;;  %18916 = vst [vmem:[#allocation22_spill] sm:$0xff] %v17381_v33  ;;  %v17392_v35 = vpack.c.bf16 %v18763_v46, %v18762_v61 }
 0xa96   : > { %v17402_v10 = vsub.f32 %v17376_v30, %v18766_v43 }
 0xa97   : > { %14900 = vmatpush3.bf16.xpose.msra.mxu1 %v16805_v27  ;;  %18917 = vst [vmem:[#allocation23_spill] sm:$0xff] %v17392_v35 }
 0xa98   : > { %14902 = vmatprep.subr.bf16.mxu1 %v16835_v42  ;;  %18919 = vst [vmem:[#allocation25_spill] sm:$0xff] %v17402_v10  ;;  %v17416_v43 = vpack.c.bf16 %v17397_v9, %v17402_v10 }
 0xa9a   : > { %18920 = vst [vmem:[#allocation26_spill] sm:$0xff] %v17416_v43 }
 0xa9f   : > { %14904 = vmatpush3.bf16.xpose.msra.mxu1 %v16835_v42 }
 0xaa0   : > { %14906 = vmatprep.subr.bf16.mxu1 %v17023_v21 }
 0xaa1   : > { %v13722_v4 = vpop.f32.mrb[10].mxu1 }
 0xaa2   : > { %v8620_v29 = vsel %vm3806_vm2, %v13722_v4, -inf  ;;  %v8609_v58 = vpop.f32.mrb[11].mxu1 }
 0xaa3   : > { %v8619_v36 = vsel %vm3806_vm2, %v8609_v58, -inf }
 0xaa4   : > { %v8621_v60 = vmax.f32 %v8619_v36, %v8620_v29  ;;  %v10709_v36 = vpop.permute.xlu1 %10708  ;;  %v10707_v29 = vpop.permute.xlu0 %10706 }
 0xaa5   : > { %v17407_v61 = vsel %vm542_vm0, %v10709_v36, 0  ;;  %v17410_v46 = vsel %vm542_vm0, %v10707_v29, 0 }
 0xaa6   : > { %v8622_v12 = vrot.slane %v8621_v60, 4  ;;  %v18774_v50 = vand.u32 4294901760, %v17407_v61  ;;  %v18776_v35 = vand.u32 4294901760, %v17410_v46 }
 0xaa7   : > { %14908 = vmatpush3.bf16.xpose.msra.mxu1 %v17023_v21 }
 0xaa8   : > { %v8623_v7 = vmax.f32 %v8621_v60, %v8622_v12  ;;  %14910 = vmatprep.subr.bf16.mxu1 %v17041_v2  ;;  %v18772_v12 = vand.u32 4294901760, %v17402_v10  ;;  %v17429_v29 = vsub.f32 %v17407_v61, %v18774_v50  ;;  %v17434_v43 = vsub.f32 %v17410_v46, %v18776_v35 }
 0xaaa   : > { %v8624_v5 = vrot.slane %v8623_v7, 2  ;;  %v17424_v36 = vpack.c.bf16 %v18773_v48, %v18772_v12  ;;  %18922 = vst [vmem:[#allocation28_spill] sm:$0xff] %v17429_v29  ;;  %18923 = vst [vmem:[#allocation29_spill] sm:$0xff] %v17434_v43  ;;  %v18785_v50 = vand.u32 4294901760, %v17429_v29  ;;  %v17448_v35 = vpack.c.bf16 %v17429_v29, %v17434_v43 }
 0xaac   : > { %v8625_v60 = vmax.f32 %v8623_v7, %v8624_v5  ;;  %18921 = vst [vmem:[#allocation27_spill] sm:$0xff] %v17424_v36  ;;  %v10713_v7 = vpop.permute.xlu1 %10712  ;;  %v10711_v5 = vpop.permute.xlu0 %10710  ;;  %v18784_v36 = vand.u32 4294901760, %v17434_v43  ;;  %18924 = vst [vmem:[#allocation30_spill] sm:$0xff] %v17448_v35 }
 0xaad   : > { %v17439_v12 = vsel %vm542_vm0, %v10713_v7, 0  ;;  %v17442_v48 = vsel %vm542_vm0, %v10711_v5, 0 }
 0xaae   : > { %v8626_v33 = vrot.slane %v8625_v60, 1  ;;  %v17456_v5 = vpack.c.bf16 %v18785_v50, %v18784_v36 }
 0xaaf   : > { %14912 = vmatpush3.bf16.xpose.msra.mxu1 %v17041_v2 }
 0xab0   : > { %v8627_v38 = vmax.f32 %v8625_v60, %v8626_v33  ;;  %14914 = vmatprep.subr.bf16.mxu1 %v17059_v11  ;;  %v18786_v33 = vand.u32 4294901760, %v17439_v12  ;;  %v18787_v60 = vand.u32 4294901760, %v17442_v48  ;;  %18925 = vst [vmem:[#allocation31_spill] sm:$0xff] %v17456_v5 }
 0xab2   : > { %v8628_v59 = vsub.f32 %v8609_v58, %v8627_v38  ;;  %v8629_v10 = vsub.f32 %v13722_v4, %v8627_v38  ;;  %v17461_v57 = vsub.f32 %v17439_v12, %v18786_v33  ;;  %v17466_v58 = vsub.f32 %v17442_v48, %v18787_v60  ;;  %v10715_v38 = vpop.permute.xlu0 %10714 }
 0xab4   : > { %v8630_v9 = vmul.f32 1.442695, %v8628_v59  ;;  %v8632_v7 = vmul.f32 1.442695, %v8629_v10  ;;  %18926 = vst [vmem:[#allocation32_spill] sm:$0xff] %v17461_v57  ;;  %18927 = vst [vmem:[#allocation33_spill] sm:$0xff] %v17466_v58  ;;  %v10717_v10 = vpop.permute.xlu1 %10716  ;;  %v17479_v36 = vpack.c.bf16 %v17461_v57, %v17466_v58 }
 0xab5   : > { %v17471_v59 = vsel %vm542_vm0, %v10717_v10, 0  ;;  %v18791_v50 = vand.u32 4294901760, %v17466_v58 }
 0xab6   : > { %15885 = vpow2.f32 %v8630_v9  ;;  %v17474_v9 = vsel %vm542_vm0, %v10715_v38, 0  ;;  %v18793_v4 = vand.u32 4294901760, %v17471_v59  ;;  %18928 = vst [vmem:[#allocation34_spill] sm:$0xff] %v17479_v36  ;;  %v10719_v36 = vpop.permute.xlu0 %10718 }
 0xab7   : > { %15887 = vpow2.f32 %v8632_v7  ;;  %14916 = vmatpush3.bf16.xpose.msra.mxu1 %v17059_v11  ;;  %v18792_v7 = vand.u32 4294901760, %v17461_v57  ;;  %v18797_v33 = vand.u32 4294901760, %v17474_v9 }
 0xab8   : > { %14918 = vmatprep.subr.bf16.mxu1 %v17077_v8  ;;  %v17493_v38 = vsub.f32 %v17471_v59, %v18793_v4  ;;  %v10721_v5 = vpop.permute.xlu1 %10720 }
 0xab9   : > { %v17488_v10 = vpack.c.bf16 %v18792_v7, %v18791_v50  ;;  %v17498_v60 = vsub.f32 %v17474_v9, %v18797_v33  ;;  %v17503_v50 = vsel %vm542_vm0, %v10721_v5, 0  ;;  %v17506_v7 = vsel %vm542_vm0, %v10719_v36, 0 }
 0xaba   : > { %18930 = vst [vmem:[#allocation36_spill] sm:$0xff] %v17493_v38  ;;  %18932 = vst [vmem:[#allocation38_spill] sm:$0xff] %v17503_v50  ;;  %v18816_v58 = vand.u32 4294901760, %v17493_v38  ;;  %v18817_v29 = vand.u32 4294901760, %v17503_v50  ;;  %v18818_v5 = vand.u32 4294901760, %v17506_v7  ;;  %v18935_v36 = vand.u32 4294901760, %v17090_v63 }
 0xabb   : > { %18929 = vst [vmem:[#allocation35_spill] sm:$0xff] %v17488_v10  ;;  %18931 = vst [vmem:[#allocation37_spill] sm:$0xff] %v17498_v60  ;;  %v17512_v33 = vpack.c.bf16 %v17493_v38, %v17498_v60  ;;  %v18815_v43 = vand.u32 4294901760, %v17498_v60 }
 0xabc   : > { %18933 = vst [vmem:[#allocation39_spill] sm:$0xff] %v17506_v7  ;;  %v14925_v31 = vpack.c.bf16 %v18936_v52, %v18935_v36  ;;  %v17531_v16 = vsub.f32 %v17503_v50, %v18817_v29  ;;  %v17539_v1 = vpop.permute.xlu1 %9934  ;;  %v17541_v52 = vpop.permute.xlu0 %9932 }
 0xabd   : > { %18934 = vst [vmem:[#allocation40_spill] sm:$0xff] %v17512_v33  ;;  %v17526_v47 = vpack.c.bf16 %v18816_v58, %v18815_v43 }
 0xabe   : > { %18938 = vst [vmem:[#allocation42_spill] sm:$0xff] %v17531_v16  ;;  %v18828_v43 = vand.u32 4294901760, %v17531_v16 }
 0xabf   : > { %14920 = vmatpush3.bf16.xpose.msra.mxu1 %v17077_v8  ;;  %18937 = vst [vmem:[#allocation41_spill] sm:$0xff] %v17526_v47 }
 0xac0   : > { %v15886_v35 = vpop.eup %15885  ;;  %14922 = vmatprep.subr.bf16.mxu1 %v17108_v22  ;;  %v11451_v38 = vpop.permute.xlu1 %11450 }
 0xac1   : > { %v15888_v4 = vpop.eup %15887  ;;  %v8634_v10 = vsel %vm3806_vm2, %v15886_v35, 0.0  ;;  %v11449_v50 = vpop.permute.xlu0 %11448 }
 0xac2   : > { %v8635_v57 = vsel %vm3806_vm2, %v15888_v4, 0.0 }
 0xac3   : > { %v8636_v56 = vadd.f32 %v8635_v57, %v8634_v10  ;;  %v17536_v57 = vsub.f32 %v17506_v7, %v18818_v5  ;;  %v18941_v5 = vand.u32 4294901760, %v17121_v25  ;;  %v17562_v7 = vsel %vm542_vm0, %v11451_v38, 0 }
 0xac4   : > { %18945 = vst [vmem:[#allocation46_spill] sm:$0xff] %v17562_v7  ;;  %v17565_v25 = vsel %vm542_vm0, %v11449_v50, 0 }
 0xac5   : > { %v8637_v33 = vrot.slane %v8636_v56, 4  ;;  %18939 = vst [vmem:[#allocation43_spill] sm:$0xff] %v17536_v57  ;;  %v17545_v36 = vpack.c.bf16 %v17531_v16, %v17536_v57  ;;  %v18827_v58 = vand.u32 4294901760, %v17536_v57  ;;  %18946 = vst [vmem:[#allocation47_spill] sm:$0xff] %v17565_v25 }
 0xac7   : > { %v8638_v63 = vadd.f32 %v8637_v33, %v8636_v56  ;;  %14924 = vmatpush3.bf16.xpose.msra.mxu1 %v17108_v22  ;;  %18940 = vst [vmem:[#allocation44_spill] sm:$0xff] %v17545_v36  ;;  %v18942_v56 = vand.u32 4294901760, %v17126_v28  ;;  %v17557_v47 = vpack.c.bf16 %v18828_v43, %v18827_v58  ;;  %v18944_v36 = vand.u32 4294901760, %v17130_v32  ;;  %v17572_v32 = vpop.permute.xlu0 %9936 }
 0xac8   : > { %14926 = vmatprep.subr.bf16.mxu1 %v14925_v31 }
 0xac9   : > { %v8639_v10 = vrot.slane %v8638_v63, 2  ;;  %v14929_v33 = vpack.c.bf16 %v18942_v56, %v18941_v5  ;;  %18943 = vst [vmem:[#allocation45_spill] sm:$0xff] %v17557_v47  ;;  %v18830_v5 = vand.u32 4294901760, %v17562_v7 }
 0xacb   : > { %v8640_v29 = vadd.f32 %v8639_v10, %v8638_v63  ;;  %v18829_v63 = vand.u32 4294901760, %v17565_v25  ;;  %v17570_v10 = vpop.permute.xlu1 %9938 }
 0xacd   : > { %v8641_v60 = vrot.slane %v8640_v29, 1  ;;  %v17578_v50 = vpack.c.bf16 %v18830_v5, %v18829_v63 }
 0xace   : > { %13903 = vmatmul.mubr.f32.vlgmr.msra.gmra.mrb[12].mxu1 %v18944_v36  ;;  %v11453_v36 = vpop.permute.xlu0 %11452 }
 0xacf   : > { %v8642_v28 = vadd.f32 %v8641_v60, %v8640_v29  ;;  %14928 = vmatpush3.bf16.xpose.msra.mxu1 %v14925_v31  ;;  %13937 = vmatprep.mubr.f32.mxu1 %v16985_v13  ;;  %18947 = vst [vmem:[#allocation48_spill] sm:$0xff] %v17578_v50  ;;  %v18948_v31 = vand.u32 4294901760, %v17138_v53  ;;  %v18949_v29 = vand.u32 4294901760, %v17143_v26  ;;  %v11455_v38 = vpop.permute.xlu1 %11454 }
 0xad0   : > { %14930 = vmatprep.subr.bf16.mxu1 %v14929_v33  ;;  %v17585_v56 = vsel %vm542_vm0, %v11455_v38, 0  ;;  %v18953_v38 = vand.u32 4294901760, %v17167_v44 }
 0xad1   : > { %15889 = vrcp.f32 %v8642_v28  ;;  %v14933_v60 = vpack.c.bf16 %v18949_v29, %v18948_v31  ;;  %18950 = vst [vmem:[#allocation49_spill] sm:$0xff] %v17585_v56  ;;  %v17588_v28 = vsel %vm542_vm0, %v11453_v36, 0  ;;  %v18840_v58 = vand.u32 4294901760, %v17585_v56 }
 0xad2   : > { %18951 = vst [vmem:[#allocation50_spill] sm:$0xff] %v17588_v28  ;;  %v18839_v43 = vand.u32 4294901760, %v17588_v28  ;;  %v17600_v31 = vpop.permute.xlu0 %9940 }
 0xad3   : > { %v17598_v26 = vpop.permute.xlu1 %9942 }
 0xad4   : > { %v17596_v53 = vpack.c.bf16 %v18840_v58, %v18839_v43 }
 0xad6   : > { %18952 = vst [vmem:[#allocation51_spill] sm:$0xff] %v17596_v53  ;;  %v11457_v7 = vpop.permute.xlu0 %11456 }
 0xad7   : > { %14932 = vmatpush3.bf16.xpose.msra.mxu1 %v14929_v33  ;;  %v18954_v33 = vand.u32 4294901760, %v17172_v45  ;;  %v11459_v25 = vpop.permute.xlu1 %11458  ;;  %v17616_v44 = vsel %vm542_vm0, %v11457_v7, 0  ;;  %v18956_v7 = vand.u32 4294901760, %v17191_v23 }
 0xad8   : > { %14934 = vmatprep.subr.bf16.mxu1 %v14933_v60  ;;  %v17613_v53 = vsel %vm542_vm0, %v11459_v25, 0 }
 0xad9   : > { %v14937_v36 = vpack.c.bf16 %v18954_v33, %v18953_v38  ;;  %v18955_v38 = vand.u32 4294901760, %v17186_v24 }
 0xadb   : > { %v15890_v29 = vpop.eup %15889  ;;  %v14941_v33 = vpack.c.bf16 %v18956_v7, %v18955_v38 }
 0xadc   : > { %v8644_v63 = vmul.f32 %v15890_v29, %v15886_v35  ;;  %v8645_v5 = vmul.f32 %v15890_v29, %v15888_v4  ;;  %v17622_v4 = vpop.permute.xlu1 %9946 }
 0xade   : > { %v8656_v28 = vsel %vm3806_vm2, %v8644_v63, 0  ;;  %v8659_v56 = vsel %vm3806_vm2, %v8645_v5, 0  ;;  %v17624_v5 = vpop.permute.xlu0 %9944  ;;  %v18849_v63 = vand.u32 4294901760, %v17613_v53 }
 0xadf   : > { %14936 = vmatpush3.bf16.xpose.msra.mxu1 %v14933_v60  ;;  %v17608_v43 = vand.u32 4294901760, %v8656_v28  ;;  %v17610_v58 = vand.u32 4294901760, %v8659_v56  ;;  %v18848_v60 = vand.u32 4294901760, %v17616_v44 }
 0xae0   : > { %14938 = vmatprep.subr.bf16.mxu1 %v14937_v36  ;;  %v11463_v47 = vpop.permute.xlu1 %11462 }
 0xae1   : > { %v8729_v35 = vsub.f32 %v8656_v28, %v17608_v43  ;;  %v17620_v45 = vsub.f32 %v8659_v56, %v17610_v58  ;;  %v17637_v56 = vpack.c.bf16 %v18849_v63, %v18848_v60  ;;  %v17643_v16 = vsel %vm542_vm0, %v11463_v47, 0 }
 0xae2   : > { %v11461_v57 = vpop.permute.xlu0 %11460  ;;  %v18854_v7 = vand.u32 4294901760, %v17643_v16 }
 0xae3   : > { %v8730_v29 = vand.u32 4294901760, %v8729_v35  ;;  %v18850_v25 = vand.u32 4294901760, %v17620_v45  ;;  %v17646_v38 = vsel %vm542_vm0, %v11461_v57, 0  ;;  %v18958_v57 = vand.u32 4294901760, %v17198_v37 }
 0xae4   : > { %18957 = vst [vmem:[#allocation52_spill] sm:$0xff] %v17646_v38  ;;  %v18853_v60 = vand.u32 4294901760, %v17646_v38  ;;  %v17650_v63 = vpop.permute.xlu1 %9950 }
 0xae5   : > { %v8731_v28 = vsub.f32 %v8729_v35, %v8730_v29  ;;  %v8741_v50 = vsub.f32 %v17620_v45, %v18850_v25 }
 0xae6   : > { %v17652_v25 = vpop.permute.xlu0 %9948  ;;  %v17660_v47 = vpack.c.bf16 %v18854_v7, %v18853_v60 }
 0xae7   : > { %14940 = vmatpush3.bf16.xpose.msra.mxu1 %v14937_v36  ;;  %v8732_v24 = vand.u32 4294901760, %v8731_v28  ;;  %v8742_v23 = vand.u32 4294901760, %v8741_v50  ;;  %v18959_v50 = vand.u32 4294901760, %v17203_v51 }
 0xae8   : > { %14942 = vmatprep.subr.bf16.mxu1 %v14941_v33  ;;  %v11467_v28 = vpop.permute.xlu1 %11466 }
 0xae9   : > { %13727 = vmatprep.mubr.f32.mxu0 %v8732_v24  ;;  %v14945_v36 = vpack.c.bf16 %v18959_v50, %v18958_v57  ;;  %v18963_v50 = vand.u32 4294901760, %v17227_v14 }
 0xaea   : > { %13728 = vmatmul.mubr.f32.vlgmr.msra.gmra.mrb[18].mxu0 %v8742_v23  ;;  %v11465_v24 = vpop.permute.xlu0 %11464  ;;  %v17668_v23 = vsel %vm542_vm0, %v11467_v28, 0 }
 0xaeb   : > { %14780 = vmatpush3.bf16.msra.mxu0 %v17269_v18  ;;  %13734 = vmatprep.mubr.f32.mxu0 %v17608_v43  ;;  %18960 = vst [vmem:[#allocation53_spill] sm:$0xff] %v17668_v23  ;;  %v17671_v18 = vsel %vm542_vm0, %v11465_v24, 0  ;;  %v18856_v38 = vand.u32 4294901760, %v17668_v23 }
 0xaec   : > { %14782 = vmatprep.subr.bf16.mxu0 %v17274_v19  ;;  %18961 = vst [vmem:[#allocation54_spill] sm:$0xff] %v17671_v18  ;;  %v18855_v60 = vand.u32 4294901760, %v17671_v18  ;;  %v17681_v51 = vpop.permute.xlu1 %9954 }
 0xaee   : > { %v17679_v37 = vpack.c.bf16 %v18856_v38, %v18855_v60  ;;  %v17683_v57 = vpop.permute.xlu0 %9952 }
 0xaef   : > { %14944 = vmatpush3.bf16.xpose.msra.mxu1 %v14941_v33  ;;  %v18962_v33 = vand.u32 4294901760, %v17222_v39 }
 0xaf0   : > { %14946 = vmatprep.subr.bf16.mxu1 %v14945_v36  ;;  %v11471_v24 = vpop.permute.xlu1 %11470 }
 0xaf1   : > { %v14949_v28 = vpack.c.bf16 %v18963_v50, %v18962_v33  ;;  %v17693_v60 = vsel %vm542_vm0, %v11471_v24, 0  ;;  %v18967_v33 = vand.u32 4294901760, %v17245_v6 }
 0xaf2   : > { %13735 = vmatmul.mubr.f32.vlgmr.msra.gmra.mrb[18].mxu0 %v17610_v58  ;;  %v11469_v7 = vpop.permute.xlu0 %11468  ;;  %18964 = vst [vmem:[#allocation55_spill] sm:$0xff] %v17693_v60  ;;  %v18860_v18 = vand.u32 4294901760, %v17693_v60 }
 0xaf3   : > { %14784 = vmatpush3.bf16.msra.mxu0 %v17274_v19  ;;  %13741 = vmatprep.mubr.f32.mxu0 %v8729_v35  ;;  %v17696_v38 = vsel %vm542_vm0, %v11469_v7, 0  ;;  %v10688_v7 = vld [vmem:[#allocation3 + $0x20] sm:$0xff] }
 0xaf4   : > { %14786 = vmatprep.subr.bf16.mxu0 %v17263_v62  ;;  %18965 = vst [vmem:[#allocation56_spill] sm:$0xff] %v17696_v38  ;;  %v18859_v19 = vand.u32 4294901760, %v17696_v38  ;;  %v17706_v14 = vpop.permute.xlu1 %9958 }
 0xaf6   : > { %v17704_v39 = vpack.c.bf16 %v18860_v18, %v18859_v19  ;;  %v17708_v35 = vpop.permute.xlu0 %9956  ;;  %v10723_v18 = vsel %vm542_vm0, %v10688_v7, 0  ;;  %v18970_v7 = vand.u32 4294901760, %v17620_v45 }
 0xaf7   : > { %14948 = vmatpush3.bf16.xpose.msra.mxu1 %v14945_v36  ;;  %v18966_v36 = vand.u32 4294901760, %v17240_v40  ;;  %v17726_v40 = vand.u32 4294901760, %v10723_v18 }
 0xaf8   : > { %14950 = vmatprep.subr.bf16.mxu1 %v14949_v28  ;;  %v11475_v24 = vpop.permute.xlu1 %11474 }
 0xaf9   : > { %v14953_v50 = vpack.c.bf16 %v18967_v33, %v18966_v36  ;;  %v17719_v38 = vsel %vm542_vm0, %v11475_v24, 0  ;;  %v18972_v36 = vand.u32 4294901760, %v17289_v34 }
 0xafa   : > { %13742 = vmatmul.mubr.f32.vlgmr.msra.gmra.mrb[18].mxu0 %v17620_v45  ;;  %v11473_v19 = vpop.permute.xlu0 %11472  ;;  %18968 = vst [vmem:[#allocation57_spill] sm:$0xff] %v17719_v38 }
 0xafb   : > { %14788 = vmatpush3.bf16.msra.mxu0 %v17263_v62  ;;  %13748 = vmatprep.mubr.f32.mxu0 %v8730_v29  ;;  %v17722_v60 = vsel %vm542_vm0, %v11473_v19, 0  ;;  %v18868_v29 = vand.u32 4294901760, %v17719_v38  ;;  %v18971_v19 = vand.u32 4294901760, %v17285_v54  ;;  %v18973_v54 = vand.u32 4294901760, %v17324_v41 }
 0xafc   : > { %14790 = vmatprep.subr.bf16.mxu0 %v17276_v55  ;;  %18969 = vst [vmem:[#allocation58_spill] sm:$0xff] %v17722_v60  ;;  %v18867_v23 = vand.u32 4294901760, %v17722_v60 }
 0xafd   : > { %v17746_v33 = vpack.c.bf16 %v18972_v36, %v18971_v19  ;;  %v18985_v19 = vld [vmem:[#allocation39_spill] sm:$0xff] }
 0xafe   : > { %v17732_v6 = vpack.c.bf16 %v18868_v29, %v18867_v23  ;;  %v18986_v36 = vand.u32 4294901760, %v18985_v19  ;;  %v18993_v19 = vld [vmem:[#allocation16_spill] sm:$0xff] }
 0xaff   : > { %14952 = vmatpush3.bf16.xpose.msra.mxu1 %v14949_v28  ;;  %v17740_v28 = vsub.f32 %v10723_v18, %v17726_v40 }
 0xb00   : > { %14954 = vmatprep.subr.bf16.mxu1 %v14953_v50 }
 0xb01   : > { %v18871_v45 = vand.u32 4294901760, %v17740_v28 }
 0xb02   : > { %13749 = vmatmul.mubr.f32.vlgmr.msra.gmra.mrb[18].mxu0 %v18970_v7 }
 0xb03   : > { %14792 = vmatpush3.bf16.msra.mxu0 %v17276_v55  ;;  %13755 = vmatprep.mubr.f32.mxu0 %v17608_v43  ;;  %v10844_v55 = vsub.f32 %v17740_v28, %v18871_v45 }
 0xb04   : > { %14794 = vmatprep.subr.bf16.mxu0 %v17263_v62 }
 0xb07   : > { %14956 = vmatpush3.bf16.xpose.msra.mxu1 %v14953_v50  ;;  %v17823_v50 = vsel %vm542_vm0, %v17539_v1, 0  ;;  %v18987_v1 = vld [vmem:[#allocation38_spill] sm:$0xff] }
 0xb08   : > { %14958 = vmatprep.subr.bf16.mxu1 %v16773_v20  ;;  %v10006_v24 = vand.u32 4294901760, %v17823_v50 }
 0xb0a   : > { %13756 = vmatmul.mubr.f32.vlgmr.msra.gmra.mrb[18].mxu0 %v17610_v58 }
 0xb0b   : > { %14796 = vmatpush3.bf16.msra.mxu0 %v17263_v62  ;;  %13762 = vmatprep.mubr.f32.mxu0 %v17608_v43  ;;  %v18974_v62 = vand.u32 4294901760, %v17321_v15  ;;  %v10845_v43 = vand.u32 4294901760, %v10844_v55  ;;  %v18977_v15 = vand.u32 4294901760, %v17376_v30  ;;  %v18988_v55 = vand.u32 4294901760, %v18987_v1  ;;  %v18995_v1 = vld [vmem:[#allocation17_spill] sm:$0xff] }
 0xb0c   : > { %15182 = vmatprep.subr.bf16.mxu0 %v17746_v33 }
 0xb0d   : > { %v17765_v34 = vpack.c.bf16 %v18974_v62, %v18973_v54  ;;  %v17840_v54 = vpack.c.bf16 %v18988_v55, %v18986_v36  ;;  %v18994_v36 = vand.u32 4294901760, %v18993_v19 }
 0xb0e   : > { %13938 = vmatmul.mubr.f32.vlgmr.msra.gmra.mrb[12].mxu1 %v17110_v17 }
 0xb0f   : > { %14960 = vmatpush3.bf16.xpose.msra.mxu1 %v16773_v20  ;;  %13972 = vmatprep.mubr.f32.mxu1 %v16985_v13  ;;  %v18975_v20 = vand.u32 4294901760, %v17344_v3  ;;  %v18976_v13 = vand.u32 4294901760, %v17341_v49  ;;  %v18979_v3 = vand.u32 4294901760, %v17410_v46  ;;  %v18983_v46 = vand.u32 4294901760, %v17474_v9 }
 0xb10   : > { %14962 = vmatprep.subr.bf16.mxu1 %v16805_v27 }
 0xb11   : > { %v17776_v41 = vpack.c.bf16 %v18976_v13, %v18975_v20  ;;  %v18991_v13 = vld [vmem:[#allocation13_spill] sm:$0xff] }
 0xb12   : > { %13763 = vmatmul.mubr.f32.vlgmr.msra.gmra.mrb[18].mxu0 %v17610_v58 }
 0xb13   : > { %14217 = vmatprep.mubr.f32.mxu0 %v10845_v43  ;;  %v18989_v43 = vld [vmem:[#allocation12_spill] sm:$0xff] }
 0xb14   : > { %15184 = vmatpush3.bf16.xpose.msra.mxu0 %v17746_v33  ;;  %v18990_v20 = vand.u32 4294901760, %v18989_v43 }
 0xb15   : > { %15186 = vmatprep.subr.bf16.mxu0 %v17765_v34 }
 0xb17   : > { %14964 = vmatpush3.bf16.xpose.msra.mxu1 %v16805_v27  ;;  %v18978_v27 = vand.u32 4294901760, %v17373_v0  ;;  %v18981_v0 = vand.u32 4294901760, %v17442_v48 }
 0xb18   : > { %14966 = vmatprep.subr.bf16.mxu1 %v16835_v42 }
 0xb19   : > { %v17786_v58 = vpack.c.bf16 %v18978_v27, %v18977_v15  ;;  %v18992_v15 = vand.u32 4294901760, %v18991_v13 }
 0xb1b   : > { %v10872_v27 = vsub.f32 %v18991_v13, %v18992_v15  ;;  %v17899_v15 = vsel %vm542_vm0, %v17598_v26, 0  ;;  %v18997_v26 = vld [vmem:[#allocation20_spill] sm:$0xff] }
 0xb1c   : > { %15188 = vmatpush3.bf16.xpose.msra.mxu0 %v17765_v34 }
 0xb1d   : > { %15190 = vmatprep.subr.bf16.mxu0 %v17776_v41 }
 0xb1f   : > { %14968 = vmatpush3.bf16.xpose.msra.mxu1 %v16835_v42  ;;  %v18980_v42 = vand.u32 4294901760, %v17407_v61  ;;  %v9930_v61 = vld [vmem:[#allocation3 + $0x10] sm:$0xff] }
 0xb20   : > { %14970 = vmatprep.subr.bf16.mxu1 %v17023_v21  ;;  %v9965_v48 = vsel %vm542_vm0, %v9930_v61, 0 }
 0xb21   : > { %v17796_v49 = vpack.c.bf16 %v18980_v42, %v18979_v3  ;;  %v17829_v9 = vand.u32 4294901760, %v9965_v48 }
 0xb24   : > { %15192 = vmatpush3.bf16.xpose.msra.mxu0 %v17776_v41 }
 0xb25   : > { %15194 = vmatprep.subr.bf16.mxu0 %v17786_v58 }
 0xb27   : > { %14972 = vmatpush3.bf16.xpose.msra.mxu1 %v17023_v21  ;;  %v18982_v21 = vand.u32 4294901760, %v17439_v12  ;;  %v10689_v12 = vld [vmem:[#allocation3 + $0x28] sm:$0xff] }
 0xb28   : > { %14974 = vmatprep.subr.bf16.mxu1 %v17041_v2 }
 0xb29   : > { %v17806_v30 = vpack.c.bf16 %v18982_v21, %v18981_v0  ;;  %v17864_v0 = vsel %vm542_vm0, %v17570_v10, 0  ;;  %v17868_v21 = vsel %vm542_vm0, %v17572_v32, 0 }
 0xb2c   : > { %15196 = vmatpush3.bf16.xpose.msra.mxu0 %v17786_v58 }
 0xb2d   : > { %15198 = vmatprep.subr.bf16.mxu0 %v17796_v49 }
 0xb2f   : > { %14976 = vmatpush3.bf16.xpose.msra.mxu1 %v17041_v2  ;;  %v18984_v2 = vand.u32 4294901760, %v17471_v59  ;;  %v10726_v59 = vsel %vm542_vm0, %v10689_v12, 0  ;;  %v18882_v12 = vand.u32 4294901760, %v17868_v21 }
 0xb30   : > { %14978 = vmatprep.subr.bf16.mxu1 %v17059_v11  ;;  %v17845_v62 = vand.u32 4294901760, %v10726_v59 }
 0xb31   : > { %v17816_v18 = vpack.c.bf16 %v18984_v2, %v18983_v46  ;;  %v10873_v2 = vand.u32 4294901760, %v10872_v27  ;;  %v17903_v27 = vsel %vm542_vm0, %v17600_v31, 0  ;;  %v18999_v31 = vld [vmem:[#allocation21_spill] sm:$0xff] }
 0xb32   : > { %v17871_v61 = vsub.f32 %v10726_v59, %v17845_v62  ;;  %v10886_v59 = vsub.f32 %v18993_v19, %v18994_v36  ;;  %v18878_v19 = vand.u32 4294901760, %v17903_v27  ;;  %v19000_v23 = vand.u32 4294901760, %v18999_v31 }
 0xb33   : > { %v19026_v38 = vand.u32 4294901760, %v17903_v27 }
 0xb34   : > { %15200 = vmatpush3.bf16.xpose.msra.mxu0 %v17796_v49  ;;  %v18869_v32 = vand.u32 4294901760, %v17871_v61 }
 0xb35   : > { %15202 = vmatprep.subr.bf16.mxu0 %v17806_v30 }
 0xb36   : > { %v10854_v13 = vsub.f32 %v17871_v61, %v18869_v32 }
 0xb37   : > { %14980 = vmatpush3.bf16.xpose.msra.mxu1 %v17059_v11  ;;  %v17827_v11 = vsel %vm542_vm0, %v17541_v52, 0  ;;  %v17843_v52 = vsub.f32 %v9965_v48, %v17829_v9  ;;  %v10012_v48 = vand.u32 4294901760, %v17864_v0 }
 0xb38   : > { %14982 = vmatprep.subr.bf16.mxu1 %v17077_v8  ;;  %v10003_v7 = vand.u32 4294901760, %v17827_v11  ;;  %v10855_v36 = vand.u32 4294901760, %v10854_v13 }
 0xb39   : > { %v18870_v42 = vand.u32 4294901760, %v17843_v52 }
 0xb3a   : > { %v17858_v3 = vpack.c.bf16 %v10006_v24, %v10003_v7 }
 0xb3b   : > { %v10086_v10 = vsub.f32 %v17843_v52, %v18870_v42 }
 0xb3c   : > { %15204 = vmatpush3.bf16.xpose.msra.mxu0 %v17806_v30 }
 0xb3d   : > { %15206 = vmatprep.subr.bf16.mxu0 %v17816_v18 }
 0xb3f   : > { %14984 = vmatpush3.bf16.xpose.msra.mxu1 %v17077_v8  ;;  %v10865_v8 = vsub.f32 %v18989_v43, %v18990_v20  ;;  %v17892_v20 = vpack.c.bf16 %v10012_v48, %v18882_v12  ;;  %v18053_v12 = vsub.f32 %v17864_v0, %v10012_v48 }
 0xb40   : > { %14986 = vmatprep.subr.bf16.mxu1 %v17108_v22 }
 0xb41   : > { %v10866_v46 = vand.u32 4294901760, %v10865_v8  ;;  %v10087_v8 = vand.u32 4294901760, %v10086_v10  ;;  %v18879_v10 = vand.u32 4294901760, %v17899_v15 }
 0xb43   : > { %v15213_v43 = vpack.c.bf16 %v10873_v2, %v10866_v46  ;;  %v10887_v2 = vand.u32 4294901760, %v10886_v59  ;;  %v17921_v59 = vpack.c.bf16 %v18879_v10, %v18878_v19 }
 0xb44   : > { %15208 = vmatpush3.bf16.xpose.msra.mxu0 %v17816_v18 }
 0xb45   : > { %15210 = vmatprep.subr.bf16.mxu0 %v17840_v54 }
 0xb47   : > { %14988 = vmatpush3.bf16.xpose.msra.mxu1 %v17108_v22  ;;  %v18996_v22 = vand.u32 4294901760, %v18995_v1 }
 0xb48   : > { %14990 = vmatprep.subr.bf16.mxu1 %v17858_v3 }
 0xb49   : > { %v10879_v55 = vsub.f32 %v18995_v1, %v18996_v22  ;;  %v18998_v1 = vand.u32 4294901760, %v18997_v26 }
 0xb4b   : > { %v10880_v46 = vand.u32 4294901760, %v10879_v55  ;;  %v10900_v22 = vsub.f32 %v18997_v26, %v18998_v1  ;;  %v17925_v55 = vsel %vm542_vm0, %v17622_v4, 0  ;;  %v19003_v4 = vld [vmem:[#allocation25_spill] sm:$0xff] }
 0xb4c   : > { %15212 = vmatpush3.bf16.xpose.msra.mxu0 %v17840_v54  ;;  %v18877_v13 = vand.u32 4294901760, %v17925_v55  ;;  %v19004_v1 = vand.u32 4294901760, %v19003_v4 }
 0xb4d   : > { %15214 = vmatprep.subr.bf16.mxu0 %v15213_v43  ;;  %v15217_v29 = vpack.c.bf16 %v10887_v2, %v10880_v46  ;;  %v19001_v2 = vld [vmem:[#allocation24_spill] sm:$0xff] }
 0xb4e   : > { %13973 = vmatmul.mubr.f32.vlgmr.msra.gmra.mrb[12].mxu1 %v17110_v17  ;;  %v10893_v17 = vsub.f32 %v18999_v31, %v19000_v23  ;;  %v10907_v31 = vsub.f32 %v19003_v4, %v19004_v1  ;;  %v19005_v4 = vld [vmem:[#allocation28_spill] sm:$0xff] }
 0xb4f   : > { %14992 = vmatpush3.bf16.xpose.msra.mxu1 %v17858_v3  ;;  %14007 = vmatprep.mubr.f32.mxu1 %v10087_v8  ;;  %v17929_v8 = vsel %vm542_vm0, %v17624_v5, 0  ;;  %v19006_v1 = vand.u32 4294901760, %v19005_v4 }
 0xb50   : > { %14994 = vmatprep.subr.bf16.mxu1 %v17892_v20  ;;  %v10894_v23 = vand.u32 4294901760, %v10893_v17  ;;  %v18874_v46 = vand.u32 4294901760, %v17929_v8  ;;  %v17949_v17 = vsel %vm542_vm0, %v17650_v63, 0  ;;  %v19007_v63 = vld [vmem:[#allocation29_spill] sm:$0xff] }
 0xb51   : > { %v10928_v32 = vsub.f32 %v19005_v4, %v19006_v1  ;;  %v19008_v42 = vand.u32 4294901760, %v19007_v63  ;;  %v17977_v4 = vsel %vm542_vm0, %v17683_v57, 0  ;;  %v19009_v1 = vld [vmem:[#allocation32_spill] sm:$0xff] }
 0xb53   : > { %14218 = vmatmul.mubr.f32.vlgmr.msra.gmra.mrb[20].mxu0 %v10855_v36  ;;  %v19002_v36 = vand.u32 4294901760, %v19001_v2  ;;  %v10921_v45 = vsub.f32 %v19007_v63, %v19008_v42  ;;  %v19010_v63 = vand.u32 4294901760, %v19009_v1 }
 0xb54   : > { %15216 = vmatpush3.bf16.xpose.msra.mxu0 %v15213_v43  ;;  %14252 = vmatprep.mubr.f32.mxu0 %v17726_v40  ;;  %v10901_v43 = vand.u32 4294901760, %v10900_v22  ;;  %v17945_v22 = vpack.c.bf16 %v18877_v13, %v18874_v46  ;;  %v19015_v13 = vld [vmem:[#allocation37_spill] sm:$0xff] }
 0xb55   : > { %15218 = vmatprep.subr.bf16.mxu0 %v15217_v29  ;;  %v10914_v26 = vsub.f32 %v19001_v2, %v19002_v36  ;;  %v17953_v2 = vsel %vm542_vm0, %v17652_v25, 0  ;;  %v10908_v36 = vand.u32 4294901760, %v10907_v31  ;;  %v17973_v31 = vsel %vm542_vm0, %v17681_v51, 0  ;;  %v19011_v51 = vld [vmem:[#allocation33_spill] sm:$0xff] }
 0xb56   : > { %v15221_v5 = vpack.c.bf16 %v10901_v43, %v10894_v23  ;;  %v18872_v43 = vand.u32 4294901760, %v17953_v2  ;;  %v10922_v42 = vand.u32 4294901760, %v10921_v45  ;;  %v19016_v19 = vand.u32 4294901760, %v19015_v13 }
 0xb57   : > { %14996 = vmatpush3.bf16.xpose.msra.mxu1 %v17892_v20  ;;  %v10915_v23 = vand.u32 4294901760, %v10914_v26 }
 0xb58   : > { %14998 = vmatprep.subr.bf16.mxu1 %v17921_v59 }
 0xb59   : > { %v15225_v25 = vpack.c.bf16 %v10915_v23, %v10908_v36  ;;  %v10929_v36 = vand.u32 4294901760, %v10928_v32  ;;  %v18875_v23 = vand.u32 4294901760, %v17977_v4  ;;  %v17997_v32 = vsel %vm542_vm0, %v17706_v14, 0 }
 0xb5b   : > { %v15229_v57 = vpack.c.bf16 %v10929_v36, %v10922_v42 }
 0xb5c   : > { %15220 = vmatpush3.bf16.xpose.msra.mxu0 %v15217_v29  ;;  %v18873_v29 = vand.u32 4294901760, %v17949_v17 }
 0xb5d   : > { %15222 = vmatprep.subr.bf16.mxu0 %v15221_v5 }
 0xb5e   : > { %v17969_v26 = vpack.c.bf16 %v18873_v29, %v18872_v43  ;;  %v10942_v43 = vsub.f32 %v19009_v1, %v19010_v63  ;;  %v19012_v29 = vand.u32 4294901760, %v19011_v51  ;;  %v18001_v1 = vsel %vm542_vm0, %v17708_v35, 0  ;;  %v9963_v63 = vpop.permute.xlu1 %9962 }
 0xb5f   : > { %15000 = vmatpush3.bf16.xpose.msra.mxu1 %v17921_v59  ;;  %v18880_v36 = vand.u32 4294901760, %v18001_v1  ;;  %v10949_v35 = vsub.f32 %v19015_v13, %v19016_v19  ;;  %v18030_v19 = vsel %vm542_vm0, %v9963_v63, 0 }
 0xb60   : > { %15002 = vmatprep.subr.bf16.mxu1 %v17945_v22  ;;  %v10935_v46 = vsub.f32 %v19011_v51, %v19012_v29  ;;  %v10943_v42 = vand.u32 4294901760, %v10942_v43  ;;  %v9961_v51 = vpop.permute.xlu0 %9960  ;;  %v18021_v43 = vsub.f32 %v17827_v11, %v10003_v7  ;;  %v19024_v0 = vand.u32 4294901760, %v18030_v19 }
 0xb62   : > { %v10936_v29 = vand.u32 4294901760, %v10935_v46  ;;  %v18016_v46 = vsub.f32 %v17823_v50, %v10006_v24  ;;  %v18033_v50 = vsel %vm542_vm0, %v9961_v51, 0  ;;  %v10950_v24 = vand.u32 4294901760, %v10949_v35  ;;  %v19017_v51 = vld [vmem:[#allocation42_spill] sm:$0xff]  ;;  %v19019_v35 = vld [vmem:[#allocation43_spill] sm:$0xff] }
 0xb64   : > { %15224 = vmatpush3.bf16.xpose.msra.mxu0 %v15221_v5  ;;  %v18876_v5 = vand.u32 4294901760, %v17973_v31  ;;  %v15233_v10 = vpack.c.bf16 %v10943_v42, %v10936_v29  ;;  %v18885_v13 = vand.u32 4294901760, %v18016_v46  ;;  %v19021_v42 = vand.u32 4294901760, %v18021_v43 }
 0xb65   : > { %15226 = vmatprep.subr.bf16.mxu0 %v15225_v25 }
 0xb66   : > { %v17993_v45 = vpack.c.bf16 %v18876_v5, %v18875_v23  ;;  %v19013_v23 = vld [vmem:[#allocation36_spill] sm:$0xff]  ;;  %v10114_v29 = vsub.f32 %v18016_v46, %v18885_v13  ;;  %v10107_v60 = vsub.f32 %v18021_v43, %v19021_v42 }
 0xb67   : > { %15004 = vmatpush3.bf16.xpose.msra.mxu1 %v17945_v22  ;;  %v19014_v5 = vand.u32 4294901760, %v19013_v23 }
 0xb68   : > { %15006 = vmatprep.subr.bf16.mxu1 %v17969_v26 }
 0xb69   : > { %v10956_v14 = vsub.f32 %v19013_v23, %v19014_v5  ;;  %v9931_v23 = vld [vmem:[#allocation3 + $0x18] sm:$0xff] }
 0xb6a   : > { %v9968_v7 = vsel %vm542_vm0, %v9931_v23, 0 }
 0xb6b   : > { %v10957_v11 = vand.u32 4294901760, %v10956_v14  ;;  %v18042_v63 = vand.u32 4294901760, %v9968_v7  ;;  %v19020_v14 = vand.u32 4294901760, %v19019_v35 }
 0xb6c   : > { %15228 = vmatpush3.bf16.xpose.msra.mxu0 %v15225_v25  ;;  %v18881_v25 = vand.u32 4294901760, %v17997_v32 }
 0xb6d   : > { %15230 = vmatprep.subr.bf16.mxu0 %v15229_v57  ;;  %v10963_v23 = vsub.f32 %v19019_v35, %v19020_v14  ;;  %v19023_v35 = vand.u32 4294901760, %v18033_v50  ;;  %v18075_v42 = vsub.f32 %v9968_v7, %v18042_v63  ;;  %v19025_v7 = vand.u32 4294901760, %v17899_v15 }
 0xb6e   : > { %v18027_v5 = vpack.c.bf16 %v18881_v25, %v18880_v36  ;;  %v19018_v36 = vand.u32 4294901760, %v19017_v51 }
 0xb6f   : > { %15008 = vmatpush3.bf16.xpose.msra.mxu1 %v17969_v26  ;;  %v18070_v48 = vpack.c.bf16 %v19024_v0, %v19023_v35  ;;  %v18890_v13 = vand.u32 4294901760, %v18075_v42 }
 0xb70   : > { %15010 = vmatprep.subr.bf16.mxu1 %v17993_v45  ;;  %v10970_v25 = vsub.f32 %v19017_v51, %v19018_v36  ;;  %v19022_v36 = vand.u32 4294901760, %v17868_v21 }
 0xb72   : > { %v18064_v51 = vsub.f32 %v17868_v21, %v19022_v36  ;;  %v10971_v14 = vand.u32 4294901760, %v10970_v25  ;;  %v10115_v36 = vand.u32 4294901760, %v10114_v29 }
 0xb74   : > { %15232 = vmatpush3.bf16.xpose.msra.mxu0 %v15229_v57  ;;  %v15237_v57 = vpack.c.bf16 %v10957_v11, %v10950_v24  ;;  %v18888_v24 = vand.u32 4294901760, %v18053_v12  ;;  %v10964_v11 = vand.u32 4294901760, %v10963_v23  ;;  %v18889_v21 = vand.u32 4294901760, %v18064_v51 }
 0xb75   : > { %15234 = vmatprep.subr.bf16.mxu0 %v15233_v10  ;;  %v18089_v23 = vsub.f32 %v17899_v15, %v19025_v7 }
 0xb76   : > { %v10128_v35 = vsub.f32 %v18053_v12, %v18888_v24  ;;  %v15241_v0 = vpack.c.bf16 %v10971_v14, %v10964_v11  ;;  %v10121_v25 = vsub.f32 %v18064_v51, %v18889_v21  ;;  %v10096_v11 = vsub.f32 %v18075_v42, %v18890_v13 }
 0xb77   : > { %15012 = vmatpush3.bf16.xpose.msra.mxu1 %v17993_v45  ;;  %v18891_v14 = vand.u32 4294901760, %v18089_v23  ;;  %v19027_v21 = vand.u32 4294901760, %v17925_v55 }
 0xb78   : > { %15014 = vmatprep.subr.bf16.mxu1 %v18027_v5  ;;  %v10122_v15 = vand.u32 4294901760, %v10121_v25  ;;  %v10129_v7 = vand.u32 4294901760, %v10128_v35  ;;  %v19029_v25 = vld [vmem:[#allocation14_spill] sm:$0xff] }
 0xb7a   : > { %v15025_v35 = vpack.c.bf16 %v10129_v7, %v10122_v15  ;;  %v19031_v7 = vand.u32 4294901760, %v17953_v2 }
 0xb7c   : > { %15236 = vmatpush3.bf16.xpose.msra.mxu0 %v15233_v10  ;;  %v10108_v10 = vand.u32 4294901760, %v10107_v60  ;;  %v18094_v60 = vsub.f32 %v17903_v27, %v19026_v38  ;;  %v18105_v38 = vsub.f32 %v17925_v55, %v19027_v21  ;;  %v10097_v27 = vand.u32 4294901760, %v10096_v11 }
 0xb7d   : > { %15238 = vmatprep.subr.bf16.mxu0 %v15237_v57 }
 0xb7e   : > { %v15021_v29 = vpack.c.bf16 %v10115_v36, %v10108_v10  ;;  %v18896_v24 = vand.u32 4294901760, %v18094_v60  ;;  %v19028_v36 = vand.u32 4294901760, %v17929_v8  ;;  %v18892_v55 = vand.u32 4294901760, %v18105_v38 }
 0xb7f   : > { %15016 = vmatpush3.bf16.xpose.msra.mxu1 %v18027_v5 }
 0xb80   : > { %15018 = vmatprep.subr.bf16.mxu1 %v18070_v48  ;;  %v10135_v10 = vsub.f32 %v18094_v60, %v18896_v24  ;;  %v18116_v13 = vsub.f32 %v17929_v8, %v19028_v36  ;;  %v10156_v8 = vsub.f32 %v18105_v38, %v18892_v55 }
 0xb82   : > { %v18895_v21 = vand.u32 4294901760, %v18116_v13  ;;  %v10136_v11 = vand.u32 4294901760, %v10135_v10  ;;  %v19032_v10 = vld [vmem:[#allocation18_spill] sm:$0xff]  ;;  %v10157_v55 = vand.u32 4294901760, %v10156_v8 }
 0xb84   : > { %15240 = vmatpush3.bf16.xpose.msra.mxu0 %v15237_v57  ;;  %v10142_v57 = vsub.f32 %v18089_v23, %v18891_v14 }
 0xb85   : > { %15242 = vmatprep.subr.bf16.mxu0 %v15241_v0 }
 0xb86   : > { %v10143_v14 = vand.u32 4294901760, %v10142_v57 }
 0xb87   : > { %15020 = vmatpush3.bf16.xpose.msra.mxu1 %v18070_v48 }
 0xb88   : > { %15022 = vmatprep.subr.bf16.mxu1 %v15021_v29  ;;  %v15029_v57 = vpack.c.bf16 %v10143_v14, %v10136_v11  ;;  %v19033_v14 = vand.u32 4294901760, %v17973_v31 }
 0xb8a   : > { %v18153_v11 = vsub.f32 %v17973_v31, %v19033_v14  ;;  %v19036_v31 = vand.u32 4294901760, %v17997_v32 }
 0xb8c   : > { %15244 = vmatpush3.bf16.xpose.msra.mxu0 %v15241_v0  ;;  %v19030_v0 = vand.u32 4294901760, %v17949_v17  ;;  %v18167_v14 = vsub.f32 %v17997_v32, %v19036_v31 }
 0xb8d   : > { %15246 = vmatprep.subr.bf16.mxu0 %v19029_v25 }
 0xb8e   : > { %14008 = vmatmul.mubr.f32.vlgmr.msra.gmra.mrb[12].mxu1 %v10097_v27  ;;  %v18128_v15 = vsub.f32 %v17949_v17, %v19030_v0  ;;  %v18137_v27 = vsub.f32 %v17953_v2, %v19031_v7  ;;  %v18898_v32 = vand.u32 4294901760, %v18167_v14 }
 0xb8f   : > { %15024 = vmatpush3.bf16.xpose.msra.mxu1 %v15021_v29  ;;  %14042 = vmatprep.mubr.f32.mxu1 %v17829_v9  ;;  %v10149_v29 = vsub.f32 %v18116_v13, %v18895_v21 }
 0xb90   : > { %15026 = vmatprep.subr.bf16.mxu1 %v15025_v35  ;;  %v18893_v17 = vand.u32 4294901760, %v18128_v15  ;;  %v18894_v36 = vand.u32 4294901760, %v18137_v27 }
 0xb91   : > { %v10150_v0 = vand.u32 4294901760, %v10149_v29  ;;  %v19035_v29 = vld [vmem:[#allocation22_spill] sm:$0xff] }
 0xb92   : > { %v10170_v2 = vsub.f32 %v18128_v15, %v18893_v17  ;;  %v18897_v17 = vand.u32 4294901760, %v18153_v11 }
 0xb93   : > { %14253 = vmatmul.mubr.f32.vlgmr.msra.gmra.mrb[20].mxu0 %v17845_v62  ;;  %v15033_v8 = vpack.c.bf16 %v10157_v55, %v10150_v0 }
 0xb94   : > { %15248 = vmatpush3.bf16.xpose.msra.mxu0 %v19029_v25  ;;  %14287 = vmatprep.mubr.f32.mxu0 %v17740_v28  ;;  %v10163_v25 = vsub.f32 %v18137_v27, %v18894_v36  ;;  %v10171_v24 = vand.u32 4294901760, %v10170_v2  ;;  %v19038_v2 = vld [vmem:[#allocation26_spill] sm:$0xff] }
 0xb95   : > { %15250 = vmatprep.subr.bf16.mxu0 %v19032_v10 }
 0xb96   : > { %v10164_v21 = vand.u32 4294901760, %v10163_v25 }
 0xb97   : > { %15028 = vmatpush3.bf16.xpose.msra.mxu1 %v15025_v35  ;;  %v19034_v35 = vand.u32 4294901760, %v17977_v4 }
 0xb98   : > { %15030 = vmatprep.subr.bf16.mxu1 %v15029_v57  ;;  %v15037_v0 = vpack.c.bf16 %v10171_v24, %v10164_v21  ;;  %v19039_v24 = vand.u32 4294901760, %v18030_v19 }
 0xb99   : > { %v18158_v7 = vsub.f32 %v17977_v4, %v19034_v35  ;;  %v10184_v4 = vsub.f32 %v18153_v11, %v18897_v17  ;;  %v10198_v17 = vsub.f32 %v18167_v14, %v18898_v32 }
 0xb9a   : > { %v18193_v21 = vsub.f32 %v18030_v19, %v19039_v24  ;;  %v15053_v24 = vpack.c.bf16 %v18016_v46, %v18021_v43 }
 0xb9b   : > { %v18900_v36 = vand.u32 4294901760, %v18158_v7  ;;  %v10185_v31 = vand.u32 4294901760, %v10184_v4 }
 0xb9c   : > { %15252 = vmatpush3.bf16.xpose.msra.mxu0 %v19032_v10 }
 0xb9d   : > { %15254 = vmatprep.subr.bf16.mxu0 %v19035_v29  ;;  %v10177_v55 = vsub.f32 %v18158_v7, %v18900_v36  ;;  %v10199_v36 = vand.u32 4294901760, %v10198_v17 }
 0xb9f   : > { %15032 = vmatpush3.bf16.xpose.msra.mxu1 %v15029_v57  ;;  %v19037_v57 = vand.u32 4294901760, %v18001_v1  ;;  %v10178_v35 = vand.u32 4294901760, %v10177_v55  ;;  %v19041_v55 = vld [vmem:[#allocation30_spill] sm:$0xff] }
 0xba0   : > { %15034 = vmatprep.subr.bf16.mxu1 %v15033_v8 }
 0xba1   : > { %v18178_v10 = vsub.f32 %v18001_v1, %v19037_v57  ;;  %v15041_v4 = vpack.c.bf16 %v10185_v31, %v10178_v35  ;;  %v10211_v57 = vand.u32 4294901760, %v18193_v21  ;;  %v19042_v35 = vld [vmem:[#allocation34_spill] sm:$0xff] }
 0xba3   : > { %v18899_v25 = vand.u32 4294901760, %v18178_v10  ;;  %v10212_v19 = vsub.f32 %v18193_v21, %v10211_v57 }
 0xba4   : > { %15256 = vmatpush3.bf16.xpose.msra.mxu0 %v19035_v29 }
 0xba5   : > { %15258 = vmatprep.subr.bf16.mxu0 %v19038_v2  ;;  %v10191_v1 = vsub.f32 %v18178_v10, %v18899_v25  ;;  %v10213_v31 = vand.u32 4294901760, %v10212_v19  ;;  %v8648_v19 = vld [vmem:[#allocation3 + $0x38] sm:$0xff] }
 0xba7   : > { %15036 = vmatpush3.bf16.xpose.msra.mxu1 %v15033_v8  ;;  %v19040_v8 = vand.u32 4294901760, %v18033_v50  ;;  %v10192_v25 = vand.u32 4294901760, %v10191_v1  ;;  %v19043_v1 = vld [vmem:[#allocation40_spill] sm:$0xff] }
 0xba8   : > { %15038 = vmatprep.subr.bf16.mxu1 %v15037_v0 }
 0xba9   : > { %v18198_v29 = vsub.f32 %v18033_v50, %v19040_v8  ;;  %v19044_v8 = vld [vmem:[#allocation44_spill] sm:$0xff] }
 0xbab   : > { %v10204_v32 = vand.u32 4294901760, %v18198_v29 }
 0xbac   : > { %15260 = vmatpush3.bf16.xpose.msra.mxu0 %v19038_v2  ;;  %v15045_v2 = vpack.c.bf16 %v10199_v36, %v10192_v25  ;;  %v15057_v36 = vpack.c.bf16 %v18053_v12, %v18064_v51  ;;  %v19045_v25 = vand.u32 4294901760, %v17740_v28  ;;  %v8647_v28 = vld [vmem:[#allocation3 + $0x30] sm:$0xff] }
 0xbad   : > { %15262 = vmatprep.subr.bf16.mxu0 %v19041_v55  ;;  %v10205_v50 = vsub.f32 %v18198_v29, %v10204_v32 }
 0xbaf   : > { %15040 = vmatpush3.bf16.xpose.msra.mxu1 %v15037_v0  ;;  %v10206_v0 = vand.u32 4294901760, %v10205_v50  ;;  %v15069_v50 = vpack.c.bf16 %v18128_v15, %v18137_v27 }
 0xbb0   : > { %15042 = vmatprep.subr.bf16.mxu1 %v15041_v4 }
 0xbb1   : > { %v15049_v17 = vpack.c.bf16 %v10213_v31, %v10206_v0 }
 0xbb4   : > { %15264 = vmatpush3.bf16.xpose.msra.mxu0 %v19041_v55  ;;  %v15065_v55 = vpack.c.bf16 %v18105_v38, %v18116_v13 }
 0xbb5   : > { %15266 = vmatprep.subr.bf16.mxu0 %v19042_v35 }
 0xbb7   : > { %15044 = vmatpush3.bf16.xpose.msra.mxu1 %v15041_v4  ;;  %v15061_v4 = vpack.c.bf16 %v18089_v23, %v18094_v60 }
 0xbb8   : > { %15046 = vmatprep.subr.bf16.mxu1 %v15045_v2 }
 0xbbc   : > { %15268 = vmatpush3.bf16.xpose.msra.mxu0 %v19042_v35 }
 0xbbd   : > { %15270 = vmatprep.subr.bf16.mxu0 %v19043_v1 }
 0xbbf   : > { %15048 = vmatpush3.bf16.xpose.msra.mxu1 %v15045_v2 }
 0xbc0   : > { %15050 = vmatprep.subr.bf16.mxu1 %v15049_v17 }
 0xbc4   : > { %15272 = vmatpush3.bf16.xpose.msra.mxu0 %v19043_v1  ;;  %v15077_v1 = vpack.c.bf16 %v18167_v14, %v18178_v10 }
 0xbc5   : > { %15274 = vmatprep.subr.bf16.mxu0 %v19044_v8 }
 0xbc7   : > { %15052 = vmatpush3.bf16.xpose.msra.mxu1 %v15049_v17  ;;  %v15073_v17 = vpack.c.bf16 %v18153_v11, %v18158_v7 }
 0xbc8   : > { %15054 = vmatprep.subr.bf16.mxu1 %v15053_v24 }
 0xbcc   : > { %15276 = vmatpush3.bf16.xpose.msra.mxu0 %v19044_v8  ;;  %v19046_v8 = vld [vmem:[#allocation15_spill] sm:$0xff] }
 0xbcd   : > { %15278 = vmatprep.subr.bf16.mxu0 %v17746_v33 }
 0xbce   : > { %14043 = vmatmul.mubr.f32.vlgmr.msra.gmra.mrb[12].mxu1 %v18042_v63 }
 0xbcf   : > { %15056 = vmatpush3.bf16.xpose.msra.mxu1 %v15053_v24  ;;  %14077 = vmatprep.mubr.f32.mxu1 %v17843_v52  ;;  %v15081_v24 = vpack.c.bf16 %v18193_v21, %v18198_v29 }
 0xbd0   : > { %15058 = vmatprep.subr.bf16.mxu1 %v15057_v36 }
 0xbd3   : > { %14288 = vmatmul.mubr.f32.vlgmr.msra.gmra.mrb[20].mxu0 %v17871_v61 }
 0xbd4   : > { %15280 = vmatpush3.bf16.xpose.msra.mxu0 %v17746_v33  ;;  %14322 = vmatprep.mubr.f32.mxu0 %v19045_v25  ;;  %v19048_v25 = vand.u32 4294901760, %v17871_v61  ;;  %v19052_v61 = vld [vmem:[#allocation31_spill] sm:$0xff] }
 0xbd5   : > { %15282 = vmatprep.subr.bf16.mxu0 %v17765_v34 }
 0xbd7   : > { %15060 = vmatpush3.bf16.xpose.msra.mxu1 %v15057_v36  ;;  %v19047_v36 = vand.u32 4294901760, %v17843_v52  ;;  %v19051_v52 = vld [vmem:[#allocation27_spill] sm:$0xff] }
 0xbd8   : > { %15062 = vmatprep.subr.bf16.mxu1 %v15061_v4 }
 0xbdc   : > { %15284 = vmatpush3.bf16.xpose.msra.mxu0 %v17765_v34 }
 0xbdd   : > { %15286 = vmatprep.subr.bf16.mxu0 %v17776_v41 }
 0xbdf   : > { %15064 = vmatpush3.bf16.xpose.msra.mxu1 %v15061_v4  ;;  %v19049_v4 = vld [vmem:[#allocation19_spill] sm:$0xff] }
 0xbe0   : > { %15066 = vmatprep.subr.bf16.mxu1 %v15065_v55 }
 0xbe4   : > { %15288 = vmatpush3.bf16.xpose.msra.mxu0 %v17776_v41 }
 0xbe5   : > { %15290 = vmatprep.subr.bf16.mxu0 %v17786_v58  ;;  %v13764_v2 = vpop.f32.mrb[18].mxu0 }
 0xbe6   : > { %v9164_v35 = vadd.f32 %v13764_v2, %v8648_v19  ;;  %v9153_v0 = vpop.f32.mrb[19].mxu0  ;;  %v19053_v19 = vld [vmem:[#allocation35_spill] sm:$0xff]  ;;  %v11477_v2 = vpop.permute.xlu0 %11476 }
 0xbe7   : > { %v9163_v31 = vadd.f32 %v9153_v0, %v8647_v28  ;;  %15068 = vmatpush3.bf16.xpose.msra.mxu1 %v15065_v55  ;;  %v19050_v55 = vld [vmem:[#allocation23_spill] sm:$0xff]  ;;  %v19054_v28 = vld [vmem:[#allocation41_spill] sm:$0xff]  ;;  %v18294_v0 = vsel %vm542_vm0, %v11477_v2, 0 }
 0xbe8   : > { %9166 = vst.msk [vmem:[#allocation3 + $0x38] sm:$0xff] %vm542_vm0, %v9164_v35  ;;  %15070 = vmatprep.subr.bf16.mxu1 %v15069_v50 }
 0xbe9   : > { %9165 = vst.msk [vmem:[#allocation3 + $0x30] sm:$0xff] %vm542_vm0, %v9163_v31 }
 0xbec   : > { %15292 = vmatpush3.bf16.xpose.msra.mxu0 %v17786_v58 }
 0xbed   : > { %15294 = vmatprep.subr.bf16.mxu0 %v17796_v49 }
 0xbef   : > { %15072 = vmatpush3.bf16.xpose.msra.mxu1 %v15069_v50  ;;  %v11479_v50 = vpop.permute.xlu1 %11478 }
 0xbf0   : > { %15074 = vmatprep.subr.bf16.mxu1 %v15073_v17  ;;  %v18291_v35 = vsel %vm542_vm0, %v11479_v50, 0  ;;  %v19060_v50 = vand.u32 4294901760, %v18075_v42 }
 0xbf1   : > { %v11564_v31 = vand.u32 4294901760, %v18291_v35 }
 0xbf4   : > { %15296 = vmatpush3.bf16.xpose.msra.mxu0 %v17796_v49 }
 0xbf5   : > { %15298 = vmatprep.subr.bf16.mxu0 %v17806_v30 }
 0xbf7   : > { %15076 = vmatpush3.bf16.xpose.msra.mxu1 %v15073_v17  ;;  %v11561_v17 = vand.u32 4294901760, %v18294_v0 }
 0xbf8   : > { %15078 = vmatprep.subr.bf16.mxu1 %v15077_v1 }
 0xbf9   : > { %v18435_v29 = vpack.c.bf16 %v11564_v31, %v11561_v17 }
 0xbfc   : > { %15300 = vmatpush3.bf16.xpose.msra.mxu0 %v17806_v30 }
 0xbfd   : > { %15302 = vmatprep.subr.bf16.mxu0 %v17816_v18 }
 0xbff   : > { %15080 = vmatpush3.bf16.xpose.msra.mxu1 %v15077_v1  ;;  %v19055_v1 = vand.u32 4294901760, %v18021_v43 }
 0xc00   : > { %15082 = vmatprep.subr.bf16.mxu1 %v15081_v24 }
 0xc04   : > { %15304 = vmatpush3.bf16.xpose.msra.mxu0 %v17816_v18 }
 0xc05   : > { %15306 = vmatprep.subr.bf16.mxu0 %v17840_v54 }
 0xc07   : > { %15084 = vmatpush3.bf16.xpose.msra.mxu1 %v15081_v24  ;;  %v19056_v24 = vand.u32 4294901760, %v18016_v46 }
 0xc08   : > { %15086 = vmatprep.subr.bf16.mxu1 %v17858_v3 }
 0xc0c   : > { %15308 = vmatpush3.bf16.xpose.msra.mxu0 %v17840_v54 }
 0xc0d   : > { %15310 = vmatprep.subr.bf16.mxu0 %v19046_v8 }
 0xc0e   : > { %14078 = vmatmul.mubr.f32.vlgmr.msra.gmra.mrb[12].mxu1 %v18075_v42  ;;  %v19063_v42 = vand.u32 4294901760, %v18116_v13  ;;  %v19068_v13 = vand.u32 4294901760, %v18153_v11 }
 0xc0f   : > { %15088 = vmatpush3.bf16.xpose.msra.mxu1 %v17858_v3  ;;  %14112 = vmatprep.mubr.f32.mxu1 %v19047_v36  ;;  %v19057_v36 = vld [vmem:[#allocation45_spill] sm:$0xff] }
 0xc10   : > { %15090 = vmatprep.subr.bf16.mxu1 %v17892_v20 }
 0xc13   : > { %14323 = vmatmul.mubr.f32.vlgmr.msra.gmra.mrb[20].mxu0 %v19048_v25  ;;  %v18307_v25 = vsub.f32 %v18291_v35, %v11564_v31 }
 0xc14   : > { %15312 = vmatpush3.bf16.xpose.msra.mxu0 %v19046_v8  ;;  %14357 = vmatprep.mubr.f32.mxu0 %v17726_v40  ;;  %v15117_v8 = vpack.c.bf16 %v19056_v24, %v19055_v1  ;;  %v19064_v1 = vand.u32 4294901760, %v18105_v38  ;;  %v19070_v38 = vand.u32 4294901760, %v18167_v14  ;;  %v19071_v14 = vld [vmem:[#allocation48_spill] sm:$0xff] }
 0xc15   : > { %15314 = vmatprep.subr.bf16.mxu0 %v19049_v4  ;;  %v11727_v43 = vand.u32 4294901760, %v18307_v25 }
 0xc16   : > { %v15129_v24 = vpack.c.bf16 %v19064_v1, %v19063_v42 }
 0xc17   : > { %15092 = vmatpush3.bf16.xpose.msra.mxu1 %v17892_v20 }
 0xc18   : > { %15094 = vmatprep.subr.bf16.mxu1 %v17921_v59 }
 0xc1c   : > { %15316 = vmatpush3.bf16.xpose.msra.mxu0 %v19049_v4  ;;  %v18312_v4 = vsub.f32 %v18294_v0, %v11561_v17  ;;  %v19079_v0 = vld [vmem:[#allocation50_spill] sm:$0xff] }
 0xc1d   : > { %15318 = vmatprep.subr.bf16.mxu0 %v19050_v55 }
 0xc1e   : > { %v11720_v46 = vand.u32 4294901760, %v18312_v4 }
 0xc1f   : > { %15096 = vmatpush3.bf16.xpose.msra.mxu1 %v17921_v59 }
 0xc20   : > { %15098 = vmatprep.subr.bf16.mxu1 %v17945_v22 }
 0xc24   : > { %15320 = vmatpush3.bf16.xpose.msra.mxu0 %v19050_v55  ;;  %v18319_v55 = vpack.c.bf16 %v18307_v25, %v18312_v4 }
 0xc25   : > { %15322 = vmatprep.subr.bf16.mxu0 %v19051_v52 }
 0xc27   : > { %15100 = vmatpush3.bf16.xpose.msra.mxu1 %v17945_v22 }
 0xc28   : > { %15102 = vmatprep.subr.bf16.mxu1 %v17969_v26 }
 0xc2c   : > { %15324 = vmatpush3.bf16.xpose.msra.mxu0 %v19051_v52  ;;  %v18325_v52 = vpack.c.bf16 %v11727_v43, %v11720_v46 }
 0xc2d   : > { %15326 = vmatprep.subr.bf16.mxu0 %v19052_v61 }
 0xc2f   : > { %15104 = vmatpush3.bf16.xpose.msra.mxu1 %v17969_v26 }
 0xc30   : > { %15106 = vmatprep.subr.bf16.mxu1 %v17993_v45 }
 0xc34   : > { %15328 = vmatpush3.bf16.xpose.msra.mxu0 %v19052_v61  ;;  %v19058_v61 = vand.u32 4294901760, %v18064_v51  ;;  %v19061_v51 = vand.u32 4294901760, %v18094_v60 }
 0xc35   : > { %15330 = vmatprep.subr.bf16.mxu0 %v19053_v19 }
 0xc37   : > { %15108 = vmatpush3.bf16.xpose.msra.mxu1 %v17993_v45 }
 0xc38   : > { %15110 = vmatprep.subr.bf16.mxu1 %v18027_v5 }
 0xc3c   : > { %15332 = vmatpush3.bf16.xpose.msra.mxu0 %v19053_v19  ;;  %v19059_v19 = vand.u32 4294901760, %v18053_v12  ;;  %v19062_v12 = vand.u32 4294901760, %v18089_v23 }
 0xc3d   : > { %15334 = vmatprep.subr.bf16.mxu0 %v19054_v28 }
 0xc3e   : > { %v15125_v2 = vpack.c.bf16 %v19062_v12, %v19061_v51 }
 0xc3f   : > { %15112 = vmatpush3.bf16.xpose.msra.mxu1 %v18027_v5 }
 0xc40   : > { %15114 = vmatprep.subr.bf16.mxu1 %v18070_v48 }
 0xc44   : > { %15336 = vmatpush3.bf16.xpose.msra.mxu0 %v19054_v28  ;;  %v15121_v28 = vpack.c.bf16 %v19059_v19, %v19058_v61 }
 0xc45   : > { %15338 = vmatprep.subr.bf16.mxu0 %v19057_v36 }
 0xc47   : > { %15116 = vmatpush3.bf16.xpose.msra.mxu1 %v18070_v48 }
 0xc48   : > { %15118 = vmatprep.subr.bf16.mxu1 %v15117_v8 }
 0xc4c   : > { %15340 = vmatpush3.bf16.xpose.msra.mxu0 %v19057_v36 }
 0xc4d   : > { %15342 = vmatprep.subr.bf16.mxu0 %v17746_v33 }
 0xc4e   : > { %14113 = vmatmul.mubr.f32.vlgmr.msra.gmra.mrb[12].mxu1 %v19060_v50 }
 0xc4f   : > { %15120 = vmatpush3.bf16.xpose.msra.mxu1 %v15117_v8  ;;  %14147 = vmatprep.mubr.f32.mxu1 %v17829_v9  ;;  %v19077_v8 = vld [vmem:[#allocation49_spill] sm:$0xff] }
 0xc50   : > { %15122 = vmatprep.subr.bf16.mxu1 %v15121_v28  ;;  %v19078_v36 = vand.u32 4294901760, %v19077_v8 }
 0xc52   : > { %v18442_v61 = vsub.f32 %v19077_v8, %v19078_v36 }
 0xc53   : > { %14358 = vmatmul.mubr.f32.vlgmr.msra.gmra.mrb[20].mxu0 %v17845_v62 }
 0xc54   : > { %15344 = vmatpush3.bf16.xpose.msra.mxu0 %v17746_v33  ;;  %14392 = vmatprep.mubr.f32.mxu0 %v17726_v40  ;;  %v19065_v40 = vand.u32 4294901760, %v18137_v27  ;;  %v19066_v33 = vand.u32 4294901760, %v18128_v15  ;;  %v11446_v27 = vld [vmem:[#allocation3 + $0x30] sm:$0xff]  ;;  %v11643_v17 = vand.u32 4294901760, %v18442_v61 }
 0xc55   : > { %15346 = vmatprep.subr.bf16.mxu0 %v17765_v34 }
 0xc56   : > { %v15133_v23 = vpack.c.bf16 %v19066_v33, %v19065_v40  ;;  %v11644_v42 = vsub.f32 %v18442_v61, %v11643_v17  ;;  %v19082_v33 = vand.u32 4294901760, %v17616_v44 }
 0xc57   : > { %15124 = vmatpush3.bf16.xpose.msra.mxu1 %v15121_v28  ;;  %v19080_v28 = vand.u32 4294901760, %v19079_v0 }
 0xc58   : > { %15126 = vmatprep.subr.bf16.mxu1 %v15125_v2 }
 0xc59   : > { %v18453_v35 = vsub.f32 %v19079_v0, %v19080_v28 }
 0xc5b   : > { %v11636_v50 = vand.u32 4294901760, %v18453_v35 }
 0xc5c   : > { %15348 = vmatpush3.bf16.xpose.msra.mxu0 %v17765_v34  ;;  %v19067_v34 = vand.u32 4294901760, %v18158_v7 }
 0xc5d   : > { %15350 = vmatprep.subr.bf16.mxu0 %v17776_v41  ;;  %v11637_v1 = vsub.f32 %v18453_v35, %v11636_v50 }
 0xc5e   : > { %v15137_v60 = vpack.c.bf16 %v19068_v13, %v19067_v34 }
 0xc5f   : > { %15128 = vmatpush3.bf16.xpose.msra.mxu1 %v15125_v2 }
 0xc60   : > { %15130 = vmatprep.subr.bf16.mxu1 %v15129_v24 }
 0xc64   : > { %15352 = vmatpush3.bf16.xpose.msra.mxu0 %v17776_v41  ;;  %v19069_v41 = vand.u32 4294901760, %v18178_v10 }
 0xc65   : > { %15354 = vmatprep.subr.bf16.mxu0 %v17786_v58 }
 0xc66   : > { %v15141_v15 = vpack.c.bf16 %v19070_v38, %v19069_v41  ;;  %v11645_v41 = vand.u32 4294901760, %v11644_v42 }
 0xc67   : > { %15132 = vmatpush3.bf16.xpose.msra.mxu1 %v15129_v24  ;;  %v19081_v24 = vand.u32 4294901760, %v17613_v53 }
 0xc68   : > { %15134 = vmatprep.subr.bf16.mxu1 %v15133_v23 }
 0xc69   : > { %v18473_v40 = vsub.f32 %v17613_v53, %v19081_v24  ;;  %v19090_v24 = vld [vmem:[#allocation55_spill] sm:$0xff] }
 0xc6b   : > { %v11657_v13 = vand.u32 4294901760, %v18473_v40 }
 0xc6c   : > { %15356 = vmatpush3.bf16.xpose.msra.mxu0 %v17786_v58  ;;  %v15145_v58 = vpack.c.bf16 %v10211_v57, %v10204_v32 }
 0xc6d   : > { %15358 = vmatprep.subr.bf16.mxu0 %v17796_v49 }
 0xc6f   : > { %15136 = vmatpush3.bf16.xpose.msra.mxu1 %v15133_v23 }
 0xc70   : > { %15138 = vmatprep.subr.bf16.mxu1 %v15137_v60 }
 0xc74   : > { %15360 = vmatpush3.bf16.xpose.msra.mxu0 %v17796_v49  ;;  %v11481_v49 = vsel %vm542_vm0, %v11446_v27, 0  ;;  %v19084_v27 = vld [vmem:[#allocation52_spill] sm:$0xff] }
 0xc75   : > { %15362 = vmatprep.subr.bf16.mxu0 %v17806_v30  ;;  %v18375_v11 = vand.u32 4294901760, %v11481_v49 }
 0xc77   : > { %15140 = vmatpush3.bf16.xpose.msra.mxu1 %v15137_v60  ;;  %v11638_v60 = vand.u32 4294901760, %v11637_v1 }
 0xc78   : > { %15142 = vmatprep.subr.bf16.mxu1 %v15141_v15 }
 0xc7c   : > { %15364 = vmatpush3.bf16.xpose.msra.mxu0 %v17806_v30  ;;  %v18380_v30 = vsub.f32 %v11481_v49, %v18375_v11  ;;  %v19085_v49 = vand.u32 4294901760, %v19084_v27 }
 0xc7d   : > { %15366 = vmatprep.subr.bf16.mxu0 %v17816_v18 }
 0xc7e   : > { %v11601_v7 = vand.u32 4294901760, %v18380_v30 }
 0xc7f   : > { %15144 = vmatpush3.bf16.xpose.msra.mxu1 %v15141_v15 }
 0xc80   : > { %15146 = vmatprep.subr.bf16.mxu1 %v15145_v58 }
 0xc84   : > { %15368 = vmatpush3.bf16.xpose.msra.mxu0 %v17816_v18  ;;  %v11602_v18 = vsub.f32 %v18380_v30, %v11601_v7 }
 0xc85   : > { %15370 = vmatprep.subr.bf16.mxu0 %v17840_v54 }
 0xc86   : > { %v11603_v10 = vand.u32 4294901760, %v11602_v18  ;;  %v18501_v18 = vsub.f32 %v19084_v27, %v19085_v49 }
 0xc87   : > { %15148 = vmatpush3.bf16.xpose.msra.mxu1 %v15145_v58  ;;  %v11658_v58 = vsub.f32 %v18473_v40, %v11657_v13 }
 0xc88   : > { %15150 = vmatprep.subr.bf16.mxu1 %v17858_v3 }
 0xc8c   : > { %15372 = vmatpush3.bf16.xpose.msra.mxu0 %v17840_v54  ;;  %v19072_v54 = vld [vmem:[#allocation51_spill] sm:$0xff] }
 0xc8d   : > { %15374 = vmatprep.subr.bf16.mxu0 %v19071_v14 }
 0xc8e   : > { %14148 = vmatmul.mubr.f32.vlgmr.msra.gmra.mrb[12].mxu1 %v18042_v63 }
 0xc8f   : > { %15152 = vmatpush3.bf16.xpose.msra.mxu1 %v17858_v3  ;;  %14182 = vmatprep.mubr.f32.mxu1 %v17829_v9  ;;  %v19073_v9 = vld [vmem:[#allocation46_spill] sm:$0xff] }
 0xc90   : > { %15154 = vmatprep.subr.bf16.mxu1 %v17892_v20 }
 0xc93   : > { %14393 = vmatmul.mubr.f32.vlgmr.msra.gmra.mrb[20].mxu0 %v17845_v62  ;;  %v19074_v62 = vand.u32 4294901760, %v19073_v9 }
 0xc94   : > { %15376 = vmatpush3.bf16.xpose.msra.mxu0 %v19071_v14  ;;  %14427 = vmatprep.mubr.f32.mxu0 %v11603_v10  ;;  %v15409_v10 = vpack.c.bf16 %v11645_v41, %v11638_v60  ;;  %v19092_v41 = vld [vmem:[#allocation56_spill] sm:$0xff] }
 0xc95   : > { %15378 = vmatprep.subr.bf16.mxu0 %v19072_v54  ;;  %v18417_v3 = vsub.f32 %v19073_v9, %v19074_v62  ;;  %v11664_v9 = vand.u32 4294901760, %v18501_v18 }
 0xc97   : > { %15156 = vmatpush3.bf16.xpose.msra.mxu1 %v17892_v20  ;;  %v19075_v20 = vld [vmem:[#allocation47_spill] sm:$0xff] }
 0xc98   : > { %15158 = vmatprep.subr.bf16.mxu1 %v17921_v59 }
 0xc9c   : > { %15380 = vmatpush3.bf16.xpose.msra.mxu0 %v19072_v54 }
 0xc9d   : > { %15382 = vmatprep.subr.bf16.mxu0 %v17637_v56 }
 0xc9f   : > { %15160 = vmatpush3.bf16.xpose.msra.mxu1 %v17921_v59  ;;  %v19076_v59 = vand.u32 4294901760, %v19075_v20 }
 0xca0   : > { %15162 = vmatprep.subr.bf16.mxu1 %v17945_v22 }
 0xca4   : > { %15384 = vmatpush3.bf16.xpose.msra.mxu0 %v17637_v56 }
 0xca5   : > { %15386 = vmatprep.subr.bf16.mxu0 %v17660_v47 }
 0xca7   : > { %15164 = vmatpush3.bf16.xpose.msra.mxu1 %v17945_v22  ;;  %v18422_v22 = vsub.f32 %v19075_v20, %v19076_v59  ;;  %v11659_v20 = vand.u32 4294901760, %v11658_v58 }
 0xca8   : > { %15166 = vmatprep.subr.bf16.mxu1 %v17969_v26 }
 0xca9   : > { %v11622_v21 = vand.u32 4294901760, %v18422_v22 }
 0xcac   : > { %15388 = vmatpush3.bf16.xpose.msra.mxu0 %v17660_v47 }
 0xcad   : > { %15390 = vmatprep.subr.bf16.mxu0 %v17679_v37 }
 0xcaf   : > { %15168 = vmatpush3.bf16.xpose.msra.mxu1 %v17969_v26  ;;  %v11447_v26 = vld [vmem:[#allocation3 + $0x38] sm:$0xff] }
 0xcb0   : > { %15170 = vmatprep.subr.bf16.mxu1 %v17993_v45  ;;  %v11484_v32 = vsel %vm542_vm0, %v11447_v26, 0  ;;  %v11665_v26 = vsub.f32 %v18501_v18, %v11664_v9 }
 0xcb1   : > { %v18437_v57 = vand.u32 4294901760, %v11484_v32 }
 0xcb2   : > { %v11666_v42 = vand.u32 4294901760, %v11665_v26 }
 0xcb3   : > { %v18458_v31 = vsub.f32 %v11484_v32, %v18437_v57  ;;  %v19086_v32 = vld [vmem:[#allocation53_spill] sm:$0xff] }
 0xcb4   : > { %15392 = vmatpush3.bf16.xpose.msra.mxu0 %v17679_v37  ;;  %v19087_v8 = vand.u32 4294901760, %v19086_v32 }
 0xcb5   : > { %15394 = vmatprep.subr.bf16.mxu0 %v17704_v39  ;;  %v11611_v2 = vand.u32 4294901760, %v18458_v31 }
 0xcb6   : > { %v18515_v36 = vsub.f32 %v19086_v32, %v19087_v8  ;;  %v19096_v8 = vld [vmem:[#allocation58_spill] sm:$0xff] }
 0xcb7   : > { %15172 = vmatpush3.bf16.xpose.msra.mxu1 %v17993_v45  ;;  %v11629_v45 = vand.u32 4294901760, %v18417_v3  ;;  %v11612_v34 = vsub.f32 %v18458_v31, %v11611_v2 }
 0xcb8   : > { %15174 = vmatprep.subr.bf16.mxu1 %v18027_v5 }
 0xcb9   : > { %v11630_v19 = vsub.f32 %v18417_v3, %v11629_v45  ;;  %v11613_v38 = vand.u32 4294901760, %v11612_v34 }
 0xcbb   : > { %v11631_v12 = vand.u32 4294901760, %v11630_v19  ;;  %v19088_v19 = vld [vmem:[#allocation54_spill] sm:$0xff] }
 0xcbc   : > { %15396 = vmatpush3.bf16.xpose.msra.mxu0 %v17704_v39 }
 0xcbd   : > { %15398 = vmatprep.subr.bf16.mxu0 %v17732_v6 }
 0xcbf   : > { %15176 = vmatpush3.bf16.xpose.msra.mxu1 %v18027_v5  ;;  %v11623_v5 = vsub.f32 %v18422_v22, %v11622_v21 }
 0xcc0   : > { %15178 = vmatprep.subr.bf16.mxu1 %v18070_v48 }
 0xcc1   : > { %v11624_v51 = vand.u32 4294901760, %v11623_v5  ;;  %v19089_v5 = vand.u32 4294901760, %v19088_v19 }
 0xcc3   : > { %v15405_v23 = vpack.c.bf16 %v11631_v12, %v11624_v51  ;;  %v18520_v0 = vsub.f32 %v19088_v19, %v19089_v5  ;;  %v11685_v51 = vand.u32 4294901760, %v18515_v36  ;;  %v19097_v19 = vand.u32 4294901760, %v19096_v8 }
 0xcc4   : > { %15400 = vmatpush3.bf16.xpose.msra.mxu0 %v17732_v6 }
 0xcc5   : > { %15402 = vmatprep.subr.bf16.mxu0 %v18435_v29  ;;  %v11678_v12 = vand.u32 4294901760, %v18520_v0  ;;  %v11686_v34 = vsub.f32 %v18515_v36, %v11685_v51  ;;  %v18556_v5 = vsub.f32 %v19096_v8, %v19097_v19  ;;  %v15437_v8 = vpack.c.bf16 %v18417_v3, %v18422_v22 }
 0xcc7   : > { %15180 = vmatpush3.bf16.xpose.msra.mxu1 %v18070_v48  ;;  %v18478_v48 = vsub.f32 %v17616_v44, %v19082_v33  ;;  %v19083_v44 = vand.u32 4294901760, %v17643_v16  ;;  %v19091_v33 = vand.u32 4294901760, %v19090_v24  ;;  %v11679_v60 = vsub.f32 %v18520_v0, %v11678_v12 }
 0xcc9   : > { %v11650_v53 = vand.u32 4294901760, %v18478_v48  ;;  %v18490_v15 = vsub.f32 %v17643_v16, %v19083_v44  ;;  %v11680_v49 = vand.u32 4294901760, %v11679_v60 }
 0xccb   : > { %v11671_v16 = vand.u32 4294901760, %v18490_v15 }
 0xccc   : > { %15404 = vmatpush3.bf16.xpose.msra.mxu0 %v18435_v29 }
 0xccd   : > { %15406 = vmatprep.subr.bf16.mxu0 %v15405_v23  ;;  %v11672_v59 = vsub.f32 %v18490_v15, %v11671_v16 }
 0xcce   : > { %14183 = vmatmul.mubr.f32.vlgmr.msra.gmra.mrb[12].mxu1 %v18042_v63  ;;  %v11651_v63 = vsub.f32 %v18478_v48, %v11650_v53 }
 0xccf   : > { %v11673_v1 = vand.u32 4294901760, %v11672_v59  ;;  %v19094_v59 = vld [vmem:[#allocation57_spill] sm:$0xff] }
 0xcd0   : > { %v11652_v62 = vand.u32 4294901760, %v11651_v63  ;;  %v19095_v26 = vand.u32 4294901760, %v19094_v59 }
 0xcd1   : > { %v15417_v58 = vpack.c.bf16 %v11673_v1, %v11666_v42  ;;  %v11706_v1 = vand.u32 4294901760, %v18556_v5 }
 0xcd2   : > { %v15413_v28 = vpack.c.bf16 %v11659_v20, %v11652_v62  ;;  %v18551_v32 = vsub.f32 %v19094_v59, %v19095_v26 }
 0xcd3   : > { %14428 = vmatmul.mubr.f32.vlgmr.msra.gmra.mrb[20].mxu0 %v11613_v38  ;;  %v19093_v38 = vand.u32 4294901760, %v19092_v41  ;;  %v11707_v60 = vsub.f32 %v18556_v5, %v11706_v1 }
 0xcd4   : > { %15408 = vmatpush3.bf16.xpose.msra.mxu0 %v15405_v23  ;;  %14462 = vmatprep.mubr.f32.mxu0 %v18375_v11  ;;  %v18527_v23 = vsub.f32 %v19090_v24, %v19091_v33  ;;  %v11713_v42 = vand.u32 4294901760, %v18551_v32 }
 0xcd5   : > { %15410 = vmatprep.subr.bf16.mxu0 %v15409_v10  ;;  %v18538_v44 = vsub.f32 %v19092_v41, %v19093_v38  ;;  %v11708_v38 = vand.u32 4294901760, %v11707_v60 }
 0xcd6   : > { %v11699_v63 = vand.u32 4294901760, %v18527_v23 }
 0xcd7   : > { %v11692_v27 = vand.u32 4294901760, %v18538_v44  ;;  %v15457_v19 = vpack.c.bf16 %v18527_v23, %v18538_v44 }
 0xcd8   : > { %v11700_v62 = vsub.f32 %v18527_v23, %v11699_v63 }
 0xcd9   : > { %v11693_v20 = vsub.f32 %v18538_v44, %v11692_v27 }
 0xcda   : > { %v11701_v33 = vand.u32 4294901760, %v11700_v62 }
 0xcdb   : > { %v11694_v24 = vand.u32 4294901760, %v11693_v20 }
 0xcdc   : > { %15412 = vmatpush3.bf16.xpose.msra.mxu0 %v15409_v10  ;;  %v11687_v10 = vand.u32 4294901760, %v11686_v34  ;;  %v11714_v34 = vsub.f32 %v18551_v32, %v11713_v42 }
 0xcdd   : > { %15414 = vmatprep.subr.bf16.mxu0 %v15413_v28  ;;  %v15425_v41 = vpack.c.bf16 %v11701_v33, %v11694_v24 }
 0xce4   : > { %15416 = vmatpush3.bf16.xpose.msra.mxu0 %v15413_v28  ;;  %v15421_v28 = vpack.c.bf16 %v11687_v10, %v11680_v49  ;;  %v11728_v49 = vsub.f32 %v18307_v25, %v11727_v43  ;;  %v11721_v10 = vsub.f32 %v18312_v4, %v11720_v46  ;;  %v15441_v25 = vpack.c.bf16 %v18442_v61, %v18453_v35 }
 0xce5   : > { %15418 = vmatprep.subr.bf16.mxu0 %v15417_v58  ;;  %v15445_v4 = vpack.c.bf16 %v18473_v40, %v18478_v48  ;;  %v15449_v43 = vpack.c.bf16 %v18490_v15, %v18501_v18  ;;  %v15453_v46 = vpack.c.bf16 %v18515_v36, %v18520_v0  ;;  %v15521_v61 = vpack.c.bf16 %v11699_v63, %v11692_v27 }
 0xce6   : > { %v11722_v20 = vand.u32 4294901760, %v11721_v10  ;;  %v11729_v59 = vand.u32 4294901760, %v11728_v49  ;;  %v15525_v35 = vpack.c.bf16 %v11713_v42, %v11706_v1 }
 0xce8   : > { %v15433_v26 = vpack.c.bf16 %v11729_v59, %v11722_v20 }
 0xcec   : > { %15420 = vmatpush3.bf16.xpose.msra.mxu0 %v15417_v58  ;;  %v11715_v58 = vand.u32 4294901760, %v11714_v34 }
 0xced   : > { %15422 = vmatprep.subr.bf16.mxu0 %v15421_v28 }
 0xcee   : > { %v15429_v62 = vpack.c.bf16 %v11715_v58, %v11708_v38 }
 0xcf4   : > { %15424 = vmatpush3.bf16.xpose.msra.mxu0 %v15421_v28  ;;  %v15461_v28 = vpack.c.bf16 %v18551_v32, %v18556_v5 }
 0xcf5   : > { %15426 = vmatprep.subr.bf16.mxu0 %v15425_v41 }
 0xcfc   : > { %15428 = vmatpush3.bf16.xpose.msra.mxu0 %v15425_v41 }
 0xcfd   : > { %15430 = vmatprep.subr.bf16.mxu0 %v15429_v62 }
 0xd04   : > { %15432 = vmatpush3.bf16.xpose.msra.mxu0 %v15429_v62 }
 0xd05   : > { %15434 = vmatprep.subr.bf16.mxu0 %v15433_v26 }
 0xd0c   : > { %15436 = vmatpush3.bf16.xpose.msra.mxu0 %v15433_v26 }
 0xd0d   : > { %15438 = vmatprep.subr.bf16.mxu0 %v15437_v8 }
 0xd13   : > { %14463 = vmatmul.mubr.f32.vlgmr.msra.gmra.mrb[20].mxu0 %v18437_v57 }
 0xd14   : > { %15440 = vmatpush3.bf16.xpose.msra.mxu0 %v15437_v8  ;;  %14497 = vmatprep.mubr.f32.mxu0 %v18380_v30  ;;  %v15505_v30 = vpack.c.bf16 %v11643_v17, %v11636_v50 }
 0xd15   : > { %15442 = vmatprep.subr.bf16.mxu0 %v15441_v25 }
 0xd1c   : > { %15444 = vmatpush3.bf16.xpose.msra.mxu0 %v15441_v25 }
 0xd1d   : > { %15446 = vmatprep.subr.bf16.mxu0 %v15445_v4 }
 0xd24   : > { %15448 = vmatpush3.bf16.xpose.msra.mxu0 %v15445_v4 }
 0xd25   : > { %15450 = vmatprep.subr.bf16.mxu0 %v15449_v43 }
 0xd2c   : > { %15452 = vmatpush3.bf16.xpose.msra.mxu0 %v15449_v43 }
 0xd2d   : > { %15454 = vmatprep.subr.bf16.mxu0 %v15453_v46 }
 0xd34   : > { %15456 = vmatpush3.bf16.xpose.msra.mxu0 %v15453_v46 }
 0xd35   : > { %15458 = vmatprep.subr.bf16.mxu0 %v15457_v19 }
 0xd3c   : > { %15460 = vmatpush3.bf16.xpose.msra.mxu0 %v15457_v19 }
 0xd3d   : > { %15462 = vmatprep.subr.bf16.mxu0 %v15461_v28 }
 0xd44   : > { %15464 = vmatpush3.bf16.xpose.msra.mxu0 %v15461_v28 }
 0xd45   : > { %15466 = vmatprep.subr.bf16.mxu0 %v18319_v55 }
 0xd4c   : > { %15468 = vmatpush3.bf16.xpose.msra.mxu0 %v18319_v55  ;;  %v15501_v55 = vpack.c.bf16 %v11629_v45, %v11622_v21  ;;  %v15513_v45 = vpack.c.bf16 %v11671_v16, %v11664_v9  ;;  %v15517_v21 = vpack.c.bf16 %v11685_v51, %v11678_v12 }
 0xd4d   : > { %15470 = vmatprep.subr.bf16.mxu0 %v19071_v14 }
 0xd53   : > { %14498 = vmatmul.mubr.f32.vlgmr.msra.gmra.mrb[20].mxu0 %v18458_v31 }
 0xd54   : > { %15472 = vmatpush3.bf16.xpose.msra.mxu0 %v19071_v14  ;;  %14532 = vmatprep.mubr.f32.mxu0 %v11601_v7  ;;  %v15509_v7 = vpack.c.bf16 %v11657_v13, %v11650_v53 }
 0xd55   : > { %15474 = vmatprep.subr.bf16.mxu0 %v19072_v54 }
 0xd5c   : > { %15476 = vmatpush3.bf16.xpose.msra.mxu0 %v19072_v54 }
 0xd5d   : > { %15478 = vmatprep.subr.bf16.mxu0 %v17637_v56 }
 0xd64   : > { %15480 = vmatpush3.bf16.xpose.msra.mxu0 %v17637_v56 }
 0xd65   : > { %15482 = vmatprep.subr.bf16.mxu0 %v17660_v47 }
 0xd6c   : > { %15484 = vmatpush3.bf16.xpose.msra.mxu0 %v17660_v47 }
 0xd6d   : > { %15486 = vmatprep.subr.bf16.mxu0 %v17679_v37 }
 0xd74   : > { %15488 = vmatpush3.bf16.xpose.msra.mxu0 %v17679_v37 }
 0xd75   : > { %15490 = vmatprep.subr.bf16.mxu0 %v17704_v39 }
 0xd7c   : > { %15492 = vmatpush3.bf16.xpose.msra.mxu0 %v17704_v39 }
 0xd7d   : > { %15494 = vmatprep.subr.bf16.mxu0 %v17732_v6 }
 0xd84   : > { %15496 = vmatpush3.bf16.xpose.msra.mxu0 %v17732_v6 }
 0xd85   : > { %15498 = vmatprep.subr.bf16.mxu0 %v18435_v29 }
 0xd8c   : > { %15500 = vmatpush3.bf16.xpose.msra.mxu0 %v18435_v29 }
 0xd8d   : > { %15502 = vmatprep.subr.bf16.mxu0 %v15501_v55 }
 0xd93   : > { %14533 = vmatmul.mubr.f32.vlgmr.msra.gmra.mrb[20].mxu0 %v11611_v2 }
 0xd94   : > { %15504 = vmatpush3.bf16.xpose.msra.mxu0 %v15501_v55  ;;  %14567 = vmatprep.mubr.f32.mxu0 %v18375_v11 }
 0xd95   : > { %15506 = vmatprep.subr.bf16.mxu0 %v15505_v30 }
 0xd9c   : > { %15508 = vmatpush3.bf16.xpose.msra.mxu0 %v15505_v30 }
 0xd9d   : > { %15510 = vmatprep.subr.bf16.mxu0 %v15509_v7 }
 0xda1   : > { %v14184_v3 = vpop.f32.mrb[12].mxu1 }
 0xda2   : > { %v10676_v22 = vpop.f32.mrb[13].mxu1 }
 0xda4   : > { %15512 = vmatpush3.bf16.xpose.msra.mxu0 %v15509_v7 }
 0xda5   : > { %15514 = vmatprep.subr.bf16.mxu0 %v15513_v45 }
 0xdac   : > { %15516 = vmatpush3.bf16.xpose.msra.mxu0 %v15513_v45 }
 0xdad   : > { %15518 = vmatprep.subr.bf16.mxu0 %v15517_v21 }
 0xdb4   : > { %15520 = vmatpush3.bf16.xpose.msra.mxu0 %v15517_v21 }
 0xdb5   : > { %15522 = vmatprep.subr.bf16.mxu0 %v15521_v61 }
 0xdbc   : > { %15524 = vmatpush3.bf16.xpose.msra.mxu0 %v15521_v61 }
 0xdbd   : > { %15526 = vmatprep.subr.bf16.mxu0 %v15525_v35 }
 0xdc4   : > { %15528 = vmatpush3.bf16.xpose.msra.mxu0 %v15525_v35 }
 0xdc5   : > { %15530 = vmatprep.subr.bf16.mxu0 %v18325_v52 }
 0xdcc   : > { %15532 = vmatpush3.bf16.xpose.msra.mxu0 %v18325_v52 }
 0xdcd   : > { %15534 = vmatprep.subr.bf16.mxu0 %v19071_v14 }
 0xdd3   : > { %14568 = vmatmul.mubr.f32.vlgmr.msra.gmra.mrb[20].mxu0 %v18437_v57 }
 0xdd4   : > { %15536 = vmatpush3.bf16.xpose.msra.mxu0 %v19071_v14  ;;  %14602 = vmatprep.mubr.f32.mxu0 %v18375_v11 }
 0xdd5   : > { %15538 = vmatprep.subr.bf16.mxu0 %v19072_v54 }
 0xddc   : > { %15540 = vmatpush3.bf16.xpose.msra.mxu0 %v19072_v54 }
 0xddd   : > { %15542 = vmatprep.subr.bf16.mxu0 %v17637_v56 }
 0xde4   : > { %15544 = vmatpush3.bf16.xpose.msra.mxu0 %v17637_v56  ;;  %v9187_v56 = vld [vmem:[%s531_s17 + $0x8] sm:$0xff] }
 0xde5   : > { %15546 = vmatprep.subr.bf16.mxu0 %v17660_v47 }
 0xdec   : > { %15548 = vmatpush3.bf16.xpose.msra.mxu0 %v17660_v47  ;;  %v9186_v47 = vld [vmem:[%s531_s17] sm:$0xff] }
 0xded   : > { %15550 = vmatprep.subr.bf16.mxu0 %v17679_v37 }
 0xdf4   : > { %15552 = vmatpush3.bf16.xpose.msra.mxu0 %v17679_v37  ;;  %v15565_v37 = vadd.f32 %v14184_v3, %v9187_v56 }
 0xdf5   : > { %15554 = vmatprep.subr.bf16.mxu0 %v17704_v39 }
 0xdfc   : > { %15556 = vmatpush3.bf16.xpose.msra.mxu0 %v17704_v39  ;;  %v15567_v39 = vadd.f32 %v10676_v22, %v9186_v47 }
 0xdfd   : > { %15558 = vmatprep.subr.bf16.mxu0 %v17732_v6 }
 0xe04   : > { %15560 = vmatpush3.bf16.xpose.msra.mxu0 %v17732_v6 }
 0xe05   : > { %15562 = vmatprep.subr.bf16.mxu0 %v18435_v29 }
 0xe0c   : > { %15564 = vmatpush3.bf16.xpose.msra.mxu0 %v18435_v29 }
 0xe13   : > { %14603 = vmatmul.mubr.f32.vlgmr.msra.gmra.mrb[20].mxu0 %v18437_v57 }
 0xee6   : > { %v14604_v6 = vpop.f32.mrb[20].mxu0 }
 0xee7   : > { %v15566_v52 = vadd.f32 %v15565_v37, %v14604_v6  ;;  %v12192_v11 = vpop.f32.mrb[21].mxu0 }
 0xee8   : > { %v15568_v14 = vadd.f32 %v15567_v39, %v12192_v11 }
 0xee9   : > { %12205 = vst [vmem:[%s526_s29 + $0x8] sm:$0xff] %v15566_v52 }
 0xeea   : > { %12204 = vst [vmem:[%s526_s29] sm:$0xff] %v15568_v14 }
 0xeeb   : > { %15907 = shalt.err (!%p15904_p8)
}
 0xeec   : > { %s15908_s19 = scalar_lea.hbm %s18673_s28, 256  ;;  %s15912_s29 = scalar_lea.hbm %s18733_s9, 512 }
 0xeed   : > { %p15909_p11 = scmp.ne.s32.totalorder %s18673_s28, %s15908_s19  ;;  %p15913_p0 = scmp.lt.u32.totalorder %s18673_s28, %s18733_s9 }
 0xeee   : > { %p15914_p1 = scmp.lt.u32.totalorder %s15912_s29, %s15908_s19  ;;  %p15916_p3 = scmp.lt.u32.totalorder %s15908_s19, %s18673_s28 }
 0xeef   : > { %p15910_p12 = pnand %p15909_p11, %p16074_p5 }
 0xef0   : > { %p15915_p2 = por %p15914_p1, %p15913_p0 }
 0xef1   : > { %p15911_p13 = pneg %p15910_p12 }
 0xef2   : > { %p15917_p4 = por %p15916_p3, %p15915_p2 }
 0xef4   : > { %p15918_p6 = pnand %p15917_p4, %p15911_p13 }
 0xef6   : > { %15921 = shalt.err (!%p15918_p6)
}
 0xef7   : > { %s15979_s26 = smov 128   ;;  %s15980_s21 = smov 8  }
 0xef8   : > { %15774 = dma.vmem_to_hbm [thread:$0]  (%p16074_p5), %s18668_s22, 256, %s18673_s28, %s18677_s12, %s15979_s26, %s15979_s26, %s15980_s21  }
 0xef9 PF: > { %s12235_s25 = sand.u32 1, %s15952_s30   ;;  %p15777_p7 = pnand %p12355_p10, %p16085_p9 }
 0xefa   : > { %s12236_s27 = scalar_lea.sflag [#allocation8], %s12235_s25 }
 0xefb   : > { %15947 = dma.done.wait (!%p15777_p7), %s12236_s27, 256  }
 0xefc   : > { %15949 = vsyncadd (!%p15777_p7), %s12236_s27, 4294967040  ;;  %s22_s14 = sadd.s32 1, %s15972_s14   ;;  %s19098_s15 = sld [smem:[#allocation11_spill]] }
 0xefd   : > { %p19_p8 = scmp.ge.s32.totalorder %s22_s14, 4   ;;  %s19099_s20 = sld [smem:[#allocation10_spill]] }
 0xefe   : > { %s19100_s30 = smov %s15956_s10  ;;  %s19101_s10 = smov %s15960_s11 }
 0xeff   : > { %s19103_s12 = smov %s15968_s13  ;;  %21 = sbr.rel (!%p19_p8) target bundleno = 4 (0x4), region = 267 }
 0xf02   : > { %s19102_s11 = smov %s19098_s15 }
 0xf03   : > { %s19104_s13 = smov %s19099_s20 }
 0xf06   :  { %12241 = vsyncpa [#allocation8], 1 }
 0xf07   :  { %12243 = vsyncpa [#allocation8 + $0x1], 1 }

</bundles_post_ra>
